<compile_context>
chip_gen: v7x
topology: tpu7x:2x2x1
jax: 0.10.0
libtpu: 0.0.40
codegen_flags: <defaults>
</compile_context>

<pallas_src>
import math

import jax
import jax.numpy as jnp
from jax import lax
from jax.experimental import pallas as pl
from jax.experimental.pallas import tpu as pltpu

# ----- model hyper-params (small, shape-consistent with the forward) -----
D_KEY = 128                  # d_key (feature dim; also the "group" axis after .view)
NUM_HEADS = 4
DROPOUT_P = 0.1
B = 1
H = 8                        # spatial / sequence axis (qk is H x H per group)
C = D_KEY // NUM_HEADS       # per-head width = 32
assert B * H * C == 2 * D_KEY    # two x2-rows per group; the kernel relies on this

_SCALE = 1.0 / math.sqrt(H)             # qk.div(sqrt(qk.shape[-1]))
_KEEP_SCALE = 1.0 / (1.0 - DROPOUT_P)   # dropout keep rescale


# ---------------- fully fused QKV-projection + attention kernel ----------------
def fused_attention_kernel(xg_ref, w_ref, u_ref, o_ref):
    """One-shot fused forward.

    xg_ref: (2*D, D) f32  parity-sorted input rows: row ri*D + d  ==  x2[2d + ri]
    w_ref : (3*D, D) f32  stacked [wq; wk; wv] in torch (out, in) layout
    u_ref : (H, H, D) f32 uniform [0,1) dropout randoms, indexed [i, j, d]
    o_ref : (D, H*C) f32  lane-dense output slab, [d, i*C + cc]
    """
    D = D_KEY
    xg = xg_ref[...]
    w = w_ref[...]

    # Single MXU matmul for q, k and v together:
    #   zz[c, ri*D + d] = sum_f w[c, f] * x2[2d + ri, f]
    zz = lax.dot_general(w, xg, (((1,), (1,)), ((), ())),
                         preferred_element_type=jnp.float32,
                         precision=lax.Precision.HIGHEST)          # (3D, 2D)

    def to_heads(z):                                               # (D, 2D) -> (H, C, D)
        # concat rows are  ri*D + c  ==  i*C + cc   (i = head, cc = channel)
        zc = jnp.concatenate([z[:, :D], z[:, D:]], axis=0)         # (2D, D)
        return zc.reshape(H, C, D)                                 # [i, cc, d]

    q = to_heads(zz[0:D])
    k = to_heads(zz[D:2 * D])
    v = to_heads(zz[2 * D:3 * D])

    # scores s[i, j, d] = <q[i, :, d], k[j, :, d]> / sqrt(H)   (VPU, 128 lanes = d)
    s = jnp.sum(q[:, None, :, :] * k[None, :, :, :], axis=2) * _SCALE   # (H, H, D)

    # softmax over j (axis=1); dropout keep-scale folded into the normalization
    # (masked entries are zeroed afterwards, so this is equivalent).
    m = jnp.max(s, axis=1, keepdims=True)
    e = jnp.exp(s - m)
    denom = jnp.sum(e, axis=1, keepdims=True)
    p = e * (_KEEP_SCALE / denom)
    p = jnp.where(u_ref[...] >= DROPOUT_P, p, 0.0)                 # dropout mask

    # out[i, cc, d] = sum_j p[i, j, d] * v[j, cc, d]
    out = jnp.sum(p[:, :, None, :] * v[None, :, :, :], axis=1)     # (H, C, D)

    # lane-dense store:  o[d, i*C + cc] = out[i, cc, d]
    o_ref[...] = out.reshape(H * C, D).T                           # (D, H*C)


def fused_attention(xg, w_all, u):
    D = D_KEY
    return pl.pallas_call(
        fused_attention_kernel,
        out_shape=jax.ShapeDtypeStruct((D, H * C), jnp.float32),
        grid=(1,),     # whole problem is one VMEM-resident step (< 4 MiB on all gens)
        in_specs=[pl.BlockSpec((2 * D, D), lambda i: (0, 0)),
                  pl.BlockSpec((3 * D, D), lambda i: (0, 0)),
                  pl.BlockSpec((H, H, D), lambda i: (0, 0, 0))],
        out_specs=pl.BlockSpec((D, H * C), lambda i: (0, 0)),
        compiler_params=pltpu.CompilerParams(
            dimension_semantics=("arbitrary",)),
    )(xg, w_all, u)


# ------------------------------- model -------------------------------
class Model:
    def __init__(self, rng, dropout_p, num_heads, d_key):
        kq, kk, kv = jax.random.split(rng, 3)
        bound = 1.0 / math.sqrt(d_key)   # nn.Linear default init U(-1/sqrt(in), 1/sqrt(in))
        self.wq = jax.random.uniform(kq, (d_key, d_key), jnp.float32, -bound, bound)
        self.wk = jax.random.uniform(kk, (d_key, d_key), jnp.float32, -bound, bound)
        self.wv = jax.random.uniform(kv, (d_key, d_key), jnp.float32, -bound, bound)
        # stacked QKV weight so the kernel does one projection matmul
        self.w_all = jnp.concatenate([self.wq, self.wk, self.wv], axis=0)  # (3D, D)
        self.dropout_p = dropout_p
        self.num_heads = num_heads
        self.d_key = d_key

    def __call__(self, x1, dropout_key):
        Bx, Cx, Hx, Dx = x1.shape
        D = self.d_key
        assert Dx == D and Cx == Dx // self.num_heads and Bx * Hx * Cx == 2 * D

        # x2: (B*C*H, D); parity-sort rows so kernel row ri*D + d holds x2[2d + ri]
        # (this is exactly the grouping induced by .view(d_key, B, H, C)).
        x2 = x1.reshape(-1, D)
        xg = x2.reshape(D, 2, D).transpose(1, 0, 2).reshape(2 * D, D)

        # dropout uniforms, one per attention score [i, j, d]
        u = jax.random.uniform(dropout_key, (Hx, Hx, D), jnp.float32)

        o = fused_attention(xg, self.w_all, u)        # (D, H*C) lane-dense slab
        return o.reshape(Bx, D, Hx, Cx)               # (B, d_key, H, C)


# -------------------------- pure-JAX reference --------------------------
def reference_forward(x1, wq, wk, wv, u, dropout_p):
    Bx, Cx, Hx, Dx = x1.shape
    hp = lax.Precision.HIGHEST
    x2 = x1.reshape(-1, Dx)
    qp = jnp.dot(x2, wq.T, precision=hp)
    kp = jnp.dot(x2, wk.T, precision=hp)
    vp = jnp.dot(x2, wv.T, precision=hp)
    view = (Dx, Bx, Hx, Cx)
    q = jnp.swapaxes(qp.reshape(view), 0, 1)          # (B, D, H, C)
    k = jnp.swapaxes(kp.reshape(view), 0, 1)
    v = jnp.swapaxes(vp.reshape(view), 0, 1)
    s = jnp.einsum('bdhc,bdkc->bdhk', q, k, precision=hp) / math.sqrt(Hx)
    p = jax.nn.softmax(s, axis=-1)
    keep = jnp.transpose(u, (2, 0, 1))[None] >= dropout_p
    p = jnp.where(keep, p / (1.0 - dropout_p), 0.0)
    return jnp.einsum('bdhk,bdkc->bdhc', p, v, precision=hp)


if __name__ == "__main__":
    root = jax.random.PRNGKey(0)
    pkey, xkey, dkey = jax.random.split(root, 3)

    model = Model(pkey, DROPOUT_P, NUM_HEADS, D_KEY)
    x1 = jax.random.normal(xkey, (B, C, H, D_KEY), jnp.float32)

    out = model(x1, dkey)
    out = jax.block_until_ready(out)

    assert out.shape == (B, D_KEY, H, C)
    assert bool(jnp.all(jnp.isfinite(out)))

    # correctness check against a pure-JAX reference using the same dropout mask
    u = jax.random.uniform(dkey, (H, H, D_KEY), jnp.float32)
    ref = reference_forward(x1, model.wq, model.wk, model.wv, u, DROPOUT_P)
    assert jnp.allclose(out, ref, atol=2e-2, rtol=2e-2), \
        float(jnp.max(jnp.abs(out - ref)))

    print("KERNEL_OK")
</pallas_src>

<mosaic_0001>
module attributes {stable_mosaic.version = 11 : i64} {
  func.func @fused_attention_kernel(%arg0: i32, %arg1: memref<256x128xf32, #tpu.memory_space<vmem>>, %arg2: memref<384x128xf32, #tpu.memory_space<vmem>>, %arg3: memref<8x8x128xf32, #tpu.memory_space<vmem>>, %arg4: memref<128x256xf32, #tpu.memory_space<vmem>>) attributes {dimension_semantics = [#tpu.dimension_semantics<arbitrary>], iteration_bounds = array<i64: 1>, scalar_prefetch = 0 : i64, scratch_operands = 0 : i64, tpu.core_type = #tpu.core_type<tc>, window_params = [{pipeline_mode = #tpu.pipeline_mode<synchronous>, transform_indices = @transform_0, window_bounds = array<i64: 256, 128>}, {pipeline_mode = #tpu.pipeline_mode<synchronous>, transform_indices = @transform_1, window_bounds = array<i64: 384, 128>}, {pipeline_mode = #tpu.pipeline_mode<synchronous>, transform_indices = @transform_2, window_bounds = array<i64: 8, 8, 128>}, {pipeline_mode = #tpu.pipeline_mode<synchronous>, transform_indices = @transform_3, window_bounds = array<i64: 128, 256>}]} {
    %c0 = arith.constant 0 : index
    %c0_0 = arith.constant 0 : index
    %0 = vector.load %arg1[%c0, %c0_0] : memref<256x128xf32, #tpu.memory_space<vmem>>, vector<256x128xf32>
    %c0_1 = arith.constant 0 : index
    %c0_2 = arith.constant 0 : index
    %1 = vector.load %arg2[%c0_1, %c0_2] : memref<384x128xf32, #tpu.memory_space<vmem>>, vector<384x128xf32>
    %cst = arith.constant dense<0.000000e+00> : vector<384x256xf32>
    %2 = tpu.matmul %1, %0, %cst {dimension_numbers = #tpu.dot_dimension_numbers<[1], [1], [0], [0], [0, 0, 1, 0], [], []>, precision = #tpu.contract_precision<fp32>} : vector<384x128xf32>, vector<256x128xf32>, vector<384x256xf32> -> vector<384x256xf32>
    %3 = vector.extract_strided_slice %2 {offsets = [0, 0], sizes = [128, 256], strides = [1, 1]} : vector<384x256xf32> to vector<128x256xf32>
    %4 = vector.extract_strided_slice %3 {offsets = [0, 0], sizes = [128, 128], strides = [1, 1]} : vector<128x256xf32> to vector<128x128xf32>
    %5 = vector.extract_strided_slice %3 {offsets = [0, 128], sizes = [128, 128], strides = [1, 1]} : vector<128x256xf32> to vector<128x128xf32>
    %6 = tpu.concatenate %4, %5 in 0 : vector<128x128xf32>, vector<128x128xf32> -> vector<256x128xf32>
    %7 = vector.shape_cast %6 : vector<256x128xf32> to vector<8x32x128xf32>
    %8 = vector.extract_strided_slice %2 {offsets = [128, 0], sizes = [128, 256], strides = [1, 1]} : vector<384x256xf32> to vector<128x256xf32>
    %9 = vector.extract_strided_slice %8 {offsets = [0, 0], sizes = [128, 128], strides = [1, 1]} : vector<128x256xf32> to vector<128x128xf32>
    %10 = vector.extract_strided_slice %8 {offsets = [0, 128], sizes = [128, 128], strides = [1, 1]} : vector<128x256xf32> to vector<128x128xf32>
    %11 = tpu.concatenate %9, %10 in 0 : vector<128x128xf32>, vector<128x128xf32> -> vector<256x128xf32>
    %12 = vector.shape_cast %11 : vector<256x128xf32> to vector<8x32x128xf32>
    %13 = vector.extract_strided_slice %2 {offsets = [256, 0], sizes = [128, 256], strides = [1, 1]} : vector<384x256xf32> to vector<128x256xf32>
    %14 = vector.extract_strided_slice %13 {offsets = [0, 0], sizes = [128, 128], strides = [1, 1]} : vector<128x256xf32> to vector<128x128xf32>
    %15 = vector.extract_strided_slice %13 {offsets = [0, 128], sizes = [128, 128], strides = [1, 1]} : vector<128x256xf32> to vector<128x128xf32>
    %16 = tpu.concatenate %14, %15 in 0 : vector<128x128xf32>, vector<128x128xf32> -> vector<256x128xf32>
    %17 = vector.shape_cast %16 : vector<256x128xf32> to vector<8x32x128xf32>
    %18 = vector.shape_cast %7 : vector<8x32x128xf32> to vector<8x1x32x128xf32>
    %19 = vector.shape_cast %12 : vector<8x32x128xf32> to vector<1x8x32x128xf32>
    %20 = vector.broadcast %18 : vector<8x1x32x128xf32> to vector<8x8x32x128xf32>
    %21 = vector.broadcast %19 : vector<1x8x32x128xf32> to vector<8x8x32x128xf32>
    %22 = arith.mulf %20, %21 : vector<8x8x32x128xf32>
    %cst_3 = arith.constant dense<0.000000e+00> : vector<8x8x128xf32>
    %23 = vector.multi_reduction <add>, %22, %cst_3 [2] : vector<8x8x32x128xf32> to vector<8x8x128xf32>
    %cst_4 = arith.constant 0.353553385 : f32
    %24 = vector.broadcast %cst_4 : f32 to vector<8x8x128xf32>
    %25 = arith.mulf %23, %24 : vector<8x8x128xf32>
    %cst_5 = arith.constant dense<0xFF800000> : vector<8x128xf32>
    %26 = vector.multi_reduction <maximumf>, %25, %cst_5 [1] : vector<8x8x128xf32> to vector<8x128xf32>
    %27 = vector.shape_cast %26 : vector<8x128xf32> to vector<8x1x128xf32>
    %28 = vector.broadcast %27 : vector<8x1x128xf32> to vector<8x8x128xf32>
    %29 = arith.subf %25, %28 : vector<8x8x128xf32>
    %30 = math.exp %29 : vector<8x8x128xf32>
    %cst_6 = arith.constant dense<0.000000e+00> : vector<8x128xf32>
    %31 = vector.multi_reduction <add>, %30, %cst_6 [1] : vector<8x8x128xf32> to vector<8x128xf32>
    %32 = vector.shape_cast %31 : vector<8x128xf32> to vector<8x1x128xf32>
    %cst_7 = arith.constant 1.11111116 : f32
    %33 = vector.broadcast %cst_7 : f32 to vector<8x1x128xf32>
    %34 = arith.divf %33, %32 : vector<8x1x128xf32>
    %35 = vector.broadcast %34 : vector<8x1x128xf32> to vector<8x8x128xf32>
    %36 = arith.mulf %30, %35 : vector<8x8x128xf32>
    %c0_8 = arith.constant 0 : index
    %c0_9 = arith.constant 0 : index
    %c0_10 = arith.constant 0 : index
    %37 = vector.load %arg3[%c0_8, %c0_9, %c0_10] : memref<8x8x128xf32, #tpu.memory_space<vmem>>, vector<8x8x128xf32>
    %cst_11 = arith.constant 1.000000e-01 : f32
    %38 = vector.broadcast %cst_11 : f32 to vector<8x8x128xf32>
    %39 = arith.cmpf oge, %37, %38 : vector<8x8x128xf32>
    %cst_12 = arith.constant 0.000000e+00 : f32
    %40 = vector.broadcast %cst_12 : f32 to vector<8x8x128xf32>
    %41 = arith.select %39, %36, %40 : vector<8x8x128xi1>, vector<8x8x128xf32>
    %42 = vector.shape_cast %41 : vector<8x8x128xf32> to vector<8x8x1x128xf32>
    %43 = vector.shape_cast %17 : vector<8x32x128xf32> to vector<1x8x32x128xf32>
    %44 = vector.broadcast %42 : vector<8x8x1x128xf32> to vector<8x8x32x128xf32>
    %45 = vector.broadcast %43 : vector<1x8x32x128xf32> to vector<8x8x32x128xf32>
    %46 = arith.mulf %44, %45 : vector<8x8x32x128xf32>
    %cst_13 = arith.constant dense<0.000000e+00> : vector<8x32x128xf32>
    %47 = vector.multi_reduction <add>, %46, %cst_13 [1] : vector<8x8x32x128xf32> to vector<8x32x128xf32>
    %48 = vector.shape_cast %47 : vector<8x32x128xf32> to vector<256x128xf32>
    %49 = tpu.transpose %48, [1, 0] : vector<256x128xf32> -> vector<128x256xf32>
    %c0_14 = arith.constant 0 : index
    %c0_15 = arith.constant 0 : index
    %50 = vector.load %arg4[%c0_14, %c0_15] : memref<128x256xf32, #tpu.memory_space<vmem>>, vector<128x256xf32>
    tpu.vector_store %arg4[%c0_14, %c0_15], %49 {strides = array<i32>} : memref<128x256xf32, #tpu.memory_space<vmem>>, vector<128x256xf32>,
    return
  }
  func.func @transform_0(%arg0: i32) -> (i32, i32) {
    %c0_i32 = arith.constant 0 : i32
    %c0_i32_0 = arith.constant 0 : i32
    %c0_i32_1 = arith.constant 0 : i32
    return %c0_i32, %c0_i32_0 : i32, i32
  }
  func.func @transform_1(%arg0: i32) -> (i32, i32) {
    %c0_i32 = arith.constant 0 : i32
    %c0_i32_0 = arith.constant 0 : i32
    %c0_i32_1 = arith.constant 0 : i32
    return %c0_i32, %c0_i32_0 : i32, i32
  }
  func.func @transform_2(%arg0: i32) -> (i32, i32, i32) {
    %c0_i32 = arith.constant 0 : i32
    %c0_i32_0 = arith.constant 0 : i32
    %c0_i32_1 = arith.constant 0 : i32
    %c0_i32_2 = arith.constant 0 : i32
    return %c0_i32, %c0_i32_0, %c0_i32_1 : i32, i32, i32
  }
  func.func @transform_3(%arg0: i32) -> (i32, i32) {
    %c0_i32 = arith.constant 0 : i32
    %c0_i32_0 = arith.constant 0 : i32
    %c0_i32_1 = arith.constant 0 : i32
    return %c0_i32, %c0_i32_0 : i32, i32
  }
}

</mosaic_0001>

<bundles_post_ra>
// kernel: tpu_custom_call.1
= control target key start
LH: loop header
LB: loop body
LE: loop exit
PB: predicated region body
PF: predicated region fallthrough
CT: control target
= control target key end

     0   :  { %8 = vsyncpa [#allocation3], 0  ;;  %s12006_s0 = inlined_call_operand.hbm [shape: f32[256,128], index: 0, kind: input, shape index: {}]   ;;  %s12007_s1 = inlined_call_operand.hbm [shape: f32[384,128], index: 1, kind: input, shape index: {}]   ;;  %s12008_s2 = inlined_call_operand.hbm [shape: f32[8,8,128], index: 2, kind: input, shape index: {}]   ;;  %s12009_s3 = inlined_call_operand.hbm [shape: f32[128,256], index: 3, kind: output, shape index: {}]  }
   0x1   :  { %9 = vsyncpa [#allocation6], 0 }
   0x2   :  { %10 = vsyncpa [#allocation4], 0  ;;  %s7998_s12 = smov [#allocation5]   ;;  %s7999_s14 = smov [#allocation2]  }
   0x3   :  { %s28_s13 = sshll.u32 %s7998_s12, 4  ;;  %s16_s15 = sshll.u32 %s7999_s14, 4  ;;  %s29_s13 = int_to_ptr.vmem [resolvable:$true] %s28_s13  ;;  %s8027_s15 = int_to_ptr.vmem [resolvable:$true] %s16_s15 }
   0x4   :  { %s7904_s18 = scalar_lea.hbm %s12007_s1, 6144 }
   0x5   :  { %p7905_p0 = scmp.ne.s32.totalorder %s12007_s1, %s7904_s18  ;;  %p7908_p1 = scmp.lt.u32.totalorder %s7904_s18, %s12007_s1 }
   0x7   :  { %p7910_p2 = pnand %p7908_p1, %p7905_p0 }
   0x9   :  { %7913 = shalt.err (!%p7910_p2)
}
   0xa   :  { %s7914_s23 = scalar_lea.vmem %s29_s13, 6144  ;;  %p7919_p4 = scmp.lt.s32.totalorder %s29_s13, %s29_s13 }
   0xb   :  { %p7915_p3 = scmp.ne.s32.totalorder %s29_s13, %s7914_s23  ;;  %p7920_p5 = scmp.lt.s32.totalorder %s7914_s23, %s7914_s23 }
   0xd   :  { %p7921_p6 = por %p7920_p5, %p7919_p4 }
   0xf   :  { %p7922_p7 = pnand %p7921_p6, %p7915_p3 }
  0x11   :  { %7925 = shalt.err (!%p7922_p7)
}
  0x12   :  { %s8000_s24 = smov 128   ;;  %s8001_s25 = smov 8  }
  0x13   :  { %34 = dma.hbm_to_vmem [thread:$0]  %s12007_s1, 6144, %s29_s13, [#allocation6], %s8000_s24, %s8000_s24, %s8001_s25  }
  0x14   :  { %s7926_s30 = scalar_lea.hbm %s12006_s0, 4096 }
  0x15   :  { %p7927_p8 = scmp.ne.s32.totalorder %s12006_s0, %s7926_s30  ;;  %p7930_p9 = scmp.lt.u32.totalorder %s7926_s30, %s12006_s0 }
  0x17   :  { %p7932_p10 = pnand %p7930_p9, %p7927_p8 }
  0x19   :  { %7935 = shalt.err (!%p7932_p10)
}
  0x1a   :  { %s7936_s8 = scalar_lea.vmem %s8027_s15, 4096  ;;  %p7941_p12 = scmp.lt.s32.totalorder %s8027_s15, %s8027_s15 }
  0x1b   :  { %p7937_p11 = scmp.ne.s32.totalorder %s8027_s15, %s7936_s8  ;;  %p7942_p13 = scmp.lt.s32.totalorder %s7936_s8, %s7936_s8 }
  0x1d   :  { %p7943_p0 = por %p7942_p13, %p7941_p12 }
  0x1f   :  { %p7944_p1 = pnand %p7943_p0, %p7937_p11 }
  0x21   :  { %7947 = shalt.err (!%p7944_p1)
}
  0x22   :  { %22 = dma.hbm_to_vmem [thread:$0]  %s12006_s0, 4096, %s8027_s15, [#allocation3], %s8000_s24, %s8000_s24, %s8001_s25  }
  0x23   :  { %s8002_s10 = smov [#allocation7]   ;;  %s7948_s14 = scalar_lea.hbm %s12008_s2, 1024 }
  0x24   :  { %s40_s11 = sshll.u32 %s8002_s10, 4  ;;  %p7949_p2 = scmp.ne.s32.totalorder %s12008_s2, %s7948_s14  ;;  %s41_s11 = int_to_ptr.vmem [resolvable:$true] %s40_s11 }
  0x25   :  { %p7952_p3 = scmp.lt.u32.totalorder %s7948_s14, %s12008_s2 }
  0x27   :  { %p7954_p4 = pnand %p7952_p3, %p7949_p2 }
  0x29   :  { %7957 = shalt.err (!%p7954_p4)
}
  0x2a   :  { %s7958_s20 = scalar_lea.vmem %s41_s11, 1024  ;;  %p7963_p6 = scmp.lt.s32.totalorder %s41_s11, %s41_s11 }
  0x2b   :  { %p7959_p5 = scmp.ne.s32.totalorder %s41_s11, %s7958_s20  ;;  %p7964_p7 = scmp.lt.s32.totalorder %s7958_s20, %s7958_s20 }
  0x2d   :  { %p7965_p8 = por %p7964_p7, %p7963_p6 }
  0x2f   :  { %p7966_p9 = pnand %p7965_p8, %p7959_p5 }
  0x31   :  { %7969 = shalt.err (!%p7966_p9)
}
  0x32   :  { %46 = dma.hbm_to_vmem [thread:$0]  %s12008_s2, 1024, %s41_s11, [#allocation6], %s8000_s24, %s8000_s24, %s8001_s25  }
  0x33   :  { %7992 = dma.done.wait [#allocation3], 4096  }
  0x34   :  { %7993 = vsyncadd [#allocation3], 4294963200 }
  0x35   :  { %7994 = dma.done.wait [#allocation6], 7168  }
  0x36   :  { %7995 = vsyncadd [#allocation6], 4294960128  ;;  %v8079_v0 = vld [vmem:[#allocation2 + $0x80] sm:$0xff]  ;;  %v8081_v1 = vld [vmem:[#allocation2 + $0x88] sm:$0xff]  ;;  %vm4503_vm0 = vcmask 1041409   ;;  %vm4506_vm1 = vcmask 1042434  }
  0x37   :  { %v8083_v2 = vld [vmem:[#allocation2] sm:$0xff]  ;;  %v185_v3 = vand.u32 4294901760, %v8079_v0  ;;  %v188_v4 = vand.u32 4294901760, %v8081_v1  ;;  %v8087_v5 = vld [vmem:[#allocation2 + $0x8] sm:$0xff]  ;;  %v8090_v7 = vld [vmem:[#allocation2 + $0x90] sm:$0xff]  ;;  %vm4509_vm2 = vcmask 1043459  }
  0x38   :  { %v137_v6 = vand.u32 4294901760, %v8083_v2  ;;  %v8092_v8 = vld [vmem:[#allocation2 + $0x98] sm:$0xff]  ;;  %v140_v9 = vand.u32 4294901760, %v8087_v5  ;;  %v191_v10 = vand.u32 4294901760, %v8090_v7  ;;  %v8103_v13 = vld [vmem:[#allocation2 + $0x10] sm:$0xff]  ;;  %v8119_v17 = vld [vmem:[#allocation2 + $0xa0] sm:$0xff] }
  0x39   :  { %v194_v11 = vand.u32 4294901760, %v8092_v8  ;;  %v8101_v12 = vpack.c.bf16 %v188_v4, %v185_v3  ;;  %v8105_v14 = vld [vmem:[#allocation2 + $0x18] sm:$0xff]  ;;  %v8121_v18 = vld [vmem:[#allocation2 + $0xa8] sm:$0xff]  ;;  %v12029_v19 = vand.u32 4294901760, %v8103_v13  ;;  %v12027_v21 = vand.u32 4294901760, %v8119_v17  ;;  %v8145_v25 = vld [vmem:[#allocation2 + $0x20] sm:$0xff] }
  0x3a   :  { %v8111_v15 = vpack.c.bf16 %v140_v9, %v137_v6  ;;  %v12028_v20 = vand.u32 4294901760, %v8105_v14  ;;  %v12026_v22 = vand.u32 4294901760, %v8121_v18  ;;  %v8147_v26 = vld [vmem:[#allocation2 + $0x28] sm:$0xff]  ;;  %v8149_v27 = vld [vmem:[#allocation2 + $0xb0] sm:$0xff]  ;;  %v8151_v28 = vld [vmem:[#allocation2 + $0xb8] sm:$0xff]  ;;  %v12025_v29 = vand.u32 4294901760, %v8145_v25 }
  0x3b   :  { %v8117_v16 = vpack.c.bf16 %v194_v11, %v191_v10  ;;  %7080 = vmatprep.subr.bf16.mxu1 %v8101_v12  ;;  %7176 = vmatprep.subr.bf16.mxu0 %v8101_v12  ;;  %v12024_v30 = vand.u32 4294901760, %v8147_v26  ;;  %v12023_v31 = vand.u32 4294901760, %v8149_v27  ;;  %v12020_v32 = vand.u32 4294901760, %v8151_v28  ;;  %v88_v33 = vld [vmem:[#allocation5] sm:$0xff]  ;;  %v8173_v36 = vld [vmem:[#allocation2 + $0x30] sm:$0xff]  ;;  %v8175_v37 = vld [vmem:[#allocation2 + $0x38] sm:$0xff] }
  0x3c   :  { %12474 = vst [vmem:[#allocation12_spill] sm:$0xff] %v8111_v15  ;;  %7082 = vmatpush3.bf16.xpose.msra.mxu1 %v8111_v15  ;;  %7178 = vmatpush3.bf16.xpose.msra.mxu0 %v8111_v15  ;;  %v8137_v23 = vpack.c.bf16 %v12028_v20, %v12029_v19  ;;  %v8143_v24 = vpack.c.bf16 %v12026_v22, %v12027_v21  ;;  %v8177_v38 = vld [vmem:[#allocation2 + $0xc0] sm:$0xff]  ;;  %v8179_v39 = vld [vmem:[#allocation2 + $0xc8] sm:$0xff]  ;;  %v8181_v40 = vand.u32 4294901760, %v88_v33  ;;  %v12017_v41 = vand.u32 4294901760, %v8173_v36  ;;  %v8216_v52 = vld [vmem:[#allocation2 + $0xd0] sm:$0xff] }
  0x3d   :  { %12475 = vst [vmem:[#allocation13_spill] sm:$0xff] %v8117_v16  ;;  %7084 = vmatprep.subr.bf16.mxu1 %v8117_v16  ;;  %7180 = vmatprep.subr.bf16.mxu0 %v8117_v16  ;;  %v8165_v34 = vpack.c.bf16 %v12024_v30, %v12025_v29  ;;  %v8171_v35 = vpack.c.bf16 %v12020_v32, %v12023_v31  ;;  %v12016_v42 = vand.u32 4294901760, %v8175_v37  ;;  %v12015_v44 = vand.u32 4294901760, %v8177_v38  ;;  %v8212_v50 = vld [vmem:[#allocation2 + $0x40] sm:$0xff]  ;;  %v8214_v51 = vld [vmem:[#allocation2 + $0x48] sm:$0xff]  ;;  %v8218_v53 = vld [vmem:[#allocation2 + $0xd8] sm:$0xff] }
  0x3e   :  { %12476 = vst [vmem:[#allocation14_spill] sm:$0xff] %v8137_v23  ;;  %12477 = vst [vmem:[#allocation15_spill] sm:$0xff] %v8143_v24  ;;  %v8188_v43 = vsub.f32 %v88_v33, %v8181_v40  ;;  %v12014_v45 = vand.u32 4294901760, %v8179_v39  ;;  %v12013_v55 = vand.u32 4294901760, %v8212_v50  ;;  %v12010_v56 = vand.u32 4294901760, %v8214_v51  ;;  %v8243_v61 = vld [vmem:[#allocation2 + $0x50] sm:$0xff] }
  0x3f   :  { %12478 = vst [vmem:[#allocation16_spill] sm:$0xff] %v8165_v34  ;;  %12479 = vst [vmem:[#allocation17_spill] sm:$0xff] %v8171_v35  ;;  %v8201_v47 = vpack.c.bf16 %v12016_v42, %v12017_v41  ;;  %v12012_v57 = vand.u32 4294901760, %v8216_v52  ;;  %v12011_v58 = vand.u32 4294901760, %v8218_v53  ;;  %v8245_v62 = vld [vmem:[#allocation2 + $0x58] sm:$0xff]  ;;  %v8247_v63 = vld [vmem:[#allocation2 + $0xe0] sm:$0xff]  ;;  %v8302_v30 = vsub.f32 %v8083_v2, %v137_v6 }
  0x40   :  { %12480 = vst [vmem:[#allocation18_spill] sm:$0xff] %v8188_v43  ;;  %v8195_v46 = vand.u32 4294901760, %v8188_v43  ;;  %v8210_v49 = vpack.c.bf16 %v12014_v45, %v12015_v44  ;;  %v8235_v59 = vpack.c.bf16 %v12010_v56, %v12013_v55  ;;  %v8249_v33 = vld [vmem:[#allocation2 + $0xe8] sm:$0xff]  ;;  %v12018_v56 = vand.u32 4294901760, %v8245_v62  ;;  %v8281_v41 = vld [vmem:[#allocation2 + $0x60] sm:$0xff]  ;;  %v8287_v32 = vld [vmem:[#allocation2 + $0xf8] sm:$0xff] }
  0x41   :  { %12481 = vst [vmem:[#allocation19_spill] sm:$0xff] %v8201_v47  ;;  %v8241_v60 = vpack.c.bf16 %v12011_v58, %v12012_v57  ;;  %v12022_v58 = vand.u32 4294901760, %v8247_v63  ;;  %v12021_v57 = vand.u32 4294901760, %v8249_v33  ;;  %v8268_v45 = vsub.f32 %v8079_v0, %v185_v3  ;;  %v89_v31 = vld [vmem:[#allocation5 + $0x8] sm:$0xff]  ;;  %12487 = vst [vmem:[#allocation25_spill] sm:$0xff] %v8302_v30  ;;  %v8321_v20 = vld [vmem:[#allocation2 + $0x70] sm:$0xff] }
  0x42   :  { %v236_v48 = vsub.f32 %v8188_v43, %v8195_v46  ;;  %6727 = vmatprep.mubr.f32.mxu0 %v8195_v46  ;;  %12482 = vst [vmem:[#allocation20_spill] sm:$0xff] %v8210_v49  ;;  %12483 = vst [vmem:[#allocation21_spill] sm:$0xff] %v8235_v59  ;;  %v8273_v44 = vsub.f32 %v8081_v1, %v188_v4  ;;  %v12033_v0 = vand.u32 4294901760, %v8281_v41  ;;  %v12031_v4 = vand.u32 4294901760, %v8287_v32  ;;  %v8323_v2 = vld [vmem:[#allocation2 + $0x78] sm:$0xff]  ;;  %v90_v19 = vld [vmem:[#allocation5 + $0x10] sm:$0xff] }
  0x43   :  { %12484 = vst [vmem:[#allocation22_spill] sm:$0xff] %v8241_v60  ;;  %v8279_v42 = vpack.c.bf16 %v12021_v57, %v12022_v58  ;;  %v876_v57 = vand.u32 4294901760, %v8268_v45  ;;  %v8307_v29 = vsub.f32 %v8087_v5, %v140_v9  ;;  %v8327_v9 = vand.u32 4294901760, %v89_v31  ;;  %s8004_s2 = smov [#allocation8]  }
  0x44   :  { %7086 = vmatpush3.bf16.xpose.msra.mxu1 %v8137_v23  ;;  %7182 = vmatpush3.bf16.xpose.msra.mxu0 %v8137_v23  ;;  %v8220_v54 = vand.u32 4294901760, %v236_v48  ;;  %v12019_v48 = vand.u32 4294901760, %v8243_v61  ;;  %v883_v58 = vand.u32 4294901760, %v8273_v44  ;;  %v12503_v16 = vand.u32 4294901760, %v8119_v17  ;;  %s6298_s21 = sshll.u32 %s8004_s2, 4  ;;  %s6299_s21 = int_to_ptr.vmem [resolvable:$true] %s6298_s21 }
  0x45   :  { %7088 = vmatprep.subr.bf16.mxu1 %v8143_v24  ;;  %7184 = vmatprep.subr.bf16.mxu0 %v8143_v24  ;;  %12486 = vst [vmem:[#allocation24_spill] sm:$0xff] %v8279_v42  ;;  %12488 = vst [vmem:[#allocation26_spill] sm:$0xff] %v8307_v29  ;;  %v877_v6 = vsub.f32 %v8268_v45, %v876_v57  ;;  %v12508_v15 = vand.u32 4294901760, %v8147_v26  ;;  %vm4512_vm3 = vcmask 1044484   ;;  %vm4515_vm4 = vcmask 1045509   ;;  %s7970_s22 = scalar_lea.vmem %s6299_s21, 4096  ;;  %p7975_p11 = scmp.lt.s32.totalorder %s6299_s21, %s6299_s21 }
  0x46   :  { %6343 = vmatprep.mubr.f32.mxu1 %v8220_v54  ;;  %v8263_v55 = vpack.c.bf16 %v12018_v56, %v12019_v48  ;;  %v8283_v56 = vld [vmem:[#allocation2 + $0x68] sm:$0xff]  ;;  %v8285_v48 = vld [vmem:[#allocation2 + $0xf0] sm:$0xff]  ;;  %v884_v5 = vsub.f32 %v8273_v44, %v883_v58  ;;  %12491 = vst [vmem:[#allocation29_spill] sm:$0xff] %v8327_v9  ;;  %v7207_v23 = vpack.c.bf16 %v883_v58, %v876_v57  ;;  %vm4518_vm5 = vcmask 1046534   ;;  %p7971_p10 = scmp.ne.s32.totalorder %s6299_s21, %s7970_s22  ;;  %p7976_p12 = scmp.lt.s32.totalorder %s7970_s22, %s7970_s22 }
  0x47   :  { %v12030_v1 = vand.u32 4294901760, %v8283_v56  ;;  %v12032_v3 = vand.u32 4294901760, %v8285_v48  ;;  %vm4521_vm6 = vcmask 1047559  }
  0x48   :  { %12485 = vst [vmem:[#allocation23_spill] sm:$0xff] %v8263_v55  ;;  %p7977_p13 = por %p7976_p12, %p7975_p11 }
  0x49   :  { %v8313_v22 = vpack.c.bf16 %v12030_v1, %v12033_v0  ;;  %v8319_v21 = vpack.c.bf16 %v12031_v4, %v12032_v3  ;;  %v8332_v1 = vsub.f32 %v8090_v7, %v191_v10  ;;  %v8337_v4 = vsub.f32 %v8092_v8, %v194_v11  ;;  %v91_v11 = vld [vmem:[#allocation5 + $0x18] sm:$0xff] }
  0x4a   :  { %v764_v3 = vand.u32 4294901760, %v8302_v30  ;;  %v771_v0 = vand.u32 4294901760, %v8307_v29  ;;  %v878_v7 = vand.u32 4294901760, %v877_v6  ;;  %v885_v8 = vand.u32 4294901760, %v884_v5  ;;  %p7978_p0 = pnand %p7977_p13, %p7971_p10 }
  0x4b   :  { %12489 = vst [vmem:[#allocation27_spill] sm:$0xff] %v8313_v22  ;;  %12490 = vst [vmem:[#allocation28_spill] sm:$0xff] %v8319_v21  ;;  %v8350_v10 = vsub.f32 %v89_v31, %v8327_v9  ;;  %v12497_v6 = vand.u32 4294901760, %v8321_v20  ;;  %v12498_v5 = vand.u32 4294901760, %v8323_v2 }
  0x4c   :  { %7090 = vmatpush3.bf16.xpose.msra.mxu1 %v8165_v34  ;;  %7186 = vmatpush3.bf16.xpose.msra.mxu0 %v8165_v34  ;;  %12492 = vst [vmem:[#allocation30_spill] sm:$0xff] %v8332_v1  ;;  %12493 = vst [vmem:[#allocation31_spill] sm:$0xff] %v8337_v4  ;;  %v765_v43 = vsub.f32 %v8302_v30, %v764_v3  ;;  %v7111_v24 = vpack.c.bf16 %v885_v8, %v878_v7  ;;  %v12513_v30 = vand.u32 4294901760, %v8175_v37 }
  0x4d   :  { %7092 = vmatprep.subr.bf16.mxu1 %v8171_v35  ;;  %7188 = vmatprep.subr.bf16.mxu0 %v8171_v35  ;;  %12495 = vst [vmem:[#allocation33_spill] sm:$0xff] %v8350_v10  ;;  %v8365_v31 = vpack.c.bf16 %v12498_v5, %v12497_v6  ;;  %v12502_v35 = vand.u32 4294901760, %v8105_v14  ;;  %v8383_v6 = vsub.f32 %v8119_v17, %v12503_v16 }
  0x4f   :  { %12499 = vst [vmem:[#allocation34_spill] sm:$0xff] %v8365_v31  ;;  %v8375_v34 = vsub.f32 %v8105_v14, %v12502_v35  ;;  %v766_v35 = vand.u32 4294901760, %v765_v43  ;;  %v93_v43 = vld [vmem:[#allocation5 + $0x28] sm:$0xff] }
  0x54   :  { %7094 = vmatpush3.bf16.xpose.msra.mxu1 %v8201_v47  ;;  %7190 = vmatpush3.bf16.xpose.msra.mxu0 %v8201_v47  ;;  %v8370_v47 = vand.u32 4294901760, %v91_v11 }
  0x55   :  { %7096 = vmatprep.subr.bf16.mxu1 %v8210_v49  ;;  %7192 = vmatprep.subr.bf16.mxu0 %v8210_v49 }
  0x56   :  { %12501 = vst [vmem:[#allocation36_spill] sm:$0xff] %v8370_v47  ;;  %v8398_v16 = vsub.f32 %v91_v11, %v8370_v47  ;;  %v904_v47 = vand.u32 4294901760, %v8383_v6 }
  0x58   :  { %12505 = vst [vmem:[#allocation37_spill] sm:$0xff] %v8398_v16 }
  0x5c   :  { %7098 = vmatpush3.bf16.xpose.msra.mxu1 %v8235_v59  ;;  %7194 = vmatpush3.bf16.xpose.msra.mxu0 %v8235_v59  ;;  %v12496_v59 = vand.u32 4294901760, %v8103_v13 }
  0x5d   :  { %7100 = vmatprep.subr.bf16.mxu1 %v8241_v60  ;;  %7196 = vmatprep.subr.bf16.mxu0 %v8241_v60  ;;  %v890_v60 = vand.u32 4294901760, %v8332_v1 }
  0x5e   :  { %v8359_v49 = vsub.f32 %v8103_v13, %v12496_v59  ;;  %v8378_v13 = vand.u32 4294901760, %v8350_v10  ;;  %v92_v59 = vld [vmem:[#allocation5 + $0x20] sm:$0xff] }
  0x5f   :  { %v8400_v17 = vand.u32 4294901760, %v92_v59 }
  0x60   :  { %v778_v8 = vand.u32 4294901760, %v8359_v49 }
  0x61   :  { %12506 = vst [vmem:[#allocation38_spill] sm:$0xff] %v8400_v17 }
  0x64   :  { %7102 = vmatpush3.bf16.xpose.msra.mxu1 %v8263_v55  ;;  %7198 = vmatpush3.bf16.xpose.msra.mxu0 %v8263_v55  ;;  %v8345_v55 = vand.u32 4294901760, %v90_v19 }
  0x65   :  { %7104 = vmatprep.subr.bf16.mxu1 %v8279_v42  ;;  %7200 = vmatprep.subr.bf16.mxu0 %v8279_v42  ;;  %v772_v42 = vsub.f32 %v8307_v29, %v771_v0 }
  0x66   :  { %12494 = vst [vmem:[#allocation32_spill] sm:$0xff] %v8345_v55 }
  0x67   :  { %v773_v57 = vand.u32 4294901760, %v772_v42  ;;  %v247_v42 = vsub.f32 %v8350_v10, %v8378_v13  ;;  %v7209_v10 = vpack.c.bf16 %v771_v0, %v764_v3  ;;  %v779_v0 = vsub.f32 %v8359_v49, %v778_v8 }
  0x6c   :  { %7106 = vmatpush3.bf16.xpose.msra.mxu1 %v8313_v22  ;;  %7202 = vmatpush3.bf16.xpose.msra.mxu0 %v8313_v22  ;;  %v897_v22 = vand.u32 4294901760, %v8337_v4 }
  0x6d   :  { %7108 = vmatprep.subr.bf16.mxu1 %v8319_v21  ;;  %7204 = vmatprep.subr.bf16.mxu0 %v8319_v21  ;;  %v8368_v21 = vsub.f32 %v90_v19, %v8345_v55  ;;  %v12504_v19 = vand.u32 4294901760, %v8121_v18  ;;  %v891_v55 = vsub.f32 %v8332_v1, %v890_v60  ;;  %v8431_v1 = vand.u32 4294901760, %v93_v43 }
  0x6e   :  { %v898_v14 = vsub.f32 %v8337_v4, %v897_v22  ;;  %v8429_v4 = vsub.f32 %v92_v59, %v8400_v17 }
  0x6f   :  { %12500 = vst [vmem:[#allocation35_spill] sm:$0xff] %v8368_v21  ;;  %v8388_v5 = vsub.f32 %v8121_v18, %v12504_v19  ;;  %v8395_v58 = vand.u32 4294901760, %v8368_v21  ;;  %v12507_v18 = vand.u32 4294901760, %v8145_v25  ;;  %v785_v19 = vand.u32 4294901760, %v8375_v34 }
  0x70   :  { %v899_v11 = vand.u32 4294901760, %v898_v14  ;;  %v8426_v14 = vand.u32 4294901760, %v8398_v16  ;;  %12510 = vst [vmem:[#allocation39_spill] sm:$0xff] %v8429_v4 }
  0x71   :  { %v8405_v7 = vsub.f32 %v8145_v25, %v12507_v18  ;;  %v911_v9 = vand.u32 4294901760, %v8388_v5  ;;  %v8416_v25 = vsub.f32 %v8147_v26, %v12508_v15  ;;  %v7113_v18 = vpack.c.bf16 %v773_v57, %v766_v35  ;;  %v94_v15 = vld [vmem:[#allocation5 + $0x30] sm:$0xff] }
  0x72   :  { %v12511_v26 = vand.u32 4294901760, %v8151_v28  ;;  %v786_v3 = vsub.f32 %v8375_v34, %v785_v19  ;;  %v7211_v57 = vpack.c.bf16 %v897_v22, %v890_v60  ;;  %v269_v60 = vsub.f32 %v8398_v16, %v8426_v14 }
  0x73   :  { %v912_v59 = vsub.f32 %v8388_v5, %v911_v9 }
  0x74   :  { %7110 = vmatpush3.bf16.xpose.msra.mxu1 %v8365_v31  ;;  %7206 = vmatpush3.bf16.xpose.msra.mxu0 %v8365_v31  ;;  %v892_v31 = vand.u32 4294901760, %v891_v55  ;;  %v258_v55 = vsub.f32 %v8368_v21, %v8395_v58  ;;  %v8436_v29 = vsub.f32 %v8151_v28, %v12511_v26  ;;  %v12512_v21 = vand.u32 4294901760, %v8173_v36 }
  0x75   :  { %7112 = vmatprep.subr.bf16.mxu1 %v7111_v24  ;;  %7208 = vmatprep.subr.bf16.mxu0 %v7207_v23  ;;  %v12509_v23 = vand.u32 4294901760, %v8149_v27  ;;  %v8450_v28 = vsub.f32 %v8175_v37, %v12513_v30  ;;  %v780_v30 = vand.u32 4294901760, %v779_v0  ;;  %v787_v37 = vand.u32 4294901760, %v786_v3 }
  0x76   :  { %v7115_v35 = vpack.c.bf16 %v899_v11, %v892_v31  ;;  %v8445_v17 = vsub.f32 %v8173_v36, %v12512_v21  ;;  %v8454_v31 = vand.u32 4294901760, %v94_v15  ;;  %v259_v22 = vand.u32 4294901760, %v258_v55 }
  0x77   :  { %v8421_v24 = vsub.f32 %v8149_v27, %v12509_v23  ;;  %v248_v27 = vand.u32 4294901760, %v247_v42  ;;  %v905_v23 = vsub.f32 %v8383_v6, %v904_v47  ;;  %v8459_v21 = vand.u32 4294901760, %v8429_v4 }
  0x78   :  { %v8462_v36 = vsub.f32 %v93_v43, %v8431_v1  ;;  %v913_v11 = vand.u32 4294901760, %v912_v59  ;;  %v925_v55 = vand.u32 4294901760, %v8436_v29  ;;  %v12515_v43 = vand.u32 4294901760, %v8177_v38 }
  0x79   :  { %v906_v42 = vand.u32 4294901760, %v905_v23  ;;  %v12516_v0 = vand.u32 4294901760, %v8179_v39  ;;  %v280_v23 = vsub.f32 %v8429_v4, %v8459_v21 }
  0x7a   :  { %12514 = vst [vmem:[#allocation40_spill] sm:$0xff] %v8462_v36  ;;  %v8472_v26 = vsub.f32 %v8177_v38, %v12515_v43  ;;  %v8487_v38 = vand.u32 4294901760, %v8462_v36  ;;  %v7213_v43 = vpack.c.bf16 %v785_v19, %v778_v8  ;;  %v926_v16 = vsub.f32 %v8436_v29, %v925_v55 }
  0x7b   :  { %6344 = vmatmul.mubr.f32.vlgmr.msra.gmra.mrb[0].mxu1 %v8220_v54  ;;  %6728 = vmatmul.mubr.f32.vlgmr.msra.gmra.mrb[0].mxu0 %v8195_v46  ;;  %v95_v46 = vld [vmem:[#allocation5 + $0x38] sm:$0xff]  ;;  %v12073_v54 = vand.u32 4294901760, %v8405_v7  ;;  %v8477_v3 = vsub.f32 %v8179_v39, %v12516_v0  ;;  %v7117_v39 = vpack.c.bf16 %v787_v37, %v780_v30  ;;  %v7215_v0 = vpack.c.bf16 %v911_v9, %v904_v47 }
  0x7c   :  { %7114 = vmatpush3.bf16.xpose.msra.mxu1 %v7113_v18  ;;  %7210 = vmatpush3.bf16.xpose.msra.mxu0 %v7209_v10  ;;  %v12072_v10 = vand.u32 4294901760, %v8416_v25  ;;  %v12071_v18 = vand.u32 4294901760, %v8421_v24  ;;  %v8489_v59 = vand.u32 4294901760, %v95_v46  ;;  %v12519_v30 = vand.u32 4294901760, %v8212_v50 }
  0x7d   :  { %6345 = vmatprep.mubr.f32.mxu1 %v248_v27  ;;  %6729 = vmatprep.mubr.f32.mxu0 %v8378_v13  ;;  %v12520_v19 = vand.u32 4294901760, %v8214_v51  ;;  %v281_v9 = vand.u32 4294901760, %v280_v23 }
  0x7e   :  { %7116 = vmatprep.subr.bf16.mxu1 %v7115_v35  ;;  %7212 = vmatprep.subr.bf16.mxu0 %v7211_v57  ;;  %v8481_v35 = vsub.f32 %v94_v15, %v8454_v31  ;;  %v270_v57 = vand.u32 4294901760, %v269_v60  ;;  %12518 = vst [vmem:[#allocation42_spill] sm:$0xff] %v8489_v59  ;;  %v800_v15 = vsub.f32 %v8416_v25, %v12072_v10 }
  0x7f   :  { %6346 = vmatmul.mubr.f32.gmra.mrb[2].mxu1 %v248_v27  ;;  %6730 = vmatmul.mubr.f32.gmra.mrb[2].mxu0 %v8378_v13  ;;  %v96_v27 = vld [vmem:[#allocation5 + $0x40] sm:$0xff]  ;;  %v793_v13 = vsub.f32 %v8405_v7, %v12073_v54  ;;  %v7119_v60 = vpack.c.bf16 %v913_v11, %v906_v42  ;;  %v919_v4 = vsub.f32 %v8421_v24, %v12071_v18  ;;  %v927_v18 = vand.u32 4294901760, %v926_v16 }
  0x80   :  { %12517 = vst [vmem:[#allocation41_spill] sm:$0xff] %v8481_v35  ;;  %6347 = vmatprep.mubr.f32.mxu1 %v259_v22  ;;  %6731 = vmatprep.mubr.f32.mxu0 %v8395_v58  ;;  %v8504_v8 = vsub.f32 %v8212_v50, %v12519_v30  ;;  %v8509_v37 = vsub.f32 %v8214_v51, %v12520_v19  ;;  %v8513_v47 = vand.u32 4294901760, %v8481_v35  ;;  %v8521_v11 = vand.u32 4294901760, %v96_v27  ;;  %v97_v51 = vld [vmem:[#allocation5 + $0x48] sm:$0xff] }
  0x81   :  { %v291_v42 = vsub.f32 %v8462_v36, %v8487_v38  ;;  %v8519_v50 = vsub.f32 %v95_v46, %v8489_v59  ;;  %v12076_v30 = vand.u32 4294901760, %v8445_v17  ;;  %v12079_v19 = vand.u32 4294901760, %v8450_v28 }
  0x82   :  { %12522 = vst [vmem:[#allocation44_spill] sm:$0xff] %v8521_v11  ;;  %v920_v23 = vand.u32 4294901760, %v919_v4  ;;  %v12523_v54 = vand.u32 4294901760, %v8216_v52  ;;  %v302_v4 = vsub.f32 %v8481_v35, %v8513_v47  ;;  %v12531_v35 = vand.u32 4294901760, %v8472_v26 }
  0x83   :  { %6348 = vmatmul.mubr.f32.gmra.mrb[4].mxu1 %v259_v22  ;;  %6732 = vmatmul.mubr.f32.gmra.mrb[4].mxu0 %v8395_v58  ;;  %12521 = vst [vmem:[#allocation43_spill] sm:$0xff] %v8519_v50  ;;  %v794_v22 = vand.u32 4294901760, %v793_v13  ;;  %v801_v58 = vand.u32 4294901760, %v800_v15  ;;  %v292_v16 = vand.u32 4294901760, %v291_v42  ;;  %v8542_v15 = vand.u32 4294901760, %v8519_v50 }
  0x84   :  { %6349 = vmatprep.mubr.f32.mxu1 %v270_v57  ;;  %6733 = vmatprep.mubr.f32.mxu0 %v8426_v14  ;;  %v814_v42 = vsub.f32 %v8450_v28, %v12079_v19  ;;  %v7123_v46 = vpack.c.bf16 %v927_v18, %v920_v23  ;;  %v12534_v36 = vand.u32 4294901760, %v8245_v62 }
  0x85   :  { %7118 = vmatpush3.bf16.xpose.msra.mxu1 %v7117_v39  ;;  %7214 = vmatpush3.bf16.xpose.msra.mxu0 %v7213_v43  ;;  %v8530_v39 = vsub.f32 %v8216_v52, %v12523_v54  ;;  %v12524_v43 = vand.u32 4294901760, %v8218_v53  ;;  %v8545_v52 = vsub.f32 %v96_v27, %v8521_v11  ;;  %v8547_v54 = vand.u32 4294901760, %v97_v51 }
  0x86   :  { %7120 = vmatprep.subr.bf16.mxu1 %v7119_v60  ;;  %7216 = vmatprep.subr.bf16.mxu0 %v7215_v0  ;;  %v7121_v60 = vpack.c.bf16 %v801_v58, %v794_v22  ;;  %v12530_v27 = vand.u32 4294901760, %v8421_v24  ;;  %v933_v22 = vsub.f32 %v8472_v26, %v12531_v35  ;;  %v12532_v58 = vand.u32 4294901760, %v8477_v3 }
  0x87   :  { %v8535_v13 = vsub.f32 %v8218_v53, %v12524_v43  ;;  %6350 = vmatmul.mubr.f32.gmra.mrb[6].mxu1 %v270_v57  ;;  %6734 = vmatmul.mubr.f32.gmra.mrb[6].mxu0 %v8426_v14  ;;  %12526 = vst [vmem:[#allocation46_spill] sm:$0xff] %v8545_v52  ;;  %12527 = vst [vmem:[#allocation47_spill] sm:$0xff] %v8547_v54  ;;  %v98_v53 = vld [vmem:[#allocation5 + $0x50] sm:$0xff]  ;;  %v12528_v57 = vand.u32 4294901760, %v8405_v7  ;;  %v12529_v14 = vand.u32 4294901760, %v8416_v25  ;;  %v303_v35 = vand.u32 4294901760, %v302_v4 }
  0x88   :  { %6351 = vmatprep.mubr.f32.mxu1 %v281_v9  ;;  %6735 = vmatprep.mubr.f32.mxu0 %v8459_v21  ;;  %v807_v43 = vsub.f32 %v8445_v17, %v12076_v30  ;;  %v7219_v10 = vpack.c.bf16 %v925_v55, %v12530_v27  ;;  %v8575_v18 = vsub.f32 %v8245_v62, %v12534_v36  ;;  %v8578_v55 = vand.u32 4294901760, %v98_v53  ;;  %v99_v62 = vld [vmem:[#allocation5 + $0x58] sm:$0xff]  ;;  %v100_v36 = vld [vmem:[#allocation5 + $0x60] sm:$0xff] }
  0x89   :  { %12525 = vst [vmem:[#allocation45_spill] sm:$0xff] %v8535_v13  ;;  %v7217_v0 = vpack.c.bf16 %v12529_v14, %v12528_v57  ;;  %v940_v57 = vsub.f32 %v8477_v3, %v12532_v58  ;;  %v12533_v14 = vand.u32 4294901760, %v8243_v61  ;;  %v313_v23 = vsub.f32 %v8519_v50, %v8542_v15 }
  0x8a   :  { %12535 = vst [vmem:[#allocation48_spill] sm:$0xff] %v8578_v55  ;;  %v8587_v27 = vsub.f32 %v97_v51, %v8547_v54  ;;  %v12092_v58 = vand.u32 4294901760, %v8504_v8  ;;  %v934_v4 = vand.u32 4294901760, %v933_v22  ;;  %v946_v50 = vand.u32 4294901760, %v8530_v39 }
  0x8b   :  { %v8570_v30 = vsub.f32 %v8243_v61, %v12533_v14  ;;  %6352 = vmatmul.mubr.f32.gmra.mrb[8].mxu1 %v281_v9  ;;  %6736 = vmatmul.mubr.f32.gmra.mrb[8].mxu0 %v8459_v21  ;;  %v8584_v61 = vand.u32 4294901760, %v8545_v52  ;;  %v808_v21 = vand.u32 4294901760, %v807_v43  ;;  %v815_v9 = vand.u32 4294901760, %v814_v42 }
  0x8c   :  { %6353 = vmatprep.mubr.f32.mxu1 %v292_v16  ;;  %6737 = vmatprep.mubr.f32.mxu0 %v8487_v38  ;;  %12536 = vst [vmem:[#allocation49_spill] sm:$0xff] %v8587_v27  ;;  %v827_v14 = vand.u32 4294901760, %v8509_v37  ;;  %v941_v19 = vand.u32 4294901760, %v940_v57  ;;  %v953_v11 = vand.u32 4294901760, %v8535_v13  ;;  %v12537_v51 = vand.u32 4294901760, %v8247_v63 }
  0x8d   :  { %7122 = vmatpush3.bf16.xpose.msra.mxu1 %v7121_v60  ;;  %7218 = vmatpush3.bf16.xpose.msra.mxu0 %v7217_v0  ;;  %v12538_v60 = vand.u32 4294901760, %v8249_v33  ;;  %v314_v43 = vand.u32 4294901760, %v313_v23  ;;  %v8613_v42 = vand.u32 4294901760, %v8587_v27  ;;  %v821_v57 = vsub.f32 %v8504_v8, %v12092_v58 }
  0x8e   :  { %7124 = vmatprep.subr.bf16.mxu1 %v7123_v46  ;;  %7220 = vmatprep.subr.bf16.mxu0 %v7219_v10  ;;  %v8596_v54 = vsub.f32 %v8247_v63, %v12537_v51  ;;  %v8605_v10 = vsub.f32 %v98_v53, %v8578_v55  ;;  %v8607_v46 = vand.u32 4294901760, %v99_v62  ;;  %v324_v63 = vsub.f32 %v8545_v52, %v8584_v61 }
  0x8f   :  { %v8601_v0 = vsub.f32 %v8249_v33, %v12538_v60  ;;  %6354 = vmatmul.mubr.f32.gmra.mrb[10].mxu1 %v292_v16  ;;  %6738 = vmatmul.mubr.f32.gmra.mrb[10].mxu0 %v8487_v38  ;;  %v8615_v33 = vand.u32 4294901760, %v100_v36  ;;  %v7125_v16 = vpack.c.bf16 %v815_v9, %v808_v21  ;;  %v12542_v38 = vand.u32 4294901760, %v8445_v17 }
  0x90   :  { %12539 = vst [vmem:[#allocation50_spill] sm:$0xff] %v8605_v10  ;;  %12540 = vst [vmem:[#allocation51_spill] sm:$0xff] %v8607_v46  ;;  %6355 = vmatprep.mubr.f32.mxu1 %v303_v35  ;;  %6739 = vmatprep.mubr.f32.mxu0 %v8513_v47  ;;  %v12543_v53 = vand.u32 4294901760, %v8450_v28  ;;  %v828_v23 = vsub.f32 %v8509_v37, %v827_v14  ;;  %v7127_v51 = vpack.c.bf16 %v941_v19, %v934_v4 }
  0x91   :  { %12541 = vst [vmem:[#allocation52_spill] sm:$0xff] %v8615_v33  ;;  %v12544_v60 = vand.u32 4294901760, %v8472_v26  ;;  %v12545_v52 = vand.u32 4294901760, %v8477_v3  ;;  %v947_v59 = vsub.f32 %v8530_v39, %v946_v50  ;;  %v954_v21 = vsub.f32 %v8535_v13, %v953_v11 }
  0x92   :  { %v7221_v22 = vpack.c.bf16 %v12543_v53, %v12542_v38  ;;  %v8633_v9 = vand.u32 4294901760, %v8605_v10  ;;  %v8636_v38 = vsub.f32 %v99_v62, %v8607_v46  ;;  %v325_v19 = vand.u32 4294901760, %v324_v63  ;;  %v101_v53 = vld [vmem:[#allocation5 + $0x68] sm:$0xff] }
  0x93   :  { %v7223_v55 = vpack.c.bf16 %v12545_v52, %v12544_v60  ;;  %6356 = vmatmul.mubr.f32.gmra.mrb[12].mxu1 %v303_v35  ;;  %6740 = vmatmul.mubr.f32.gmra.mrb[12].mxu0 %v8513_v47  ;;  %v335_v52 = vsub.f32 %v8587_v27, %v8613_v42  ;;  %v8642_v4 = vsub.f32 %v100_v36, %v8615_v33  ;;  %v822_v47 = vand.u32 4294901760, %v821_v57 }
  0x94   :  { %12546 = vst [vmem:[#allocation53_spill] sm:$0xff] %v8636_v38  ;;  %6357 = vmatprep.mubr.f32.mxu1 %v314_v43  ;;  %6741 = vmatprep.mubr.f32.mxu0 %v8542_v15  ;;  %v829_v35 = vand.u32 4294901760, %v828_v23  ;;  %v12103_v60 = vand.u32 4294901760, %v8570_v30  ;;  %v12102_v62 = vand.u32 4294901760, %v8575_v18  ;;  %v948_v58 = vand.u32 4294901760, %v947_v59 }
  0x95   :  { %12547 = vst [vmem:[#allocation54_spill] sm:$0xff] %v8642_v4  ;;  %7126 = vmatpush3.bf16.xpose.msra.mxu1 %v7125_v16  ;;  %7222 = vmatpush3.bf16.xpose.msra.mxu0 %v7221_v22  ;;  %v955_v46 = vand.u32 4294901760, %v954_v21  ;;  %v960_v63 = vand.u32 4294901760, %v8596_v54  ;;  %v967_v27 = vand.u32 4294901760, %v8601_v0  ;;  %v12548_v36 = vand.u32 4294901760, %v8281_v41 }
  0x96   :  { %7128 = vmatprep.subr.bf16.mxu1 %v7127_v51  ;;  %7224 = vmatprep.subr.bf16.mxu0 %v7223_v55  ;;  %v346_v16 = vsub.f32 %v8605_v10, %v8633_v9  ;;  %v8657_v22 = vand.u32 4294901760, %v8636_v38  ;;  %v12549_v59 = vand.u32 4294901760, %v8283_v56  ;;  %v336_v57 = vand.u32 4294901760, %v335_v52 }
  0x97   :  { %v8651_v33 = vsub.f32 %v8281_v41, %v12548_v36  ;;  %6358 = vmatmul.mubr.f32.gmra.mrb[14].mxu1 %v314_v43  ;;  %6742 = vmatmul.mubr.f32.gmra.mrb[14].mxu0 %v8542_v15  ;;  %v8666_v41 = vand.u32 4294901760, %v8642_v4  ;;  %v8668_v43 = vand.u32 4294901760, %v101_v53  ;;  %v102_v15 = vld [vmem:[#allocation5 + $0x70] sm:$0xff]  ;;  %v7129_v23 = vpack.c.bf16 %v829_v35, %v822_v47 }
  0x98   :  { %v8662_v55 = vsub.f32 %v8283_v56, %v12549_v59  ;;  %6359 = vmatprep.mubr.f32.mxu1 %v325_v19  ;;  %6743 = vmatprep.mubr.f32.mxu0 %v8584_v61  ;;  %v12550_v51 = vand.u32 4294901760, %v8504_v8  ;;  %v835_v36 = vsub.f32 %v8570_v30, %v12103_v60  ;;  %v842_v56 = vsub.f32 %v8575_v18, %v12102_v62 }
  0x99   :  { %v7131_v59 = vpack.c.bf16 %v955_v46, %v948_v58  ;;  %v7227_v52 = vpack.c.bf16 %v953_v11, %v946_v50  ;;  %v961_v10 = vsub.f32 %v8596_v54, %v960_v63  ;;  %v968_v13 = vsub.f32 %v8601_v0, %v967_v27  ;;  %v103_v50 = vld [vmem:[#allocation5 + $0x78] sm:$0xff] }
  0x9a   :  { %v7225_v21 = vpack.c.bf16 %v827_v14, %v12550_v51  ;;  %v347_v47 = vand.u32 4294901760, %v346_v16  ;;  %v357_v14 = vsub.f32 %v8636_v38, %v8657_v22  ;;  %v8685_v35 = vsub.f32 %v101_v53, %v8668_v43 }
  0x9b   :  { %6360 = vmatmul.mubr.f32.gmra.mrb[16].mxu1 %v325_v19  ;;  %6744 = vmatmul.mubr.f32.gmra.mrb[16].mxu0 %v8584_v61  ;;  %v8687_v51 = vand.u32 4294901760, %v102_v15  ;;  %v836_v61 = vand.u32 4294901760, %v835_v36  ;;  %v843_v46 = vand.u32 4294901760, %v842_v56  ;;  %v368_v19 = vsub.f32 %v8642_v4, %v8666_v41 }
  0x9c   :  { %6361 = vmatprep.mubr.f32.mxu1 %v336_v57  ;;  %6745 = vmatprep.mubr.f32.mxu0 %v8613_v42  ;;  %12551 = vst [vmem:[#allocation55_spill] sm:$0xff] %v8685_v35  ;;  %v962_v16 = vand.u32 4294901760, %v961_v10  ;;  %v969_v62 = vand.u32 4294901760, %v968_v13  ;;  %v12553_v53 = vand.u32 4294901760, %v8285_v48  ;;  %v12554_v11 = vand.u32 4294901760, %v8287_v32  ;;  %v104_v10 = vld [vmem:[#allocation5 + $0x80] sm:$0xff] }
  0x9d   :  { %12552 = vst [vmem:[#allocation56_spill] sm:$0xff] %v8687_v51  ;;  %7130 = vmatpush3.bf16.xpose.msra.mxu1 %v7129_v23  ;;  %7226 = vmatpush3.bf16.xpose.msra.mxu0 %v7225_v21  ;;  %v358_v23 = vand.u32 4294901760, %v357_v14  ;;  %v8704_v21 = vand.u32 4294901760, %v103_v50  ;;  %v8708_v13 = vand.u32 4294901760, %v8685_v35  ;;  %v12556_v36 = vand.u32 4294901760, %v8651_v33 }
  0x9e   :  { %7132 = vmatprep.subr.bf16.mxu1 %v7131_v59  ;;  %7228 = vmatprep.subr.bf16.mxu0 %v7227_v52  ;;  %v8696_v60 = vsub.f32 %v8285_v48, %v12553_v53  ;;  %v8701_v58 = vsub.f32 %v8287_v32, %v12554_v11  ;;  %v8711_v48 = vsub.f32 %v102_v15, %v8687_v51  ;;  %v12558_v56 = vand.u32 4294901760, %v8321_v20 }
  0x9f   :  { %6362 = vmatmul.mubr.f32.gmra.mrb[18].mxu1 %v336_v57  ;;  %6746 = vmatmul.mubr.f32.gmra.mrb[18].mxu0 %v8613_v42  ;;  %v849_v32 = vsub.f32 %v8651_v33, %v12556_v36  ;;  %v12557_v57 = vand.u32 4294901760, %v8662_v55  ;;  %v12559_v52 = vand.u32 4294901760, %v8323_v2  ;;  %v7133_v15 = vpack.c.bf16 %v843_v46, %v836_v61 }
  0xa0   :  { %6363 = vmatprep.mubr.f32.mxu1 %v347_v47  ;;  %6747 = vmatprep.mubr.f32.mxu0 %v8633_v9  ;;  %12555 = vst [vmem:[#allocation57_spill] sm:$0xff] %v8711_v48  ;;  %v8722_v59 = vsub.f32 %v8321_v20, %v12558_v56  ;;  %v12560_v11 = vand.u32 4294901760, %v8570_v30  ;;  %v12561_v53 = vand.u32 4294901760, %v8575_v18  ;;  %v369_v4 = vand.u32 4294901760, %v368_v19 }
  0xa1   :  { %v856_v42 = vsub.f32 %v8662_v55, %v12557_v57  ;;  %v8727_v14 = vsub.f32 %v8323_v2, %v12559_v52  ;;  %v7135_v38 = vpack.c.bf16 %v969_v62, %v962_v16  ;;  %v7231_v51 = vpack.c.bf16 %v967_v27, %v960_v63 }
  0xa2   :  { %v7229_v36 = vpack.c.bf16 %v12561_v53, %v12560_v11  ;;  %v8735_v20 = vsub.f32 %v103_v50, %v8704_v21  ;;  %v8737_v57 = vand.u32 4294901760, %v104_v10  ;;  %v974_v2 = vand.u32 4294901760, %v8696_v60 }
  0xa3   :  { %6364 = vmatmul.mubr.f32.gmra.mrb[20].mxu1 %v347_v47  ;;  %6748 = vmatmul.mubr.f32.gmra.mrb[20].mxu0 %v8633_v9  ;;  %v981_v61 = vand.u32 4294901760, %v8701_v58  ;;  %v379_v46 = vsub.f32 %v8685_v35, %v8708_v13  ;;  %v389_v27 = vand.u32 4294901760, %v8711_v48  ;;  %v850_v62 = vand.u32 4294901760, %v849_v32  ;;  %v105_v9 = vld [vmem:[#allocation5 + $0x88] sm:$0xff] }
  0xa4   :  { %12562 = vst [vmem:[#allocation58_spill] sm:$0xff] %v8735_v20  ;;  %6365 = vmatprep.mubr.f32.mxu1 %v358_v23  ;;  %6749 = vmatprep.mubr.f32.mxu0 %v8657_v22  ;;  %v857_v63 = vand.u32 4294901760, %v856_v42  ;;  %v975_v47 = vsub.f32 %v8696_v60, %v974_v2  ;;  %v862_v19 = vand.u32 4294901760, %v8722_v59  ;;  %v869_v16 = vand.u32 4294901760, %v8727_v14 }
  0xa5   :  { %7134 = vmatpush3.bf16.xpose.msra.mxu1 %v7133_v15  ;;  %7230 = vmatpush3.bf16.xpose.msra.mxu0 %v7229_v36  ;;  %v982_v50 = vsub.f32 %v8701_v58, %v981_v61  ;;  %v8751_v56 = vsub.f32 %v104_v10, %v8737_v57  ;;  %v380_v52 = vand.u32 4294901760, %v379_v46  ;;  %v390_v15 = vsub.f32 %v8711_v48, %v389_v27 }
  0xa6   :  { %7136 = vmatprep.subr.bf16.mxu1 %v7135_v38  ;;  %7232 = vmatprep.subr.bf16.mxu0 %v7231_v51  ;;  %v976_v32 = vand.u32 4294901760, %v975_v47  ;;  %v400_v11 = vand.u32 4294901760, %v8735_v20  ;;  %v8756_v53 = vand.u32 4294901760, %v105_v9  ;;  %v106_v38 = vld [vmem:[#allocation5 + $0x90] sm:$0xff]  ;;  %v7137_v51 = vpack.c.bf16 %v857_v63, %v850_v62 }
  0xa7   :  { %6366 = vmatmul.mubr.f32.gmra.mrb[22].mxu1 %v358_v23  ;;  %6750 = vmatmul.mubr.f32.gmra.mrb[22].mxu0 %v8657_v22  ;;  %12563 = vst [vmem:[#allocation59_spill] sm:$0xff] %v8751_v56  ;;  %v983_v42 = vand.u32 4294901760, %v982_v50  ;;  %v12564_v23 = vand.u32 4294901760, %v8651_v33  ;;  %v12565_v22 = vand.u32 4294901760, %v8662_v55  ;;  %v863_v36 = vsub.f32 %v8722_v59, %v862_v19 }
  0xa8   :  { %6367 = vmatprep.mubr.f32.mxu1 %v369_v4  ;;  %6751 = vmatprep.mubr.f32.mxu0 %v8666_v41  ;;  %v870_v47 = vsub.f32 %v8727_v14, %v869_v16  ;;  %v7235_v35 = vpack.c.bf16 %v981_v61, %v974_v2  ;;  %v8765_v46 = vand.u32 4294901760, %v106_v38  ;;  %v391_v62 = vand.u32 4294901760, %v390_v15  ;;  %v108_v15 = vld [vmem:[#allocation5 + $0xa0] sm:$0xff] }
  0xa9   :  { %v7233_v10 = vpack.c.bf16 %v12565_v22, %v12564_v23  ;;  %v7139_v50 = vpack.c.bf16 %v983_v42, %v976_v32  ;;  %v401_v63 = vsub.f32 %v8735_v20, %v400_v11  ;;  %v411_v48 = vand.u32 4294901760, %v8751_v56  ;;  %v107_v22 = vld [vmem:[#allocation5 + $0x98] sm:$0xff] }
  0xaa   :  { %v8771_v23 = vsub.f32 %v105_v9, %v8756_v53  ;;  %v864_v2 = vand.u32 4294901760, %v863_v36  ;;  %v8779_v42 = vand.u32 4294901760, %v107_v22  ;;  %v8786_v36 = vand.u32 4294901760, %v108_v15 }
  0xab   :  { %6368 = vmatmul.mubr.f32.gmra.mrb[24].mxu1 %v369_v4  ;;  %6752 = vmatmul.mubr.f32.gmra.mrb[24].mxu0 %v8666_v41  ;;  %v871_v4 = vand.u32 4294901760, %v870_v47  ;;  %v8775_v41 = vsub.f32 %v106_v38, %v8765_v46  ;;  %v402_v61 = vand.u32 4294901760, %v401_v63  ;;  %v412_v32 = vsub.f32 %v8751_v56, %v411_v48  ;;  %v109_v47 = vld [vmem:[#allocation5 + $0xa8] sm:$0xff]  ;;  %v110_v63 = vld [vmem:[#allocation5 + $0xb0] sm:$0xff] }
  0xac   :  { %6369 = vmatprep.mubr.f32.mxu1 %v380_v52  ;;  %6753 = vmatprep.mubr.f32.mxu0 %v8708_v13  ;;  %12566 = vst [vmem:[#allocation60_spill] sm:$0xff] %v8771_v23  ;;  %v422_v9 = vand.u32 4294901760, %v8771_v23  ;;  %v8784_v38 = vsub.f32 %v107_v22, %v8779_v42 }
  0xad   :  { %7138 = vmatpush3.bf16.xpose.msra.mxu1 %v7137_v51  ;;  %7234 = vmatpush3.bf16.xpose.msra.mxu0 %v7233_v10  ;;  %12567 = vst [vmem:[#allocation61_spill] sm:$0xff] %v8775_v41  ;;  %v7141_v51 = vpack.c.bf16 %v871_v4, %v864_v2  ;;  %v7237_v10 = vpack.c.bf16 %v869_v16, %v862_v19 }
  0xae   :  { %7140 = vmatprep.subr.bf16.mxu1 %v7139_v50  ;;  %7236 = vmatprep.subr.bf16.mxu0 %v7235_v35  ;;  %v433_v35 = vand.u32 4294901760, %v8775_v41  ;;  %12568 = vst [vmem:[#allocation62_spill] sm:$0xff] %v8784_v38  ;;  %v444_v16 = vand.u32 4294901760, %v8784_v38  ;;  %v8792_v50 = vsub.f32 %v108_v15, %v8786_v36 }
  0xaf   :  { %6370 = vmatmul.mubr.f32.gmra.mrb[26].mxu1 %v380_v52  ;;  %6754 = vmatmul.mubr.f32.gmra.mrb[26].mxu0 %v8708_v13  ;;  %v413_v13 = vand.u32 4294901760, %v412_v32  ;;  %v423_v52 = vsub.f32 %v8771_v23, %v422_v9  ;;  %v111_v32 = vld [vmem:[#allocation5 + $0xb8] sm:$0xff] }
  0xb0   :  { %6371 = vmatprep.mubr.f32.mxu1 %v391_v62  ;;  %6755 = vmatprep.mubr.f32.mxu0 %v389_v27  ;;  %12569 = vst [vmem:[#allocation63_spill] sm:$0xff] %v8792_v50  ;;  %v455_v2 = vand.u32 4294901760, %v8792_v50 }
  0xb1   :  { %v424_v19 = vand.u32 4294901760, %v423_v52 }
  0xb3   :  { %6372 = vmatmul.mubr.f32.gmra.mrb[28].mxu1 %v391_v62  ;;  %6756 = vmatmul.mubr.f32.gmra.mrb[28].mxu0 %v389_v27  ;;  %v434_v27 = vsub.f32 %v8775_v41, %v433_v35  ;;  %v8794_v62 = vand.u32 4294901760, %v109_v47 }
  0xb4   :  { %6373 = vmatprep.mubr.f32.mxu1 %v402_v61  ;;  %6757 = vmatprep.mubr.f32.mxu0 %v400_v11 }
  0xb5   :  { %7142 = vmatpush3.bf16.xpose.msra.mxu1 %v7141_v51  ;;  %7238 = vmatpush3.bf16.xpose.msra.mxu0 %v7237_v10  ;;  %v435_v22 = vand.u32 4294901760, %v434_v27  ;;  %v8801_v4 = vsub.f32 %v109_v47, %v8794_v62  ;;  %v112_v10 = vld [vmem:[#allocation5 + $0xc0] sm:$0xff] }
  0xb6   :  { %7240 = vmatprep.subr.bf16.mxu0 %v8101_v12  ;;  %v7143_v12 = vpack.c.bf16 %v8273_v44, %v8268_v45  ;;  %v456_v45 = vsub.f32 %v8792_v50, %v455_v2 }
  0xb7   :  { %6374 = vmatmul.mubr.f32.gmra.mrb[30].mxu1 %v402_v61  ;;  %6758 = vmatmul.mubr.f32.gmra.mrb[30].mxu0 %v400_v11  ;;  %v445_v11 = vsub.f32 %v8784_v38, %v444_v16  ;;  %12570 = vst [vmem:[#allocation64_spill] sm:$0xff] %v8801_v4  ;;  %v8803_v61 = vand.u32 4294901760, %v110_v63  ;;  %v466_v15 = vand.u32 4294901760, %v8801_v4  ;;  %v117_v38 = vld [vmem:[#allocation5 + $0xe8] sm:$0xff] }
  0xb8   :  { %6375 = vmatprep.mubr.f32.mxu1 %v413_v13  ;;  %6759 = vmatprep.mubr.f32.mxu0 %v411_v48  ;;  %v8852_v41 = vand.u32 4294901760, %v117_v38 }
  0xb9   :  { %7144 = vmatprep.subr.bf16.mxu1 %v7143_v12  ;;  %v446_v44 = vand.u32 4294901760, %v445_v11  ;;  %v8810_v51 = vsub.f32 %v110_v63, %v8803_v61  ;;  %v467_v52 = vsub.f32 %v8801_v4, %v466_v15 }
  0xbb   :  { %6376 = vmatmul.mubr.f32.gmra.mrb[32].mxu1 %v413_v13  ;;  %6760 = vmatmul.mubr.f32.gmra.mrb[32].mxu0 %v411_v48  ;;  %v8805_v48 = vand.u32 4294901760, %v111_v32  ;;  %12571 = vst [vmem:[#allocation65_spill] sm:$0xff] %v8810_v51  ;;  %v8812_v13 = vand.u32 4294901760, %v112_v10  ;;  %v477_v47 = vand.u32 4294901760, %v8810_v51 }
  0xbc   :  { %6377 = vmatprep.mubr.f32.mxu1 %v424_v19  ;;  %6761 = vmatprep.mubr.f32.mxu0 %v422_v9 }
  0xbd   :  { %v8817_v27 = vsub.f32 %v111_v32, %v8805_v48  ;;  %v8820_v63 = vsub.f32 %v112_v10, %v8812_v13 }
  0xbf   :  { %6378 = vmatmul.mubr.f32.gmra.mrb[34].mxu1 %v424_v19  ;;  %6762 = vmatmul.mubr.f32.gmra.mrb[34].mxu0 %v422_v9  ;;  %v457_v9 = vand.u32 4294901760, %v456_v45  ;;  %12572 = vst [vmem:[#allocation66_spill] sm:$0xff] %v8817_v27  ;;  %v113_v19 = vld [vmem:[#allocation5 + $0xc8] sm:$0xff]  ;;  %12573 = vst [vmem:[#allocation67_spill] sm:$0xff] %v8820_v63  ;;  %v488_v12 = vand.u32 4294901760, %v8817_v27  ;;  %v114_v45 = vld [vmem:[#allocation5 + $0xd0] sm:$0xff] }
  0xc0   :  { %6379 = vmatprep.mubr.f32.mxu1 %v435_v22  ;;  %6763 = vmatprep.mubr.f32.mxu0 %v433_v35  ;;  %v8824_v11 = vand.u32 4294901760, %v113_v19  ;;  %v499_v32 = vand.u32 4294901760, %v8820_v63 }
  0xc2   :  { %v8829_v10 = vsub.f32 %v113_v19, %v8824_v11  ;;  %v500_v4 = vsub.f32 %v8820_v63, %v499_v32 }
  0xc3   :  { %6380 = vmatmul.mubr.f32.gmra.mrb[36].mxu1 %v435_v22  ;;  %6764 = vmatmul.mubr.f32.gmra.mrb[36].mxu0 %v433_v35  ;;  %v468_v35 = vand.u32 4294901760, %v467_v52  ;;  %v478_v22 = vsub.f32 %v8810_v51, %v477_v47  ;;  %v8831_v52 = vand.u32 4294901760, %v114_v45  ;;  %v115_v51 = vld [vmem:[#allocation5 + $0xd8] sm:$0xff] }
  0xc4   :  { %6381 = vmatprep.mubr.f32.mxu1 %v446_v44  ;;  %6765 = vmatprep.mubr.f32.mxu0 %v444_v16  ;;  %12574 = vst [vmem:[#allocation68_spill] sm:$0xff] %v8829_v10 }
  0xc5   :  { %v8836_v50 = vsub.f32 %v114_v45, %v8831_v52 }
  0xc7   :  { %6382 = vmatmul.mubr.f32.gmra.mrb[38].mxu1 %v446_v44  ;;  %6766 = vmatmul.mubr.f32.gmra.mrb[38].mxu0 %v444_v16  ;;  %v479_v16 = vand.u32 4294901760, %v478_v22  ;;  %v489_v44 = vsub.f32 %v8817_v27, %v488_v12  ;;  %12575 = vst [vmem:[#allocation69_spill] sm:$0xff] %v8836_v50  ;;  %v8838_v22 = vand.u32 4294901760, %v115_v51  ;;  %v116_v27 = vld [vmem:[#allocation5 + $0xe0] sm:$0xff]  ;;  %v521_v63 = vand.u32 4294901760, %v8836_v50 }
  0xc8   :  { %6383 = vmatprep.mubr.f32.mxu1 %v457_v9  ;;  %6767 = vmatprep.mubr.f32.mxu0 %v455_v2  ;;  %v8840_v19 = vand.u32 4294901760, %v116_v27 }
  0xca   :  { %v8848_v45 = vsub.f32 %v116_v27, %v8840_v19 }
  0xcb   :  { %6384 = vmatmul.mubr.f32.gmra.mrb[40].mxu1 %v457_v9  ;;  %6768 = vmatmul.mubr.f32.gmra.mrb[40].mxu0 %v455_v2  ;;  %v490_v2 = vand.u32 4294901760, %v489_v44  ;;  %v510_v9 = vand.u32 4294901760, %v8829_v10  ;;  %v8845_v44 = vsub.f32 %v115_v51, %v8838_v22 }
  0xcc   :  { %6385 = vmatprep.mubr.f32.mxu1 %v468_v35  ;;  %6769 = vmatprep.mubr.f32.mxu0 %v466_v15  ;;  %12577 = vst [vmem:[#allocation71_spill] sm:$0xff] %v8848_v45 }
  0xcd   :  { %12576 = vst [vmem:[#allocation70_spill] sm:$0xff] %v8845_v44 }
  0xcf   :  { %6386 = vmatmul.mubr.f32.gmra.mrb[42].mxu1 %v468_v35  ;;  %6770 = vmatmul.mubr.f32.gmra.mrb[42].mxu0 %v466_v15  ;;  %v501_v15 = vand.u32 4294901760, %v500_v4  ;;  %v511_v35 = vsub.f32 %v8829_v10, %v510_v9  ;;  %v532_v4 = vand.u32 4294901760, %v8845_v44  ;;  %v118_v10 = vld [vmem:[#allocation5 + $0xf0] sm:$0xff] }
  0xd0   :  { %6387 = vmatprep.mubr.f32.mxu1 %v479_v16  ;;  %6771 = vmatprep.mubr.f32.mxu0 %v477_v47  ;;  %v8854_v51 = vand.u32 4294901760, %v118_v10 }
  0xd1   :  { %v533_v27 = vsub.f32 %v8845_v44, %v532_v4  ;;  %v120_v44 = vld [vmem:[#allocation5 + $0x100] sm:$0xff] }
  0xd2   :  { %12578 = vst [vmem:[#allocation72_spill] sm:$0xff] %v8854_v51  ;;  %v8862_v23 = vsub.f32 %v118_v10, %v8854_v51 }
  0xd3   :  { %6388 = vmatmul.mubr.f32.gmra.mrb[44].mxu1 %v479_v16  ;;  %6772 = vmatmul.mubr.f32.gmra.mrb[44].mxu0 %v477_v47  ;;  %v512_v47 = vand.u32 4294901760, %v511_v35  ;;  %v522_v16 = vsub.f32 %v8836_v50, %v521_v63  ;;  %v8859_v35 = vsub.f32 %v117_v38, %v8852_v41  ;;  %v119_v50 = vld [vmem:[#allocation5 + $0xf8] sm:$0xff] }
  0xd4   :  { %6389 = vmatprep.mubr.f32.mxu1 %v490_v2  ;;  %6773 = vmatprep.mubr.f32.mxu0 %v488_v12  ;;  %12580 = vst [vmem:[#allocation74_spill] sm:$0xff] %v8862_v23  ;;  %v8866_v56 = vand.u32 4294901760, %v119_v50  ;;  %v565_v38 = vand.u32 4294901760, %v8862_v23 }
  0xd5   :  { %12579 = vst [vmem:[#allocation73_spill] sm:$0xff] %v8859_v35 }
  0xd6   :  { %12581 = vst [vmem:[#allocation75_spill] sm:$0xff] %v8866_v56  ;;  %v566_v20 = vsub.f32 %v8862_v23, %v565_v38 }
  0xd7   :  { %6390 = vmatmul.mubr.f32.gmra.mrb[46].mxu1 %v490_v2  ;;  %6774 = vmatmul.mubr.f32.gmra.mrb[46].mxu0 %v488_v12  ;;  %v523_v12 = vand.u32 4294901760, %v522_v16  ;;  %v543_v2 = vand.u32 4294901760, %v8848_v45  ;;  %v554_v16 = vand.u32 4294901760, %v8859_v35 }
  0xd8   :  { %6391 = vmatprep.mubr.f32.mxu1 %v501_v15  ;;  %6775 = vmatprep.mubr.f32.mxu0 %v499_v32 }
  0xd9   :  { %v555_v10 = vsub.f32 %v8859_v35, %v554_v16  ;;  %v122_v35 = vld [vmem:[#allocation5 + $0x110] sm:$0xff] }
  0xdb   :  { %6392 = vmatmul.mubr.f32.gmra.mrb[48].mxu1 %v501_v15  ;;  %6776 = vmatmul.mubr.f32.gmra.mrb[48].mxu0 %v499_v32  ;;  %v534_v32 = vand.u32 4294901760, %v533_v27  ;;  %v544_v15 = vsub.f32 %v8848_v45, %v543_v2  ;;  %v8873_v27 = vand.u32 4294901760, %v120_v44  ;;  %v121_v45 = vld [vmem:[#allocation5 + $0x108] sm:$0xff] }
  0xdc   :  { %6393 = vmatprep.mubr.f32.mxu1 %v512_v47  ;;  %6777 = vmatprep.mubr.f32.mxu0 %v510_v9 }
  0xdd   :  { %12583 = vst [vmem:[#allocation77_spill] sm:$0xff] %v8873_v27  ;;  %v8878_v51 = vsub.f32 %v120_v44, %v8873_v27  ;;  %v124_v27 = vld [vmem:[#allocation5 + $0x120] sm:$0xff] }
  0xdf   :  { %6394 = vmatmul.mubr.f32.gmra.mrb[50].mxu1 %v512_v47  ;;  %6778 = vmatmul.mubr.f32.gmra.mrb[50].mxu0 %v510_v9  ;;  %v545_v9 = vand.u32 4294901760, %v544_v15  ;;  %v8871_v47 = vsub.f32 %v119_v50, %v8866_v56  ;;  %12584 = vst [vmem:[#allocation78_spill] sm:$0xff] %v8878_v51  ;;  %v8880_v15 = vand.u32 4294901760, %v121_v45  ;;  %v567_v50 = vand.u32 4294901760, %v566_v20  ;;  %v123_v56 = vld [vmem:[#allocation5 + $0x118] sm:$0xff] }
  0xe0   :  { %6395 = vmatprep.mubr.f32.mxu1 %v523_v12  ;;  %6779 = vmatprep.mubr.f32.mxu0 %v521_v63  ;;  %v8889_v44 = vand.u32 4294901760, %v123_v56 }
  0xe1   :  { %12582 = vst [vmem:[#allocation76_spill] sm:$0xff] %v8871_v47  ;;  %12585 = vst [vmem:[#allocation79_spill] sm:$0xff] %v8880_v15  ;;  %v8885_v23 = vsub.f32 %v121_v45, %v8880_v15  ;;  %v8896_v45 = vand.u32 4294901760, %v124_v27 }
  0xe2   :  { %12588 = vst [vmem:[#allocation82_spill] sm:$0xff] %v8889_v44 }
  0xe3   :  { %6396 = vmatmul.mubr.f32.gmra.mrb[52].mxu1 %v523_v12  ;;  %6780 = vmatmul.mubr.f32.gmra.mrb[52].mxu0 %v521_v63  ;;  %v556_v63 = vand.u32 4294901760, %v555_v10  ;;  %v576_v12 = vand.u32 4294901760, %v8871_v47  ;;  %12586 = vst [vmem:[#allocation80_spill] sm:$0xff] %v8885_v23  ;;  %v8887_v10 = vand.u32 4294901760, %v122_v35  ;;  %12590 = vst [vmem:[#allocation84_spill] sm:$0xff] %v8896_v45 }
  0xe4   :  { %6397 = vmatprep.mubr.f32.mxu1 %v534_v32  ;;  %6781 = vmatprep.mubr.f32.mxu0 %v532_v4 }
  0xe5   :  { %12587 = vst [vmem:[#allocation81_spill] sm:$0xff] %v8887_v10 }
  0xe7   :  { %6398 = vmatmul.mubr.f32.gmra.mrb[54].mxu1 %v534_v32  ;;  %6782 = vmatmul.mubr.f32.gmra.mrb[54].mxu0 %v532_v4  ;;  %v577_v4 = vsub.f32 %v8871_v47, %v576_v12  ;;  %v587_v32 = vand.u32 4294901760, %v8878_v51  ;;  %v8894_v47 = vsub.f32 %v122_v35, %v8887_v10  ;;  %v8904_v35 = vsub.f32 %v124_v27, %v8896_v45 }
  0xe8   :  { %6399 = vmatprep.mubr.f32.mxu1 %v545_v9  ;;  %6783 = vmatprep.mubr.f32.mxu0 %v543_v2 }
  0xe9   :  { %v588_v20 = vsub.f32 %v8878_v51, %v587_v32  ;;  %12589 = vst [vmem:[#allocation83_spill] sm:$0xff] %v8894_v47  ;;  %v609_v15 = vand.u32 4294901760, %v8894_v47  ;;  %v125_v51 = vld [vmem:[#allocation5 + $0x128] sm:$0xff]  ;;  %12592 = vst [vmem:[#allocation86_spill] sm:$0xff] %v8904_v35 }
  0xea   :  { %v8908_v10 = vand.u32 4294901760, %v125_v51 }
  0xeb   :  { %6400 = vmatmul.mubr.f32.gmra.mrb[56].mxu1 %v545_v9  ;;  %6784 = vmatmul.mubr.f32.gmra.mrb[56].mxu0 %v543_v2  ;;  %v578_v2 = vand.u32 4294901760, %v577_v4  ;;  %v598_v9 = vand.u32 4294901760, %v8885_v23  ;;  %v8901_v4 = vsub.f32 %v123_v56, %v8889_v44  ;;  %v631_v56 = vand.u32 4294901760, %v8904_v35 }
  0xec   :  { %6401 = vmatprep.mubr.f32.mxu1 %v556_v63  ;;  %6785 = vmatprep.mubr.f32.mxu0 %v554_v16  ;;  %12593 = vst [vmem:[#allocation87_spill] sm:$0xff] %v8908_v10 }
  0xed   :  { %12591 = vst [vmem:[#allocation85_spill] sm:$0xff] %v8901_v4  ;;  %v632_v45 = vsub.f32 %v8904_v35, %v631_v56 }
  0xef   :  { %6402 = vmatmul.mubr.f32.gmra.mrb[58].mxu1 %v556_v63  ;;  %6786 = vmatmul.mubr.f32.gmra.mrb[58].mxu0 %v554_v16  ;;  %v589_v16 = vand.u32 4294901760, %v588_v20  ;;  %v599_v63 = vsub.f32 %v8885_v23, %v598_v9  ;;  %v620_v20 = vand.u32 4294901760, %v8901_v4  ;;  %v126_v23 = vld [vmem:[#allocation5 + $0x130] sm:$0xff] }
  0xf0   :  { %6403 = vmatprep.mubr.f32.mxu1 %v567_v50  ;;  %6787 = vmatprep.mubr.f32.mxu0 %v565_v38 }
  0xf1   :  { %v621_v27 = vsub.f32 %v8901_v4, %v620_v20  ;;  %v128_v4 = vld [vmem:[#allocation5 + $0x140] sm:$0xff] }
  0xf3   :  { %6404 = vmatmul.mubr.f32.gmra.mrb[60].mxu1 %v567_v50  ;;  %6788 = vmatmul.mubr.f32.gmra.mrb[60].mxu0 %v565_v38  ;;  %v600_v38 = vand.u32 4294901760, %v599_v63  ;;  %v610_v50 = vsub.f32 %v8894_v47, %v609_v15  ;;  %v8915_v63 = vand.u32 4294901760, %v126_v23  ;;  %v127_v47 = vld [vmem:[#allocation5 + $0x138] sm:$0xff] }
  0xf4   :  { %6405 = vmatprep.mubr.f32.mxu1 %v578_v2  ;;  %6789 = vmatprep.mubr.f32.mxu0 %v576_v12 }
  0xf5   :  { %12595 = vst [vmem:[#allocation89_spill] sm:$0xff] %v8915_v63  ;;  %v8920_v44 = vsub.f32 %v126_v23, %v8915_v63 }
  0xf7   :  { %6406 = vmatmul.mubr.f32.gmra.mrb[62].mxu1 %v578_v2  ;;  %6790 = vmatmul.mubr.f32.gmra.mrb[62].mxu0 %v576_v12  ;;  %v611_v12 = vand.u32 4294901760, %v610_v50  ;;  %v8913_v2 = vsub.f32 %v125_v51, %v8908_v10  ;;  %12596 = vst [vmem:[#allocation90_spill] sm:$0xff] %v8920_v44  ;;  %v8922_v50 = vand.u32 4294901760, %v127_v47  ;;  %v8924_v51 = vand.u32 4294901760, %v128_v4  ;;  %v129_v10 = vld [vmem:[#allocation5 + $0x148] sm:$0xff] }
  0xf8   :  { %6407 = vmatprep.mubr.f32.mxu1 %v589_v16  ;;  %6791 = vmatprep.mubr.f32.mxu0 %v587_v32  ;;  %v653_v35 = vand.u32 4294901760, %v8920_v44  ;;  %v8936_v63 = vand.u32 4294901760, %v129_v10 }
  0xf9   :  { %12594 = vst [vmem:[#allocation88_spill] sm:$0xff] %v8913_v2  ;;  %12597 = vst [vmem:[#allocation91_spill] sm:$0xff] %v8922_v50  ;;  %v8932_v23 = vsub.f32 %v128_v4, %v8924_v51 }
  0xfa   :  { %12598 = vst [vmem:[#allocation92_spill] sm:$0xff] %v8924_v51  ;;  %12601 = vst [vmem:[#allocation95_spill] sm:$0xff] %v8936_v63 }
  0xfb   :  { %6408 = vmatmul.mubr.f32.gmra.mrb[64].mxu1 %v589_v16  ;;  %6792 = vmatmul.mubr.f32.gmra.mrb[64].mxu0 %v587_v32  ;;  %v622_v32 = vand.u32 4294901760, %v621_v27  ;;  %v642_v16 = vand.u32 4294901760, %v8913_v2  ;;  %v8929_v27 = vsub.f32 %v127_v47, %v8922_v50  ;;  %12600 = vst [vmem:[#allocation94_spill] sm:$0xff] %v8932_v23 }
  0xfc   :  { %6409 = vmatprep.mubr.f32.mxu1 %v600_v38  ;;  %6793 = vmatprep.mubr.f32.mxu0 %v598_v9 }
  0xfd   :  { %12599 = vst [vmem:[#allocation93_spill] sm:$0xff] %v8929_v27 }
  0xff   :  { %6410 = vmatmul.mubr.f32.gmra.mrb[66].mxu1 %v600_v38  ;;  %6794 = vmatmul.mubr.f32.gmra.mrb[66].mxu0 %v598_v9  ;;  %v633_v9 = vand.u32 4294901760, %v632_v45  ;;  %v643_v38 = vsub.f32 %v8913_v2, %v642_v16  ;;  %v664_v45 = vand.u32 4294901760, %v8929_v27  ;;  %v130_v2 = vld [vmem:[#allocation5 + $0x150] sm:$0xff] }
 0x100   :  { %6411 = vmatprep.mubr.f32.mxu1 %v611_v12  ;;  %6795 = vmatprep.mubr.f32.mxu0 %v609_v15  ;;  %v8938_v47 = vand.u32 4294901760, %v130_v2 }
 0x101   :  { %v665_v4 = vsub.f32 %v8929_v27, %v664_v45  ;;  %v132_v27 = vld [vmem:[#allocation5 + $0x160] sm:$0xff] }
 0x102   :  { %12602 = vst [vmem:[#allocation96_spill] sm:$0xff] %v8938_v47 }
 0x103   :  { %6412 = vmatmul.mubr.f32.gmra.mrb[68].mxu1 %v611_v12  ;;  %6796 = vmatmul.mubr.f32.gmra.mrb[68].mxu0 %v609_v15  ;;  %v644_v15 = vand.u32 4294901760, %v643_v38  ;;  %v654_v12 = vsub.f32 %v8920_v44, %v653_v35  ;;  %v8943_v38 = vsub.f32 %v129_v10, %v8936_v63  ;;  %v131_v44 = vld [vmem:[#allocation5 + $0x158] sm:$0xff]  ;;  %v8957_v63 = vand.u32 4294901760, %v132_v27 }
 0x104   :  { %6413 = vmatprep.mubr.f32.mxu1 %v622_v32  ;;  %6797 = vmatprep.mubr.f32.mxu0 %v620_v20  ;;  %v8945_v51 = vand.u32 4294901760, %v131_v44 }
 0x105   :  { %12603 = vst [vmem:[#allocation97_spill] sm:$0xff] %v8943_v38  ;;  %v686_v50 = vand.u32 4294901760, %v8943_v38 }
 0x106   :  { %12604 = vst [vmem:[#allocation98_spill] sm:$0xff] %v8945_v51  ;;  %v8953_v10 = vsub.f32 %v131_v44, %v8945_v51 }
 0x107   :  { %6414 = vmatmul.mubr.f32.gmra.mrb[70].mxu1 %v622_v32  ;;  %6798 = vmatmul.mubr.f32.gmra.mrb[70].mxu0 %v620_v20  ;;  %v655_v20 = vand.u32 4294901760, %v654_v12  ;;  %v675_v32 = vand.u32 4294901760, %v8932_v23  ;;  %v8950_v12 = vsub.f32 %v130_v2, %v8938_v47 }
 0x108   :  { %6415 = vmatprep.mubr.f32.mxu1 %v633_v9  ;;  %6799 = vmatprep.mubr.f32.mxu0 %v631_v56  ;;  %12606 = vst [vmem:[#allocation100_spill] sm:$0xff] %v8953_v10  ;;  %v708_v2 = vand.u32 4294901760, %v8953_v10 }
 0x109   :  { %12605 = vst [vmem:[#allocation99_spill] sm:$0xff] %v8950_v12 }
 0x10a   :  { %v709_v51 = vsub.f32 %v8953_v10, %v708_v2 }
 0x10b   :  { %6416 = vmatmul.mubr.f32.gmra.mrb[72].mxu1 %v633_v9  ;;  %6800 = vmatmul.mubr.f32.gmra.mrb[72].mxu0 %v631_v56  ;;  %v666_v56 = vand.u32 4294901760, %v665_v4  ;;  %v676_v9 = vsub.f32 %v8932_v23, %v675_v32  ;;  %v697_v4 = vand.u32 4294901760, %v8950_v12  ;;  %v133_v23 = vld [vmem:[#allocation5 + $0x168] sm:$0xff] }
 0x10c   :  { %6417 = vmatprep.mubr.f32.mxu1 %v644_v15  ;;  %6801 = vmatprep.mubr.f32.mxu0 %v642_v16 }
 0x10d   :  { %v698_v44 = vsub.f32 %v8950_v12, %v697_v4  ;;  %v135_v12 = vld [vmem:[#allocation5 + $0x178] sm:$0xff] }
 0x10f   :  { %6418 = vmatmul.mubr.f32.gmra.mrb[74].mxu1 %v644_v15  ;;  %6802 = vmatmul.mubr.f32.gmra.mrb[74].mxu0 %v642_v16  ;;  %v677_v16 = vand.u32 4294901760, %v676_v9  ;;  %v687_v15 = vsub.f32 %v8943_v38, %v686_v50  ;;  %v8964_v9 = vand.u32 4294901760, %v133_v23  ;;  %v134_v38 = vld [vmem:[#allocation5 + $0x170] sm:$0xff] }
 0x110   :  { %6419 = vmatprep.mubr.f32.mxu1 %v655_v20  ;;  %6803 = vmatprep.mubr.f32.mxu0 %v653_v35 }
 0x111   :  { %v8969_v47 = vsub.f32 %v133_v23, %v8964_v9 }
 0x113   :  { %6420 = vmatmul.mubr.f32.gmra.mrb[76].mxu1 %v655_v20  ;;  %6804 = vmatmul.mubr.f32.gmra.mrb[76].mxu0 %v653_v35  ;;  %v688_v35 = vand.u32 4294901760, %v687_v15  ;;  %v8962_v20 = vsub.f32 %v132_v27, %v8957_v63  ;;  %v8971_v15 = vand.u32 4294901760, %v134_v38  ;;  %v710_v27 = vand.u32 4294901760, %v709_v51 }
 0x114   :  { %6421 = vmatprep.mubr.f32.mxu1 %v666_v56  ;;  %6805 = vmatprep.mubr.f32.mxu0 %v664_v45 }
 0x115   :  { %12607 = vst [vmem:[#allocation101_spill] sm:$0xff] %v8962_v20  ;;  %v8976_v10 = vsub.f32 %v134_v38, %v8971_v15 }
 0x117   :  { %6422 = vmatmul.mubr.f32.gmra.mrb[78].mxu1 %v666_v56  ;;  %6806 = vmatmul.mubr.f32.gmra.mrb[78].mxu0 %v664_v45  ;;  %v699_v45 = vand.u32 4294901760, %v698_v44  ;;  %v719_v56 = vand.u32 4294901760, %v8962_v20  ;;  %v8978_v44 = vand.u32 4294901760, %v135_v12 }
 0x118   :  { %6423 = vmatprep.mubr.f32.mxu1 %v677_v16  ;;  %6807 = vmatprep.mubr.f32.mxu0 %v675_v32 }
 0x119   :  { %v8983_v51 = vsub.f32 %v135_v12, %v8978_v44 }
 0x11b   :  { %6424 = vmatmul.mubr.f32.gmra.mrb[80].mxu1 %v677_v16  ;;  %6808 = vmatmul.mubr.f32.gmra.mrb[80].mxu0 %v675_v32  ;;  %v720_v32 = vsub.f32 %v8962_v20, %v719_v56  ;;  %v730_v16 = vand.u32 4294901760, %v8969_v47 }
 0x11c   :  { %6425 = vmatprep.mubr.f32.mxu1 %v688_v35  ;;  %6809 = vmatprep.mubr.f32.mxu0 %v686_v50 }
 0x11d   :  { %v721_v23 = vand.u32 4294901760, %v720_v32 }
 0x11f   :  { %6426 = vmatmul.mubr.f32.gmra.mrb[82].mxu1 %v688_v35  ;;  %6810 = vmatmul.mubr.f32.gmra.mrb[82].mxu0 %v686_v50  ;;  %v731_v35 = vsub.f32 %v8969_v47, %v730_v16  ;;  %v741_v50 = vand.u32 4294901760, %v8976_v10 }
 0x120   :  { %6427 = vmatprep.mubr.f32.mxu1 %v699_v45  ;;  %6811 = vmatprep.mubr.f32.mxu0 %v697_v4 }
 0x121   :  { %v732_v38 = vand.u32 4294901760, %v731_v35  ;;  %v742_v20 = vsub.f32 %v8976_v10, %v741_v50 }
 0x123   :  { %6428 = vmatmul.mubr.f32.gmra.mrb[84].mxu1 %v699_v45  ;;  %6812 = vmatmul.mubr.f32.gmra.mrb[84].mxu0 %v697_v4  ;;  %v752_v45 = vand.u32 4294901760, %v8983_v51  ;;  %v743_v4 = vand.u32 4294901760, %v742_v20 }
 0x124   :  { %6429 = vmatprep.mubr.f32.mxu1 %v710_v27  ;;  %6813 = vmatprep.mubr.f32.mxu0 %v708_v2 }
 0x125   :  { %v753_v32 = vsub.f32 %v8983_v51, %v752_v45 }
 0x127   :  { %6430 = vmatmul.mubr.f32.gmra.mrb[86].mxu1 %v710_v27  ;;  %6814 = vmatmul.mubr.f32.gmra.mrb[86].mxu0 %v708_v2  ;;  %v754_v12 = vand.u32 4294901760, %v753_v32  ;;  %v12608_v2 = vld [vmem:[#allocation25_spill] sm:$0xff]  ;;  %v12610_v27 = vld [vmem:[#allocation30_spill] sm:$0xff]  ;;  %v7151_v32 = vpack.c.bf16 %v8388_v5, %v8383_v6  ;;  %v7155_v6 = vpack.c.bf16 %v8436_v29, %v8421_v24  ;;  %v12620_v5 = vld [vmem:[#allocation16_spill] sm:$0xff]  ;;  %v7157_v29 = vpack.c.bf16 %v8450_v28, %v8445_v17 }
 0x128   :  { %6431 = vmatprep.mubr.f32.mxu1 %v721_v23  ;;  %6815 = vmatprep.mubr.f32.mxu0 %v719_v56  ;;  %v12623_v24 = vld [vmem:[#allocation19_spill] sm:$0xff]  ;;  %v12625_v17 = vld [vmem:[#allocation44_spill] sm:$0xff]  ;;  %v7161_v28 = vpack.c.bf16 %v8509_v37, %v8504_v8  ;;  %v7165_v37 = vpack.c.bf16 %v8575_v18, %v8570_v30  ;;  %v7171_v18 = vpack.c.bf16 %v8701_v58, %v8696_v60 }
 0x129   :  { %v12630_v8 = vld [vmem:[#allocation48_spill] sm:$0xff]  ;;  %v7173_v60 = vpack.c.bf16 %v8727_v14, %v8722_v59  ;;  %v12640_v59 = vld [vmem:[#allocation75_spill] sm:$0xff]  ;;  %v12641_v14 = vld [vmem:[#allocation77_spill] sm:$0xff] }
 0x12a   :  { %v12634_v30 = vld [vmem:[#allocation52_spill] sm:$0xff] }
 0x12b   :  { %6432 = vmatmul.mubr.f32.gmra.mrb[88].mxu1 %v721_v23  ;;  %6816 = vmatmul.mubr.f32.gmra.mrb[88].mxu0 %v719_v56  ;;  %v12609_v56 = vld [vmem:[#allocation26_spill] sm:$0xff]  ;;  %v12611_v23 = vld [vmem:[#allocation31_spill] sm:$0xff]  ;;  %v12639_v58 = vld [vmem:[#allocation72_spill] sm:$0xff] }
 0x12c   :  { %6433 = vmatprep.mubr.f32.mxu1 %v732_v38  ;;  %6817 = vmatprep.mubr.f32.mxu0 %v730_v16  ;;  %v7145_v20 = vpack.c.bf16 %v12609_v56, %v12608_v2  ;;  %v7147_v35 = vpack.c.bf16 %v12611_v23, %v12610_v27  ;;  %v12617_v2 = vld [vmem:[#allocation14_spill] sm:$0xff]  ;;  %v12618_v56 = vld [vmem:[#allocation15_spill] sm:$0xff]  ;;  %v12624_v27 = vld [vmem:[#allocation20_spill] sm:$0xff] }
 0x12d   :  { %v12627_v23 = vld [vmem:[#allocation47_spill] sm:$0xff] }
 0x12f   :  { %6434 = vmatmul.mubr.f32.gmra.mrb[90].mxu1 %v732_v38  ;;  %6818 = vmatmul.mubr.f32.gmra.mrb[90].mxu0 %v730_v16  ;;  %v12612_v16 = vld [vmem:[#allocation12_spill] sm:$0xff]  ;;  %v12614_v38 = vld [vmem:[#allocation13_spill] sm:$0xff] }
 0x130   :  { %6435 = vmatprep.mubr.f32.mxu1 %v743_v4  ;;  %6819 = vmatprep.mubr.f32.mxu0 %v741_v50 }
 0x133   :  { %6436 = vmatmul.mubr.f32.gmra.mrb[92].mxu1 %v743_v4  ;;  %6820 = vmatmul.mubr.f32.gmra.mrb[92].mxu0 %v741_v50  ;;  %v12613_v50 = vld [vmem:[#allocation29_spill] sm:$0xff]  ;;  %v7149_v4 = vpack.c.bf16 %v8375_v34, %v8359_v49  ;;  %v12619_v34 = vld [vmem:[#allocation38_spill] sm:$0xff]  ;;  %v7153_v49 = vpack.c.bf16 %v8416_v25, %v8405_v7  ;;  %v7159_v7 = vpack.c.bf16 %v8477_v3, %v8472_v26 }
 0x134   :  { %6437 = vmatprep.mubr.f32.mxu1 %v754_v12  ;;  %6821 = vmatprep.mubr.f32.mxu0 %v752_v45  ;;  %v12622_v25 = vld [vmem:[#allocation42_spill] sm:$0xff]  ;;  %v12626_v26 = vld [vmem:[#allocation45_spill] sm:$0xff] }
 0x135   :  { %v7163_v3 = vpack.c.bf16 %v12626_v26, %v8530_v39  ;;  %v7167_v39 = vpack.c.bf16 %v8601_v0, %v8596_v54  ;;  %v7169_v54 = vpack.c.bf16 %v8662_v55, %v8651_v33  ;;  %v12635_v0 = vld [vmem:[#allocation27_spill] sm:$0xff]  ;;  %v12637_v33 = vld [vmem:[#allocation56_spill] sm:$0xff]  ;;  %v12638_v55 = vld [vmem:[#allocation34_spill] sm:$0xff] }
 0x136   :  { %v12652_v26 = vld [vmem:[#allocation98_spill] sm:$0xff] }
 0x137   :  { %6438 = vmatmul.mubr.f32.gmra.mrb[94].mxu1 %v754_v12  ;;  %6822 = vmatmul.mubr.f32.gmra.mrb[94].mxu0 %v752_v45  ;;  %v12615_v45 = vld [vmem:[#allocation32_spill] sm:$0xff] }
 0x138   :  { %6471 = vmatprep.mubr.f32.mxu1 %v8181_v40  ;;  %6855 = vmatprep.mubr.f32.mxu0 %v8181_v40  ;;  %v12616_v12 = vld [vmem:[#allocation36_spill] sm:$0xff] }
 0x13b   :  { %6472 = vmatmul.mubr.f32.vlgmr.msra.gmra.mrb[0].mxu1 %v8181_v40  ;;  %6856 = vmatmul.mubr.f32.vlgmr.msra.gmra.mrb[0].mxu0 %v8181_v40 }
 0x13c   :  { %7146 = vmatpush3.bf16.xpose.msra.mxu1 %v7145_v20  ;;  %7242 = vmatpush3.bf16.xpose.msra.mxu0 %v12612_v16  ;;  %v12621_v20 = vld [vmem:[#allocation17_spill] sm:$0xff]  ;;  %v12629_v16 = vld [vmem:[#allocation22_spill] sm:$0xff] }
 0x13d   :  { %6473 = vmatprep.mubr.f32.mxu1 %v12613_v50  ;;  %6857 = vmatprep.mubr.f32.mxu0 %v12613_v50 }
 0x13e   :  { %7148 = vmatprep.subr.bf16.mxu1 %v7147_v35  ;;  %7244 = vmatprep.subr.bf16.mxu0 %v12614_v38  ;;  %v12628_v35 = vld [vmem:[#allocation21_spill] sm:$0xff]  ;;  %v12631_v38 = vld [vmem:[#allocation51_spill] sm:$0xff] }
 0x13f   :  { %6474 = vmatmul.mubr.f32.gmra.mrb[2].mxu1 %v12613_v50  ;;  %6858 = vmatmul.mubr.f32.gmra.mrb[2].mxu0 %v12613_v50 }
 0x140   :  { %6475 = vmatprep.mubr.f32.mxu1 %v12615_v45  ;;  %6859 = vmatprep.mubr.f32.mxu0 %v12615_v45 }
 0x143   :  { %6476 = vmatmul.mubr.f32.gmra.mrb[4].mxu1 %v12615_v45  ;;  %6860 = vmatmul.mubr.f32.gmra.mrb[4].mxu0 %v12615_v45 }
 0x144   :  { %6477 = vmatprep.mubr.f32.mxu1 %v12616_v12  ;;  %6861 = vmatprep.mubr.f32.mxu0 %v12616_v12 }
 0x145   :  { %7150 = vmatpush3.bf16.xpose.msra.mxu1 %v7149_v4  ;;  %7246 = vmatpush3.bf16.xpose.msra.mxu0 %v12617_v2  ;;  %v12632_v4 = vld [vmem:[#allocation23_spill] sm:$0xff]  ;;  %v12636_v2 = vld [vmem:[#allocation28_spill] sm:$0xff] }
 0x146   :  { %7152 = vmatprep.subr.bf16.mxu1 %v7151_v32  ;;  %7248 = vmatprep.subr.bf16.mxu0 %v12618_v56  ;;  %v12633_v32 = vld [vmem:[#allocation24_spill] sm:$0xff]  ;;  %v12642_v56 = vld [vmem:[#allocation79_spill] sm:$0xff] }
 0x147   :  { %6478 = vmatmul.mubr.f32.gmra.mrb[6].mxu1 %v12616_v12  ;;  %6862 = vmatmul.mubr.f32.gmra.mrb[6].mxu0 %v12616_v12 }
 0x148   :  { %6479 = vmatprep.mubr.f32.mxu1 %v12619_v34  ;;  %6863 = vmatprep.mubr.f32.mxu0 %v12619_v34 }
 0x14b   :  { %6480 = vmatmul.mubr.f32.gmra.mrb[8].mxu1 %v12619_v34  ;;  %6864 = vmatmul.mubr.f32.gmra.mrb[8].mxu0 %v12619_v34 }
 0x14c   :  { %6481 = vmatprep.mubr.f32.mxu1 %v8431_v1  ;;  %6865 = vmatprep.mubr.f32.mxu0 %v8431_v1 }
 0x14d   :  { %7154 = vmatpush3.bf16.xpose.msra.mxu1 %v7153_v49  ;;  %7250 = vmatpush3.bf16.xpose.msra.mxu0 %v12620_v5  ;;  %v12643_v49 = vld [vmem:[#allocation81_spill] sm:$0xff]  ;;  %v12645_v5 = vld [vmem:[#allocation84_spill] sm:$0xff] }
 0x14e   :  { %7156 = vmatprep.subr.bf16.mxu1 %v7155_v6  ;;  %7252 = vmatprep.subr.bf16.mxu0 %v12621_v20  ;;  %v12644_v6 = vld [vmem:[#allocation82_spill] sm:$0xff]  ;;  %v12646_v20 = vld [vmem:[#allocation87_spill] sm:$0xff] }
 0x14f   :  { %6482 = vmatmul.mubr.f32.gmra.mrb[10].mxu1 %v8431_v1  ;;  %6866 = vmatmul.mubr.f32.gmra.mrb[10].mxu0 %v8431_v1 }
 0x150   :  { %6483 = vmatprep.mubr.f32.mxu1 %v8454_v31  ;;  %6867 = vmatprep.mubr.f32.mxu0 %v8454_v31 }
 0x153   :  { %6484 = vmatmul.mubr.f32.gmra.mrb[12].mxu1 %v8454_v31  ;;  %6868 = vmatmul.mubr.f32.gmra.mrb[12].mxu0 %v8454_v31 }
 0x154   :  { %6485 = vmatprep.mubr.f32.mxu1 %v12622_v25  ;;  %6869 = vmatprep.mubr.f32.mxu0 %v12622_v25 }
 0x155   :  { %7158 = vmatpush3.bf16.xpose.msra.mxu1 %v7157_v29  ;;  %7254 = vmatpush3.bf16.xpose.msra.mxu0 %v12623_v24  ;;  %v12647_v29 = vld [vmem:[#allocation89_spill] sm:$0xff]  ;;  %v12649_v24 = vld [vmem:[#allocation92_spill] sm:$0xff] }
 0x156   :  { %7160 = vmatprep.subr.bf16.mxu1 %v7159_v7  ;;  %7256 = vmatprep.subr.bf16.mxu0 %v12624_v27  ;;  %v12648_v7 = vld [vmem:[#allocation91_spill] sm:$0xff] }
 0x157   :  { %6486 = vmatmul.mubr.f32.gmra.mrb[14].mxu1 %v12622_v25  ;;  %6870 = vmatmul.mubr.f32.gmra.mrb[14].mxu0 %v12622_v25  ;;  %v12650_v27 = vld [vmem:[#allocation95_spill] sm:$0xff] }
 0x158   :  { %6487 = vmatprep.mubr.f32.mxu1 %v12625_v17  ;;  %6871 = vmatprep.mubr.f32.mxu0 %v12625_v17 }
 0x15b   :  { %6488 = vmatmul.mubr.f32.gmra.mrb[16].mxu1 %v12625_v17  ;;  %6872 = vmatmul.mubr.f32.gmra.mrb[16].mxu0 %v12625_v17 }
 0x15c   :  { %6489 = vmatprep.mubr.f32.mxu1 %v12627_v23  ;;  %6873 = vmatprep.mubr.f32.mxu0 %v12627_v23 }
 0x15d   :  { %7162 = vmatpush3.bf16.xpose.msra.mxu1 %v7161_v28  ;;  %7258 = vmatpush3.bf16.xpose.msra.mxu0 %v12628_v35  ;;  %v12651_v28 = vld [vmem:[#allocation96_spill] sm:$0xff]  ;;  %v12654_v35 = vld [vmem:[#allocation33_spill] sm:$0xff] }
 0x15e   :  { %7164 = vmatprep.subr.bf16.mxu1 %v7163_v3  ;;  %7260 = vmatprep.subr.bf16.mxu0 %v12629_v16  ;;  %v12653_v3 = vld [vmem:[#allocation18_spill] sm:$0xff]  ;;  %v12655_v16 = vld [vmem:[#allocation35_spill] sm:$0xff] }
 0x15f   :  { %6490 = vmatmul.mubr.f32.gmra.mrb[18].mxu1 %v12627_v23  ;;  %6874 = vmatmul.mubr.f32.gmra.mrb[18].mxu0 %v12627_v23 }
 0x160   :  { %6491 = vmatprep.mubr.f32.mxu1 %v12630_v8  ;;  %6875 = vmatprep.mubr.f32.mxu0 %v12630_v8 }
 0x163   :  { %6492 = vmatmul.mubr.f32.gmra.mrb[20].mxu1 %v12630_v8  ;;  %6876 = vmatmul.mubr.f32.gmra.mrb[20].mxu0 %v12630_v8 }
 0x164   :  { %6493 = vmatprep.mubr.f32.mxu1 %v12631_v38  ;;  %6877 = vmatprep.mubr.f32.mxu0 %v12631_v38 }
 0x165   :  { %7166 = vmatpush3.bf16.xpose.msra.mxu1 %v7165_v37  ;;  %7262 = vmatpush3.bf16.xpose.msra.mxu0 %v12632_v4  ;;  %v12656_v37 = vld [vmem:[#allocation37_spill] sm:$0xff] }
 0x166   :  { %7168 = vmatprep.subr.bf16.mxu1 %v7167_v39  ;;  %7264 = vmatprep.subr.bf16.mxu0 %v12633_v32  ;;  %v12668_v39 = vld [vmem:[#allocation58_spill] sm:$0xff]  ;;  %v12671_v4 = vld [vmem:[#allocation61_spill] sm:$0xff]  ;;  %v12687_v32 = vld [vmem:[#allocation83_spill] sm:$0xff] }
 0x167   :  { %6494 = vmatmul.mubr.f32.gmra.mrb[22].mxu1 %v12631_v38  ;;  %6878 = vmatmul.mubr.f32.gmra.mrb[22].mxu0 %v12631_v38 }
 0x168   :  { %6495 = vmatprep.mubr.f32.mxu1 %v12634_v30  ;;  %6879 = vmatprep.mubr.f32.mxu0 %v12634_v30 }
 0x16b   :  { %6496 = vmatmul.mubr.f32.gmra.mrb[24].mxu1 %v12634_v30  ;;  %6880 = vmatmul.mubr.f32.gmra.mrb[24].mxu0 %v12634_v30 }
 0x16c   :  { %6497 = vmatprep.mubr.f32.mxu1 %v8668_v43  ;;  %6881 = vmatprep.mubr.f32.mxu0 %v8668_v43 }
 0x16d   :  { %7170 = vmatpush3.bf16.xpose.msra.mxu1 %v7169_v54  ;;  %7266 = vmatpush3.bf16.xpose.msra.mxu0 %v12635_v0  ;;  %v12689_v54 = vld [vmem:[#allocation86_spill] sm:$0xff] }
 0x16e   :  { %7172 = vmatprep.subr.bf16.mxu1 %v7171_v18  ;;  %7268 = vmatprep.subr.bf16.mxu0 %v12636_v2  ;;  %v12690_v18 = vld [vmem:[#allocation88_spill] sm:$0xff]  ;;  %v12691_v0 = vld [vmem:[#allocation90_spill] sm:$0xff]  ;;  %v12692_v2 = vld [vmem:[#allocation93_spill] sm:$0xff] }
 0x16f   :  { %6498 = vmatmul.mubr.f32.gmra.mrb[26].mxu1 %v8668_v43  ;;  %6882 = vmatmul.mubr.f32.gmra.mrb[26].mxu0 %v8668_v43 }
 0x170   :  { %6499 = vmatprep.mubr.f32.mxu1 %v12637_v33  ;;  %6883 = vmatprep.mubr.f32.mxu0 %v12637_v33 }
 0x173   :  { %6500 = vmatmul.mubr.f32.gmra.mrb[28].mxu1 %v12637_v33  ;;  %6884 = vmatmul.mubr.f32.gmra.mrb[28].mxu0 %v12637_v33 }
 0x174   :  { %6501 = vmatprep.mubr.f32.mxu1 %v8704_v21  ;;  %6885 = vmatprep.mubr.f32.mxu0 %v8704_v21 }
 0x175   :  { %7174 = vmatpush3.bf16.xpose.msra.mxu1 %v7173_v60  ;;  %7270 = vmatpush3.bf16.xpose.msra.mxu0 %v12638_v55  ;;  %v12694_v60 = vld [vmem:[#allocation97_spill] sm:$0xff]  ;;  %v12695_v55 = vld [vmem:[#allocation99_spill] sm:$0xff] }
 0x177   :  { %6502 = vmatmul.mubr.f32.gmra.mrb[30].mxu1 %v8704_v21  ;;  %6886 = vmatmul.mubr.f32.gmra.mrb[30].mxu0 %v8704_v21 }
 0x178   :  { %6503 = vmatprep.mubr.f32.mxu1 %v8737_v57  ;;  %6887 = vmatprep.mubr.f32.mxu0 %v8737_v57 }
 0x17b   :  { %6504 = vmatmul.mubr.f32.gmra.mrb[32].mxu1 %v8737_v57  ;;  %6888 = vmatmul.mubr.f32.gmra.mrb[32].mxu0 %v8737_v57 }
 0x17c   :  { %6505 = vmatprep.mubr.f32.mxu1 %v8756_v53  ;;  %6889 = vmatprep.mubr.f32.mxu0 %v8756_v53 }
 0x17f   :  { %6506 = vmatmul.mubr.f32.gmra.mrb[34].mxu1 %v8756_v53  ;;  %6890 = vmatmul.mubr.f32.gmra.mrb[34].mxu0 %v8756_v53 }
 0x180   :  { %6507 = vmatprep.mubr.f32.mxu1 %v8765_v46  ;;  %6891 = vmatprep.mubr.f32.mxu0 %v8765_v46 }
 0x183   :  { %6508 = vmatmul.mubr.f32.gmra.mrb[36].mxu1 %v8765_v46  ;;  %6892 = vmatmul.mubr.f32.gmra.mrb[36].mxu0 %v8765_v46 }
 0x184   :  { %6509 = vmatprep.mubr.f32.mxu1 %v8779_v42  ;;  %6893 = vmatprep.mubr.f32.mxu0 %v8779_v42 }
 0x187   :  { %6510 = vmatmul.mubr.f32.gmra.mrb[38].mxu1 %v8779_v42  ;;  %6894 = vmatmul.mubr.f32.gmra.mrb[38].mxu0 %v8779_v42 }
 0x188   :  { %6511 = vmatprep.mubr.f32.mxu1 %v8786_v36  ;;  %6895 = vmatprep.mubr.f32.mxu0 %v8786_v36 }
 0x18b   :  { %6512 = vmatmul.mubr.f32.gmra.mrb[40].mxu1 %v8786_v36  ;;  %6896 = vmatmul.mubr.f32.gmra.mrb[40].mxu0 %v8786_v36 }
 0x18c   :  { %6513 = vmatprep.mubr.f32.mxu1 %v8794_v62  ;;  %6897 = vmatprep.mubr.f32.mxu0 %v8794_v62 }
 0x18f   :  { %6514 = vmatmul.mubr.f32.gmra.mrb[42].mxu1 %v8794_v62  ;;  %6898 = vmatmul.mubr.f32.gmra.mrb[42].mxu0 %v8794_v62 }
 0x190   :  { %6515 = vmatprep.mubr.f32.mxu1 %v8803_v61  ;;  %6899 = vmatprep.mubr.f32.mxu0 %v8803_v61 }
 0x193   :  { %6516 = vmatmul.mubr.f32.gmra.mrb[44].mxu1 %v8803_v61  ;;  %6900 = vmatmul.mubr.f32.gmra.mrb[44].mxu0 %v8803_v61 }
 0x194   :  { %6517 = vmatprep.mubr.f32.mxu1 %v8805_v48  ;;  %6901 = vmatprep.mubr.f32.mxu0 %v8805_v48 }
 0x197   :  { %6518 = vmatmul.mubr.f32.gmra.mrb[46].mxu1 %v8805_v48  ;;  %6902 = vmatmul.mubr.f32.gmra.mrb[46].mxu0 %v8805_v48 }
 0x198   :  { %6519 = vmatprep.mubr.f32.mxu1 %v8812_v13  ;;  %6903 = vmatprep.mubr.f32.mxu0 %v8812_v13 }
 0x19b   :  { %6520 = vmatmul.mubr.f32.gmra.mrb[48].mxu1 %v8812_v13  ;;  %6904 = vmatmul.mubr.f32.gmra.mrb[48].mxu0 %v8812_v13 }
 0x19c   :  { %6521 = vmatprep.mubr.f32.mxu1 %v8824_v11  ;;  %6905 = vmatprep.mubr.f32.mxu0 %v8824_v11 }
 0x19f   :  { %6522 = vmatmul.mubr.f32.gmra.mrb[50].mxu1 %v8824_v11  ;;  %6906 = vmatmul.mubr.f32.gmra.mrb[50].mxu0 %v8824_v11 }
 0x1a0   :  { %6523 = vmatprep.mubr.f32.mxu1 %v8831_v52  ;;  %6907 = vmatprep.mubr.f32.mxu0 %v8831_v52 }
 0x1a3   :  { %6524 = vmatmul.mubr.f32.gmra.mrb[52].mxu1 %v8831_v52  ;;  %6908 = vmatmul.mubr.f32.gmra.mrb[52].mxu0 %v8831_v52 }
 0x1a4   :  { %6525 = vmatprep.mubr.f32.mxu1 %v8838_v22  ;;  %6909 = vmatprep.mubr.f32.mxu0 %v8838_v22 }
 0x1a7   :  { %6526 = vmatmul.mubr.f32.gmra.mrb[54].mxu1 %v8838_v22  ;;  %6910 = vmatmul.mubr.f32.gmra.mrb[54].mxu0 %v8838_v22 }
 0x1a8   :  { %6527 = vmatprep.mubr.f32.mxu1 %v8840_v19  ;;  %6911 = vmatprep.mubr.f32.mxu0 %v8840_v19 }
 0x1ab   :  { %6528 = vmatmul.mubr.f32.gmra.mrb[56].mxu1 %v8840_v19  ;;  %6912 = vmatmul.mubr.f32.gmra.mrb[56].mxu0 %v8840_v19 }
 0x1ac   :  { %6529 = vmatprep.mubr.f32.mxu1 %v8852_v41  ;;  %6913 = vmatprep.mubr.f32.mxu0 %v8852_v41 }
 0x1af   :  { %6530 = vmatmul.mubr.f32.gmra.mrb[58].mxu1 %v8852_v41  ;;  %6914 = vmatmul.mubr.f32.gmra.mrb[58].mxu0 %v8852_v41 }
 0x1b0   :  { %6531 = vmatprep.mubr.f32.mxu1 %v12639_v58  ;;  %6915 = vmatprep.mubr.f32.mxu0 %v12639_v58 }
 0x1b3   :  { %6532 = vmatmul.mubr.f32.gmra.mrb[60].mxu1 %v12639_v58  ;;  %6916 = vmatmul.mubr.f32.gmra.mrb[60].mxu0 %v12639_v58 }
 0x1b4   :  { %6533 = vmatprep.mubr.f32.mxu1 %v12640_v59  ;;  %6917 = vmatprep.mubr.f32.mxu0 %v12640_v59 }
 0x1b7   :  { %6534 = vmatmul.mubr.f32.gmra.mrb[62].mxu1 %v12640_v59  ;;  %6918 = vmatmul.mubr.f32.gmra.mrb[62].mxu0 %v12640_v59 }
 0x1b8   :  { %6535 = vmatprep.mubr.f32.mxu1 %v12641_v14  ;;  %6919 = vmatprep.mubr.f32.mxu0 %v12641_v14 }
 0x1bb   :  { %6536 = vmatmul.mubr.f32.gmra.mrb[64].mxu1 %v12641_v14  ;;  %6920 = vmatmul.mubr.f32.gmra.mrb[64].mxu0 %v12641_v14 }
 0x1bc   :  { %6537 = vmatprep.mubr.f32.mxu1 %v12642_v56  ;;  %6921 = vmatprep.mubr.f32.mxu0 %v12642_v56 }
 0x1bf   :  { %6538 = vmatmul.mubr.f32.gmra.mrb[66].mxu1 %v12642_v56  ;;  %6922 = vmatmul.mubr.f32.gmra.mrb[66].mxu0 %v12642_v56 }
 0x1c0   :  { %6539 = vmatprep.mubr.f32.mxu1 %v12643_v49  ;;  %6923 = vmatprep.mubr.f32.mxu0 %v12643_v49 }
 0x1c3   :  { %6540 = vmatmul.mubr.f32.gmra.mrb[68].mxu1 %v12643_v49  ;;  %6924 = vmatmul.mubr.f32.gmra.mrb[68].mxu0 %v12643_v49 }
 0x1c4   :  { %6541 = vmatprep.mubr.f32.mxu1 %v12644_v6  ;;  %6925 = vmatprep.mubr.f32.mxu0 %v12644_v6 }
 0x1c7   :  { %6542 = vmatmul.mubr.f32.gmra.mrb[70].mxu1 %v12644_v6  ;;  %6926 = vmatmul.mubr.f32.gmra.mrb[70].mxu0 %v12644_v6 }
 0x1c8   :  { %6543 = vmatprep.mubr.f32.mxu1 %v12645_v5  ;;  %6927 = vmatprep.mubr.f32.mxu0 %v12645_v5 }
 0x1cb   :  { %6544 = vmatmul.mubr.f32.gmra.mrb[72].mxu1 %v12645_v5  ;;  %6928 = vmatmul.mubr.f32.gmra.mrb[72].mxu0 %v12645_v5 }
 0x1cc   :  { %6545 = vmatprep.mubr.f32.mxu1 %v12646_v20  ;;  %6929 = vmatprep.mubr.f32.mxu0 %v12646_v20 }
 0x1cf   :  { %6546 = vmatmul.mubr.f32.gmra.mrb[74].mxu1 %v12646_v20  ;;  %6930 = vmatmul.mubr.f32.gmra.mrb[74].mxu0 %v12646_v20 }
 0x1d0   :  { %6547 = vmatprep.mubr.f32.mxu1 %v12647_v29  ;;  %6931 = vmatprep.mubr.f32.mxu0 %v12647_v29 }
 0x1d3   :  { %6548 = vmatmul.mubr.f32.gmra.mrb[76].mxu1 %v12647_v29  ;;  %6932 = vmatmul.mubr.f32.gmra.mrb[76].mxu0 %v12647_v29 }
 0x1d4   :  { %6549 = vmatprep.mubr.f32.mxu1 %v12648_v7  ;;  %6933 = vmatprep.mubr.f32.mxu0 %v12648_v7 }
 0x1d7   :  { %6550 = vmatmul.mubr.f32.gmra.mrb[78].mxu1 %v12648_v7  ;;  %6934 = vmatmul.mubr.f32.gmra.mrb[78].mxu0 %v12648_v7 }
 0x1d8   :  { %6551 = vmatprep.mubr.f32.mxu1 %v12649_v24  ;;  %6935 = vmatprep.mubr.f32.mxu0 %v12649_v24 }
 0x1db   :  { %6552 = vmatmul.mubr.f32.gmra.mrb[80].mxu1 %v12649_v24  ;;  %6936 = vmatmul.mubr.f32.gmra.mrb[80].mxu0 %v12649_v24 }
 0x1dc   :  { %6553 = vmatprep.mubr.f32.mxu1 %v12650_v27  ;;  %6937 = vmatprep.mubr.f32.mxu0 %v12650_v27 }
 0x1df   :  { %6554 = vmatmul.mubr.f32.gmra.mrb[82].mxu1 %v12650_v27  ;;  %6938 = vmatmul.mubr.f32.gmra.mrb[82].mxu0 %v12650_v27 }
 0x1e0   :  { %6555 = vmatprep.mubr.f32.mxu1 %v12651_v28  ;;  %6939 = vmatprep.mubr.f32.mxu0 %v12651_v28 }
 0x1e3   :  { %6556 = vmatmul.mubr.f32.gmra.mrb[84].mxu1 %v12651_v28  ;;  %6940 = vmatmul.mubr.f32.gmra.mrb[84].mxu0 %v12651_v28 }
 0x1e4   :  { %6557 = vmatprep.mubr.f32.mxu1 %v12652_v26  ;;  %6941 = vmatprep.mubr.f32.mxu0 %v12652_v26 }
 0x1e7   :  { %6558 = vmatmul.mubr.f32.gmra.mrb[86].mxu1 %v12652_v26  ;;  %6942 = vmatmul.mubr.f32.gmra.mrb[86].mxu0 %v12652_v26 }
 0x1e8   :  { %6559 = vmatprep.mubr.f32.mxu1 %v8957_v63  ;;  %6943 = vmatprep.mubr.f32.mxu0 %v8957_v63 }
 0x1eb   :  { %6560 = vmatmul.mubr.f32.gmra.mrb[88].mxu1 %v8957_v63  ;;  %6944 = vmatmul.mubr.f32.gmra.mrb[88].mxu0 %v8957_v63 }
 0x1ec   :  { %6561 = vmatprep.mubr.f32.mxu1 %v8964_v9  ;;  %6945 = vmatprep.mubr.f32.mxu0 %v8964_v9 }
 0x1ef   :  { %6562 = vmatmul.mubr.f32.gmra.mrb[90].mxu1 %v8964_v9  ;;  %6946 = vmatmul.mubr.f32.gmra.mrb[90].mxu0 %v8964_v9 }
 0x1f0   :  { %6563 = vmatprep.mubr.f32.mxu1 %v8971_v15  ;;  %6947 = vmatprep.mubr.f32.mxu0 %v8971_v15 }
 0x1f3   :  { %6564 = vmatmul.mubr.f32.gmra.mrb[92].mxu1 %v8971_v15  ;;  %6948 = vmatmul.mubr.f32.gmra.mrb[92].mxu0 %v8971_v15 }
 0x1f4   :  { %6565 = vmatprep.mubr.f32.mxu1 %v8978_v44  ;;  %6949 = vmatprep.mubr.f32.mxu0 %v8978_v44 }
 0x1f7   :  { %6566 = vmatmul.mubr.f32.gmra.mrb[94].mxu1 %v8978_v44  ;;  %6950 = vmatmul.mubr.f32.gmra.mrb[94].mxu0 %v8978_v44 }
 0x1f8   :  { %6599 = vmatprep.mubr.f32.mxu1 %v12653_v3  ;;  %6983 = vmatprep.mubr.f32.mxu0 %v8181_v40 }
 0x1fb   :  { %6600 = vmatmul.mubr.f32.vlgmr.msra.gmra.mrb[0].mxu1 %v12653_v3  ;;  %6984 = vmatmul.mubr.f32.vlgmr.msra.gmra.mrb[0].mxu0 %v8181_v40  ;;  %v12657_v40 = vld [vmem:[#allocation39_spill] sm:$0xff] }
 0x1fc   :  { %6601 = vmatprep.mubr.f32.mxu1 %v12654_v35  ;;  %6985 = vmatprep.mubr.f32.mxu0 %v12613_v50 }
 0x1ff   :  { %6602 = vmatmul.mubr.f32.gmra.mrb[2].mxu1 %v12654_v35  ;;  %6986 = vmatmul.mubr.f32.gmra.mrb[2].mxu0 %v12613_v50  ;;  %v12658_v50 = vld [vmem:[#allocation40_spill] sm:$0xff] }
 0x200   :  { %6603 = vmatprep.mubr.f32.mxu1 %v12655_v16  ;;  %6987 = vmatprep.mubr.f32.mxu0 %v12615_v45 }
 0x203   :  { %6604 = vmatmul.mubr.f32.gmra.mrb[4].mxu1 %v12655_v16  ;;  %6988 = vmatmul.mubr.f32.gmra.mrb[4].mxu0 %v12615_v45  ;;  %v12659_v45 = vld [vmem:[#allocation41_spill] sm:$0xff] }
 0x204   :  { %6605 = vmatprep.mubr.f32.mxu1 %v12656_v37  ;;  %6989 = vmatprep.mubr.f32.mxu0 %v12616_v12 }
 0x207   :  { %6606 = vmatmul.mubr.f32.gmra.mrb[6].mxu1 %v12656_v37  ;;  %6990 = vmatmul.mubr.f32.gmra.mrb[6].mxu0 %v12616_v12  ;;  %v12660_v12 = vld [vmem:[#allocation43_spill] sm:$0xff] }
 0x208   :  { %6607 = vmatprep.mubr.f32.mxu1 %v12657_v40  ;;  %6991 = vmatprep.mubr.f32.mxu0 %v12619_v34 }
 0x20b   :  { %6608 = vmatmul.mubr.f32.gmra.mrb[8].mxu1 %v12657_v40  ;;  %6992 = vmatmul.mubr.f32.gmra.mrb[8].mxu0 %v12619_v34  ;;  %v12661_v34 = vld [vmem:[#allocation46_spill] sm:$0xff] }
 0x20c   :  { %6609 = vmatprep.mubr.f32.mxu1 %v12658_v50  ;;  %6993 = vmatprep.mubr.f32.mxu0 %v8431_v1 }
 0x20f   :  { %6610 = vmatmul.mubr.f32.gmra.mrb[10].mxu1 %v12658_v50  ;;  %6994 = vmatmul.mubr.f32.gmra.mrb[10].mxu0 %v8431_v1  ;;  %v12662_v1 = vld [vmem:[#allocation49_spill] sm:$0xff] }
 0x210   :  { %6611 = vmatprep.mubr.f32.mxu1 %v12659_v45  ;;  %6995 = vmatprep.mubr.f32.mxu0 %v8454_v31 }
 0x213   :  { %6612 = vmatmul.mubr.f32.gmra.mrb[12].mxu1 %v12659_v45  ;;  %6996 = vmatmul.mubr.f32.gmra.mrb[12].mxu0 %v8454_v31  ;;  %v12663_v31 = vld [vmem:[#allocation50_spill] sm:$0xff] }
 0x214   :  { %6613 = vmatprep.mubr.f32.mxu1 %v12660_v12  ;;  %6997 = vmatprep.mubr.f32.mxu0 %v12622_v25 }
 0x217   :  { %6614 = vmatmul.mubr.f32.gmra.mrb[14].mxu1 %v12660_v12  ;;  %6998 = vmatmul.mubr.f32.gmra.mrb[14].mxu0 %v12622_v25  ;;  %v12664_v25 = vld [vmem:[#allocation53_spill] sm:$0xff] }
 0x218   :  { %6615 = vmatprep.mubr.f32.mxu1 %v12661_v34  ;;  %6999 = vmatprep.mubr.f32.mxu0 %v12625_v17 }
 0x21b   :  { %6616 = vmatmul.mubr.f32.gmra.mrb[16].mxu1 %v12661_v34  ;;  %7000 = vmatmul.mubr.f32.gmra.mrb[16].mxu0 %v12625_v17  ;;  %v12665_v17 = vld [vmem:[#allocation54_spill] sm:$0xff] }
 0x21c   :  { %6617 = vmatprep.mubr.f32.mxu1 %v12662_v1  ;;  %7001 = vmatprep.mubr.f32.mxu0 %v12627_v23 }
 0x21f   :  { %6618 = vmatmul.mubr.f32.gmra.mrb[18].mxu1 %v12662_v1  ;;  %7002 = vmatmul.mubr.f32.gmra.mrb[18].mxu0 %v12627_v23  ;;  %v12666_v23 = vld [vmem:[#allocation55_spill] sm:$0xff] }
 0x220   :  { %6619 = vmatprep.mubr.f32.mxu1 %v12663_v31  ;;  %7003 = vmatprep.mubr.f32.mxu0 %v12630_v8 }
 0x223   :  { %6620 = vmatmul.mubr.f32.gmra.mrb[20].mxu1 %v12663_v31  ;;  %7004 = vmatmul.mubr.f32.gmra.mrb[20].mxu0 %v12630_v8  ;;  %v12667_v8 = vld [vmem:[#allocation57_spill] sm:$0xff] }
 0x224   :  { %6621 = vmatprep.mubr.f32.mxu1 %v12664_v25  ;;  %7005 = vmatprep.mubr.f32.mxu0 %v12631_v38 }
 0x227   :  { %6622 = vmatmul.mubr.f32.gmra.mrb[22].mxu1 %v12664_v25  ;;  %7006 = vmatmul.mubr.f32.gmra.mrb[22].mxu0 %v12631_v38  ;;  %v12669_v38 = vld [vmem:[#allocation59_spill] sm:$0xff] }
 0x228   :  { %6623 = vmatprep.mubr.f32.mxu1 %v12665_v17  ;;  %7007 = vmatprep.mubr.f32.mxu0 %v12634_v30 }
 0x22b   :  { %6624 = vmatmul.mubr.f32.gmra.mrb[24].mxu1 %v12665_v17  ;;  %7008 = vmatmul.mubr.f32.gmra.mrb[24].mxu0 %v12634_v30  ;;  %v12688_v30 = vld [vmem:[#allocation85_spill] sm:$0xff] }
 0x22c   :  { %6625 = vmatprep.mubr.f32.mxu1 %v12666_v23  ;;  %7009 = vmatprep.mubr.f32.mxu0 %v8668_v43 }
 0x22f   :  { %6626 = vmatmul.mubr.f32.gmra.mrb[26].mxu1 %v12666_v23  ;;  %7010 = vmatmul.mubr.f32.gmra.mrb[26].mxu0 %v8668_v43  ;;  %v12670_v43 = vld [vmem:[#allocation60_spill] sm:$0xff] }
 0x230   :  { %6627 = vmatprep.mubr.f32.mxu1 %v12667_v8  ;;  %7011 = vmatprep.mubr.f32.mxu0 %v12637_v33 }
 0x233   :  { %6628 = vmatmul.mubr.f32.gmra.mrb[28].mxu1 %v12667_v8  ;;  %7012 = vmatmul.mubr.f32.gmra.mrb[28].mxu0 %v12637_v33  ;;  %v12693_v33 = vld [vmem:[#allocation94_spill] sm:$0xff] }
 0x234   :  { %6629 = vmatprep.mubr.f32.mxu1 %v12668_v39  ;;  %7013 = vmatprep.mubr.f32.mxu0 %v8704_v21 }
 0x237   :  { %6630 = vmatmul.mubr.f32.gmra.mrb[30].mxu1 %v12668_v39  ;;  %7014 = vmatmul.mubr.f32.gmra.mrb[30].mxu0 %v8704_v21  ;;  %v12672_v21 = vld [vmem:[#allocation62_spill] sm:$0xff] }
 0x238   :  { %6631 = vmatprep.mubr.f32.mxu1 %v12669_v38  ;;  %7015 = vmatprep.mubr.f32.mxu0 %v8737_v57 }
 0x23b   :  { %6632 = vmatmul.mubr.f32.gmra.mrb[32].mxu1 %v12669_v38  ;;  %7016 = vmatmul.mubr.f32.gmra.mrb[32].mxu0 %v8737_v57  ;;  %v12673_v57 = vld [vmem:[#allocation63_spill] sm:$0xff] }
 0x23c   :  { %6633 = vmatprep.mubr.f32.mxu1 %v12670_v43  ;;  %7017 = vmatprep.mubr.f32.mxu0 %v8756_v53 }
 0x23f   :  { %6634 = vmatmul.mubr.f32.gmra.mrb[34].mxu1 %v12670_v43  ;;  %7018 = vmatmul.mubr.f32.gmra.mrb[34].mxu0 %v8756_v53  ;;  %v12674_v53 = vld [vmem:[#allocation64_spill] sm:$0xff] }
 0x240   :  { %6635 = vmatprep.mubr.f32.mxu1 %v12671_v4  ;;  %7019 = vmatprep.mubr.f32.mxu0 %v8765_v46 }
 0x243   :  { %6636 = vmatmul.mubr.f32.gmra.mrb[36].mxu1 %v12671_v4  ;;  %7020 = vmatmul.mubr.f32.gmra.mrb[36].mxu0 %v8765_v46  ;;  %v12675_v46 = vld [vmem:[#allocation65_spill] sm:$0xff] }
 0x244   :  { %6637 = vmatprep.mubr.f32.mxu1 %v12672_v21  ;;  %7021 = vmatprep.mubr.f32.mxu0 %v8779_v42 }
 0x247   :  { %6638 = vmatmul.mubr.f32.gmra.mrb[38].mxu1 %v12672_v21  ;;  %7022 = vmatmul.mubr.f32.gmra.mrb[38].mxu0 %v8779_v42  ;;  %v12676_v42 = vld [vmem:[#allocation66_spill] sm:$0xff] }
 0x248   :  { %6639 = vmatprep.mubr.f32.mxu1 %v12673_v57  ;;  %7023 = vmatprep.mubr.f32.mxu0 %v8786_v36 }
 0x24b   :  { %6640 = vmatmul.mubr.f32.gmra.mrb[40].mxu1 %v12673_v57  ;;  %7024 = vmatmul.mubr.f32.gmra.mrb[40].mxu0 %v8786_v36  ;;  %v12677_v36 = vld [vmem:[#allocation67_spill] sm:$0xff] }
 0x24c   :  { %6641 = vmatprep.mubr.f32.mxu1 %v12674_v53  ;;  %7025 = vmatprep.mubr.f32.mxu0 %v8794_v62 }
 0x24f   :  { %6642 = vmatmul.mubr.f32.gmra.mrb[42].mxu1 %v12674_v53  ;;  %7026 = vmatmul.mubr.f32.gmra.mrb[42].mxu0 %v8794_v62  ;;  %v12678_v62 = vld [vmem:[#allocation68_spill] sm:$0xff] }
 0x250   :  { %6643 = vmatprep.mubr.f32.mxu1 %v12675_v46  ;;  %7027 = vmatprep.mubr.f32.mxu0 %v8803_v61 }
 0x253   :  { %6644 = vmatmul.mubr.f32.gmra.mrb[44].mxu1 %v12675_v46  ;;  %7028 = vmatmul.mubr.f32.gmra.mrb[44].mxu0 %v8803_v61  ;;  %v12679_v61 = vld [vmem:[#allocation69_spill] sm:$0xff] }
 0x254   :  { %6645 = vmatprep.mubr.f32.mxu1 %v12676_v42  ;;  %7029 = vmatprep.mubr.f32.mxu0 %v8805_v48 }
 0x257   :  { %6646 = vmatmul.mubr.f32.gmra.mrb[46].mxu1 %v12676_v42  ;;  %7030 = vmatmul.mubr.f32.gmra.mrb[46].mxu0 %v8805_v48  ;;  %v12680_v48 = vld [vmem:[#allocation70_spill] sm:$0xff] }
 0x258   :  { %6647 = vmatprep.mubr.f32.mxu1 %v12677_v36  ;;  %7031 = vmatprep.mubr.f32.mxu0 %v8812_v13 }
 0x25b   :  { %6648 = vmatmul.mubr.f32.gmra.mrb[48].mxu1 %v12677_v36  ;;  %7032 = vmatmul.mubr.f32.gmra.mrb[48].mxu0 %v8812_v13  ;;  %v12681_v13 = vld [vmem:[#allocation71_spill] sm:$0xff] }
 0x25c   :  { %6649 = vmatprep.mubr.f32.mxu1 %v12678_v62  ;;  %7033 = vmatprep.mubr.f32.mxu0 %v8824_v11 }
 0x25f   :  { %6650 = vmatmul.mubr.f32.gmra.mrb[50].mxu1 %v12678_v62  ;;  %7034 = vmatmul.mubr.f32.gmra.mrb[50].mxu0 %v8824_v11  ;;  %v12682_v11 = vld [vmem:[#allocation73_spill] sm:$0xff] }
 0x260   :  { %6651 = vmatprep.mubr.f32.mxu1 %v12679_v61  ;;  %7035 = vmatprep.mubr.f32.mxu0 %v8831_v52 }
 0x263   :  { %6652 = vmatmul.mubr.f32.gmra.mrb[52].mxu1 %v12679_v61  ;;  %7036 = vmatmul.mubr.f32.gmra.mrb[52].mxu0 %v8831_v52  ;;  %v12683_v52 = vld [vmem:[#allocation74_spill] sm:$0xff] }
 0x264   :  { %6653 = vmatprep.mubr.f32.mxu1 %v12680_v48  ;;  %7037 = vmatprep.mubr.f32.mxu0 %v8838_v22 }
 0x267   :  { %6654 = vmatmul.mubr.f32.gmra.mrb[54].mxu1 %v12680_v48  ;;  %7038 = vmatmul.mubr.f32.gmra.mrb[54].mxu0 %v8838_v22  ;;  %v12684_v22 = vld [vmem:[#allocation76_spill] sm:$0xff] }
 0x268   :  { %6655 = vmatprep.mubr.f32.mxu1 %v12681_v13  ;;  %7039 = vmatprep.mubr.f32.mxu0 %v8840_v19 }
 0x26b   :  { %6656 = vmatmul.mubr.f32.gmra.mrb[56].mxu1 %v12681_v13  ;;  %7040 = vmatmul.mubr.f32.gmra.mrb[56].mxu0 %v8840_v19  ;;  %v12685_v19 = vld [vmem:[#allocation78_spill] sm:$0xff] }
 0x26c   :  { %6657 = vmatprep.mubr.f32.mxu1 %v12682_v11  ;;  %7041 = vmatprep.mubr.f32.mxu0 %v8852_v41 }
 0x26f   :  { %6658 = vmatmul.mubr.f32.gmra.mrb[58].mxu1 %v12682_v11  ;;  %7042 = vmatmul.mubr.f32.gmra.mrb[58].mxu0 %v8852_v41  ;;  %v12686_v41 = vld [vmem:[#allocation80_spill] sm:$0xff] }
 0x270   :  { %6659 = vmatprep.mubr.f32.mxu1 %v12683_v52  ;;  %7043 = vmatprep.mubr.f32.mxu0 %v12639_v58 }
 0x273   :  { %6660 = vmatmul.mubr.f32.gmra.mrb[60].mxu1 %v12683_v52  ;;  %7044 = vmatmul.mubr.f32.gmra.mrb[60].mxu0 %v12639_v58  ;;  %v12696_v58 = vld [vmem:[#allocation100_spill] sm:$0xff] }
 0x274   :  { %6661 = vmatprep.mubr.f32.mxu1 %v12684_v22  ;;  %7045 = vmatprep.mubr.f32.mxu0 %v12640_v59 }
 0x277   :  { %6662 = vmatmul.mubr.f32.gmra.mrb[62].mxu1 %v12684_v22  ;;  %7046 = vmatmul.mubr.f32.gmra.mrb[62].mxu0 %v12640_v59  ;;  %v12697_v59 = vld [vmem:[#allocation101_spill] sm:$0xff] }
 0x278   :  { %6663 = vmatprep.mubr.f32.mxu1 %v12685_v19  ;;  %7047 = vmatprep.mubr.f32.mxu0 %v12641_v14 }
 0x27b   :  { %6664 = vmatmul.mubr.f32.gmra.mrb[64].mxu1 %v12685_v19  ;;  %7048 = vmatmul.mubr.f32.gmra.mrb[64].mxu0 %v12641_v14 }
 0x27c   :  { %6665 = vmatprep.mubr.f32.mxu1 %v12686_v41  ;;  %7049 = vmatprep.mubr.f32.mxu0 %v12642_v56 }
 0x27f   :  { %6666 = vmatmul.mubr.f32.gmra.mrb[66].mxu1 %v12686_v41  ;;  %7050 = vmatmul.mubr.f32.gmra.mrb[66].mxu0 %v12642_v56 }
 0x280   :  { %6667 = vmatprep.mubr.f32.mxu1 %v12687_v32  ;;  %7051 = vmatprep.mubr.f32.mxu0 %v12643_v49 }
 0x283   :  { %6668 = vmatmul.mubr.f32.gmra.mrb[68].mxu1 %v12687_v32  ;;  %7052 = vmatmul.mubr.f32.gmra.mrb[68].mxu0 %v12643_v49 }
 0x284   :  { %6669 = vmatprep.mubr.f32.mxu1 %v12688_v30  ;;  %7053 = vmatprep.mubr.f32.mxu0 %v12644_v6 }
 0x287   :  { %6670 = vmatmul.mubr.f32.gmra.mrb[70].mxu1 %v12688_v30  ;;  %7054 = vmatmul.mubr.f32.gmra.mrb[70].mxu0 %v12644_v6 }
 0x288   :  { %6671 = vmatprep.mubr.f32.mxu1 %v12689_v54  ;;  %7055 = vmatprep.mubr.f32.mxu0 %v12645_v5 }
 0x28b   :  { %6672 = vmatmul.mubr.f32.gmra.mrb[72].mxu1 %v12689_v54  ;;  %7056 = vmatmul.mubr.f32.gmra.mrb[72].mxu0 %v12645_v5 }
 0x28c   :  { %6673 = vmatprep.mubr.f32.mxu1 %v12690_v18  ;;  %7057 = vmatprep.mubr.f32.mxu0 %v12646_v20 }
 0x28f   :  { %6674 = vmatmul.mubr.f32.gmra.mrb[74].mxu1 %v12690_v18  ;;  %7058 = vmatmul.mubr.f32.gmra.mrb[74].mxu0 %v12646_v20 }
 0x290   :  { %6675 = vmatprep.mubr.f32.mxu1 %v12691_v0  ;;  %7059 = vmatprep.mubr.f32.mxu0 %v12647_v29 }
 0x293   :  { %6676 = vmatmul.mubr.f32.gmra.mrb[76].mxu1 %v12691_v0  ;;  %7060 = vmatmul.mubr.f32.gmra.mrb[76].mxu0 %v12647_v29 }
 0x294   :  { %6677 = vmatprep.mubr.f32.mxu1 %v12692_v2  ;;  %7061 = vmatprep.mubr.f32.mxu0 %v12648_v7 }
 0x297   :  { %6678 = vmatmul.mubr.f32.gmra.mrb[78].mxu1 %v12692_v2  ;;  %7062 = vmatmul.mubr.f32.gmra.mrb[78].mxu0 %v12648_v7 }
 0x298   :  { %6679 = vmatprep.mubr.f32.mxu1 %v12693_v33  ;;  %7063 = vmatprep.mubr.f32.mxu0 %v12649_v24 }
 0x29b   :  { %6680 = vmatmul.mubr.f32.gmra.mrb[80].mxu1 %v12693_v33  ;;  %7064 = vmatmul.mubr.f32.gmra.mrb[80].mxu0 %v12649_v24 }
 0x29c   :  { %6681 = vmatprep.mubr.f32.mxu1 %v12694_v60  ;;  %7065 = vmatprep.mubr.f32.mxu0 %v12650_v27 }
 0x29f   :  { %6682 = vmatmul.mubr.f32.gmra.mrb[82].mxu1 %v12694_v60  ;;  %7066 = vmatmul.mubr.f32.gmra.mrb[82].mxu0 %v12650_v27 }
 0x2a0   :  { %6683 = vmatprep.mubr.f32.mxu1 %v12695_v55  ;;  %7067 = vmatprep.mubr.f32.mxu0 %v12651_v28 }
 0x2a3   :  { %6684 = vmatmul.mubr.f32.gmra.mrb[84].mxu1 %v12695_v55  ;;  %7068 = vmatmul.mubr.f32.gmra.mrb[84].mxu0 %v12651_v28 }
 0x2a4   :  { %6685 = vmatprep.mubr.f32.mxu1 %v12696_v58  ;;  %7069 = vmatprep.mubr.f32.mxu0 %v12652_v26 }
 0x2a7   :  { %6686 = vmatmul.mubr.f32.gmra.mrb[86].mxu1 %v12696_v58  ;;  %7070 = vmatmul.mubr.f32.gmra.mrb[86].mxu0 %v12652_v26 }
 0x2a8   :  { %6687 = vmatprep.mubr.f32.mxu1 %v12697_v59  ;;  %7071 = vmatprep.mubr.f32.mxu0 %v8957_v63 }
 0x2ab   :  { %6688 = vmatmul.mubr.f32.gmra.mrb[88].mxu1 %v12697_v59  ;;  %7072 = vmatmul.mubr.f32.gmra.mrb[88].mxu0 %v8957_v63 }
 0x2ac   :  { %6689 = vmatprep.mubr.f32.mxu1 %v8969_v47  ;;  %7073 = vmatprep.mubr.f32.mxu0 %v8964_v9 }
 0x2af   :  { %6690 = vmatmul.mubr.f32.gmra.mrb[90].mxu1 %v8969_v47  ;;  %7074 = vmatmul.mubr.f32.gmra.mrb[90].mxu0 %v8964_v9 }
 0x2b0   :  { %6691 = vmatprep.mubr.f32.mxu1 %v8976_v10  ;;  %7075 = vmatprep.mubr.f32.mxu0 %v8971_v15 }
 0x2b3   :  { %6692 = vmatmul.mubr.f32.gmra.mrb[92].mxu1 %v8976_v10  ;;  %7076 = vmatmul.mubr.f32.gmra.mrb[92].mxu0 %v8971_v15 }
 0x2b4   :  { %6693 = vmatprep.mubr.f32.mxu1 %v8983_v51  ;;  %7077 = vmatprep.mubr.f32.mxu0 %v8978_v44 }
 0x2b7   :  { %6694 = vmatmul.mubr.f32.gmra.mrb[94].mxu1 %v8983_v51  ;;  %7078 = vmatmul.mubr.f32.gmra.mrb[94].mxu0 %v8978_v44 }
 0x2ce   :  { %v1454_v63 = vpop.f32.mrb[0].mxu1  ;;  %v2960_v47 = vpop.f32.mrb[0].mxu0 }
 0x2cf   :  { %v9417_v14 = vadd.f32 %v2960_v47, %v1454_v63  ;;  %v1456_v9 = vpop.f32.mrb[1].mxu1  ;;  %v2962_v56 = vpop.f32.mrb[1].mxu0 }
 0x2d0   :  { %v9419_v49 = vadd.f32 %v2962_v56, %v1456_v9 }
 0x2d1   :  { %12698 = vst [vmem:[#allocation25_spill] sm:$0xff] %v9417_v14 }
 0x2d2   :  { %12699 = vst [vmem:[#allocation26_spill] sm:$0xff] %v9419_v49  ;;  %v1462_v6 = vpop.f32.mrb[2].mxu1  ;;  %v2967_v10 = vpop.f32.mrb[2].mxu0 }
 0x2d3   :  { %v9421_v5 = vadd.f32 %v2967_v10, %v1462_v6  ;;  %v1464_v15 = vpop.f32.mrb[3].mxu1  ;;  %v2969_v20 = vpop.f32.mrb[3].mxu0 }
 0x2d4   :  { %v9423_v29 = vadd.f32 %v2969_v20, %v1464_v15 }
 0x2d5   :  { %12700 = vst [vmem:[#allocation30_spill] sm:$0xff] %v9421_v5 }
 0x2d6   :  { %12701 = vst [vmem:[#allocation31_spill] sm:$0xff] %v9423_v29  ;;  %v1470_v7 = vpop.f32.mrb[4].mxu1  ;;  %v2974_v51 = vpop.f32.mrb[4].mxu0 }
 0x2d7   :  { %v9425_v24 = vadd.f32 %v2974_v51, %v1470_v7  ;;  %v1472_v44 = vpop.f32.mrb[5].mxu1  ;;  %v2976_v27 = vpop.f32.mrb[5].mxu0 }
 0x2d8   :  { %v9427_v28 = vadd.f32 %v2976_v27, %v1472_v44 }
 0x2d9   :  { %12702 = vst [vmem:[#allocation12_spill] sm:$0xff] %v9425_v24 }
 0x2da   :  { %12703 = vst [vmem:[#allocation29_spill] sm:$0xff] %v9427_v28  ;;  %v1478_v26 = vpop.f32.mrb[6].mxu1  ;;  %v2981_v3 = vpop.f32.mrb[6].mxu0 }
 0x2db   :  { %v9429_v35 = vadd.f32 %v2981_v3, %v1478_v26  ;;  %v1480_v16 = vpop.f32.mrb[7].mxu1  ;;  %v2983_v37 = vpop.f32.mrb[7].mxu0 }
 0x2dc   :  { %v9431_v40 = vadd.f32 %v2983_v37, %v1480_v16 }
 0x2de   :  { %12704 = vst [vmem:[#allocation13_spill] sm:$0xff] %v9431_v40  ;;  %v1486_v50 = vpop.f32.mrb[8].mxu1  ;;  %v2988_v45 = vpop.f32.mrb[8].mxu0 }
 0x2df   :  { %v9433_v12 = vadd.f32 %v2988_v45, %v1486_v50  ;;  %v1488_v34 = vpop.f32.mrb[9].mxu1  ;;  %v2990_v1 = vpop.f32.mrb[9].mxu0 }
 0x2e0   :  { %v9435_v31 = vadd.f32 %v2990_v1, %v1488_v34 }
 0x2e1   :  { %12705 = vst [vmem:[#allocation32_spill] sm:$0xff] %v9433_v12 }
 0x2e2   :  { %12706 = vst [vmem:[#allocation36_spill] sm:$0xff] %v9435_v31  ;;  %v1494_v25 = vpop.f32.mrb[10].mxu1  ;;  %v2995_v17 = vpop.f32.mrb[10].mxu0 }
 0x2e3   :  { %v9437_v23 = vadd.f32 %v2995_v17, %v1494_v25  ;;  %v1496_v8 = vpop.f32.mrb[11].mxu1  ;;  %v2997_v39 = vpop.f32.mrb[11].mxu0 }
 0x2e4   :  { %v9439_v38 = vadd.f32 %v2997_v39, %v1496_v8 }
 0x2e5   :  { %12707 = vst [vmem:[#allocation14_spill] sm:$0xff] %v9437_v23 }
 0x2e6   :  { %12708 = vst [vmem:[#allocation15_spill] sm:$0xff] %v9439_v38  ;;  %v1502_v43 = vpop.f32.mrb[12].mxu1  ;;  %v3002_v4 = vpop.f32.mrb[12].mxu0 }
 0x2e7   :  { %v9441_v21 = vadd.f32 %v3002_v4, %v1502_v43  ;;  %v1504_v57 = vpop.f32.mrb[13].mxu1  ;;  %v3004_v53 = vpop.f32.mrb[13].mxu0 }
 0x2e8   :  { %v9443_v46 = vadd.f32 %v3004_v53, %v1504_v57 }
 0x2e9   :  { %12709 = vst [vmem:[#allocation38_spill] sm:$0xff] %v9441_v21 }
 0x2ea   :  { %12710 = vst [vmem:[#allocation16_spill] sm:$0xff] %v9443_v46  ;;  %v1510_v42 = vpop.f32.mrb[14].mxu1  ;;  %v3009_v36 = vpop.f32.mrb[14].mxu0 }
 0x2eb   :  { %v9445_v62 = vadd.f32 %v3009_v36, %v1510_v42  ;;  %v1512_v61 = vpop.f32.mrb[15].mxu1  ;;  %v3011_v48 = vpop.f32.mrb[15].mxu0 }
 0x2ec   :  { %v9447_v13 = vadd.f32 %v3011_v48, %v1512_v61 }
 0x2ee   :  { %12711 = vst [vmem:[#allocation17_spill] sm:$0xff] %v9447_v13  ;;  %v1518_v11 = vpop.f32.mrb[16].mxu1  ;;  %v3016_v52 = vpop.f32.mrb[16].mxu0 }
 0x2ef   :  { %v9449_v22 = vadd.f32 %v3016_v52, %v1518_v11  ;;  %v1520_v19 = vpop.f32.mrb[17].mxu1  ;;  %v3018_v41 = vpop.f32.mrb[17].mxu0 }
 0x2f0   :  { %v9451_v32 = vadd.f32 %v3018_v41, %v1520_v19 }
 0x2f1   :  { %12712 = vst [vmem:[#allocation42_spill] sm:$0xff] %v9449_v22 }
 0x2f2   :  { %12713 = vst [vmem:[#allocation19_spill] sm:$0xff] %v9451_v32  ;;  %v1526_v30 = vpop.f32.mrb[18].mxu1  ;;  %v3023_v54 = vpop.f32.mrb[18].mxu0 }
 0x2f3   :  { %v9453_v18 = vadd.f32 %v3023_v54, %v1526_v30  ;;  %v1528_v0 = vpop.f32.mrb[19].mxu1  ;;  %v3025_v2 = vpop.f32.mrb[19].mxu0 }
 0x2f4   :  { %v9455_v33 = vadd.f32 %v3025_v2, %v1528_v0 }
 0x2f5   :  { %12714 = vst [vmem:[#allocation20_spill] sm:$0xff] %v9453_v18 }
 0x2f6   :  { %12715 = vst [vmem:[#allocation44_spill] sm:$0xff] %v9455_v33  ;;  %v1534_v60 = vpop.f32.mrb[20].mxu1  ;;  %v3030_v55 = vpop.f32.mrb[20].mxu0 }
 0x2f7   :  { %v9457_v58 = vadd.f32 %v3030_v55, %v1534_v60  ;;  %v1536_v59 = vpop.f32.mrb[21].mxu1  ;;  %v3032_v63 = vpop.f32.mrb[21].mxu0 }
 0x2f8   :  { %v9459_v47 = vadd.f32 %v3032_v63, %v1536_v59 }
 0x2f9   :  { %12716 = vst [vmem:[#allocation45_spill] sm:$0xff] %v9457_v58 }
 0x2fa   :  { %12717 = vst [vmem:[#allocation47_spill] sm:$0xff] %v9459_v47  ;;  %v1542_v9 = vpop.f32.mrb[22].mxu1  ;;  %v3037_v56 = vpop.f32.mrb[22].mxu0 }
 0x2fb   :  { %v9461_v6 = vadd.f32 %v3037_v56, %v1542_v9  ;;  %v1544_v10 = vpop.f32.mrb[23].mxu1  ;;  %v3039_v15 = vpop.f32.mrb[23].mxu0 }
 0x2fc   :  { %v9463_v20 = vadd.f32 %v3039_v15, %v1544_v10 }
 0x2fe   :  { %12718 = vst [vmem:[#allocation21_spill] sm:$0xff] %v9463_v20  ;;  %v1550_v7 = vpop.f32.mrb[24].mxu1  ;;  %v3044_v51 = vpop.f32.mrb[24].mxu0 }
 0x2ff   :  { %v9465_v44 = vadd.f32 %v3044_v51, %v1550_v7  ;;  %v1552_v27 = vpop.f32.mrb[25].mxu1  ;;  %v3046_v26 = vpop.f32.mrb[25].mxu0 }
 0x300   :  { %v9467_v3 = vadd.f32 %v3046_v26, %v1552_v27 }
 0x301   :  { %12719 = vst [vmem:[#allocation22_spill] sm:$0xff] %v9465_v44 }
 0x302   :  { %12720 = vst [vmem:[#allocation48_spill] sm:$0xff] %v9467_v3  ;;  %v1558_v16 = vpop.f32.mrb[26].mxu1  ;;  %v3051_v37 = vpop.f32.mrb[26].mxu0 }
 0x303   :  { %v9469_v50 = vadd.f32 %v3051_v37, %v1558_v16  ;;  %v1560_v45 = vpop.f32.mrb[27].mxu1  ;;  %v3053_v34 = vpop.f32.mrb[27].mxu0 }
 0x304   :  { %v9471_v1 = vadd.f32 %v3053_v34, %v1560_v45 }
 0x305   :  { %12721 = vst [vmem:[#allocation51_spill] sm:$0xff] %v9469_v50 }
 0x306   :  { %12722 = vst [vmem:[#allocation23_spill] sm:$0xff] %v9471_v1  ;;  %v1566_v25 = vpop.f32.mrb[28].mxu1  ;;  %v3058_v17 = vpop.f32.mrb[28].mxu0 }
 0x307   :  { %v9473_v8 = vadd.f32 %v3058_v17, %v1566_v25  ;;  %v1568_v39 = vpop.f32.mrb[29].mxu1  ;;  %v3060_v43 = vpop.f32.mrb[29].mxu0 }
 0x308   :  { %v9475_v4 = vadd.f32 %v3060_v43, %v1568_v39 }
 0x309   :  { %12723 = vst [vmem:[#allocation24_spill] sm:$0xff] %v9473_v8 }
 0x30a   :  { %12724 = vst [vmem:[#allocation52_spill] sm:$0xff] %v9475_v4  ;;  %v1574_v57 = vpop.f32.mrb[30].mxu1  ;;  %v3065_v53 = vpop.f32.mrb[30].mxu0 }
 0x30b   :  { %v9477_v42 = vadd.f32 %v3065_v53, %v1574_v57  ;;  %v1576_v36 = vpop.f32.mrb[31].mxu1  ;;  %v3067_v61 = vpop.f32.mrb[31].mxu0 }
 0x30c   :  { %v9479_v48 = vadd.f32 %v3067_v61, %v1576_v36 }
 0x30d   :  { %12725 = vst [vmem:[#allocation27_spill] sm:$0xff] %v9477_v42 }
 0x30e   :  { %12726 = vst [vmem:[#allocation28_spill] sm:$0xff] %v9479_v48  ;;  %v1582_v11 = vpop.f32.mrb[32].mxu1  ;;  %v3072_v52 = vpop.f32.mrb[32].mxu0 }
 0x30f   :  { %v7303_v19 = vadd.f32 %v3072_v52, %v1582_v11  ;;  %v1584_v41 = vpop.f32.mrb[33].mxu1  ;;  %v3074_v30 = vpop.f32.mrb[33].mxu0 }
 0x310   :  { %v7304_v54 = vadd.f32 %v3074_v30, %v1584_v41 }
 0x311   :  { %v3294_v0 = vmul.f32 %v7303_v19, %v9417_v14  ;;  %v3326_v2 = vmul.f32 %v7303_v19, %v9433_v12  ;;  %v3358_v60 = vmul.f32 %v7303_v19, %v9449_v22  ;;  %v3390_v55 = vmul.f32 %v7303_v19, %v9465_v44 }
 0x312   :  { %v3422_v59 = vmul.f32 %v7303_v19, %v9419_v49  ;;  %v3454_v63 = vmul.f32 %v7303_v19, %v9435_v31  ;;  %v3486_v9 = vmul.f32 %v7303_v19, %v9451_v32  ;;  %v3518_v56 = vmul.f32 %v7303_v19, %v9467_v3  ;;  %v1590_v10 = vpop.f32.mrb[34].mxu1  ;;  %v3079_v15 = vpop.f32.mrb[34].mxu0 }
 0x313   :  { %v3310_v7 = vmul.f32 %v7304_v54, %v9417_v14  ;;  %v3342_v51 = vmul.f32 %v7304_v54, %v9433_v12  ;;  %v3374_v27 = vmul.f32 %v7304_v54, %v9449_v22  ;;  %v3406_v26 = vmul.f32 %v7304_v54, %v9465_v44  ;;  %v1592_v16 = vpop.f32.mrb[35].mxu1  ;;  %v3081_v37 = vpop.f32.mrb[35].mxu0 }
 0x314   :  { %v3438_v45 = vmul.f32 %v7304_v54, %v9419_v49  ;;  %v3470_v34 = vmul.f32 %v7304_v54, %v9435_v31  ;;  %v3502_v25 = vmul.f32 %v7304_v54, %v9451_v32  ;;  %v3534_v17 = vmul.f32 %v7304_v54, %v9467_v3 }
 0x315   :  { %v7305_v39 = vadd.f32 %v3079_v15, %v1590_v10  ;;  %v7306_v43 = vadd.f32 %v3081_v37, %v1592_v16 }
 0x316   :  { %v1598_v57 = vpop.f32.mrb[36].mxu1  ;;  %v3086_v53 = vpop.f32.mrb[36].mxu0 }
 0x317   :  { %v3295_v36 = vmul.f32 %v7305_v39, %v9421_v5  ;;  %v3327_v61 = vmul.f32 %v7305_v39, %v9437_v23  ;;  %v3359_v11 = vmul.f32 %v7305_v39, %v9453_v18  ;;  %v3391_v52 = vmul.f32 %v7305_v39, %v9469_v50  ;;  %v1600_v19 = vpop.f32.mrb[37].mxu1  ;;  %v3088_v41 = vpop.f32.mrb[37].mxu0 }
 0x318   :  { %v3423_v30 = vmul.f32 %v7305_v39, %v9423_v29  ;;  %v3455_v32 = vmul.f32 %v7305_v39, %v9439_v38  ;;  %v3487_v54 = vmul.f32 %v7305_v39, %v9455_v33  ;;  %v3519_v10 = vmul.f32 %v7305_v39, %v9471_v1 }
 0x319   :  { %v3550_v15 = vadd.f32 %v3295_v36, %v3294_v0  ;;  %v3622_v16 = vadd.f32 %v3327_v61, %v3326_v2  ;;  %v3694_v37 = vadd.f32 %v3359_v11, %v3358_v60  ;;  %v3766_v3 = vadd.f32 %v3391_v52, %v3390_v55 }
 0x31a   :  { %v3838_v31 = vadd.f32 %v3423_v30, %v3422_v59  ;;  %v3910_v49 = vadd.f32 %v3455_v32, %v3454_v63  ;;  %v3982_v44 = vadd.f32 %v3487_v54, %v3486_v9  ;;  %v4054_v22 = vadd.f32 %v3519_v10, %v3518_v56  ;;  %v1606_v12 = vpop.f32.mrb[38].mxu1  ;;  %v3093_v14 = vpop.f32.mrb[38].mxu0 }
 0x31b   :  { %v3311_v48 = vmul.f32 %v7306_v43, %v9421_v5  ;;  %v3343_v20 = vmul.f32 %v7306_v43, %v9437_v23  ;;  %v3375_v13 = vmul.f32 %v7306_v43, %v9453_v18  ;;  %v3407_v40 = vmul.f32 %v7306_v43, %v9469_v50  ;;  %v1608_v42 = vpop.f32.mrb[39].mxu1  ;;  %v3095_v39 = vpop.f32.mrb[39].mxu0 }
 0x31c   :  { %v3439_v0 = vmul.f32 %v7306_v43, %v9423_v29  ;;  %v3471_v2 = vmul.f32 %v7306_v43, %v9439_v38  ;;  %v3503_v32 = vmul.f32 %v7306_v43, %v9455_v33  ;;  %v3535_v60 = vmul.f32 %v7306_v43, %v9471_v1 }
 0x31d   :  { %v3586_v55 = vadd.f32 %v3311_v48, %v3310_v7  ;;  %v3658_v59 = vadd.f32 %v3343_v20, %v3342_v51  ;;  %v3730_v63 = vadd.f32 %v3375_v13, %v3374_v27  ;;  %v3802_v9 = vadd.f32 %v3407_v40, %v3406_v26 }
 0x31e   :  { %v3874_v56 = vadd.f32 %v3439_v0, %v3438_v45  ;;  %v3946_v36 = vadd.f32 %v3471_v2, %v3470_v34  ;;  %v4018_v61 = vadd.f32 %v3503_v32, %v3502_v25  ;;  %v4090_v11 = vadd.f32 %v3535_v60, %v3534_v17  ;;  %v1614_v52 = vpop.f32.mrb[40].mxu1  ;;  %v3100_v30 = vpop.f32.mrb[40].mxu0 }
 0x31f   :  { %v7307_v54 = vadd.f32 %v3086_v53, %v1598_v57  ;;  %v7308_v10 = vadd.f32 %v3088_v41, %v1600_v19  ;;  %v7309_v50 = vadd.f32 %v3093_v14, %v1606_v12  ;;  %v9513_v29 = vadd.f32 %v3095_v39, %v1608_v42  ;;  %v1616_v38 = vpop.f32.mrb[41].mxu1  ;;  %v3102_v18 = vpop.f32.mrb[41].mxu0 }
 0x320   :  { %v9515_v33 = vadd.f32 %v3100_v30, %v1614_v52  ;;  %v9517_v43 = vadd.f32 %v3102_v18, %v1616_v38 }
 0x321   :  { %v3296_v13 = vmul.f32 %v7307_v54, %v9425_v24  ;;  %v3328_v40 = vmul.f32 %v7307_v54, %v9441_v21  ;;  %v3360_v20 = vmul.f32 %v7307_v54, %v9457_v58  ;;  %v3392_v48 = vmul.f32 %v7307_v54, %v9473_v8 }
 0x322   :  { %v3424_v7 = vmul.f32 %v7307_v54, %v9427_v28  ;;  %v3456_v14 = vmul.f32 %v7307_v54, %v9443_v46  ;;  %v3488_v12 = vmul.f32 %v7307_v54, %v9459_v47  ;;  %v3520_v42 = vmul.f32 %v7307_v54, %v9475_v4  ;;  %v9527_v51 = vpop.f32.mrb[42].mxu1  ;;  %v9529_v38 = vpop.f32.mrb[42].mxu0 }
 0x323   :  { %v3551_v18 = vadd.f32 %v3550_v15, %v3296_v13  ;;  %v3623_v27 = vadd.f32 %v3622_v16, %v3328_v40  ;;  %v3695_v26 = vadd.f32 %v3694_v37, %v3360_v20  ;;  %v3767_v45 = vadd.f32 %v3766_v3, %v3392_v48  ;;  %v9531_v34 = vpop.f32.mrb[43].mxu1  ;;  %v9533_v25 = vpop.f32.mrb[43].mxu0  ;;  %v12728_v48 = vld [vmem:[#allocation13_spill] sm:$0xff] }
 0x324   :  { %v3839_v17 = vadd.f32 %v3838_v31, %v3424_v7  ;;  %v3911_v57 = vadd.f32 %v3910_v49, %v3456_v14  ;;  %v3983_v53 = vadd.f32 %v3982_v44, %v3488_v12  ;;  %v4055_v19 = vadd.f32 %v4054_v22, %v3520_v42  ;;  %v12729_v14 = vld [vmem:[#allocation17_spill] sm:$0xff] }
 0x325   :  { %v3312_v41 = vmul.f32 %v7308_v10, %v9425_v24  ;;  %v3344_v39 = vmul.f32 %v7308_v10, %v9441_v21  ;;  %v3376_v0 = vmul.f32 %v7308_v10, %v9457_v58  ;;  %v3408_v2 = vmul.f32 %v7308_v10, %v9473_v8 }
 0x326   :  { %v3440_v15 = vmul.f32 %v7308_v10, %v9427_v28  ;;  %v3472_v3 = vmul.f32 %v7308_v10, %v9443_v46  ;;  %v3504_v16 = vmul.f32 %v7308_v10, %v9459_v47  ;;  %v3536_v37 = vmul.f32 %v7308_v10, %v9475_v4  ;;  %v9543_v31 = vpop.f32.mrb[44].mxu1  ;;  %v9545_v49 = vpop.f32.mrb[44].mxu0 }
 0x327   :  { %v9547_v22 = vadd.f32 %v3586_v55, %v3312_v41  ;;  %v9549_v44 = vadd.f32 %v3658_v59, %v3344_v39  ;;  %v9551_v32 = vadd.f32 %v3730_v63, %v3376_v0  ;;  %v9553_v60 = vadd.f32 %v3802_v9, %v3408_v2  ;;  %v9555_v52 = vpop.f32.mrb[45].mxu1  ;;  %v9557_v30 = vpop.f32.mrb[45].mxu0  ;;  %v12727_v9 = vld [vmem:[#allocation27_spill] sm:$0xff] }
 0x328   :  { %v9559_v54 = vadd.f32 %v3874_v56, %v3440_v15  ;;  %v9561_v13 = vadd.f32 %v3946_v36, %v3472_v3  ;;  %v9563_v10 = vadd.f32 %v4018_v61, %v3504_v16  ;;  %v9565_v40 = vadd.f32 %v4090_v11, %v3536_v37  ;;  %v12730_v56 = vld [vmem:[#allocation21_spill] sm:$0xff]  ;;  %v12731_v36 = vld [vmem:[#allocation28_spill] sm:$0xff] }
 0x329   :  { %v3297_v55 = vmul.f32 %v7309_v50, %v9429_v35  ;;  %v3329_v59 = vmul.f32 %v7309_v50, %v9445_v62  ;;  %v3361_v63 = vmul.f32 %v7309_v50, %v9461_v6  ;;  %v3393_v20 = vmul.f32 %v7309_v50, %v12727_v9 }
 0x32a   :  { %v3425_v7 = vmul.f32 %v7309_v50, %v12728_v48  ;;  %v3457_v12 = vmul.f32 %v7309_v50, %v12729_v14  ;;  %v3489_v42 = vmul.f32 %v7309_v50, %v12730_v56  ;;  %v3521_v41 = vmul.f32 %v7309_v50, %v12731_v36  ;;  %v9575_v61 = vpop.f32.mrb[46].mxu1  ;;  %v9577_v11 = vpop.f32.mrb[46].mxu0 }
 0x32b   :  { %v3552_v39 = vadd.f32 %v3551_v18, %v3297_v55  ;;  %v3624_v0 = vadd.f32 %v3623_v27, %v3329_v59  ;;  %v3696_v2 = vadd.f32 %v3695_v26, %v3361_v63  ;;  %v3768_v15 = vadd.f32 %v3767_v45, %v3393_v20  ;;  %v9579_v3 = vpop.f32.mrb[47].mxu1  ;;  %v9581_v16 = vpop.f32.mrb[47].mxu0 }
 0x32c   :  { %12732 = vst [vmem:[#allocation56_spill] sm:$0xff] %v9581_v16  ;;  %v3840_v37 = vadd.f32 %v3839_v17, %v3425_v7  ;;  %v3912_v4 = vadd.f32 %v3911_v57, %v3457_v12  ;;  %v3984_v47 = vadd.f32 %v3983_v53, %v3489_v42  ;;  %v4056_v46 = vadd.f32 %v4055_v19, %v3521_v41 }
 0x32d   :  { %v3553_v28 = vrot.slane %v3552_v39, 4  ;;  %v3625_v8 = vrot.slane %v3624_v0, 4  ;;  %v3697_v58 = vrot.slane %v3696_v2, 4  ;;  %v3769_v50 = vrot.slane %v3768_v15, 4 }
 0x32e   :  { %v3841_v21 = vrot.slane %v3840_v37, 4  ;;  %v3913_v24 = vrot.slane %v3912_v4, 4  ;;  %v3985_v1 = vrot.slane %v3984_v47, 4  ;;  %v4057_v23 = vrot.slane %v4056_v46, 4  ;;  %v9583_v18 = vpop.f32.mrb[48].mxu1  ;;  %v9585_v27 = vpop.f32.mrb[48].mxu0 }
 0x32f   :  { %12733 = vst [vmem:[#allocation34_spill] sm:$0xff] %v9583_v18  ;;  %12734 = vst [vmem:[#allocation72_spill] sm:$0xff] %v9585_v27  ;;  %v3554_v26 = vadd.f32 %v3553_v28, %v3552_v39  ;;  %v3626_v45 = vadd.f32 %v3625_v8, %v3624_v0  ;;  %v3698_v55 = vadd.f32 %v3697_v58, %v3696_v2  ;;  %v9587_v17 = vpop.f32.mrb[49].mxu1  ;;  %v9589_v57 = vpop.f32.mrb[49].mxu0 }
 0x330   :  { %v3770_v59 = vadd.f32 %v3769_v50, %v3768_v15  ;;  %12735 = vst [vmem:[#allocation75_spill] sm:$0xff] %v9587_v17  ;;  %12736 = vst [vmem:[#allocation77_spill] sm:$0xff] %v9589_v57  ;;  %v3842_v53 = vadd.f32 %v3841_v21, %v3840_v37  ;;  %v3914_v19 = vadd.f32 %v3913_v24, %v3912_v4 }
 0x331   :  { %v3986_v63 = vadd.f32 %v3985_v1, %v3984_v47  ;;  %v4058_v20 = vadd.f32 %v4057_v23, %v4056_v46  ;;  %v3555_v7 = vrot.slane %v3554_v26, 2  ;;  %v3627_v12 = vrot.slane %v3626_v45, 2 }
 0x332   :  { %v3699_v42 = vrot.slane %v3698_v55, 2  ;;  %v3771_v41 = vrot.slane %v3770_v59, 2  ;;  %v3843_v5 = vrot.slane %v3842_v53, 2  ;;  %v3915_v18 = vrot.slane %v3914_v19, 2  ;;  %v9591_v28 = vpop.f32.mrb[50].mxu1  ;;  %v9593_v58 = vpop.f32.mrb[50].mxu0 }
 0x333   :  { %v3987_v16 = vrot.slane %v3986_v63, 2  ;;  %v4059_v27 = vrot.slane %v4058_v20, 2  ;;  %12737 = vst [vmem:[#allocation79_spill] sm:$0xff] %v9591_v28  ;;  %12738 = vst [vmem:[#allocation81_spill] sm:$0xff] %v9593_v58  ;;  %v3556_v8 = vadd.f32 %v3555_v7, %v3554_v26  ;;  %v3628_v39 = vadd.f32 %v3627_v12, %v3626_v45  ;;  %v9595_v21 = vpop.f32.mrb[51].mxu1  ;;  %v9597_v24 = vpop.f32.mrb[51].mxu0 }
 0x334   :  { %v3700_v0 = vadd.f32 %v3699_v42, %v3698_v55  ;;  %v3772_v2 = vadd.f32 %v3771_v41, %v3770_v59  ;;  %12739 = vst [vmem:[#allocation82_spill] sm:$0xff] %v9595_v21  ;;  %12740 = vst [vmem:[#allocation84_spill] sm:$0xff] %v9597_v24  ;;  %v3844_v23 = vadd.f32 %v3843_v5, %v3842_v53 }
 0x335   :  { %v3916_v46 = vadd.f32 %v3915_v18, %v3914_v19  ;;  %v3988_v47 = vadd.f32 %v3987_v16, %v3986_v63  ;;  %v4060_v1 = vadd.f32 %v4059_v27, %v4058_v20  ;;  %v3557_v4 = vrot.slane %v3556_v8, 1 }
 0x336   :  { %v3629_v15 = vrot.slane %v3628_v39, 1  ;;  %v3701_v37 = vrot.slane %v3700_v0, 1  ;;  %v3773_v50 = vrot.slane %v3772_v2, 1  ;;  %v3845_v57 = vrot.slane %v3844_v23, 1  ;;  %v9599_v26 = vpop.f32.mrb[52].mxu1  ;;  %v9601_v45 = vpop.f32.mrb[52].mxu0 }
 0x337   :  { %v3917_v28 = vrot.slane %v3916_v46, 1  ;;  %v3989_v17 = vrot.slane %v3988_v47, 1  ;;  %v4061_v58 = vrot.slane %v4060_v1, 1  ;;  %12741 = vst [vmem:[#allocation87_spill] sm:$0xff] %v9599_v26  ;;  %12742 = vst [vmem:[#allocation89_spill] sm:$0xff] %v9601_v45  ;;  %v3558_v55 = vadd.f32 %v3557_v4, %v3556_v8  ;;  %v9603_v5 = vpop.f32.mrb[53].mxu1 }
 0x338   :  { %v3630_v59 = vadd.f32 %v3629_v15, %v3628_v39  ;;  %v3702_v7 = vadd.f32 %v3701_v37, %v3700_v0  ;;  %v3774_v12 = vadd.f32 %v3773_v50, %v3772_v2  ;;  %12743 = vst [vmem:[#allocation91_spill] sm:$0xff] %v9603_v5  ;;  %v9605_v16 = vpop.f32.mrb[53].mxu0  ;;  %v3846_v18 = vadd.f32 %v3845_v57, %v3844_v23 }
 0x339   :  { %12744 = vst [vmem:[#allocation92_spill] sm:$0xff] %v9605_v16  ;;  %v3918_v27 = vadd.f32 %v3917_v28, %v3916_v46  ;;  %v9607_v53 = vadd.f32 %v3989_v17, %v3988_v47  ;;  %v9609_v19 = vadd.f32 %v4061_v58, %v4060_v1  ;;  %v9611_v63 = vmul.f32 0.35355338, %v3558_v55 }
 0x33a   :  { %v3313_v20 = vmul.f32 %v9513_v29, %v9429_v35  ;;  %v9615_v42 = vmul.f32 0.35355338, %v3630_v59  ;;  %v9617_v41 = vmul.f32 0.35355338, %v3702_v7  ;;  %v9619_v8 = vmul.f32 0.35355338, %v3774_v12 }
 0x33b   :  { %12745 = vst [vmem:[#allocation95_spill] sm:$0xff] %v9611_v63  ;;  %v3345_v39 = vmul.f32 %v9513_v29, %v9445_v62  ;;  %v9623_v57 = vmul.f32 0.35355338, %v3846_v18  ;;  %v9625_v17 = vmul.f32 0.35355338, %v3918_v27  ;;  %v3377_v28 = vmul.f32 %v9513_v29, %v9461_v6  ;;  %v9631_v0 = vpop.f32.mrb[54].mxu1 }
 0x33c   :  { %12746 = vst [vmem:[#allocation96_spill] sm:$0xff] %v9615_v42  ;;  %12747 = vst [vmem:[#allocation98_spill] sm:$0xff] %v9617_v41  ;;  %v3409_v58 = vmul.f32 %v9513_v29, %v12727_v9  ;;  %v9633_v2 = vpop.f32.mrb[54].mxu0  ;;  %v3441_v23 = vmul.f32 %v9513_v29, %v12728_v48  ;;  %v3473_v46 = vmul.f32 %v9513_v29, %v12729_v14  ;;  %v9643_v4 = vpop.f32.mrb[55].mxu1 }
 0x33d   :  { %12748 = vst [vmem:[#allocation18_spill] sm:$0xff] %v9619_v8  ;;  %12749 = vst [vmem:[#allocation33_spill] sm:$0xff] %v9623_v57  ;;  %v3505_v47 = vmul.f32 %v9513_v29, %v12730_v56  ;;  %v3537_v1 = vmul.f32 %v9513_v29, %v12731_v36  ;;  %v9645_v15 = vpop.f32.mrb[55].mxu0  ;;  %v3588_v37 = vadd.f32 %v9547_v22, %v3313_v20 }
 0x33e   :  { %12750 = vst [vmem:[#allocation35_spill] sm:$0xff] %v9625_v17  ;;  %12751 = vst [vmem:[#allocation37_spill] sm:$0xff] %v9631_v0  ;;  %v3660_v50 = vadd.f32 %v9549_v44, %v3345_v39  ;;  %v3732_v55 = vadd.f32 %v9551_v32, %v3377_v28  ;;  %v3804_v59 = vadd.f32 %v9553_v60, %v3409_v58  ;;  %v9655_v27 = vpop.f32.mrb[56].mxu1 }
 0x33f   :  { %12752 = vst [vmem:[#allocation39_spill] sm:$0xff] %v9633_v2  ;;  %12753 = vst [vmem:[#allocation40_spill] sm:$0xff] %v9643_v4  ;;  %v3876_v7 = vadd.f32 %v9559_v54, %v3441_v23  ;;  %v3948_v12 = vadd.f32 %v9561_v13, %v3473_v46  ;;  %v4020_v18 = vadd.f32 %v9563_v10, %v3505_v47  ;;  %v9657_v4 = vpop.f32.mrb[56].mxu0  ;;  %v9659_v26 = vpop.f32.mrb[57].mxu1 }
 0x340   :  { %12754 = vst [vmem:[#allocation41_spill] sm:$0xff] %v9645_v15  ;;  %v4092_v29 = vadd.f32 %v9565_v40, %v3537_v1  ;;  %12755 = vst [vmem:[#allocation43_spill] sm:$0xff] %v9655_v27  ;;  %v3589_v15 = vrot.slane %v3588_v37, 4  ;;  %v3661_v22 = vrot.slane %v3660_v50, 4  ;;  %v3733_v20 = vrot.slane %v3732_v55, 4  ;;  %v9661_v24 = vpop.f32.mrb[57].mxu0 }
 0x341   :  { %12756 = vst [vmem:[#allocation46_spill] sm:$0xff] %v9657_v4  ;;  %v3805_v44 = vrot.slane %v3804_v59, 4  ;;  %v3877_v39 = vrot.slane %v3876_v7, 4  ;;  %v3949_v32 = vrot.slane %v3948_v12, 4  ;;  %v4021_v28 = vrot.slane %v4020_v18, 4  ;;  %12757 = vst [vmem:[#allocation49_spill] sm:$0xff] %v9659_v26 }
 0x342   :  { %v4093_v60 = vrot.slane %v4092_v29, 4  ;;  %v3590_v58 = vadd.f32 %v3589_v15, %v3588_v37  ;;  %v3662_v54 = vadd.f32 %v3661_v22, %v3660_v50  ;;  %v3734_v23 = vadd.f32 %v3733_v20, %v3732_v55  ;;  %12758 = vst [vmem:[#allocation50_spill] sm:$0xff] %v9661_v24  ;;  %v9663_v21 = vpop.f32.mrb[58].mxu1  ;;  %v9665_v26 = vpop.f32.mrb[58].mxu0 }
 0x343   :  { %v3806_v13 = vadd.f32 %v3805_v44, %v3804_v59  ;;  %v3878_v46 = vadd.f32 %v3877_v39, %v3876_v7  ;;  %v3950_v10 = vadd.f32 %v3949_v32, %v3948_v12  ;;  %v4022_v47 = vadd.f32 %v4021_v28, %v4020_v18  ;;  %12759 = vst [vmem:[#allocation53_spill] sm:$0xff] %v9663_v21  ;;  %v12784_v21 = vld [vmem:[#allocation34_spill] sm:$0xff] }
 0x344   :  { %v4094_v40 = vadd.f32 %v4093_v60, %v4092_v29  ;;  %v3591_v1 = vrot.slane %v3590_v58, 2  ;;  %v3663_v27 = vrot.slane %v3662_v54, 2  ;;  %v3735_v2 = vrot.slane %v3734_v23, 2  ;;  %12760 = vst [vmem:[#allocation54_spill] sm:$0xff] %v9665_v26 }
 0x345   :  { %v3807_v4 = vrot.slane %v3806_v13, 2  ;;  %v3879_v0 = vrot.slane %v3878_v46, 2  ;;  %v3951_v16 = vrot.slane %v3950_v10, 2  ;;  %v4023_v5 = vrot.slane %v4022_v47, 2 }
 0x346   :  { %v4095_v45 = vrot.slane %v4094_v40, 2  ;;  %v3592_v15 = vadd.f32 %v3591_v1, %v3590_v58  ;;  %v3664_v37 = vadd.f32 %v3663_v27, %v3662_v54  ;;  %v3736_v50 = vadd.f32 %v3735_v2, %v3734_v23 }
 0x347   :  { %v3808_v55 = vadd.f32 %v3807_v4, %v3806_v13  ;;  %v3880_v59 = vadd.f32 %v3879_v0, %v3878_v46  ;;  %v3952_v7 = vadd.f32 %v3951_v16, %v3950_v10  ;;  %v4024_v12 = vadd.f32 %v4023_v5, %v4022_v47  ;;  %v9673_v5 = vpop.f32.mrb[59].mxu1  ;;  %v9675_v0 = vpop.f32.mrb[59].mxu0  ;;  %v12768_v46 = vld [vmem:[#allocation25_spill] sm:$0xff] }
 0x348   :  { %v4096_v18 = vadd.f32 %v4095_v45, %v4094_v40  ;;  %v3593_v29 = vrot.slane %v3592_v15, 1  ;;  %v3665_v22 = vrot.slane %v3664_v37, 1  ;;  %v3737_v20 = vrot.slane %v3736_v50, 1  ;;  %12763 = vst [vmem:[#allocation58_spill] sm:$0xff] %v9673_v5  ;;  %12764 = vst [vmem:[#allocation59_spill] sm:$0xff] %v9675_v0 }
 0x349   :  { %v3809_v44 = vrot.slane %v3808_v55, 1  ;;  %v3881_v39 = vrot.slane %v3880_v59, 1  ;;  %v3953_v32 = vrot.slane %v3952_v7, 1  ;;  %v4025_v28 = vrot.slane %v4024_v12, 1 }
 0x34a   :  { %v4097_v60 = vrot.slane %v4096_v18, 1  ;;  %v3594_v58 = vadd.f32 %v3593_v29, %v3592_v15  ;;  %v3666_v27 = vadd.f32 %v3665_v22, %v3664_v37  ;;  %v3738_v2 = vadd.f32 %v3737_v20, %v3736_v50  ;;  %v12775_v50 = vld [vmem:[#allocation42_spill] sm:$0xff]  ;;  %v12778_v29 = vld [vmem:[#allocation36_spill] sm:$0xff]  ;;  %v12779_v20 = vld [vmem:[#allocation19_spill] sm:$0xff] }
 0x34b   :  { %v3810_v4 = vadd.f32 %v3809_v44, %v3808_v55  ;;  %v9668_v16 = vmul.f32 0.35355338, %v9607_v53  ;;  %v9671_v45 = vmul.f32 0.35355338, %v9609_v19  ;;  %v9677_v54 = vadd.f32 %v3881_v39, %v3880_v59  ;;  %v12772_v19 = vld [vmem:[#allocation32_spill] sm:$0xff]  ;;  %v12776_v59 = vld [vmem:[#allocation22_spill] sm:$0xff] }
 0x34c   :  { %v9679_v23 = vadd.f32 %v3953_v32, %v3952_v7  ;;  %v9681_v13 = vadd.f32 %v4025_v28, %v4024_v12  ;;  %v3298_v10 = vmul.f32 %v9515_v33, %v12768_v46  ;;  %v9685_v47 = vadd.f32 %v4097_v60, %v4096_v18  ;;  %v12777_v12 = vld [vmem:[#allocation26_spill] sm:$0xff]  ;;  %v12780_v39 = vld [vmem:[#allocation48_spill] sm:$0xff] }
 0x34d   :  { %12761 = vst [vmem:[#allocation55_spill] sm:$0xff] %v9668_v16  ;;  %12762 = vst [vmem:[#allocation57_spill] sm:$0xff] %v9671_v45  ;;  %v9687_v53 = vmul.f32 0.35355338, %v3594_v58  ;;  %v9689_v40 = vmul.f32 0.35355338, %v3666_v27  ;;  %v3330_v1 = vmul.f32 %v9515_v33, %v12772_v19  ;;  %v3362_v55 = vmul.f32 %v9515_v33, %v12775_v50 }
 0x34e   :  { %12765 = vst [vmem:[#allocation60_spill] sm:$0xff] %v9677_v54  ;;  %12766 = vst [vmem:[#allocation61_spill] sm:$0xff] %v9679_v23  ;;  %v9693_v15 = vmul.f32 0.35355338, %v3738_v2  ;;  %v9695_v37 = vmul.f32 0.35355338, %v3810_v4  ;;  %v3394_v7 = vmul.f32 %v9515_v33, %v12776_v59  ;;  %v3426_v18 = vmul.f32 %v9515_v33, %v12777_v12 }
 0x34f   :  { %12767 = vst [vmem:[#allocation62_spill] sm:$0xff] %v9681_v13  ;;  %12769 = vst [vmem:[#allocation63_spill] sm:$0xff] %v9685_v47  ;;  %v3458_v22 = vmul.f32 %v9515_v33, %v12778_v29  ;;  %v3490_v44 = vmul.f32 %v9515_v33, %v12779_v20  ;;  %v3522_v32 = vmul.f32 %v9515_v33, %v12780_v39 }
 0x350   :  { %12770 = vst [vmem:[#allocation64_spill] sm:$0xff] %v9687_v53  ;;  %12771 = vst [vmem:[#allocation65_spill] sm:$0xff] %v9689_v40  ;;  %v3314_v28 = vmul.f32 %v9517_v43, %v12768_v46  ;;  %v3346_v60 = vmul.f32 %v9517_v43, %v12772_v19  ;;  %v3378_v58 = vmul.f32 %v9517_v43, %v12775_v50  ;;  %v9727_v40 = vpop.f32.mrb[60].mxu0 }
 0x351   :  { %12773 = vst [vmem:[#allocation66_spill] sm:$0xff] %v9693_v15  ;;  %12774 = vst [vmem:[#allocation67_spill] sm:$0xff] %v9695_v37  ;;  %v3410_v27 = vmul.f32 %v9517_v43, %v12776_v59  ;;  %v3442_v2 = vmul.f32 %v9517_v43, %v12777_v12  ;;  %v3474_v4 = vmul.f32 %v9517_v43, %v12778_v29  ;;  %v9725_v15 = vpop.f32.mrb[60].mxu1  ;;  %v12796_v29 = vld [vmem:[#allocation31_spill] sm:$0xff]  ;;  %v12798_v59 = vld [vmem:[#allocation44_spill] sm:$0xff] }
 0x352   :  { %v3506_v33 = vmul.f32 %v9517_v43, %v12779_v20  ;;  %v3538_v37 = vmul.f32 %v9517_v43, %v12780_v39  ;;  %12781 = vst [vmem:[#allocation68_spill] sm:$0xff] %v9725_v15  ;;  %12782 = vst [vmem:[#allocation69_spill] sm:$0xff] %v9727_v40  ;;  %v7313_v53 = vadd.f32 %v9529_v38, %v9527_v51  ;;  %v12783_v15 = vld [vmem:[#allocation56_spill] sm:$0xff] }
 0x353   :  { %v7314_v0 = vadd.f32 %v9533_v25, %v9531_v34  ;;  %v7315_v5 = vadd.f32 %v9545_v49, %v9543_v31  ;;  %v9737_v26 = vadd.f32 %v9557_v30, %v9555_v52  ;;  %v9741_v43 = vadd.f32 %v9577_v11, %v9575_v61  ;;  %v12785_v51 = vld [vmem:[#allocation72_spill] sm:$0xff]  ;;  %v12787_v34 = vld [vmem:[#allocation75_spill] sm:$0xff]  ;;  %v12788_v25 = vld [vmem:[#allocation77_spill] sm:$0xff]  ;;  %v9755_v31 = vpop.f32.mrb[61].mxu1  ;;  %v9757_v49 = vpop.f32.mrb[61].mxu0 }
 0x354   :  { %v9745_v40 = vadd.f32 %v12783_v15, %v9579_v3  ;;  %v9749_v38 = vadd.f32 %v12785_v51, %v12784_v21  ;;  %v9753_v24 = vadd.f32 %v12788_v25, %v12787_v34  ;;  %12790 = vst [vmem:[#allocation73_spill] sm:$0xff] %v9755_v31  ;;  %12791 = vst [vmem:[#allocation74_spill] sm:$0xff] %v9757_v49  ;;  %v12792_v52 = vld [vmem:[#allocation30_spill] sm:$0xff]  ;;  %v12794_v39 = vld [vmem:[#allocation20_spill] sm:$0xff] }
 0x355   :  { %v3299_v30 = vmul.f32 %v7313_v53, %v12792_v52  ;;  %v12793_v61 = vld [vmem:[#allocation14_spill] sm:$0xff]  ;;  %v3363_v20 = vmul.f32 %v7313_v53, %v12794_v39  ;;  %v12795_v3 = vld [vmem:[#allocation51_spill] sm:$0xff]  ;;  %v3427_v12 = vmul.f32 %v7313_v53, %v12796_v29  ;;  %v3491_v50 = vmul.f32 %v7313_v53, %v12798_v59 }
 0x356   :  { %12786 = vst [vmem:[#allocation70_spill] sm:$0xff] %v9749_v38  ;;  %12789 = vst [vmem:[#allocation71_spill] sm:$0xff] %v9753_v24  ;;  %v3331_v11 = vmul.f32 %v7313_v53, %v12793_v61  ;;  %v3395_v15 = vmul.f32 %v7313_v53, %v12795_v3  ;;  %v12797_v21 = vld [vmem:[#allocation15_spill] sm:$0xff]  ;;  %v3315_v23 = vmul.f32 %v7314_v0, %v12792_v52 }
 0x357   :  { %v3459_v51 = vmul.f32 %v7313_v53, %v12797_v21  ;;  %v12799_v34 = vld [vmem:[#allocation23_spill] sm:$0xff]  ;;  %v3559_v24 = vadd.f32 %v3299_v30, %v3298_v10  ;;  %v3703_v19 = vadd.f32 %v3363_v20, %v3362_v55  ;;  %v3847_v38 = vadd.f32 %v3427_v12, %v3426_v18  ;;  %v9775_v55 = vpop.f32.mrb[62].mxu1 }
 0x358   :  { %v3523_v25 = vmul.f32 %v7313_v53, %v12799_v34  ;;  %v3631_v31 = vadd.f32 %v3331_v11, %v3330_v1  ;;  %v3775_v49 = vadd.f32 %v3395_v15, %v3394_v7  ;;  %v3991_v47 = vadd.f32 %v3491_v50, %v3490_v44  ;;  %12800 = vst [vmem:[#allocation76_spill] sm:$0xff] %v9775_v55  ;;  %v9777_v50 = vpop.f32.mrb[62].mxu0  ;;  %v12802_v11 = vld [vmem:[#allocation12_spill] sm:$0xff] }
 0x359   :  { %v3919_v46 = vadd.f32 %v3459_v51, %v3458_v22  ;;  %v3347_v54 = vmul.f32 %v7314_v0, %v12793_v61  ;;  %v3379_v45 = vmul.f32 %v7314_v0, %v12794_v39  ;;  %v3411_v16 = vmul.f32 %v7314_v0, %v12795_v3  ;;  %12801 = vst [vmem:[#allocation78_spill] sm:$0xff] %v9777_v50  ;;  %v12803_v51 = vld [vmem:[#allocation38_spill] sm:$0xff]  ;;  %v9785_v55 = vpop.f32.mrb[63].mxu0 }
 0x35a   :  { %v4063_v13 = vadd.f32 %v3523_v25, %v3522_v32  ;;  %v3443_v17 = vmul.f32 %v7314_v0, %v12796_v29  ;;  %v3475_v53 = vmul.f32 %v7314_v0, %v12797_v21  ;;  %v3507_v10 = vmul.f32 %v7314_v0, %v12798_v59  ;;  %v12804_v21 = vld [vmem:[#allocation45_spill] sm:$0xff]  ;;  %v12805_v29 = vld [vmem:[#allocation24_spill] sm:$0xff]  ;;  %12807 = vst [vmem:[#allocation83_spill] sm:$0xff] %v9785_v55 }
 0x35b   :  { %v3539_v1 = vmul.f32 %v7314_v0, %v12799_v34  ;;  %v3595_v7 = vadd.f32 %v3315_v23, %v3314_v28  ;;  %v3667_v12 = vadd.f32 %v3347_v54, %v3346_v60  ;;  %v3739_v18 = vadd.f32 %v3379_v45, %v3378_v58  ;;  %v9783_v34 = vpop.f32.mrb[63].mxu1  ;;  %v12808_v23 = vld [vmem:[#allocation29_spill] sm:$0xff]  ;;  %v12809_v45 = vld [vmem:[#allocation16_spill] sm:$0xff] }
 0x35c   :  { %v3811_v22 = vadd.f32 %v3411_v16, %v3410_v27  ;;  %v3883_v20 = vadd.f32 %v3443_v17, %v3442_v2  ;;  %v3955_v44 = vadd.f32 %v3475_v53, %v3474_v4  ;;  %v4027_v32 = vadd.f32 %v3507_v10, %v3506_v33  ;;  %12806 = vst [vmem:[#allocation80_spill] sm:$0xff] %v9783_v34  ;;  %v12810_v17 = vld [vmem:[#allocation47_spill] sm:$0xff]  ;;  %v12811_v60 = vld [vmem:[#allocation52_spill] sm:$0xff] }
 0x35d   :  { %v4099_v30 = vadd.f32 %v3539_v1, %v3538_v37  ;;  %v3300_v15 = vmul.f32 %v7315_v5, %v12802_v11  ;;  %v3332_v25 = vmul.f32 %v7315_v5, %v12803_v51  ;;  %v3364_v59 = vmul.f32 %v7315_v5, %v12804_v21 }
 0x35e   :  { %v3396_v0 = vmul.f32 %v7315_v5, %v12805_v29  ;;  %v3428_v54 = vmul.f32 %v7315_v5, %v12808_v23  ;;  %v3460_v16 = vmul.f32 %v7315_v5, %v12809_v45  ;;  %v3492_v28 = vmul.f32 %v7315_v5, %v12810_v17 }
 0x35f   :  { %v3524_v37 = vmul.f32 %v7315_v5, %v12811_v60  ;;  %v3560_v58 = vadd.f32 %v3559_v24, %v3300_v15  ;;  %v3632_v27 = vadd.f32 %v3631_v31, %v3332_v25  ;;  %v3704_v2 = vadd.f32 %v3703_v19, %v3364_v59 }
 0x360   :  { %v3776_v4 = vadd.f32 %v3775_v49, %v3396_v0  ;;  %v3848_v33 = vadd.f32 %v3847_v38, %v3428_v54  ;;  %v3920_v53 = vadd.f32 %v3919_v46, %v3460_v16  ;;  %v3992_v10 = vadd.f32 %v3991_v47, %v3492_v28 }
 0x361   :  { %v4064_v1 = vadd.f32 %v4063_v13, %v3524_v37  ;;  %v3316_v34 = vmul.f32 %v9737_v26, %v12802_v11  ;;  %v3348_v55 = vmul.f32 %v9737_v26, %v12803_v51  ;;  %v3380_v50 = vmul.f32 %v9737_v26, %v12804_v21 }
 0x362   :  { %v3412_v5 = vmul.f32 %v9737_v26, %v12805_v29  ;;  %v3444_v24 = vmul.f32 %v9737_v26, %v12808_v23  ;;  %v3476_v46 = vmul.f32 %v9737_v26, %v12809_v45  ;;  %v3508_v13 = vmul.f32 %v9737_v26, %v12810_v17 }
 0x363   :  { %v3540_v47 = vmul.f32 %v9737_v26, %v12811_v60  ;;  %v9807_v19 = vadd.f32 %v3595_v7, %v3316_v34  ;;  %v9809_v59 = vadd.f32 %v3667_v12, %v3348_v55  ;;  %v9811_v38 = vadd.f32 %v3739_v18, %v3380_v50 }
 0x364   :  { %v9813_v31 = vadd.f32 %v3811_v22, %v3412_v5  ;;  %v9815_v49 = vadd.f32 %v3883_v20, %v3444_v24  ;;  %v9817_v15 = vadd.f32 %v3955_v44, %v3476_v46  ;;  %v9819_v25 = vadd.f32 %v4027_v32, %v3508_v13 }
 0x365   :  { %v9821_v0 = vadd.f32 %v4099_v30, %v3540_v47  ;;  %v3301_v54 = vmul.f32 %v9741_v43, %v9429_v35  ;;  %v3333_v26 = vmul.f32 %v9741_v43, %v9445_v62  ;;  %v3365_v34 = vmul.f32 %v9741_v43, %v9461_v6 }
 0x366   :  { %v3397_v55 = vmul.f32 %v9741_v43, %v12727_v9  ;;  %v3429_v50 = vmul.f32 %v9741_v43, %v12728_v48  ;;  %v3461_v7 = vmul.f32 %v9741_v43, %v12729_v14  ;;  %v3493_v12 = vmul.f32 %v9741_v43, %v12730_v56 }
 0x367   :  { %v3525_v18 = vmul.f32 %v9741_v43, %v12731_v36  ;;  %v3561_v22 = vadd.f32 %v3560_v58, %v3301_v54  ;;  %v3633_v20 = vadd.f32 %v3632_v27, %v3333_v26  ;;  %v3705_v44 = vadd.f32 %v3704_v2, %v3365_v34 }
 0x368   :  { %v3777_v32 = vadd.f32 %v3776_v4, %v3397_v55  ;;  %v3849_v30 = vadd.f32 %v3848_v33, %v3429_v50  ;;  %v3921_v16 = vadd.f32 %v3920_v53, %v3461_v7  ;;  %v3993_v28 = vadd.f32 %v3992_v10, %v3493_v12 }
 0x369   :  { %v4065_v37 = vadd.f32 %v4064_v1, %v3525_v18  ;;  %v3562_v5 = vrot.slane %v3561_v22, 4  ;;  %v3634_v24 = vrot.slane %v3633_v20, 4  ;;  %v3706_v46 = vrot.slane %v3705_v44, 4 }
 0x36a   :  { %v3778_v13 = vrot.slane %v3777_v32, 4  ;;  %v3850_v47 = vrot.slane %v3849_v30, 4  ;;  %v3922_v60 = vrot.slane %v3921_v16, 4  ;;  %v3994_v17 = vrot.slane %v3993_v28, 4 }
 0x36b   :  { %v4066_v45 = vrot.slane %v4065_v37, 4  ;;  %v3563_v23 = vadd.f32 %v3562_v5, %v3561_v22  ;;  %v3635_v29 = vadd.f32 %v3634_v24, %v3633_v20  ;;  %v3707_v21 = vadd.f32 %v3706_v46, %v3705_v44 }
 0x36c   :  { %v3779_v43 = vadd.f32 %v3778_v13, %v3777_v32  ;;  %v3851_v58 = vadd.f32 %v3850_v47, %v3849_v30  ;;  %v3923_v27 = vadd.f32 %v3922_v60, %v3921_v16  ;;  %v3995_v2 = vadd.f32 %v3994_v17, %v3993_v28 }
 0x36d   :  { %v4067_v4 = vadd.f32 %v4066_v45, %v4065_v37  ;;  %v3564_v33 = vrot.slane %v3563_v23, 2  ;;  %v3636_v53 = vrot.slane %v3635_v29, 2  ;;  %v3708_v10 = vrot.slane %v3707_v21, 2 }
 0x36e   :  { %v3780_v1 = vrot.slane %v3779_v43, 2  ;;  %v3852_v54 = vrot.slane %v3851_v58, 2  ;;  %v3924_v26 = vrot.slane %v3923_v27, 2  ;;  %v3996_v34 = vrot.slane %v3995_v2, 2 }
 0x36f   :  { %v4068_v55 = vrot.slane %v4067_v4, 2  ;;  %v3565_v50 = vadd.f32 %v3564_v33, %v3563_v23  ;;  %v3637_v7 = vadd.f32 %v3636_v53, %v3635_v29  ;;  %v3709_v12 = vadd.f32 %v3708_v10, %v3707_v21 }
 0x370   :  { %v3781_v18 = vadd.f32 %v3780_v1, %v3779_v43  ;;  %v3853_v22 = vadd.f32 %v3852_v54, %v3851_v58  ;;  %v3925_v20 = vadd.f32 %v3924_v26, %v3923_v27  ;;  %v3997_v44 = vadd.f32 %v3996_v34, %v3995_v2  ;;  %v9839_v58 = vpop.f32.mrb[64].mxu1  ;;  %v9841_v27 = vpop.f32.mrb[64].mxu0 }
 0x371   :  { %v4069_v32 = vadd.f32 %v4068_v55, %v4067_v4  ;;  %v3566_v30 = vrot.slane %v3565_v50, 1  ;;  %v3638_v60 = vrot.slane %v3637_v7, 1  ;;  %v3710_v17 = vrot.slane %v3709_v12, 1  ;;  %12812 = vst [vmem:[#allocation85_spill] sm:$0xff] %v9839_v58  ;;  %12813 = vst [vmem:[#allocation86_spill] sm:$0xff] %v9841_v27 }
 0x372   :  { %v3782_v45 = vrot.slane %v3781_v18, 1  ;;  %v3854_v16 = vrot.slane %v3853_v22, 1  ;;  %v3926_v28 = vrot.slane %v3925_v20, 1  ;;  %v3998_v37 = vrot.slane %v3997_v44, 1 }
 0x373   :  { %v4070_v5 = vrot.slane %v4069_v32, 1  ;;  %v3567_v24 = vadd.f32 %v3566_v30, %v3565_v50  ;;  %v3639_v46 = vadd.f32 %v3638_v60, %v3637_v7  ;;  %v3711_v13 = vadd.f32 %v3710_v17, %v3709_v12  ;;  %v9867_v12 = vpop.f32.mrb[65].mxu1 }
 0x374   :  { %v3783_v47 = vadd.f32 %v3782_v45, %v3781_v18  ;;  %v3855_v23 = vadd.f32 %v3854_v16, %v3853_v22  ;;  %v3927_v29 = vadd.f32 %v3926_v28, %v3925_v20  ;;  %v3999_v21 = vadd.f32 %v3998_v37, %v3997_v44  ;;  %12822 = vst [vmem:[#allocation27_spill] sm:$0xff] %v9867_v12  ;;  %v9869_v18 = vpop.f32.mrb[65].mxu0  ;;  %v9879_v60 = vpop.f32.mrb[66].mxu1 }
 0x375   :  { %v4071_v43 = vadd.f32 %v4070_v5, %v4069_v32  ;;  %v9843_v2 = vmul.f32 0.35355338, %v3567_v24  ;;  %v9845_v4 = vmul.f32 0.35355338, %v3639_v46  ;;  %v9847_v33 = vmul.f32 0.35355338, %v3711_v13 }
 0x376   :  { %v3317_v53 = vmul.f32 %v9745_v40, %v9429_v35  ;;  %v9851_v10 = vmul.f32 0.35355338, %v3783_v47  ;;  %v9853_v1 = vmul.f32 0.35355338, %v3855_v23  ;;  %v9855_v54 = vmul.f32 0.35355338, %v3927_v29 }
 0x377   :  { %12814 = vst [vmem:[#allocation88_spill] sm:$0xff] %v9843_v2  ;;  %12815 = vst [vmem:[#allocation90_spill] sm:$0xff] %v9845_v4  ;;  %v3349_v26 = vmul.f32 %v9745_v40, %v9445_v62  ;;  %v9859_v34 = vmul.f32 0.35355338, %v3999_v21  ;;  %v9861_v55 = vmul.f32 0.35355338, %v4071_v43  ;;  %v3381_v5 = vmul.f32 %v9745_v40, %v9461_v6 }
 0x378   :  { %12816 = vst [vmem:[#allocation93_spill] sm:$0xff] %v9847_v33  ;;  %12817 = vst [vmem:[#allocation94_spill] sm:$0xff] %v9851_v10  ;;  %v9881_v17 = vpop.f32.mrb[66].mxu0  ;;  %v3413_v24 = vmul.f32 %v9745_v40, %v12727_v9  ;;  %v3445_v46 = vmul.f32 %v9745_v40, %v12728_v48  ;;  %v3477_v13 = vmul.f32 %v9745_v40, %v12729_v14 }
 0x379   :  { %12818 = vst [vmem:[#allocation97_spill] sm:$0xff] %v9853_v1  ;;  %12819 = vst [vmem:[#allocation99_spill] sm:$0xff] %v9855_v54  ;;  %v3509_v47 = vmul.f32 %v9745_v40, %v12730_v56  ;;  %v3541_v23 = vmul.f32 %v9745_v40, %v12731_v36  ;;  %v3597_v29 = vadd.f32 %v9807_v19, %v3317_v53 }
 0x37a   :  { %12820 = vst [vmem:[#allocation100_spill] sm:$0xff] %v9859_v34  ;;  %12821 = vst [vmem:[#allocation101_spill] sm:$0xff] %v9861_v55  ;;  %v3669_v21 = vadd.f32 %v9809_v59, %v3349_v26  ;;  %v3741_v43 = vadd.f32 %v9811_v38, %v3381_v5  ;;  %v3813_v37 = vadd.f32 %v9813_v31, %v3413_v24 }
 0x37b   :  { %12823 = vst [vmem:[#allocation13_spill] sm:$0xff] %v9869_v18  ;;  %12825 = vst [vmem:[#allocation17_spill] sm:$0xff] %v9879_v60  ;;  %v3885_v16 = vadd.f32 %v9815_v49, %v3445_v46  ;;  %v3957_v30 = vadd.f32 %v9817_v15, %v3477_v13  ;;  %v4029_v44 = vadd.f32 %v9819_v25, %v3509_v47  ;;  %v3598_v22 = vrot.slane %v3597_v29, 4 }
 0x37c   :  { %12826 = vst [vmem:[#allocation21_spill] sm:$0xff] %v9881_v17  ;;  %v4101_v20 = vadd.f32 %v9821_v0, %v3541_v23  ;;  %v3670_v7 = vrot.slane %v3669_v21, 4  ;;  %v3742_v50 = vrot.slane %v3741_v43, 4  ;;  %v3814_v40 = vrot.slane %v3813_v37, 4 }
 0x37d   :  { %v3886_v17 = vrot.slane %v3885_v16, 4  ;;  %v3958_v19 = vrot.slane %v3957_v30, 4  ;;  %v4030_v53 = vrot.slane %v4029_v44, 4  ;;  %v3599_v26 = vadd.f32 %v3598_v22, %v3597_v29 }
 0x37e   :  { %v4102_v59 = vrot.slane %v4101_v20, 4  ;;  %v3671_v38 = vadd.f32 %v3670_v7, %v3669_v21  ;;  %v3743_v5 = vadd.f32 %v3742_v50, %v3741_v43  ;;  %v3815_v31 = vadd.f32 %v3814_v40, %v3813_v37  ;;  %v9907_v40 = vpop.f32.mrb[67].mxu1 }
 0x37f   :  { %v3887_v24 = vadd.f32 %v3886_v17, %v3885_v16  ;;  %v3959_v49 = vadd.f32 %v3958_v19, %v3957_v30  ;;  %v4031_v46 = vadd.f32 %v4030_v53, %v4029_v44  ;;  %v3600_v13 = vrot.slane %v3599_v26, 2  ;;  %12829 = vst [vmem:[#allocation28_spill] sm:$0xff] %v9907_v40  ;;  %v9909_v19 = vpop.f32.mrb[67].mxu0  ;;  %v12831_v53 = vld [vmem:[#allocation60_spill] sm:$0xff] }
 0x380   :  { %v4103_v15 = vadd.f32 %v4102_v59, %v4101_v20  ;;  %v3672_v25 = vrot.slane %v3671_v38, 2  ;;  %v3744_v47 = vrot.slane %v3743_v5, 2  ;;  %v3816_v0 = vrot.slane %v3815_v31, 2  ;;  %12830 = vst [vmem:[#allocation56_spill] sm:$0xff] %v9909_v19 }
 0x381   :  { %v3888_v23 = vrot.slane %v3887_v24, 2  ;;  %v3960_v60 = vrot.slane %v3959_v49, 2  ;;  %v4032_v18 = vrot.slane %v4031_v46, 2  ;;  %v3601_v27 = vadd.f32 %v3600_v13, %v3599_v26 }
 0x382   :  { %v4104_v12 = vrot.slane %v4103_v15, 2  ;;  %v3673_v58 = vadd.f32 %v3672_v25, %v3671_v38  ;;  %v3745_v55 = vadd.f32 %v3744_v47, %v3743_v5  ;;  %v3817_v28 = vadd.f32 %v3816_v0, %v3815_v31  ;;  %v12835_v5 = vld [vmem:[#allocation62_spill] sm:$0xff]  ;;  %v12842_v47 = vld [vmem:[#allocation25_spill] sm:$0xff] }
 0x383   :  { %v3889_v22 = vadd.f32 %v3888_v23, %v3887_v24  ;;  %v3961_v7 = vadd.f32 %v3960_v60, %v3959_v49  ;;  %v4033_v50 = vadd.f32 %v4032_v18, %v4031_v46  ;;  %v3602_v17 = vrot.slane %v3601_v27, 1  ;;  %v12833_v18 = vld [vmem:[#allocation61_spill] sm:$0xff]  ;;  %v12837_v24 = vld [vmem:[#allocation63_spill] sm:$0xff] }
 0x384   :  { %v4105_v37 = vadd.f32 %v4104_v12, %v4103_v15  ;;  %v3674_v30 = vrot.slane %v3673_v58, 1  ;;  %v3746_v44 = vrot.slane %v3745_v55, 1  ;;  %v3818_v20 = vrot.slane %v3817_v28, 1 }
 0x385   :  { %v3890_v16 = vrot.slane %v3889_v22, 1  ;;  %v3962_v29 = vrot.slane %v3961_v7, 1  ;;  %v4034_v21 = vrot.slane %v4033_v50, 1  ;;  %v9912_v59 = vmul.f32 0.35355338, %v12831_v53 }
 0x386   :  { %v4106_v43 = vrot.slane %v4105_v37, 1  ;;  %v3675_v26 = vadd.f32 %v3674_v30, %v3673_v58  ;;  %v3747_v38 = vadd.f32 %v3746_v44, %v3745_v55  ;;  %v3819_v60 = vadd.f32 %v3818_v20, %v3817_v28  ;;  %v12843_v58 = vld [vmem:[#allocation70_spill] sm:$0xff]  ;;  %v12847_v30 = vld [vmem:[#allocation32_spill] sm:$0xff] }
 0x387   :  { %12832 = vst [vmem:[#allocation34_spill] sm:$0xff] %v9912_v59  ;;  %v9915_v12 = vmul.f32 0.35355338, %v12833_v18  ;;  %v9918_v31 = vmul.f32 0.35355338, %v12835_v5  ;;  %v3891_v46 = vadd.f32 %v3890_v16, %v3889_v22  ;;  %v9923_v15 = vadd.f32 %v3602_v17, %v3601_v27  ;;  %v12850_v22 = vld [vmem:[#allocation42_spill] sm:$0xff] }
 0x388   :  { %v9921_v49 = vmul.f32 0.35355338, %v12837_v24  ;;  %v9925_v13 = vadd.f32 %v3962_v29, %v3961_v7  ;;  %v9927_v25 = vadd.f32 %v4034_v21, %v4033_v50  ;;  %v3302_v55 = vmul.f32 %v12843_v58, %v12842_v47  ;;  %v12851_v50 = vld [vmem:[#allocation22_spill] sm:$0xff]  ;;  %v9947_v16 = vpop.f32.mrb[68].mxu1 }
 0x389   :  { %12834 = vst [vmem:[#allocation72_spill] sm:$0xff] %v9915_v12  ;;  %12836 = vst [vmem:[#allocation75_spill] sm:$0xff] %v9918_v31  ;;  %v9931_v28 = vadd.f32 %v4106_v43, %v4105_v37  ;;  %v9933_v0 = vmul.f32 0.35355338, %v3675_v26  ;;  %v9935_v23 = vmul.f32 0.35355338, %v3747_v38  ;;  %v3334_v44 = vmul.f32 %v12843_v58, %v12847_v30 }
 0x38a   :  { %12838 = vst [vmem:[#allocation77_spill] sm:$0xff] %v9921_v49  ;;  %12839 = vst [vmem:[#allocation30_spill] sm:$0xff] %v9923_v15  ;;  %v9939_v20 = vmul.f32 0.35355338, %v3819_v60  ;;  %v9941_v27 = vmul.f32 0.35355338, %v3891_v46  ;;  %v3366_v7 = vmul.f32 %v12843_v58, %v12850_v22  ;;  %v3398_v17 = vmul.f32 %v12843_v58, %v12851_v50 }
 0x38b   :  { %12840 = vst [vmem:[#allocation14_spill] sm:$0xff] %v9925_v13  ;;  %12841 = vst [vmem:[#allocation20_spill] sm:$0xff] %v9927_v25  ;;  %v9949_v37 = vpop.f32.mrb[68].mxu0  ;;  %v12854_v29 = vld [vmem:[#allocation26_spill] sm:$0xff]  ;;  %v12855_v43 = vld [vmem:[#allocation36_spill] sm:$0xff]  ;;  %v9959_v5 = vpop.f32.mrb[69].mxu1 }
 0x38c   :  { %12844 = vst [vmem:[#allocation51_spill] sm:$0xff] %v9931_v28  ;;  %12845 = vst [vmem:[#allocation12_spill] sm:$0xff] %v9933_v0  ;;  %v3430_v21 = vmul.f32 %v12843_v58, %v12854_v29  ;;  %v3462_v53 = vmul.f32 %v12843_v58, %v12855_v43  ;;  %v12856_v26 = vld [vmem:[#allocation19_spill] sm:$0xff]  ;;  %v12857_v60 = vld [vmem:[#allocation48_spill] sm:$0xff]  ;;  %v9961_v24 = vpop.f32.mrb[69].mxu0  ;;  %v9971_v19 = vpop.f32.mrb[70].mxu1 }
 0x38d   :  { %12846 = vst [vmem:[#allocation38_spill] sm:$0xff] %v9935_v23  ;;  %12848 = vst [vmem:[#allocation60_spill] sm:$0xff] %v9939_v20  ;;  %v3494_v38 = vmul.f32 %v12843_v58, %v12856_v26  ;;  %v3526_v18 = vmul.f32 %v12843_v58, %v12857_v60  ;;  %v12860_v46 = vld [vmem:[#allocation71_spill] sm:$0xff]  ;;  %v9973_v40 = vpop.f32.mrb[70].mxu0  ;;  %v9983_v23 = vpop.f32.mrb[71].mxu1  ;;  %v12868_v12 = vld [vmem:[#allocation84_spill] sm:$0xff] }
 0x38e   :  { %12849 = vst [vmem:[#allocation61_spill] sm:$0xff] %v9941_v27  ;;  %12852 = vst [vmem:[#allocation62_spill] sm:$0xff] %v9947_v16  ;;  %v3318_v15 = vmul.f32 %v12860_v46, %v12842_v47  ;;  %v3350_v27 = vmul.f32 %v12860_v46, %v12847_v30  ;;  %v3414_v16 = vmul.f32 %v12860_v46, %v12851_v50  ;;  %v9985_v0 = vpop.f32.mrb[71].mxu0  ;;  %v12865_v49 = vld [vmem:[#allocation79_spill] sm:$0xff]  ;;  %v12870_v50 = vld [vmem:[#allocation89_spill] sm:$0xff]  ;;  %v9999_v47 = vpop.f32.mrb[72].mxu1 }
 0x38f   :  { %12853 = vst [vmem:[#allocation63_spill] sm:$0xff] %v9949_v37  ;;  %12858 = vst [vmem:[#allocation70_spill] sm:$0xff] %v9959_v5  ;;  %v3382_v37 = vmul.f32 %v12860_v46, %v12850_v22  ;;  %v3446_v58 = vmul.f32 %v12860_v46, %v12854_v29  ;;  %v3510_v5 = vmul.f32 %v12860_v46, %v12856_v26  ;;  %v12869_v29 = vld [vmem:[#allocation87_spill] sm:$0xff]  ;;  %v12872_v30 = vld [vmem:[#allocation92_spill] sm:$0xff] }
 0x390   :  { %12859 = vst [vmem:[#allocation102_spill] sm:$0xff] %v9961_v24  ;;  %12861 = vst [vmem:[#allocation71_spill] sm:$0xff] %v9971_v19  ;;  %v3478_v24 = vmul.f32 %v12860_v46, %v12855_v43  ;;  %v3542_v20 = vmul.f32 %v12860_v46, %v12857_v60  ;;  %v12866_v19 = vld [vmem:[#allocation81_spill] sm:$0xff]  ;;  %v9993_v22 = vadd.f32 %v12870_v50, %v12869_v29  ;;  %v12871_v43 = vld [vmem:[#allocation91_spill] sm:$0xff]  ;;  %v10001_v46 = vpop.f32.mrb[72].mxu0 }
 0x391   :  { %12862 = vst [vmem:[#allocation103_spill] sm:$0xff] %v9973_v40  ;;  %12863 = vst [vmem:[#allocation104_spill] sm:$0xff] %v9983_v23  ;;  %v7321_v31 = vadd.f32 %v12866_v19, %v12865_v49  ;;  %v12867_v40 = vld [vmem:[#allocation82_spill] sm:$0xff]  ;;  %v9997_v26 = vadd.f32 %v12872_v30, %v12871_v43  ;;  %v12875_v23 = vld [vmem:[#allocation37_spill] sm:$0xff]  ;;  %v10019_v43 = vpop.f32.mrb[73].mxu1 }
 0x392   :  { %12864 = vst [vmem:[#allocation105_spill] sm:$0xff] %v9985_v0  ;;  %v7322_v59 = vadd.f32 %v12868_v12, %v12867_v40  ;;  %12873 = vst [vmem:[#allocation79_spill] sm:$0xff] %v9999_v47  ;;  %v12876_v0 = vld [vmem:[#allocation39_spill] sm:$0xff]  ;;  %v12877_v19 = vld [vmem:[#allocation40_spill] sm:$0xff]  ;;  %v10021_v47 = vpop.f32.mrb[73].mxu0 }
 0x393   :  { %12874 = vst [vmem:[#allocation81_spill] sm:$0xff] %v10001_v46  ;;  %v10005_v60 = vadd.f32 %v12876_v0, %v12875_v23  ;;  %v12878_v49 = vld [vmem:[#allocation41_spill] sm:$0xff]  ;;  %v12879_v40 = vld [vmem:[#allocation43_spill] sm:$0xff]  ;;  %v12880_v12 = vld [vmem:[#allocation46_spill] sm:$0xff]  ;;  %v3303_v46 = vmul.f32 %v7321_v31, %v12792_v52  ;;  %v3335_v0 = vmul.f32 %v7321_v31, %v12793_v61  ;;  %v3367_v23 = vmul.f32 %v7321_v31, %v12794_v39 }
 0x394   :  { %v10009_v28 = vadd.f32 %v12878_v49, %v12877_v19  ;;  %v10013_v50 = vadd.f32 %v12880_v12, %v12879_v40  ;;  %v12882_v29 = vld [vmem:[#allocation49_spill] sm:$0xff]  ;;  %v12883_v25 = vld [vmem:[#allocation50_spill] sm:$0xff]  ;;  %12885 = vst [vmem:[#allocation87_spill] sm:$0xff] %v10019_v43  ;;  %12886 = vst [vmem:[#allocation89_spill] sm:$0xff] %v10021_v47  ;;  %v3399_v19 = vmul.f32 %v7321_v31, %v12795_v3  ;;  %v10027_v49 = vpop.f32.mrb[74].mxu1  ;;  %v10029_v40 = vpop.f32.mrb[74].mxu0 }
 0x395   :  { %v10017_v30 = vadd.f32 %v12883_v25, %v12882_v29  ;;  %12887 = vst [vmem:[#allocation91_spill] sm:$0xff] %v10027_v49  ;;  %12888 = vst [vmem:[#allocation92_spill] sm:$0xff] %v10029_v40  ;;  %v12889_v12 = vld [vmem:[#allocation31_spill] sm:$0xff]  ;;  %v10035_v34 = vpop.f32.mrb[75].mxu1  ;;  %v10037_v45 = vpop.f32.mrb[75].mxu0  ;;  %v3568_v54 = vadd.f32 %v3303_v46, %v3302_v55  ;;  %v3640_v32 = vadd.f32 %v3335_v0, %v3334_v44 }
 0x396   :  { %12881 = vst [vmem:[#allocation82_spill] sm:$0xff] %v10013_v50  ;;  %v3431_v50 = vmul.f32 %v7321_v31, %v12889_v12  ;;  %v12890_v25 = vld [vmem:[#allocation15_spill] sm:$0xff]  ;;  %12893 = vst [vmem:[#allocation37_spill] sm:$0xff] %v10035_v34  ;;  %v3712_v1 = vadd.f32 %v3367_v23, %v3366_v7  ;;  %v3784_v57 = vadd.f32 %v3399_v19, %v3398_v17  ;;  %v10039_v10 = vpop.f32.mrb[76].mxu1  ;;  %v10041_v49 = vpop.f32.mrb[76].mxu0 }
 0x397   :  { %12884 = vst [vmem:[#allocation84_spill] sm:$0xff] %v10017_v30  ;;  %v3463_v29 = vmul.f32 %v7321_v31, %v12890_v25  ;;  %v12891_v30 = vld [vmem:[#allocation44_spill] sm:$0xff]  ;;  %v12892_v13 = vld [vmem:[#allocation23_spill] sm:$0xff]  ;;  %12894 = vst [vmem:[#allocation39_spill] sm:$0xff] %v10037_v45  ;;  %v10043_v4 = vpop.f32.mrb[77].mxu1  ;;  %v10045_v42 = vpop.f32.mrb[77].mxu0  ;;  %v3351_v45 = vmul.f32 %v7322_v59, %v12793_v61  ;;  %v3383_v55 = vmul.f32 %v7322_v59, %v12794_v39 }
 0x398   :  { %v3495_v43 = vmul.f32 %v7321_v31, %v12891_v30  ;;  %v3527_v47 = vmul.f32 %v7321_v31, %v12892_v13  ;;  %12895 = vst [vmem:[#allocation40_spill] sm:$0xff] %v10039_v10  ;;  %12896 = vst [vmem:[#allocation41_spill] sm:$0xff] %v10041_v49  ;;  %v3856_v40 = vadd.f32 %v3431_v50, %v3430_v21  ;;  %v10051_v7 = vpop.f32.mrb[78].mxu1  ;;  %v10053_v17 = vpop.f32.mrb[78].mxu0 }
 0x399   :  { %v3928_v8 = vadd.f32 %v3463_v29, %v3462_v53  ;;  %12897 = vst [vmem:[#allocation43_spill] sm:$0xff] %v10043_v4  ;;  %12898 = vst [vmem:[#allocation46_spill] sm:$0xff] %v10045_v42  ;;  %v3319_v31 = vmul.f32 %v7322_v59, %v12792_v52  ;;  %v3415_v44 = vmul.f32 %v7322_v59, %v12795_v3  ;;  %v10061_v46 = vpop.f32.mrb[79].mxu0 }
 0x39a   :  { %v4000_v33 = vadd.f32 %v3495_v43, %v3494_v38  ;;  %v4072_v41 = vadd.f32 %v3527_v47, %v3526_v18  ;;  %12899 = vst [vmem:[#allocation49_spill] sm:$0xff] %v10051_v7  ;;  %12900 = vst [vmem:[#allocation50_spill] sm:$0xff] %v10053_v17  ;;  %v3447_v21 = vmul.f32 %v7322_v59, %v12889_v12  ;;  %v10059_v18 = vpop.f32.mrb[79].mxu1  ;;  %v10065_v29 = vpop.f32.mrb[80].mxu0 }
 0x39b   :  { %v3479_v47 = vmul.f32 %v7322_v59, %v12890_v25  ;;  %v3511_v53 = vmul.f32 %v7322_v59, %v12891_v30  ;;  %v3543_v38 = vmul.f32 %v7322_v59, %v12892_v13  ;;  %12901 = vst [vmem:[#allocation106_spill] sm:$0xff] %v10059_v18  ;;  %12902 = vst [vmem:[#allocation107_spill] sm:$0xff] %v10061_v46  ;;  %v10063_v19 = vpop.f32.mrb[80].mxu1  ;;  %v10069_v10 = vpop.f32.mrb[81].mxu0 }
 0x39c   :  { %v3604_v50 = vadd.f32 %v3319_v31, %v3318_v15  ;;  %v3676_v43 = vadd.f32 %v3351_v45, %v3350_v27  ;;  %v3748_v0 = vadd.f32 %v3383_v55, %v3382_v37  ;;  %v3820_v23 = vadd.f32 %v3415_v44, %v3414_v16  ;;  %12903 = vst [vmem:[#allocation108_spill] sm:$0xff] %v10063_v19  ;;  %v10067_v49 = vpop.f32.mrb[81].mxu1  ;;  %v12907_v15 = vld [vmem:[#allocation45_spill] sm:$0xff]  ;;  %v12908_v16 = vld [vmem:[#allocation24_spill] sm:$0xff]  ;;  %v12913_v44 = vld [vmem:[#allocation47_spill] sm:$0xff] }
 0x39d   :  { %12904 = vst [vmem:[#allocation109_spill] sm:$0xff] %v10065_v29  ;;  %v3892_v17 = vadd.f32 %v3447_v21, %v3446_v58  ;;  %v3964_v7 = vadd.f32 %v3479_v47, %v3478_v24  ;;  %v4036_v42 = vadd.f32 %v3511_v53, %v3510_v5  ;;  %v4108_v4 = vadd.f32 %v3543_v38, %v3542_v20  ;;  %v10079_v58 = vpop.f32.mrb[82].mxu1  ;;  %v10081_v5 = vpop.f32.mrb[82].mxu0  ;;  %v12911_v20 = vld [vmem:[#allocation29_spill] sm:$0xff]  ;;  %v12912_v31 = vld [vmem:[#allocation16_spill] sm:$0xff] }
 0x39e   :  { %12905 = vst [vmem:[#allocation110_spill] sm:$0xff] %v10067_v49  ;;  %12906 = vst [vmem:[#allocation111_spill] sm:$0xff] %v10069_v10  ;;  %v3304_v59 = vmul.f32 %v9993_v22, %v12802_v11  ;;  %v3336_v45 = vmul.f32 %v9993_v22, %v12803_v51  ;;  %v3368_v27 = vmul.f32 %v9993_v22, %v12907_v15  ;;  %v12914_v47 = vld [vmem:[#allocation52_spill] sm:$0xff]  ;;  %v10091_v38 = vpop.f32.mrb[83].mxu1  ;;  %v10093_v10 = vpop.f32.mrb[83].mxu0 }
 0x39f   :  { %v3400_v37 = vmul.f32 %v9993_v22, %v12908_v16  ;;  %12909 = vst [vmem:[#allocation45_spill] sm:$0xff] %v10079_v58  ;;  %12910 = vst [vmem:[#allocation24_spill] sm:$0xff] %v10081_v5  ;;  %v3432_v24 = vmul.f32 %v9993_v22, %v12911_v20  ;;  %v3464_v55 = vmul.f32 %v9993_v22, %v12912_v31  ;;  %v10095_v19 = vpop.f32.mrb[84].mxu1  ;;  %v10097_v46 = vpop.f32.mrb[84].mxu0 }
 0x3a0   :  { %v3496_v21 = vmul.f32 %v9993_v22, %v12913_v44  ;;  %v3528_v53 = vmul.f32 %v9993_v22, %v12914_v47  ;;  %12915 = vst [vmem:[#allocation29_spill] sm:$0xff] %v10091_v38  ;;  %12916 = vst [vmem:[#allocation112_spill] sm:$0xff] %v10093_v10  ;;  %v3569_v49 = vadd.f32 %v3568_v54, %v3304_v59  ;;  %v10099_v25 = vpop.f32.mrb[85].mxu1  ;;  %v10101_v12 = vpop.f32.mrb[85].mxu0 }
 0x3a1   :  { %v3641_v58 = vadd.f32 %v3640_v32, %v3336_v45  ;;  %v3713_v29 = vadd.f32 %v3712_v1, %v3368_v27  ;;  %v3785_v5 = vadd.f32 %v3784_v57, %v3400_v37  ;;  %12917 = vst [vmem:[#allocation113_spill] sm:$0xff] %v10095_v19  ;;  %12918 = vst [vmem:[#allocation114_spill] sm:$0xff] %v10097_v46  ;;  %v10111_v32 = vpop.f32.mrb[86].mxu1 }
 0x3a2   :  { %v3857_v18 = vadd.f32 %v3856_v40, %v3432_v24  ;;  %v3929_v34 = vadd.f32 %v3928_v8, %v3464_v55  ;;  %v4001_v13 = vadd.f32 %v4000_v33, %v3496_v21  ;;  %v4073_v30 = vadd.f32 %v4072_v41, %v3528_v53  ;;  %12919 = vst [vmem:[#allocation115_spill] sm:$0xff] %v10099_v25  ;;  %v10113_v8 = vpop.f32.mrb[86].mxu0  ;;  %v10123_v45 = vpop.f32.mrb[87].mxu1 }
 0x3a3   :  { %12920 = vst [vmem:[#allocation116_spill] sm:$0xff] %v10101_v12  ;;  %v3320_v22 = vmul.f32 %v9997_v26, %v12802_v11  ;;  %v3352_v54 = vmul.f32 %v9997_v26, %v12803_v51  ;;  %v3384_v57 = vmul.f32 %v9997_v26, %v12907_v15  ;;  %v3416_v1 = vmul.f32 %v9997_v26, %v12908_v16  ;;  %v10125_v27 = vpop.f32.mrb[87].mxu0  ;;  %v10135_v53 = vpop.f32.mrb[88].mxu1 }
 0x3a4   :  { %12921 = vst [vmem:[#allocation117_spill] sm:$0xff] %v10111_v32  ;;  %12922 = vst [vmem:[#allocation118_spill] sm:$0xff] %v10113_v8  ;;  %v3448_v41 = vmul.f32 %v9997_v26, %v12911_v20  ;;  %v3480_v33 = vmul.f32 %v9997_v26, %v12912_v31  ;;  %v3512_v40 = vmul.f32 %v9997_v26, %v12913_v44  ;;  %v10137_v8 = vpop.f32.mrb[88].mxu0 }
 0x3a5   :  { %v3544_v59 = vmul.f32 %v9997_v26, %v12914_v47  ;;  %12923 = vst [vmem:[#allocation119_spill] sm:$0xff] %v10123_v45  ;;  %12924 = vst [vmem:[#allocation120_spill] sm:$0xff] %v10125_v27  ;;  %v10127_v37 = vadd.f32 %v3604_v50, %v3320_v22  ;;  %v10129_v24 = vadd.f32 %v3676_v43, %v3352_v54  ;;  %v10147_v50 = vpop.f32.mrb[89].mxu1  ;;  %v10149_v43 = vpop.f32.mrb[89].mxu0 }
 0x3a6   :  { %v10131_v55 = vadd.f32 %v3748_v0, %v3384_v57  ;;  %v10133_v21 = vadd.f32 %v3820_v23, %v3416_v1  ;;  %12925 = vst [vmem:[#allocation121_spill] sm:$0xff] %v10135_v53  ;;  %12926 = vst [vmem:[#allocation122_spill] sm:$0xff] %v10137_v8  ;;  %v10139_v32 = vadd.f32 %v3892_v17, %v3448_v41 }
 0x3a7   :  { %v10141_v12 = vadd.f32 %v3964_v7, %v3480_v33  ;;  %v10143_v26 = vadd.f32 %v4036_v42, %v3512_v40  ;;  %v10145_v45 = vadd.f32 %v4108_v4, %v3544_v59  ;;  %12927 = vst [vmem:[#allocation123_spill] sm:$0xff] %v10147_v50  ;;  %12928 = vst [vmem:[#allocation124_spill] sm:$0xff] %v10149_v43  ;;  %v10159_v42 = vpop.f32.mrb[90].mxu1  ;;  %v10161_v4 = vpop.f32.mrb[90].mxu0 }
 0x3a8   :  { %v3305_v0 = vmul.f32 %v10005_v60, %v9429_v35  ;;  %v3337_v23 = vmul.f32 %v10005_v60, %v9445_v62  ;;  %v3369_v17 = vmul.f32 %v10005_v60, %v9461_v6  ;;  %v3401_v7 = vmul.f32 %v10005_v60, %v12727_v9  ;;  %12929 = vst [vmem:[#allocation125_spill] sm:$0xff] %v10159_v42  ;;  %v10171_v41 = vpop.f32.mrb[91].mxu1  ;;  %v10173_v33 = vpop.f32.mrb[91].mxu0 }
 0x3a9   :  { %12930 = vst [vmem:[#allocation126_spill] sm:$0xff] %v10161_v4  ;;  %v3433_v22 = vmul.f32 %v10005_v60, %v12728_v48  ;;  %v3465_v54 = vmul.f32 %v10005_v60, %v12729_v14  ;;  %v3497_v57 = vmul.f32 %v10005_v60, %v12730_v56  ;;  %v3529_v1 = vmul.f32 %v10005_v60, %v12731_v36  ;;  %v10175_v43 = vpop.f32.mrb[92].mxu1  ;;  %v10177_v50 = vpop.f32.mrb[92].mxu0 }
 0x3aa   :  { %12931 = vst [vmem:[#allocation127_spill] sm:$0xff] %v10171_v41  ;;  %12932 = vst [vmem:[#allocation128_spill] sm:$0xff] %v10173_v33  ;;  %v3570_v40 = vadd.f32 %v3569_v49, %v3305_v0  ;;  %v3642_v59 = vadd.f32 %v3641_v58, %v3337_v23  ;;  %v3714_v42 = vadd.f32 %v3713_v29, %v3369_v17  ;;  %v10179_v46 = vpop.f32.mrb[93].mxu1  ;;  %v10181_v19 = vpop.f32.mrb[93].mxu0 }
 0x3ab   :  { %v3786_v4 = vadd.f32 %v3785_v5, %v3401_v7  ;;  %12933 = vst [vmem:[#allocation129_spill] sm:$0xff] %v10175_v43  ;;  %12934 = vst [vmem:[#allocation130_spill] sm:$0xff] %v10177_v50  ;;  %v3858_v8 = vadd.f32 %v3857_v18, %v3433_v22  ;;  %v3930_v53 = vadd.f32 %v3929_v34, %v3465_v54  ;;  %v10183_v49 = vpop.f32.mrb[94].mxu1  ;;  %v10185_v29 = vpop.f32.mrb[94].mxu0 }
 0x3ac   :  { %v4002_v27 = vadd.f32 %v4001_v13, %v3497_v57  ;;  %v4074_v25 = vadd.f32 %v4073_v30, %v3529_v1  ;;  %12935 = vst [vmem:[#allocation131_spill] sm:$0xff] %v10179_v46  ;;  %12936 = vst [vmem:[#allocation132_spill] sm:$0xff] %v10181_v19  ;;  %v3571_v60 = vrot.slane %v3570_v40, 4  ;;  %v3643_v41 = vrot.slane %v3642_v59, 4  ;;  %v10187_v18 = vpop.f32.mrb[95].mxu1  ;;  %v10189_v34 = vpop.f32.mrb[95].mxu0 }
 0x3ad   :  { %v3715_v10 = vrot.slane %v3714_v42, 4  ;;  %v3787_v33 = vrot.slane %v3786_v4, 4  ;;  %12937 = vst [vmem:[#allocation133_spill] sm:$0xff] %v10183_v49  ;;  %12938 = vst [vmem:[#allocation134_spill] sm:$0xff] %v10185_v29  ;;  %v3859_v58 = vrot.slane %v3858_v8, 4  ;;  %v3931_v5 = vrot.slane %v3930_v53, 4 }
 0x3ae   :  { %v4003_v0 = vrot.slane %v4002_v27, 4  ;;  %v4075_v23 = vrot.slane %v4074_v25, 4  ;;  %12939 = vst [vmem:[#allocation135_spill] sm:$0xff] %v10187_v18  ;;  %12940 = vst [vmem:[#allocation136_spill] sm:$0xff] %v10189_v34  ;;  %v3572_v13 = vadd.f32 %v3571_v60, %v3570_v40  ;;  %v3644_v30 = vadd.f32 %v3643_v41, %v3642_v59 }
 0x3af   :  { %v3716_v17 = vadd.f32 %v3715_v10, %v3714_v42  ;;  %v3788_v7 = vadd.f32 %v3787_v33, %v3786_v4  ;;  %v3860_v22 = vadd.f32 %v3859_v58, %v3858_v8  ;;  %v3932_v54 = vadd.f32 %v3931_v5, %v3930_v53 }
 0x3b0   :  { %v4004_v57 = vadd.f32 %v4003_v0, %v4002_v27  ;;  %v4076_v1 = vadd.f32 %v4075_v23, %v4074_v25  ;;  %v3573_v19 = vrot.slane %v3572_v13, 2  ;;  %v3645_v49 = vrot.slane %v3644_v30, 2 }
 0x3b1   :  { %v3717_v46 = vrot.slane %v3716_v17, 2  ;;  %v3789_v29 = vrot.slane %v3788_v7, 2  ;;  %v3861_v50 = vrot.slane %v3860_v22, 2  ;;  %v3933_v43 = vrot.slane %v3932_v54, 2 }
 0x3b2   :  { %v4005_v38 = vrot.slane %v4004_v57, 2  ;;  %v4077_v47 = vrot.slane %v4076_v1, 2  ;;  %v3574_v44 = vadd.f32 %v3573_v19, %v3572_v13  ;;  %v3646_v18 = vadd.f32 %v3645_v49, %v3644_v30 }
 0x3b3   :  { %v3718_v31 = vadd.f32 %v3717_v46, %v3716_v17  ;;  %v3790_v34 = vadd.f32 %v3789_v29, %v3788_v7  ;;  %v3862_v40 = vadd.f32 %v3861_v50, %v3860_v22  ;;  %v3934_v41 = vadd.f32 %v3933_v43, %v3932_v54  ;;  %v12951_v22 = vld [vmem:[#allocation96_spill] sm:$0xff]  ;;  %v12952_v54 = vld [vmem:[#allocation90_spill] sm:$0xff] }
 0x3b4   :  { %v4006_v10 = vadd.f32 %v4005_v38, %v4004_v57  ;;  %v4078_v42 = vadd.f32 %v4077_v47, %v4076_v1  ;;  %v3575_v8 = vrot.slane %v3574_v44, 1  ;;  %v3647_v53 = vrot.slane %v3646_v18, 1 }
 0x3b5   :  { %v3719_v27 = vrot.slane %v3718_v31, 1  ;;  %v3791_v25 = vrot.slane %v3790_v34, 1  ;;  %v3863_v4 = vrot.slane %v3862_v40, 1  ;;  %v3935_v33 = vrot.slane %v3934_v41, 1 }
 0x3b6   :  { %v4007_v59 = vrot.slane %v4006_v10, 1  ;;  %v4079_v60 = vrot.slane %v4078_v42, 1  ;;  %v3576_v58 = vadd.f32 %v3575_v8, %v3574_v44  ;;  %v3648_v5 = vadd.f32 %v3647_v53, %v3646_v18  ;;  %v12959_v8 = vld [vmem:[#allocation18_spill] sm:$0xff] }
 0x3b7   :  { %v3720_v0 = vadd.f32 %v3719_v27, %v3718_v31  ;;  %v3792_v23 = vadd.f32 %v3791_v25, %v3790_v34  ;;  %v3864_v19 = vadd.f32 %v3863_v4, %v3862_v40  ;;  %v3936_v49 = vadd.f32 %v3935_v33, %v3934_v41  ;;  %v12955_v40 = vld [vmem:[#allocation98_spill] sm:$0xff]  ;;  %v12956_v41 = vld [vmem:[#allocation93_spill] sm:$0xff] }
 0x3b8   :  { %v4008_v46 = vadd.f32 %v4007_v59, %v4006_v10  ;;  %v4080_v29 = vadd.f32 %v4079_v60, %v4078_v42  ;;  %v10191_v50 = vmul.f32 0.35355338, %v3576_v58  ;;  %v10193_v38 = vmul.f32 0.35355338, %v3648_v5  ;;  %v12960_v53 = vld [vmem:[#allocation94_spill] sm:$0xff]  ;;  %v12963_v4 = vld [vmem:[#allocation33_spill] sm:$0xff] }
 0x3b9   :  { %v10195_v47 = vmul.f32 0.35355338, %v3720_v0  ;;  %v3321_v43 = vmul.f32 %v10009_v28, %v9429_v35  ;;  %v10199_v13 = vmul.f32 0.35355338, %v3792_v23  ;;  %v10201_v30 = vmul.f32 0.35355338, %v3864_v19 }
 0x3ba   :  { %12941 = vst [vmem:[#allocation137_spill] sm:$0xff] %v10191_v50  ;;  %12942 = vst [vmem:[#allocation138_spill] sm:$0xff] %v10193_v38  ;;  %v10203_v44 = vmul.f32 0.35355338, %v3936_v49  ;;  %v3353_v31 = vmul.f32 %v10009_v28, %v9445_v62  ;;  %v10207_v18 = vmul.f32 0.35355338, %v4008_v46  ;;  %v12949_v17 = vmax.f32 %v9611_v63, %v9843_v2 }
 0x3bb   :  { %12943 = vst [vmem:[#allocation139_spill] sm:$0xff] %v10195_v47  ;;  %12944 = vst [vmem:[#allocation140_spill] sm:$0xff] %v10199_v13  ;;  %v10209_v34 = vmul.f32 0.35355338, %v4080_v29  ;;  %v12953_v57 = vmax.f32 %v12951_v22, %v12952_v54  ;;  %v12957_v10 = vmax.f32 %v12955_v40, %v12956_v41  ;;  %v12961_v27 = vmax.f32 %v12959_v8, %v12960_v53  ;;  %v12964_v33 = vld [vmem:[#allocation97_spill] sm:$0xff]  ;;  %v12967_v58 = vld [vmem:[#allocation35_spill] sm:$0xff] }
 0x3bc   :  { %12945 = vst [vmem:[#allocation141_spill] sm:$0xff] %v10201_v30  ;;  %12946 = vst [vmem:[#allocation142_spill] sm:$0xff] %v10203_v44  ;;  %v10215_v7 = vmax.f32 %v12949_v17, %v10191_v50  ;;  %v12965_v59 = vmax.f32 %v12963_v4, %v12964_v33  ;;  %v12968_v5 = vld [vmem:[#allocation99_spill] sm:$0xff]  ;;  %v12972_v49 = vld [vmem:[#allocation100_spill] sm:$0xff]  ;;  %v3481_v53 = vmul.f32 %v10009_v28, %v12729_v14 }
 0x3bd   :  { %12947 = vst [vmem:[#allocation143_spill] sm:$0xff] %v10207_v18  ;;  %12948 = vst [vmem:[#allocation144_spill] sm:$0xff] %v10209_v34  ;;  %v10221_v1 = vmax.f32 %v12953_v57, %v10193_v38  ;;  %v10227_v42 = vmax.f32 %v12957_v10, %v10195_v47  ;;  %v10233_v25 = vmax.f32 %v12961_v27, %v10199_v13  ;;  %v12971_v19 = vld [vmem:[#allocation55_spill] sm:$0xff]  ;;  %v12975_v17 = vld [vmem:[#allocation57_spill] sm:$0xff] }
 0x3be   :  { %12950 = vst [vmem:[#allocation145_spill] sm:$0xff] %v10215_v7  ;;  %v10239_v60 = vmax.f32 %v12965_v59, %v10201_v30  ;;  %v12969_v0 = vmax.f32 %v12967_v58, %v12968_v5  ;;  %v12973_v46 = vmax.f32 %v12971_v19, %v12972_v49  ;;  %v12976_v57 = vld [vmem:[#allocation101_spill] sm:$0xff]  ;;  %v3385_v59 = vmul.f32 %v10009_v28, %v9461_v6  ;;  %v13005_v5 = vld [vmem:[#allocation58_spill] sm:$0xff] }
 0x3bf   :  { %12954 = vst [vmem:[#allocation146_spill] sm:$0xff] %v10221_v1  ;;  %12958 = vst [vmem:[#allocation147_spill] sm:$0xff] %v10227_v42  ;;  %v12977_v10 = vmax.f32 %v12975_v17, %v12976_v57  ;;  %v3417_v13 = vmul.f32 %v10009_v28, %v12727_v9  ;;  %v3545_v8 = vmul.f32 %v10009_v28, %v12731_v36 }
 0x3c0   :  { %12962 = vst [vmem:[#allocation148_spill] sm:$0xff] %v10233_v25  ;;  %12966 = vst [vmem:[#allocation149_spill] sm:$0xff] %v10239_v60  ;;  %v10245_v23 = vmax.f32 %v12969_v0, %v10203_v44  ;;  %v10251_v29 = vmax.f32 %v12973_v46, %v10207_v18  ;;  %v3449_v0 = vmul.f32 %v10009_v28, %v12728_v48 }
 0x3c1   :  { %v10257_v27 = vmax.f32 %v12977_v10, %v10209_v34  ;;  %v3513_v46 = vmul.f32 %v10009_v28, %v12730_v56  ;;  %v3606_v10 = vadd.f32 %v10127_v37, %v3321_v43  ;;  %v3678_v34 = vadd.f32 %v10129_v24, %v3353_v31 }
 0x3c2   :  { %12970 = vst [vmem:[#allocation150_spill] sm:$0xff] %v10245_v23  ;;  %12974 = vst [vmem:[#allocation151_spill] sm:$0xff] %v10251_v29  ;;  %v3750_v57 = vadd.f32 %v10131_v55, %v3385_v59  ;;  %v3822_v17 = vadd.f32 %v10133_v21, %v3417_v13  ;;  %v3894_v47 = vadd.f32 %v10139_v32, %v3449_v0 }
 0x3c3   :  { %12978 = vst [vmem:[#allocation152_spill] sm:$0xff] %v10257_v27  ;;  %v3966_v41 = vadd.f32 %v10141_v12, %v3481_v53  ;;  %v4038_v40 = vadd.f32 %v10143_v26, %v3513_v46  ;;  %v4110_v18 = vadd.f32 %v10145_v45, %v3545_v8  ;;  %v3607_v49 = vrot.slane %v3606_v10, 4 }
 0x3c4   :  { %v3679_v19 = vrot.slane %v3678_v34, 4  ;;  %v3751_v38 = vrot.slane %v3750_v57, 4  ;;  %v3823_v28 = vrot.slane %v3822_v17, 4  ;;  %v3895_v54 = vrot.slane %v3894_v47, 4 }
 0x3c5   :  { %v3967_v37 = vrot.slane %v3966_v41, 4  ;;  %v4039_v43 = vrot.slane %v4038_v40, 4  ;;  %v4111_v24 = vrot.slane %v4110_v18, 4  ;;  %v3608_v31 = vadd.f32 %v3607_v49, %v3606_v10 }
 0x3c6   :  { %v3680_v55 = vadd.f32 %v3679_v19, %v3678_v34  ;;  %v3752_v59 = vadd.f32 %v3751_v38, %v3750_v57  ;;  %v3824_v21 = vadd.f32 %v3823_v28, %v3822_v17  ;;  %v3896_v13 = vadd.f32 %v3895_v54, %v3894_v47  ;;  %v12979_v28 = vld [vmem:[#allocation14_spill] sm:$0xff] }
 0x3c7   :  { %v3968_v32 = vadd.f32 %v3967_v37, %v3966_v41  ;;  %v4040_v0 = vadd.f32 %v4039_v43, %v4038_v40  ;;  %v4112_v12 = vadd.f32 %v4111_v24, %v4110_v18  ;;  %v3609_v53 = vrot.slane %v3608_v31, 2 }
 0x3c8   :  { %v3681_v26 = vrot.slane %v3680_v55, 2  ;;  %v3753_v46 = vrot.slane %v3752_v59, 2  ;;  %v3825_v45 = vrot.slane %v3824_v21, 2  ;;  %v3897_v8 = vrot.slane %v3896_v13, 2 }
 0x3c9   :  { %v3969_v22 = vrot.slane %v3968_v32, 2  ;;  %v4041_v50 = vrot.slane %v4040_v0, 2  ;;  %v4113_v2 = vrot.slane %v4112_v12, 2  ;;  %v3610_v63 = vadd.f32 %v3609_v53, %v3608_v31  ;;  %v12989_v53 = vld [vmem:[#allocation82_spill] sm:$0xff] }
 0x3ca   :  { %v3682_v30 = vadd.f32 %v3681_v26, %v3680_v55  ;;  %v3754_v33 = vadd.f32 %v3753_v46, %v3752_v59  ;;  %v3826_v4 = vadd.f32 %v3825_v45, %v3824_v21  ;;  %v3898_v49 = vadd.f32 %v3897_v8, %v3896_v13  ;;  %v12981_v55 = vld [vmem:[#allocation20_spill] sm:$0xff] }
 0x3cb   :  { %v3970_v34 = vadd.f32 %v3969_v22, %v3968_v32  ;;  %v4042_v38 = vadd.f32 %v4041_v50, %v4040_v0  ;;  %v4114_v19 = vadd.f32 %v4113_v2, %v4112_v12  ;;  %v3611_v47 = vrot.slane %v3610_v63, 1  ;;  %v12983_v22 = vld [vmem:[#allocation51_spill] sm:$0xff]  ;;  %v12988_v12 = vld [vmem:[#allocation25_spill] sm:$0xff]  ;;  %v12993_v46 = vld [vmem:[#allocation32_spill] sm:$0xff] }
 0x3cc   :  { %v3683_v54 = vrot.slane %v3682_v30, 1  ;;  %v3755_v40 = vrot.slane %v3754_v33, 1  ;;  %v3827_v18 = vrot.slane %v3826_v4, 1  ;;  %v3899_v41 = vrot.slane %v3898_v49, 1 }
 0x3cd   :  { %v3971_v17 = vrot.slane %v3970_v34, 1  ;;  %v4043_v57 = vrot.slane %v4042_v38, 1  ;;  %v4115_v10 = vrot.slane %v4114_v19, 1  ;;  %v10280_v37 = vmul.f32 0.35355338, %v12979_v28  ;;  %v13002_v28 = vld [vmem:[#allocation84_spill] sm:$0xff] }
 0x3ce   :  { %v3684_v43 = vadd.f32 %v3683_v54, %v3682_v30  ;;  %v3756_v24 = vadd.f32 %v3755_v40, %v3754_v33  ;;  %v3828_v31 = vadd.f32 %v3827_v18, %v3826_v4  ;;  %v10283_v59 = vmul.f32 0.35355338, %v12981_v55  ;;  %v12999_v40 = vld [vmem:[#allocation36_spill] sm:$0xff] }
 0x3cf   :  { %12980 = vst [vmem:[#allocation14_spill] sm:$0xff] %v10280_v37  ;;  %v10286_v50 = vmul.f32 0.35355338, %v12983_v22  ;;  %v3972_v2 = vadd.f32 %v3971_v17, %v3970_v34  ;;  %v4044_v21 = vadd.f32 %v4043_v57, %v4042_v38  ;;  %v10288_v13 = vadd.f32 %v3611_v47, %v3610_v63  ;;  %v12997_v38 = vld [vmem:[#allocation22_spill] sm:$0xff]  ;;  %v13001_v57 = vld [vmem:[#allocation48_spill] sm:$0xff] }
 0x3d0   :  { %12982 = vst [vmem:[#allocation20_spill] sm:$0xff] %v10283_v59  ;;  %v10290_v32 = vadd.f32 %v3899_v41, %v3898_v49  ;;  %v10292_v0 = vadd.f32 %v4115_v10, %v4114_v19  ;;  %v3306_v26 = vmul.f32 %v12989_v53, %v12988_v12  ;;  %v10296_v30 = vmul.f32 0.35355338, %v3684_v43  ;;  %v12996_v49 = vld [vmem:[#allocation42_spill] sm:$0xff]  ;;  %v13000_v41 = vld [vmem:[#allocation19_spill] sm:$0xff]  ;;  %v13023_v37 = vld [vmem:[#allocation44_spill] sm:$0xff] }
 0x3d1   :  { %12984 = vst [vmem:[#allocation51_spill] sm:$0xff] %v10286_v50  ;;  %12985 = vst [vmem:[#allocation153_spill] sm:$0xff] %v10288_v13  ;;  %v10298_v4 = vmul.f32 0.35355338, %v3756_v24  ;;  %v10300_v33 = vmul.f32 0.35355338, %v3828_v31  ;;  %v3338_v45 = vmul.f32 %v12989_v53, %v12993_v46  ;;  %v3370_v34 = vmul.f32 %v12989_v53, %v12996_v49 }
 0x3d2   :  { %12986 = vst [vmem:[#allocation154_spill] sm:$0xff] %v10290_v32  ;;  %12987 = vst [vmem:[#allocation155_spill] sm:$0xff] %v10292_v0  ;;  %v10304_v8 = vmul.f32 0.35355338, %v3972_v2  ;;  %v10306_v63 = vmul.f32 0.35355338, %v4044_v21  ;;  %v3402_v19 = vmul.f32 %v12989_v53, %v12997_v38  ;;  %v3466_v18 = vmul.f32 %v12989_v53, %v12999_v40 }
 0x3d3   :  { %12990 = vst [vmem:[#allocation25_spill] sm:$0xff] %v10296_v30  ;;  %12991 = vst [vmem:[#allocation82_spill] sm:$0xff] %v10298_v4  ;;  %v12998_v47 = vld [vmem:[#allocation26_spill] sm:$0xff]  ;;  %v3498_v17 = vmul.f32 %v12989_v53, %v13000_v41  ;;  %v3530_v10 = vmul.f32 %v12989_v53, %v13001_v57  ;;  %v3322_v43 = vmul.f32 %v13002_v28, %v12988_v12  ;;  %v13007_v13 = vld [vmem:[#allocation68_spill] sm:$0xff] }
 0x3d4   :  { %12992 = vst [vmem:[#allocation156_spill] sm:$0xff] %v10300_v33  ;;  %12994 = vst [vmem:[#allocation32_spill] sm:$0xff] %v10304_v8  ;;  %v3434_v54 = vmul.f32 %v12989_v53, %v12998_v47  ;;  %v3354_v24 = vmul.f32 %v13002_v28, %v12993_v46  ;;  %v3386_v31 = vmul.f32 %v13002_v28, %v12996_v49  ;;  %v13003_v53 = vld [vmem:[#allocation53_spill] sm:$0xff]  ;;  %v13004_v46 = vld [vmem:[#allocation54_spill] sm:$0xff] }
 0x3d5   :  { %12995 = vst [vmem:[#allocation157_spill] sm:$0xff] %v10306_v63  ;;  %v3418_v55 = vmul.f32 %v13002_v28, %v12997_v38  ;;  %v3450_v22 = vmul.f32 %v13002_v28, %v12998_v47  ;;  %v3482_v2 = vmul.f32 %v13002_v28, %v12999_v40  ;;  %v3514_v21 = vmul.f32 %v13002_v28, %v13000_v41  ;;  %v13006_v49 = vld [vmem:[#allocation59_spill] sm:$0xff]  ;;  %v13008_v38 = vld [vmem:[#allocation69_spill] sm:$0xff]  ;;  %v13010_v47 = vld [vmem:[#allocation74_spill] sm:$0xff] }
 0x3d6   :  { %v3546_v12 = vmul.f32 %v13002_v28, %v13001_v57  ;;  %v7329_v44 = vadd.f32 %v13004_v46, %v13003_v53  ;;  %v7330_v58 = vadd.f32 %v13006_v49, %v13005_v5  ;;  %v7331_v32 = vadd.f32 %v13008_v38, %v13007_v13  ;;  %v13009_v63 = vld [vmem:[#allocation73_spill] sm:$0xff]  ;;  %v13011_v33 = vld [vmem:[#allocation76_spill] sm:$0xff]  ;;  %v13012_v40 = vld [vmem:[#allocation78_spill] sm:$0xff] }
 0x3d7   :  { %v7332_v8 = vadd.f32 %v13010_v47, %v13009_v63  ;;  %v10346_v50 = vadd.f32 %v13012_v40, %v13011_v33  ;;  %v13013_v41 = vld [vmem:[#allocation80_spill] sm:$0xff]  ;;  %v13014_v4 = vld [vmem:[#allocation83_spill] sm:$0xff]  ;;  %v13015_v57 = vld [vmem:[#allocation85_spill] sm:$0xff] }
 0x3d8   :  { %v10350_v59 = vadd.f32 %v13014_v4, %v13013_v41  ;;  %v13016_v28 = vld [vmem:[#allocation86_spill] sm:$0xff]  ;;  %v13018_v46 = vld [vmem:[#allocation27_spill] sm:$0xff]  ;;  %v13019_v5 = vld [vmem:[#allocation13_spill] sm:$0xff]  ;;  %v3307_v13 = vmul.f32 %v7329_v44, %v12792_v52  ;;  %v3339_v63 = vmul.f32 %v7329_v44, %v12793_v61  ;;  %v3371_v38 = vmul.f32 %v7329_v44, %v12794_v39 }
 0x3d9   :  { %v10354_v53 = vadd.f32 %v13016_v28, %v13015_v57  ;;  %v10358_v49 = vadd.f32 %v13019_v5, %v13018_v46  ;;  %v3403_v33 = vmul.f32 %v7329_v44, %v12795_v3  ;;  %v13021_v47 = vld [vmem:[#allocation31_spill] sm:$0xff]  ;;  %v3499_v30 = vmul.f32 %v7329_v44, %v13023_v37 }
 0x3da   :  { %v3435_v40 = vmul.f32 %v7329_v44, %v13021_v47  ;;  %v13022_v4 = vld [vmem:[#allocation15_spill] sm:$0xff]  ;;  %v3649_v0 = vadd.f32 %v3339_v63, %v3338_v45  ;;  %v3721_v46 = vadd.f32 %v3371_v38, %v3370_v34  ;;  %v3323_v60 = vmul.f32 %v7330_v58, %v12792_v52  ;;  %v13025_v63 = vld [vmem:[#allocation16_spill] sm:$0xff] }
 0x3db   :  { %13017 = vst [vmem:[#allocation42_spill] sm:$0xff] %v10354_v53  ;;  %13020 = vst [vmem:[#allocation22_spill] sm:$0xff] %v10358_v49  ;;  %v3467_v41 = vmul.f32 %v7329_v44, %v13022_v4  ;;  %v13024_v57 = vld [vmem:[#allocation23_spill] sm:$0xff]  ;;  %v3577_v53 = vadd.f32 %v3307_v13, %v3306_v26  ;;  %v3793_v5 = vadd.f32 %v3403_v33, %v3402_v19 }
 0x3dc   :  { %v3531_v28 = vmul.f32 %v7329_v44, %v13024_v57  ;;  %v3865_v49 = vadd.f32 %v3435_v40, %v3434_v54  ;;  %v4009_v29 = vadd.f32 %v3499_v30, %v3498_v17  ;;  %v3355_v25 = vmul.f32 %v7330_v58, %v12793_v61 }
 0x3dd   :  { %v3937_v27 = vadd.f32 %v3467_v41, %v3466_v18  ;;  %v3387_v42 = vmul.f32 %v7330_v58, %v12794_v39  ;;  %v3419_v1 = vmul.f32 %v7330_v58, %v12795_v3  ;;  %v3451_v7 = vmul.f32 %v7330_v58, %v13021_v47 }
 0x3de   :  { %v4081_v23 = vadd.f32 %v3531_v28, %v3530_v10  ;;  %v3483_v44 = vmul.f32 %v7330_v58, %v13022_v4  ;;  %v3515_v26 = vmul.f32 %v7330_v58, %v13023_v37  ;;  %v3547_v45 = vmul.f32 %v7330_v58, %v13024_v57 }
 0x3df   :  { %v3613_v34 = vadd.f32 %v3323_v60, %v3322_v43  ;;  %v3685_v19 = vadd.f32 %v3355_v25, %v3354_v24  ;;  %v3757_v30 = vadd.f32 %v3387_v42, %v3386_v31  ;;  %v3829_v54 = vadd.f32 %v3419_v1, %v3418_v55  ;;  %v13026_v60 = vld [vmem:[#allocation47_spill] sm:$0xff]  ;;  %v13027_v42 = vld [vmem:[#allocation52_spill] sm:$0xff] }
 0x3e0   :  { %v3901_v18 = vadd.f32 %v3451_v7, %v3450_v22  ;;  %v3973_v52 = vadd.f32 %v3483_v44, %v3482_v2  ;;  %v4045_v17 = vadd.f32 %v3515_v26, %v3514_v21  ;;  %v4117_v61 = vadd.f32 %v3547_v45, %v3546_v12 }
 0x3e1   :  { %v3308_v39 = vmul.f32 %v7331_v32, %v12802_v11  ;;  %v3340_v3 = vmul.f32 %v7331_v32, %v12803_v51  ;;  %v3372_v10 = vmul.f32 %v7331_v32, %v12907_v15  ;;  %v3404_v13 = vmul.f32 %v7331_v32, %v12908_v16 }
 0x3e2   :  { %v3436_v37 = vmul.f32 %v7331_v32, %v12911_v20  ;;  %v3468_v58 = vmul.f32 %v7331_v32, %v13025_v63  ;;  %v3500_v25 = vmul.f32 %v7331_v32, %v13026_v60  ;;  %v3532_v1 = vmul.f32 %v7331_v32, %v13027_v42 }
 0x3e3   :  { %v3578_v7 = vadd.f32 %v3577_v53, %v3308_v39  ;;  %v3650_v43 = vadd.f32 %v3649_v0, %v3340_v3  ;;  %v3722_v24 = vadd.f32 %v3721_v46, %v3372_v10  ;;  %v3794_v31 = vadd.f32 %v3793_v5, %v3404_v13 }
 0x3e4   :  { %v3866_v55 = vadd.f32 %v3865_v49, %v3436_v37  ;;  %v3938_v22 = vadd.f32 %v3937_v27, %v3468_v58  ;;  %v4010_v2 = vadd.f32 %v4009_v29, %v3500_v25  ;;  %v4082_v21 = vadd.f32 %v4081_v23, %v3532_v1 }
 0x3e5   :  { %v3324_v12 = vmul.f32 %v7332_v8, %v12802_v11  ;;  %v3356_v38 = vmul.f32 %v7332_v8, %v12803_v51  ;;  %v3388_v33 = vmul.f32 %v7332_v8, %v12907_v15  ;;  %v3420_v47 = vmul.f32 %v7332_v8, %v12908_v16 }
 0x3e6   :  { %v3452_v40 = vmul.f32 %v7332_v8, %v12911_v20  ;;  %v3484_v32 = vmul.f32 %v7332_v8, %v13025_v63  ;;  %v3516_v0 = vmul.f32 %v7332_v8, %v13026_v60  ;;  %v3548_v53 = vmul.f32 %v7332_v8, %v13027_v42 }
 0x3e7   :  { %v10392_v49 = vadd.f32 %v3613_v34, %v3324_v12  ;;  %v10394_v29 = vadd.f32 %v3685_v19, %v3356_v38  ;;  %v10396_v23 = vadd.f32 %v3757_v30, %v3388_v33  ;;  %v10398_v11 = vadd.f32 %v3829_v54, %v3420_v47 }
 0x3e8   :  { %v10400_v51 = vadd.f32 %v3901_v18, %v3452_v40  ;;  %v10402_v15 = vadd.f32 %v3973_v52, %v3484_v32  ;;  %v10404_v16 = vadd.f32 %v4045_v17, %v3516_v0  ;;  %v10406_v20 = vadd.f32 %v4117_v61, %v3548_v53 }
 0x3e9   :  { %v3309_v27 = vmul.f32 %v10346_v50, %v9429_v35  ;;  %v3341_v8 = vmul.f32 %v10346_v50, %v9445_v62  ;;  %v3373_v4 = vmul.f32 %v10346_v50, %v9461_v6  ;;  %v3405_v41 = vmul.f32 %v10346_v50, %v12727_v9 }
 0x3ea   :  { %v3437_v57 = vmul.f32 %v10346_v50, %v12728_v48  ;;  %v3469_v28 = vmul.f32 %v10346_v50, %v12729_v14  ;;  %v3501_v46 = vmul.f32 %v10346_v50, %v12730_v56  ;;  %v3533_v5 = vmul.f32 %v10346_v50, %v12731_v36 }
 0x3eb   :  { %v3579_v44 = vadd.f32 %v3578_v7, %v3309_v27  ;;  %v3651_v26 = vadd.f32 %v3650_v43, %v3341_v8  ;;  %v3723_v45 = vadd.f32 %v3722_v24, %v3373_v4  ;;  %v3795_v34 = vadd.f32 %v3794_v31, %v3405_v41 }
 0x3ec   :  { %v3867_v19 = vadd.f32 %v3866_v55, %v3437_v57  ;;  %v3939_v30 = vadd.f32 %v3938_v22, %v3469_v28  ;;  %v4011_v54 = vadd.f32 %v4010_v2, %v3501_v46  ;;  %v4083_v18 = vadd.f32 %v4082_v21, %v3533_v5 }
 0x3ed   :  { %v3580_v52 = vrot.slane %v3579_v44, 4  ;;  %v3652_v17 = vrot.slane %v3651_v26, 4  ;;  %v3724_v61 = vrot.slane %v3723_v45, 4  ;;  %v3796_v39 = vrot.slane %v3795_v34, 4 }
 0x3ee   :  { %v3868_v3 = vrot.slane %v3867_v19, 4  ;;  %v3940_v10 = vrot.slane %v3939_v30, 4  ;;  %v4012_v13 = vrot.slane %v4011_v54, 4  ;;  %v4084_v37 = vrot.slane %v4083_v18, 4 }
 0x3ef   :  { %v3581_v63 = vadd.f32 %v3580_v52, %v3579_v44  ;;  %v3653_v58 = vadd.f32 %v3652_v17, %v3651_v26  ;;  %v3725_v60 = vadd.f32 %v3724_v61, %v3723_v45  ;;  %v3797_v50 = vadd.f32 %v3796_v39, %v3795_v34 }
 0x3f0   :  { %v3869_v25 = vadd.f32 %v3868_v3, %v3867_v19  ;;  %v3941_v42 = vadd.f32 %v3940_v10, %v3939_v30  ;;  %v4013_v1 = vadd.f32 %v4012_v13, %v4011_v54  ;;  %v4085_v7 = vadd.f32 %v4084_v37, %v4083_v18 }
 0x3f1   :  { %v3582_v43 = vrot.slane %v3581_v63, 2  ;;  %v3654_v24 = vrot.slane %v3653_v58, 2  ;;  %v3726_v31 = vrot.slane %v3725_v60, 2  ;;  %v3798_v55 = vrot.slane %v3797_v50, 2 }
 0x3f2   :  { %v3870_v22 = vrot.slane %v3869_v25, 2  ;;  %v3942_v2 = vrot.slane %v3941_v42, 2  ;;  %v4014_v21 = vrot.slane %v4013_v1, 2  ;;  %v4086_v12 = vrot.slane %v4085_v7, 2 }
 0x3f3   :  { %v3583_v38 = vadd.f32 %v3582_v43, %v3581_v63  ;;  %v3655_v33 = vadd.f32 %v3654_v24, %v3653_v58  ;;  %v3727_v47 = vadd.f32 %v3726_v31, %v3725_v60  ;;  %v3799_v40 = vadd.f32 %v3798_v55, %v3797_v50  ;;  %v13031_v50 = vld [vmem:[#allocation145_spill] sm:$0xff]  ;;  %v13034_v43 = vld [vmem:[#allocation148_spill] sm:$0xff] }
 0x3f4   :  { %v3871_v32 = vadd.f32 %v3870_v22, %v3869_v25  ;;  %v3943_v0 = vadd.f32 %v3942_v2, %v3941_v42  ;;  %v4015_v53 = vadd.f32 %v4014_v21, %v4013_v1  ;;  %v4087_v27 = vadd.f32 %v4086_v12, %v4085_v7  ;;  %v13032_v42 = vld [vmem:[#allocation146_spill] sm:$0xff]  ;;  %v13035_v31 = vld [vmem:[#allocation149_spill] sm:$0xff]  ;;  %v13037_v2 = vld [vmem:[#allocation64_spill] sm:$0xff] }
 0x3f5   :  { %v3584_v8 = vrot.slane %v3583_v38, 1  ;;  %v3656_v4 = vrot.slane %v3655_v33, 1  ;;  %v3728_v41 = vrot.slane %v3727_v47, 1  ;;  %v3800_v57 = vrot.slane %v3799_v40, 1  ;;  %v13038_v12 = vld [vmem:[#allocation65_spill] sm:$0xff] }
 0x3f6   :  { %v3872_v28 = vrot.slane %v3871_v32, 1  ;;  %v3944_v46 = vrot.slane %v3943_v0, 1  ;;  %v4016_v5 = vrot.slane %v4015_v53, 1  ;;  %v4088_v44 = vrot.slane %v4087_v27, 1 }
 0x3f7   :  { %v3585_v26 = vadd.f32 %v3584_v8, %v3583_v38  ;;  %v3657_v45 = vadd.f32 %v3656_v4, %v3655_v33  ;;  %v3729_v34 = vadd.f32 %v3728_v41, %v3727_v47  ;;  %v3801_v19 = vadd.f32 %v3800_v57, %v3799_v40  ;;  %v13039_v33 = vld [vmem:[#allocation151_spill] sm:$0xff]  ;;  %v13040_v40 = vld [vmem:[#allocation152_spill] sm:$0xff]  ;;  %v13043_v4 = vld [vmem:[#allocation34_spill] sm:$0xff] }
 0x3f8   :  { %v3873_v30 = vadd.f32 %v3872_v28, %v3871_v32  ;;  %v3945_v54 = vadd.f32 %v3944_v46, %v3943_v0  ;;  %v4017_v18 = vadd.f32 %v4016_v5, %v4015_v53  ;;  %v4089_v52 = vadd.f32 %v4088_v44, %v4087_v27  ;;  %v13041_v0 = vld [vmem:[#allocation66_spill] sm:$0xff]  ;;  %v13042_v27 = vld [vmem:[#allocation67_spill] sm:$0xff]  ;;  %v13044_v57 = vld [vmem:[#allocation72_spill] sm:$0xff] }
 0x3f9   :  { %v10424_v17 = vmul.f32 0.35355338, %v3585_v26  ;;  %v10426_v61 = vmul.f32 0.35355338, %v3657_v45  ;;  %v10428_v39 = vmul.f32 0.35355338, %v3729_v34  ;;  %v3325_v3 = vmul.f32 %v10350_v59, %v9429_v35 }
 0x3fa   :  { %v10432_v10 = vmul.f32 0.35355338, %v3801_v19  ;;  %v10434_v13 = vmul.f32 0.35355338, %v3873_v30  ;;  %v10436_v37 = vmul.f32 0.35355338, %v3945_v54  ;;  %v3357_v63 = vmul.f32 %v10350_v59, %v9445_v62 }
 0x3fb   :  { %13028 = vst [vmem:[#allocation26_spill] sm:$0xff] %v10428_v39  ;;  %v10440_v58 = vmul.f32 0.35355338, %v4017_v18  ;;  %v10442_v60 = vmul.f32 0.35355338, %v4089_v52  ;;  %v4192_v25 = vmax.f32 %v13031_v50, %v10424_v17  ;;  %v4199_v1 = vmax.f32 %v13032_v42, %v10426_v61  ;;  %v13033_v35 = vld [vmem:[#allocation147_spill] sm:$0xff] }
 0x3fc   :  { %13029 = vst [vmem:[#allocation36_spill] sm:$0xff] %v10432_v10  ;;  %v4206_v7 = vmax.f32 %v13033_v35, %v10428_v39  ;;  %v4213_v24 = vmax.f32 %v13034_v43, %v10432_v10  ;;  %v4220_v55 = vmax.f32 %v13035_v31, %v10434_v13  ;;  %v13036_v62 = vld [vmem:[#allocation150_spill] sm:$0xff]  ;;  %v13045_v46 = vld [vmem:[#allocation75_spill] sm:$0xff]  ;;  %v13046_v44 = vld [vmem:[#allocation77_spill] sm:$0xff]  ;;  %v3389_v45 = vmul.f32 %v10350_v59, %v9461_v6 }
 0x3fd   :  { %13030 = vst [vmem:[#allocation19_spill] sm:$0xff] %v10442_v60  ;;  %v4227_v22 = vmax.f32 %v13036_v62, %v10436_v37  ;;  %v10457_v21 = vmax.f32 %v4192_v25, %v13037_v2  ;;  %v10460_v38 = vmax.f32 %v4199_v1, %v13038_v12  ;;  %v4234_v47 = vmax.f32 %v13039_v33, %v10440_v58  ;;  %v13106_v10 = vld [vmem:[#allocation107_spill] sm:$0xff] }
 0x3fe   :  { %v4241_v32 = vmax.f32 %v13040_v40, %v10442_v60  ;;  %v10467_v53 = vmax.f32 %v4206_v7, %v13041_v0  ;;  %v10470_v8 = vmax.f32 %v4213_v24, %v13042_v27  ;;  %v10473_v41 = vmax.f32 %v4220_v55, %v13043_v4  ;;  %v13103_v27 = vld [vmem:[#allocation50_spill] sm:$0xff]  ;;  %v13124_v60 = vld [vmem:[#allocation116_spill] sm:$0xff] }
 0x3ff   :  { %v10476_v28 = vmax.f32 %v4227_v22, %v13044_v57  ;;  %v10479_v5 = vmax.f32 %v4234_v47, %v13045_v46  ;;  %v3421_v34 = vmul.f32 %v10350_v59, %v12727_v9  ;;  %v3453_v19 = vmul.f32 %v10350_v59, %v12728_v48 }
 0x400   :  { %v10482_v26 = vmax.f32 %v4241_v32, %v13046_v44  ;;  %v3485_v30 = vmul.f32 %v10350_v59, %v12729_v14  ;;  %v3517_v54 = vmul.f32 %v10350_v59, %v12730_v56  ;;  %v3549_v18 = vmul.f32 %v10350_v59, %v12731_v36  ;;  %v13121_v44 = vld [vmem:[#allocation114_spill] sm:$0xff] }
 0x401   :  { %v3615_v52 = vadd.f32 %v10392_v49, %v3325_v3  ;;  %v3687_v50 = vadd.f32 %v10394_v29, %v3357_v63  ;;  %v3759_v6 = vadd.f32 %v10396_v23, %v3389_v45  ;;  %v3831_v9 = vadd.f32 %v10398_v11, %v3421_v34 }
 0x402   :  { %v3903_v25 = vadd.f32 %v10400_v51, %v3453_v19  ;;  %v3975_v48 = vadd.f32 %v10402_v15, %v3485_v30  ;;  %v4047_v14 = vadd.f32 %v10404_v16, %v3517_v54  ;;  %v4119_v42 = vadd.f32 %v10406_v20, %v3549_v18 }
 0x403   :  { %v3616_v56 = vrot.slane %v3615_v52, 4  ;;  %v3688_v1 = vrot.slane %v3687_v50, 4  ;;  %v3760_v35 = vrot.slane %v3759_v6, 4  ;;  %v3832_v36 = vrot.slane %v3831_v9, 4 }
 0x404   :  { %v3904_v59 = vrot.slane %v3903_v25, 4  ;;  %v3976_v49 = vrot.slane %v3975_v48, 4  ;;  %v4048_v3 = vrot.slane %v4047_v14, 4  ;;  %v4120_v29 = vrot.slane %v4119_v42, 4 }
 0x405   :  { %v3617_v63 = vadd.f32 %v3616_v56, %v3615_v52  ;;  %v3689_v23 = vadd.f32 %v3688_v1, %v3687_v50  ;;  %v3761_v7 = vadd.f32 %v3760_v35, %v3759_v6  ;;  %v3833_v11 = vadd.f32 %v3832_v36, %v3831_v9  ;;  %v13047_v52 = vld [vmem:[#allocation155_spill] sm:$0xff] }
 0x406   :  { %v3905_v43 = vadd.f32 %v3904_v59, %v3903_v25  ;;  %v3977_v51 = vadd.f32 %v3976_v49, %v3975_v48  ;;  %v4049_v24 = vadd.f32 %v4048_v3, %v4047_v14  ;;  %v4121_v15 = vadd.f32 %v4120_v29, %v4119_v42 }
 0x407   :  { %v3618_v31 = vrot.slane %v3617_v63, 2  ;;  %v3690_v16 = vrot.slane %v3689_v23, 2  ;;  %v3762_v55 = vrot.slane %v3761_v7, 2  ;;  %v3834_v20 = vrot.slane %v3833_v11, 2 }
 0x408   :  { %v3906_v62 = vrot.slane %v3905_v43, 2  ;;  %v3978_v22 = vrot.slane %v3977_v51, 2  ;;  %v4050_v33 = vrot.slane %v4049_v24, 2  ;;  %v4122_v47 = vrot.slane %v4121_v15, 2 }
 0x409   :  { %v10504_v40 = vadd.f32 %v3618_v31, %v3617_v63  ;;  %v3691_v32 = vadd.f32 %v3690_v16, %v3689_v23  ;;  %v3763_v45 = vadd.f32 %v3762_v55, %v3761_v7  ;;  %v3835_v34 = vadd.f32 %v3834_v20, %v3833_v11  ;;  %v13053_v16 = vld [vmem:[#allocation38_spill] sm:$0xff]  ;;  %v13054_v20 = vld [vmem:[#allocation25_spill] sm:$0xff] }
 0x40a   :  { %v3907_v19 = vadd.f32 %v3906_v62, %v3905_v43  ;;  %v3979_v30 = vadd.f32 %v3978_v22, %v3977_v51  ;;  %v4051_v54 = vadd.f32 %v4050_v33, %v4049_v24  ;;  %v4123_v18 = vadd.f32 %v4122_v47, %v4121_v15  ;;  %v13051_v43 = vld [vmem:[#allocation12_spill] sm:$0xff]  ;;  %v13056_v47 = vld [vmem:[#allocation14_spill] sm:$0xff] }
 0x40b   :  { %v10507_v50 = vmul.f32 0.35355338, %v13047_v52  ;;  %v3692_v6 = vrot.slane %v3691_v32, 1  ;;  %v3764_v9 = vrot.slane %v3763_v45, 1  ;;  %v3836_v25 = vrot.slane %v3835_v34, 1  ;;  %v13055_v22 = vld [vmem:[#allocation60_spill] sm:$0xff] }
 0x40c   :  { %v3908_v48 = vrot.slane %v3907_v19, 1  ;;  %v3980_v14 = vrot.slane %v3979_v30, 1  ;;  %v4052_v42 = vrot.slane %v4051_v54, 1  ;;  %v4124_v56 = vrot.slane %v4123_v18, 1  ;;  %v13061_v52 = vld [vmem:[#allocation21_spill] sm:$0xff] }
 0x40d   :  { %13048 = vst [vmem:[#allocation48_spill] sm:$0xff] %v10507_v50  ;;  %v3693_v35 = vadd.f32 %v3692_v6, %v3691_v32  ;;  %v3765_v36 = vadd.f32 %v3764_v9, %v3763_v45  ;;  %v3837_v59 = vadd.f32 %v3836_v25, %v3835_v34  ;;  %v4201_v51 = vmax.f32 %v10460_v38, %v13051_v43  ;;  %v13057_v45 = vld [vmem:[#allocation20_spill] sm:$0xff]  ;;  %v13058_v34 = vld [vmem:[#allocation82_spill] sm:$0xff] }
 0x40e   :  { %v3909_v49 = vadd.f32 %v3908_v48, %v3907_v19  ;;  %v3981_v3 = vadd.f32 %v3980_v14, %v3979_v30  ;;  %v4053_v29 = vadd.f32 %v4052_v42, %v4051_v54  ;;  %v4125_v63 = vadd.f32 %v4124_v56, %v4123_v18  ;;  %v13059_v30 = vld [vmem:[#allocation51_spill] sm:$0xff]  ;;  %v13060_v18 = vld [vmem:[#allocation17_spill] sm:$0xff]  ;;  %v13064_v9 = vld [vmem:[#allocation56_spill] sm:$0xff] }
 0x40f   :  { %v10510_v23 = vmul.f32 0.35355338, %v3693_v35  ;;  %v10512_v7 = vmul.f32 0.35355338, %v3765_v36  ;;  %v10514_v11 = vmul.f32 0.35355338, %v3837_v59  ;;  %v4208_v55 = vmax.f32 %v10467_v53, %v13053_v16 }
 0x410   :  { %v10518_v24 = vmul.f32 0.35355338, %v3981_v3  ;;  %v10520_v15 = vmul.f32 0.35355338, %v4053_v29  ;;  %v10522_v31 = vmul.f32 0.35355338, %v4125_v63  ;;  %v4202_v62 = vmax.f32 %v4201_v51, %v13054_v20 }
 0x411   :  { %13049 = vst [vmem:[#allocation84_spill] sm:$0xff] %v10512_v7  ;;  %13050 = vst [vmem:[#allocation53_spill] sm:$0xff] %v10514_v11  ;;  %v4215_v33 = vmax.f32 %v10470_v8, %v13055_v22  ;;  %v4229_v32 = vmax.f32 %v10476_v28, %v13056_v47  ;;  %v4236_v38 = vmax.f32 %v10479_v5, %v13057_v45  ;;  %v13063_v53 = vld [vmem:[#allocation28_spill] sm:$0xff]  ;;  %v13068_v42 = vld [vmem:[#allocation157_spill] sm:$0xff] }
 0x412   :  { %13052 = vst [vmem:[#allocation54_spill] sm:$0xff] %v10522_v31  ;;  %v4209_v19 = vmax.f32 %v4208_v55, %v13058_v34  ;;  %v4243_v54 = vmax.f32 %v10482_v26, %v13059_v30  ;;  %v10538_v6 = vadd.f32 %v13061_v52, %v13060_v18  ;;  %v10542_v25 = vadd.f32 %v13064_v9, %v13063_v53  ;;  %v13066_v28 = vld [vmem:[#allocation156_spill] sm:$0xff]  ;;  %v13070_v36 = vld [vmem:[#allocation62_spill] sm:$0xff]  ;;  %v13071_v59 = vld [vmem:[#allocation63_spill] sm:$0xff] }
 0x413   :  { %v10545_v8 = vmax.f32 %v4202_v62, %v10510_v23  ;;  %v4216_v48 = vmax.f32 %v4215_v33, %v13066_v28  ;;  %v13067_v14 = vld [vmem:[#allocation32_spill] sm:$0xff]  ;;  %v4237_v56 = vmax.f32 %v4236_v38, %v13068_v42  ;;  %v10556_v3 = vadd.f32 %v13071_v59, %v13070_v36  ;;  %v13073_v29 = vld [vmem:[#allocation70_spill] sm:$0xff]  ;;  %v13078_v38 = vld [vmem:[#allocation103_spill] sm:$0xff] }
 0x414   :  { %13062 = vst [vmem:[#allocation58_spill] sm:$0xff] %v10538_v6  ;;  %13065 = vst [vmem:[#allocation59_spill] sm:$0xff] %v10542_v25  ;;  %v4230_v5 = vmax.f32 %v4229_v32, %v13067_v14  ;;  %v10551_v35 = vmax.f32 %v4209_v19, %v10512_v7  ;;  %v4244_v26 = vmax.f32 %v4243_v54, %v10507_v50  ;;  %v13074_v63 = vld [vmem:[#allocation102_spill] sm:$0xff]  ;;  %v13077_v32 = vld [vmem:[#allocation71_spill] sm:$0xff] }
 0x415   :  { %13072 = vst [vmem:[#allocation69_spill] sm:$0xff] %v10556_v3  ;;  %v10560_v51 = vadd.f32 %v13074_v63, %v13073_v29  ;;  %v10563_v55 = vmax.f32 %v4216_v48, %v10514_v11  ;;  %v10569_v33 = vmax.f32 %v4237_v56, %v10520_v15  ;;  %v10573_v19 = vadd.f32 %v13078_v38, %v13077_v32  ;;  %v13081_v18 = vld [vmem:[#allocation104_spill] sm:$0xff]  ;;  %v13082_v52 = vld [vmem:[#allocation105_spill] sm:$0xff]  ;;  %v13084_v9 = vld [vmem:[#allocation79_spill] sm:$0xff] }
 0x416   :  { %13069 = vst [vmem:[#allocation68_spill] sm:$0xff] %v10551_v35  ;;  %v10566_v62 = vmax.f32 %v4230_v5, %v10518_v24  ;;  %v10576_v54 = vmax.f32 %v4244_v26, %v10522_v31  ;;  %v10580_v53 = vadd.f32 %v13082_v52, %v13081_v18  ;;  %v13085_v48 = vld [vmem:[#allocation81_spill] sm:$0xff]  ;;  %v13087_v5 = vld [vmem:[#allocation87_spill] sm:$0xff]  ;;  %v13091_v63 = vld [vmem:[#allocation92_spill] sm:$0xff] }
 0x417   :  { %13075 = vst [vmem:[#allocation73_spill] sm:$0xff] %v10560_v51  ;;  %13076 = vst [vmem:[#allocation74_spill] sm:$0xff] %v10563_v55  ;;  %v10584_v36 = vadd.f32 %v13085_v48, %v13084_v9  ;;  %v13088_v59 = vld [vmem:[#allocation89_spill] sm:$0xff]  ;;  %v13090_v56 = vld [vmem:[#allocation91_spill] sm:$0xff] }
 0x418   :  { %13079 = vst [vmem:[#allocation76_spill] sm:$0xff] %v10573_v19  ;;  %13080 = vst [vmem:[#allocation78_spill] sm:$0xff] %v10576_v54  ;;  %v10588_v29 = vadd.f32 %v13088_v59, %v13087_v5  ;;  %v10592_v1 = vadd.f32 %v13091_v63, %v13090_v56  ;;  %v13093_v32 = vld [vmem:[#allocation37_spill] sm:$0xff]  ;;  %v13094_v38 = vld [vmem:[#allocation39_spill] sm:$0xff] }
 0x419   :  { %13083 = vst [vmem:[#allocation80_spill] sm:$0xff] %v10580_v53  ;;  %13086 = vst [vmem:[#allocation83_spill] sm:$0xff] %v10584_v36  ;;  %v10596_v26 = vadd.f32 %v13094_v38, %v13093_v32  ;;  %v13096_v11 = vld [vmem:[#allocation40_spill] sm:$0xff]  ;;  %v13097_v28 = vld [vmem:[#allocation41_spill] sm:$0xff] }
 0x41a   :  { %13089 = vst [vmem:[#allocation85_spill] sm:$0xff] %v10588_v29  ;;  %13092 = vst [vmem:[#allocation86_spill] sm:$0xff] %v10592_v1  ;;  %v10600_v18 = vadd.f32 %v13097_v28, %v13096_v11  ;;  %v13099_v52 = vld [vmem:[#allocation43_spill] sm:$0xff]  ;;  %v13100_v22 = vld [vmem:[#allocation46_spill] sm:$0xff] }
 0x41b   :  { %13095 = vst [vmem:[#allocation27_spill] sm:$0xff] %v10596_v26  ;;  %v10604_v9 = vadd.f32 %v13100_v22, %v13099_v52  ;;  %v13102_v48 = vld [vmem:[#allocation49_spill] sm:$0xff]  ;;  %v13105_v59 = vld [vmem:[#allocation106_spill] sm:$0xff]  ;;  %v13108_v63 = vld [vmem:[#allocation108_spill] sm:$0xff] }
 0x41c   :  { %13098 = vst [vmem:[#allocation13_spill] sm:$0xff] %v10600_v18  ;;  %v10608_v5 = vadd.f32 %v13103_v27, %v13102_v48  ;;  %v10612_v56 = vadd.f32 %v13106_v10, %v13105_v59  ;;  %v13109_v55 = vld [vmem:[#allocation109_spill] sm:$0xff]  ;;  %v13111_v38 = vld [vmem:[#allocation110_spill] sm:$0xff]  ;;  %v13112_v31 = vld [vmem:[#allocation111_spill] sm:$0xff] }
 0x41d   :  { %13101 = vst [vmem:[#allocation31_spill] sm:$0xff] %v10604_v9  ;;  %v10616_v32 = vadd.f32 %v13109_v55, %v13108_v63  ;;  %v10620_v11 = vadd.f32 %v13112_v31, %v13111_v38  ;;  %v13114_v28 = vld [vmem:[#allocation45_spill] sm:$0xff]  ;;  %v13115_v50 = vld [vmem:[#allocation24_spill] sm:$0xff]  ;;  %v13123_v59 = vld [vmem:[#allocation115_spill] sm:$0xff] }
 0x41e   :  { %13104 = vst [vmem:[#allocation15_spill] sm:$0xff] %v10608_v5  ;;  %13107 = vst [vmem:[#allocation44_spill] sm:$0xff] %v10612_v56  ;;  %v10624_v22 = vadd.f32 %v13115_v50, %v13114_v28  ;;  %v13117_v52 = vld [vmem:[#allocation29_spill] sm:$0xff]  ;;  %v13118_v30 = vld [vmem:[#allocation112_spill] sm:$0xff]  ;;  %v10636_v55 = vadd.f32 %v13124_v60, %v13123_v59 }
 0x41f   :  { %13110 = vst [vmem:[#allocation23_spill] sm:$0xff] %v10616_v32  ;;  %13113 = vst [vmem:[#allocation16_spill] sm:$0xff] %v10620_v11  ;;  %v10628_v27 = vadd.f32 %v13118_v30, %v13117_v52  ;;  %v13120_v48 = vld [vmem:[#allocation113_spill] sm:$0xff]  ;;  %v13127_v54 = vld [vmem:[#allocation118_spill] sm:$0xff] }
 0x420   :  { %13116 = vst [vmem:[#allocation47_spill] sm:$0xff] %v10624_v22  ;;  %v10632_v10 = vadd.f32 %v13121_v44, %v13120_v48  ;;  %13125 = vst [vmem:[#allocation146_spill] sm:$0xff] %v10636_v55  ;;  %v13126_v63 = vld [vmem:[#allocation117_spill] sm:$0xff]  ;;  %v13129_v38 = vld [vmem:[#allocation119_spill] sm:$0xff] }
 0x421   :  { %13119 = vst [vmem:[#allocation52_spill] sm:$0xff] %v10628_v27  ;;  %v10640_v31 = vadd.f32 %v13127_v54, %v13126_v63  ;;  %v13130_v7 = vld [vmem:[#allocation120_spill] sm:$0xff]  ;;  %v13132_v28 = vld [vmem:[#allocation121_spill] sm:$0xff]  ;;  %v13133_v34 = vld [vmem:[#allocation122_spill] sm:$0xff] }
 0x422   :  { %13122 = vst [vmem:[#allocation145_spill] sm:$0xff] %v10632_v10  ;;  %v10644_v50 = vadd.f32 %v13130_v7, %v13129_v38  ;;  %v10648_v30 = vadd.f32 %v13133_v34, %v13132_v28  ;;  %v13135_v52 = vld [vmem:[#allocation123_spill] sm:$0xff]  ;;  %v13136_v56 = vld [vmem:[#allocation124_spill] sm:$0xff]  ;;  %v13138_v48 = vld [vmem:[#allocation125_spill] sm:$0xff] }
 0x423   :  { %13128 = vst [vmem:[#allocation147_spill] sm:$0xff] %v10640_v31  ;;  %v10652_v44 = vadd.f32 %v13136_v56, %v13135_v52  ;;  %v13139_v53 = vld [vmem:[#allocation126_spill] sm:$0xff]  ;;  %v13141_v59 = vld [vmem:[#allocation127_spill] sm:$0xff]  ;;  %v13142_v5 = vld [vmem:[#allocation128_spill] sm:$0xff] }
 0x424   :  { %13131 = vst [vmem:[#allocation148_spill] sm:$0xff] %v10644_v50  ;;  %13134 = vst [vmem:[#allocation149_spill] sm:$0xff] %v10648_v30  ;;  %v10656_v60 = vadd.f32 %v13139_v53, %v13138_v48  ;;  %v10660_v54 = vadd.f32 %v13142_v5, %v13141_v59  ;;  %v13144_v63 = vld [vmem:[#allocation129_spill] sm:$0xff]  ;;  %v13145_v31 = vld [vmem:[#allocation130_spill] sm:$0xff] }
 0x425   :  { %13137 = vst [vmem:[#allocation150_spill] sm:$0xff] %v10652_v44  ;;  %v10664_v7 = vadd.f32 %v13145_v31, %v13144_v63  ;;  %v13147_v38 = vld [vmem:[#allocation131_spill] sm:$0xff]  ;;  %v13148_v50 = vld [vmem:[#allocation132_spill] sm:$0xff]  ;;  %v13150_v28 = vld [vmem:[#allocation154_spill] sm:$0xff]  ;;  %v13158_v31 = vrot.slane %v10504_v40, 1 }
 0x426   :  { %13140 = vst [vmem:[#allocation64_spill] sm:$0xff] %v10656_v60  ;;  %13143 = vst [vmem:[#allocation65_spill] sm:$0xff] %v10660_v54  ;;  %v10668_v34 = vadd.f32 %v13148_v50, %v13147_v38  ;;  %v4164_v19 = vmul.f32 0.35355338, %v13150_v28  ;;  %v13151_v56 = vld [vmem:[#allocation133_spill] sm:$0xff]  ;;  %v13152_v52 = vld [vmem:[#allocation134_spill] sm:$0xff] }
 0x427   :  { %13146 = vst [vmem:[#allocation151_spill] sm:$0xff] %v10664_v7  ;;  %v10673_v55 = vadd.f32 %v13152_v52, %v13151_v56  ;;  %v13154_v53 = vld [vmem:[#allocation135_spill] sm:$0xff]  ;;  %v13155_v48 = vld [vmem:[#allocation136_spill] sm:$0xff]  ;;  %v13157_v5 = vld [vmem:[#allocation61_spill] sm:$0xff]  ;;  %v3621_v63 = vadd.f32 %v13158_v31, %v10504_v40  ;;  %v4165_v38 = vmul.f32 0.35355338, %v3909_v49  ;;  %v4693_v52 = vlaneseq }
 0x428   :  { %13149 = vst [vmem:[#allocation152_spill] sm:$0xff] %v10668_v34  ;;  %v10677_v9 = vadd.f32 %v13155_v48, %v13154_v53  ;;  %v4222_v59 = vmax.f32 %v10473_v41, %v13157_v5  ;;  %v13159_v51 = vld [vmem:[#allocation30_spill] sm:$0xff]  ;;  %v13160_v34 = vld [vmem:[#allocation153_spill] sm:$0xff]  ;;  %v13161_v41 = vld [vmem:[#allocation35_spill] sm:$0xff]  ;;  %v8003_v49 = vmov 1966171168  }
 0x429   :  { %13153 = vst [vmem:[#allocation34_spill] sm:$0xff] %v10673_v55  ;;  %v10685_v50 = vmul.f32 0.35355338, %v13159_v51  ;;  %v10688_v7 = vmul.f32 0.35355338, %v13160_v34  ;;  %v13162_v40 = vld [vmem:[#allocation99_spill] sm:$0xff] }
 0x42a   :  { %13156 = vst [vmem:[#allocation72_spill] sm:$0xff] %v10677_v9  ;;  %v4223_v28 = vmax.f32 %v4222_v59, %v4164_v19  ;;  %v10692_v48 = vmul.f32 0.35355338, %v3621_v63  ;;  %v13163_v51 = vld [vmem:[#allocation142_spill] sm:$0xff]  ;;  %v13164_v59 = vld [vmem:[#allocation33_spill] sm:$0xff]  ;;  %v10706_v60 = vshrl.u32 %v4693_v52, 7 }
 0x42b   :  { %v4194_v53 = vmax.f32 %v10457_v21, %v10685_v50  ;;  %v13165_v34 = vld [vmem:[#allocation97_spill] sm:$0xff] }
 0x42c   :  { %v4224_v56 = vmax.f32 %v4223_v28, %v4165_v38  ;;  %v13166_v28 = vld [vmem:[#allocation141_spill] sm:$0xff] }
 0x42d   :  { %v13213_v39 = vld [vmem:[#allocation69_spill] sm:$0xff] }
 0x42e   :  { %v4278_v55 = vsub.f32 %v13164_v59, %v4224_v56  ;;  %v4279_v10 = vsub.f32 %v13165_v34, %v4224_v56  ;;  %v4280_v18 = vsub.f32 %v13166_v28, %v4224_v56  ;;  %v4281_v3 = vsub.f32 %v10434_v13, %v4224_v56 }
 0x42f   :  { %v4282_v21 = vsub.f32 %v13043_v4, %v4224_v56  ;;  %v4283_v63 = vsub.f32 %v13157_v5, %v4224_v56  ;;  %v4284_v54 = vsub.f32 %v4164_v19, %v4224_v56  ;;  %v4285_v9 = vsub.f32 %v4165_v38, %v4224_v56  ;;  %v13169_v5 = vld [vmem:[#allocation137_spill] sm:$0xff] }
 0x430   :  { %v4374_v27 = vmul.f32 1.442695, %v4278_v55  ;;  %v4376_v26 = vmul.f32 1.442695, %v4279_v10  ;;  %v4378_v31 = vmul.f32 1.442695, %v4280_v18  ;;  %v10708_v59 = vunpack.c.l.s4 %v8003_v49 }
 0x431   :  { %v4380_v25 = vmul.f32 1.442695, %v4281_v3  ;;  %v4195_v34 = vmax.f32 %v4194_v53, %v10688_v7  ;;  %v4382_v28 = vmul.f32 1.442695, %v4282_v21  ;;  %v4384_v13 = vmul.f32 1.442695, %v4283_v63 }
 0x432   :  { %7760 = vpow2.f32 %v4374_v27  ;;  %v4386_v22 = vmul.f32 1.442695, %v4284_v54  ;;  %v4388_v4 = vmul.f32 1.442695, %v4285_v9  ;;  %v4289_v10 = vsub.f32 %v10436_v37, %v10566_v62  ;;  %v13167_v55 = vld [vmem:[#allocation95_spill] sm:$0xff]  ;;  %v13168_v9 = vld [vmem:[#allocation88_spill] sm:$0xff] }
 0x433   :  { %7762 = vpow2.f32 %v4376_v26  ;;  %v4196_v19 = vmax.f32 %v4195_v34, %v10692_v48  ;;  %v4290_v3 = vsub.f32 %v13044_v57, %v10566_v62  ;;  %v4291_v18 = vsub.f32 %v13056_v47, %v10566_v62 }
 0x434   :  { %7764 = vpow2.f32 %v4378_v31  ;;  %v4292_v27 = vsub.f32 %v13067_v14, %v10566_v62  ;;  %v13171_v21 = vsub.f32 %v13161_v41, %v10566_v62  ;;  %v13172_v34 = vsub.f32 %v13162_v40, %v10566_v62  ;;  %v13174_v41 = vld [vmem:[#allocation96_spill] sm:$0xff] }
 0x435   :  { %7766 = vpow2.f32 %v4380_v25  ;;  %v4246_v26 = vsub.f32 %v13167_v55, %v4196_v19  ;;  %v4247_v54 = vsub.f32 %v13168_v9, %v4196_v19  ;;  %v4248_v38 = vsub.f32 %v13169_v5, %v4196_v19 }
 0x436   :  { %7768 = vpow2.f32 %v4382_v28  ;;  %v4249_v37 = vsub.f32 %v10424_v17, %v4196_v19  ;;  %v4250_v57 = vsub.f32 %v13037_v2, %v4196_v19  ;;  %v4251_v56 = vsub.f32 %v10685_v50, %v4196_v19 }
 0x437   :  { %7770 = vpow2.f32 %v4384_v13  ;;  %v4252_v47 = vsub.f32 %v10688_v7, %v4196_v19  ;;  %v4253_v25 = vsub.f32 %v10692_v48, %v4196_v19  ;;  %v4310_v14 = vmul.f32 1.442695, %v4246_v26 }
 0x438   :  { %7772 = vpow2.f32 %v4386_v22  ;;  %v4312_v53 = vmul.f32 1.442695, %v4247_v54  ;;  %v4314_v31 = vmul.f32 1.442695, %v4248_v38  ;;  %v10730_v17 = vsub.s32 0, %v10706_v60 }
 0x439   :  { %7774 = vpow2.f32 %v4388_v4  ;;  %v4316_v2 = vmul.f32 1.442695, %v4249_v37  ;;  %v4318_v50 = vmul.f32 1.442695, %v4250_v57  ;;  %v4320_v49 = vmul.f32 1.442695, %v4251_v56 }
 0x43a   :  { %13170 = vst [vmem:[#allocation75_spill] sm:$0xff] %v10730_v17  ;;  %7776 = vpow2.f32 %v4310_v14  ;;  %v4322_v7 = vmul.f32 1.442695, %v4252_v47  ;;  %v4293_v48 = vsub.f32 %v10518_v24, %v10566_v62  ;;  %v4324_v22 = vmul.f32 1.442695, %v4253_v25  ;;  %v13175_v37 = vld [vmem:[#allocation90_spill] sm:$0xff] }
 0x43b   :  { %7778 = vpow2.f32 %v4312_v53  ;;  %v4390_v63 = vmul.f32 1.442695, %v13171_v21  ;;  %v4392_v28 = vmul.f32 1.442695, %v13172_v34  ;;  %v13173_v4 = vsub.f32 %v13163_v51, %v10566_v62  ;;  %v13176_v62 = vld [vmem:[#allocation138_spill] sm:$0xff] }
 0x43c   :  { %v10740_v13 = vpop.eup %7760  ;;  %7780 = vpow2.f32 %v4314_v31  ;;  %v4396_v55 = vmul.f32 1.442695, %v4289_v10  ;;  %v4398_v24 = vmul.f32 1.442695, %v4290_v3  ;;  %v4400_v9 = vmul.f32 1.442695, %v4291_v18 }
 0x43d   :  { %v4394_v19 = vmul.f32 1.442695, %v13173_v4  ;;  %v10745_v26 = vpop.eup %7762  ;;  %7782 = vpow2.f32 %v4316_v2  ;;  %v4402_v54 = vmul.f32 1.442695, %v4292_v27  ;;  %v4254_v5 = vsub.f32 %v13174_v41, %v10545_v8 }
 0x43e   :  { %v10749_v38 = vpop.eup %7764  ;;  %v4565_v40 = vrot.slane %v10745_v26, 7  ;;  %7784 = vpow2.f32 %v4318_v50  ;;  %v4255_v57 = vsub.f32 %v13175_v37, %v10545_v8  ;;  %v4256_v51 = vsub.f32 %v13176_v62, %v10545_v8 }
 0x43f   :  { %v10756_v10 = vpop.eup %7766  ;;  %v4567_v3 = vrot.slane %v10749_v38, 6  ;;  %7786 = vpow2.f32 %v4320_v49  ;;  %v4257_v18 = vsub.f32 %v10426_v61, %v10545_v8  ;;  %v4258_v27 = vsub.f32 %v13038_v12, %v10545_v8 }
 0x440   :  { %v10763_v56 = vpop.eup %7768  ;;  %v4566_v47 = vsel %vm4503_vm0, %v4565_v40, %v10740_v13  ;;  %v4569_v25 = vrot.slane %v10756_v10, 5  ;;  %7788 = vpow2.f32 %v4322_v7  ;;  %v4259_v14 = vsub.f32 %v13051_v43, %v10545_v8 }
 0x441   :  { %v10770_v53 = vpop.eup %7770  ;;  %v4568_v31 = vsel %vm4506_vm1, %v4567_v3, %v4566_v47  ;;  %v4571_v61 = vrot.slane %v10763_v56, 4  ;;  %7790 = vpow2.f32 %v4324_v22  ;;  %v4260_v12 = vsub.f32 %v13054_v20, %v10545_v8 }
 0x442   :  { %v10776_v2 = vpop.eup %7772  ;;  %v4570_v50 = vsel %vm4509_vm2, %v4569_v25, %v4568_v31  ;;  %v4573_v49 = vrot.slane %v10770_v53, 3  ;;  %7792 = vpow2.f32 %v4390_v63  ;;  %v4261_v43 = vsub.f32 %v10510_v23, %v10545_v8 }
 0x443   :  { %v10782_v7 = vpop.eup %7774  ;;  %v4572_v21 = vsel %vm4512_vm3, %v4571_v61, %v4570_v50  ;;  %v4575_v34 = vrot.slane %v10776_v2, 2  ;;  %7794 = vpow2.f32 %v4392_v28  ;;  %v4404_v22 = vmul.f32 1.442695, %v4293_v48 }
 0x444   :  { %v10786_v4 = vpop.eup %7776  ;;  %v4574_v20 = vsel %vm4515_vm4, %v4573_v49, %v4572_v21  ;;  %v4577_v41 = vrot.slane %v10782_v7, 1  ;;  %7796 = vpow2.f32 %v4394_v19  ;;  %v4326_v40 = vmul.f32 1.442695, %v4254_v5 }
 0x445   :  { %v10790_v63 = vpop.eup %7778  ;;  %v4576_v23 = vsel %vm4518_vm5, %v4575_v34, %v4574_v20  ;;  %7798 = vpow2.f32 %v4396_v55  ;;  %v4328_v8 = vmul.f32 1.442695, %v4255_v57  ;;  %v4330_v37 = vmul.f32 1.442695, %v4256_v51 }
 0x446   :  { %v10793_v62 = vpop.eup %7780  ;;  %v4578_v28 = vsel %vm4521_vm6, %v4577_v41, %v4576_v23  ;;  %v4502_v48 = vrot.slane %v10790_v63, 7  ;;  %7800 = vpow2.f32 %v4398_v24  ;;  %v4332_v3 = vmul.f32 1.442695, %v4257_v18 }
 0x447   :  { %v10797_v47 = vpop.eup %7782  ;;  %v4653_v25 = vrot.slane %v4578_v28, 4  ;;  %v4505_v19 = vrot.slane %v10793_v62, 6  ;;  %7802 = vpow2.f32 %v4400_v9  ;;  %v4334_v5 = vmul.f32 1.442695, %v4258_v27 }
 0x448   :  { %v10800_v31 = vpop.eup %7784  ;;  %v4504_v55 = vsel %vm4503_vm0, %v4502_v48, %v10786_v4  ;;  %v4508_v57 = vrot.slane %v10797_v47, 5  ;;  %7804 = vpow2.f32 %v4402_v54  ;;  %v4336_v51 = vmul.f32 1.442695, %v4259_v14 }
 0x449   :  { %v10805_v61 = vpop.eup %7786  ;;  %v4654_v24 = vadd.f32 %v4653_v25, %v4578_v28  ;;  %v4507_v18 = vsel %vm4506_vm1, %v4505_v19, %v4504_v55  ;;  %v4511_v50 = vrot.slane %v10800_v31, 4  ;;  %7806 = vpow2.f32 %v4404_v22  ;;  %v13177_v25 = vld [vmem:[#allocation55_spill] sm:$0xff] }
 0x44a   :  { %v10809_v49 = vpop.eup %7788  ;;  %v4510_v9 = vsel %vm4509_vm2, %v4508_v57, %v4507_v18  ;;  %v4514_v27 = vrot.slane %v10805_v61, 3  ;;  %7808 = vpow2.f32 %v4326_v40  ;;  %v4338_v21 = vmul.f32 1.442695, %v4260_v12  ;;  %v13178_v18 = vld [vmem:[#allocation100_spill] sm:$0xff] }
 0x44b   :  { %v10813_v34 = vpop.eup %7790  ;;  %v4655_v54 = vrot.slane %v4654_v24, 2  ;;  %v4513_v14 = vsel %vm4512_vm3, %v4511_v50, %v4510_v9  ;;  %v4517_v20 = vrot.slane %v10809_v49, 2  ;;  %7810 = vpow2.f32 %v4328_v8 }
 0x44c   :  { %v10817_v41 = vpop.eup %7792  ;;  %v4516_v22 = vsel %vm4515_vm4, %v4514_v27, %v4513_v14  ;;  %v4520_v23 = vrot.slane %v10813_v34, 1  ;;  %7812 = vpow2.f32 %v4330_v37  ;;  %v4340_v28 = vmul.f32 1.442695, %v4261_v43 }
 0x44d   :  { %v10821_v48 = vpop.eup %7794  ;;  %v4656_v40 = vadd.f32 %v4655_v54, %v4654_v24  ;;  %v4519_v12 = vsel %vm4518_vm5, %v4517_v20, %v4516_v22  ;;  %7814 = vpow2.f32 %v4332_v3  ;;  %v4294_v19 = vsub.f32 %v13177_v25, %v10569_v33 }
 0x44e   :  { %v10826_v55 = vpop.eup %7796  ;;  %v4522_v8 = vsel %vm4521_vm6, %v4520_v23, %v4519_v12  ;;  %v4579_v57 = vrot.slane %v10821_v48, 7  ;;  %7816 = vpow2.f32 %v4334_v5  ;;  %v4295_v37 = vsub.f32 %v13178_v18, %v10569_v33  ;;  %v13179_v5 = vld [vmem:[#allocation143_spill] sm:$0xff] }
 0x44f   :  { %v10832_v43 = vpop.eup %7798  ;;  %v4657_v50 = vrot.slane %v4656_v40, 1  ;;  %v4629_v24 = vrot.slane %v4522_v8, 4  ;;  %v4581_v9 = vrot.slane %v10826_v55, 6  ;;  %7818 = vpow2.f32 %v4336_v51 }
 0x450   :  { %v10835_v3 = vpop.eup %7800  ;;  %v4580_v27 = vsel %vm4503_vm0, %v4579_v57, %v10817_v41  ;;  %v4583_v54 = vrot.slane %v10832_v43, 5  ;;  %7820 = vpow2.f32 %v4338_v21  ;;  %v4296_v14 = vsub.f32 %v13179_v5, %v10569_v33 }
 0x451   :  { %v10842_v20 = vpop.eup %7802  ;;  %v4658_v22 = vadd.f32 %v4657_v50, %v4656_v40  ;;  %v4630_v23 = vadd.f32 %v4629_v24, %v4522_v8  ;;  %v4582_v12 = vsel %vm4506_vm1, %v4581_v9, %v4580_v27  ;;  %v4585_v25 = vrot.slane %v10835_v3, 4 }
 0x452   :  { %13180 = vst [vmem:[#allocation155_spill] sm:$0xff] %v10842_v20  ;;  %v10846_v51 = vpop.eup %7804  ;;  %v4584_v18 = vsel %vm4509_vm2, %v4583_v54, %v4582_v12  ;;  %v4587_v57 = vrot.slane %v10842_v20, 3  ;;  %7822 = vpow2.f32 %v4340_v28  ;;  %v4297_v21 = vsub.f32 %v10440_v58, %v10569_v33 }
 0x453   :  { %13181 = vst [vmem:[#allocation12_spill] sm:$0xff] %v10846_v51  ;;  %v10852_v52 = vpop.eup %7806  ;;  %7824 = vrcp.f32 %v4658_v22  ;;  %v4631_v5 = vrot.slane %v4630_v23, 2  ;;  %v4586_v40 = vsel %vm4512_vm3, %v4585_v25, %v4584_v18  ;;  %v4589_v8 = vrot.slane %v10846_v51, 2 }
 0x454   :  { %13182 = vst [vmem:[#allocation25_spill] sm:$0xff] %v10852_v52  ;;  %v10856_v50 = vpop.eup %7808  ;;  %v4588_v24 = vsel %vm4515_vm4, %v4587_v57, %v4586_v40  ;;  %v4591_v9 = vrot.slane %v10852_v52, 1  ;;  %v4298_v28 = vsub.f32 %v13045_v46, %v10569_v33  ;;  %v4299_v58 = vsub.f32 %v13057_v45, %v10569_v33 }
 0x455   :  { %13183 = vst [vmem:[#allocation14_spill] sm:$0xff] %v10856_v50  ;;  %v10864_v27 = vpop.eup %7810  ;;  %v4632_v54 = vadd.f32 %v4631_v5, %v4630_v23  ;;  %v4590_v22 = vsel %vm4518_vm5, %v4589_v8, %v4588_v24  ;;  %v4300_v12 = vsub.f32 %v13068_v42, %v10569_v33  ;;  %v4301_v25 = vsub.f32 %v10520_v15, %v10569_v33 }
 0x456   :  { %13184 = vst [vmem:[#allocation20_spill] sm:$0xff] %v10864_v27  ;;  %v10871_v18 = vpop.eup %7812  ;;  %v4592_v57 = vsel %vm4521_vm6, %v4591_v9, %v4590_v22  ;;  %v4523_v46 = vrot.slane %v10864_v27, 7  ;;  %v4406_v40 = vmul.f32 1.442695, %v4294_v19  ;;  %v4408_v52 = vmul.f32 1.442695, %v4295_v37 }
 0x457   :  { %13185 = vst [vmem:[#allocation17_spill] sm:$0xff] %v10871_v18  ;;  %v10875_v45 = vpop.eup %7814  ;;  %v4633_v51 = vrot.slane %v4632_v54, 1  ;;  %v4659_v23 = vrot.slane %v4592_v57, 4  ;;  %v4525_v5 = vrot.slane %v10871_v18, 6  ;;  %v4410_v8 = vmul.f32 1.442695, %v4296_v14 }
 0x458   :  { %13186 = vst [vmem:[#allocation21_spill] sm:$0xff] %v10875_v45  ;;  %v10878_v24 = vpop.eup %7816  ;;  %v4524_v15 = vsel %vm4503_vm0, %v4523_v46, %v10856_v50  ;;  %v4527_v42 = vrot.slane %v10875_v45, 5  ;;  %7826 = vpow2.f32 %v4406_v40  ;;  %v4412_v33 = vmul.f32 1.442695, %v4297_v21 }
 0x459   :  { %13187 = vst [vmem:[#allocation28_spill] sm:$0xff] %v10878_v24  ;;  %v10883_v9 = vpop.eup %7818  ;;  %v4634_v19 = vadd.f32 %v4633_v51, %v4632_v54  ;;  %v4660_v37 = vadd.f32 %v4659_v23, %v4592_v57  ;;  %v4526_v22 = vsel %vm4506_vm1, %v4525_v5, %v4524_v15  ;;  %v4529_v27 = vrot.slane %v10878_v24, 4 }
 0x45a   :  { %13188 = vst [vmem:[#allocation56_spill] sm:$0xff] %v10883_v9  ;;  %v10887_v20 = vpop.eup %7820  ;;  %v4528_v14 = vsel %vm4509_vm2, %v4527_v42, %v4526_v22  ;;  %v4531_v18 = vrot.slane %v10883_v9, 3  ;;  %7828 = vpow2.f32 %v4408_v52  ;;  %v4414_v46 = vmul.f32 1.442695, %v4298_v28 }
 0x45b   :  { %13189 = vst [vmem:[#allocation32_spill] sm:$0xff] %v10887_v20  ;;  %7830 = vrcp.f32 %v4634_v19  ;;  %v4661_v45 = vrot.slane %v4660_v37, 2  ;;  %v4530_v21 = vsel %vm4512_vm3, %v4529_v27, %v4528_v14  ;;  %v4533_v40 = vrot.slane %v10887_v20, 2  ;;  %v10900_v14 = vld [vmem:[#allocation7 + $0x20] sm:$0xff] }
 0x45c   :  { %v10893_v51 = vpop.eup %7822  ;;  %v4532_v54 = vsel %vm4515_vm4, %v4531_v18, %v4530_v21  ;;  %7832 = vpow2.f32 %v4410_v8  ;;  %v4416_v57 = vmul.f32 1.442695, %v4299_v58  ;;  %v4418_v23 = vmul.f32 1.442695, %v4300_v12 }
 0x45d   :  { %13190 = vst [vmem:[#allocation157_spill] sm:$0xff] %v10893_v51  ;;  %v7825_v5 = vpop.eup %7824  ;;  %v4662_v15 = vadd.f32 %v4661_v45, %v4660_v37  ;;  %v4534_v42 = vsel %vm4518_vm5, %v4533_v40, %v4532_v54  ;;  %v4535_v52 = vrot.slane %v10893_v51, 1  ;;  %7834 = vpow2.f32 %v4412_v33 }
 0x45e   :  { %v4686_v28 = vmul.f32 1.1111112, %v7825_v5  ;;  %7836 = vpow2.f32 %v4414_v46  ;;  %v4420_v19 = vmul.f32 1.442695, %v4301_v25  ;;  %vm4801_vm7 = vcmp.ge.f32.partialorder %v10900_v14, 0.1 }
 0x45f   :  { %v4663_v20 = vrot.slane %v4662_v15, 1  ;;  %v4536_v18 = vsel %vm4521_vm6, %v4535_v52, %v4534_v42  ;;  %7838 = vpow2.f32 %v4416_v57 }
 0x460   :  { %v4712_v45 = vrot.slane %v4686_v28, %v10730_v17  ;;  %v4635_v8 = vrot.slane %v4536_v18, 4  ;;  %7840 = vpow2.f32 %v4418_v23 }
 0x461   :  { %v4664_v25 = vadd.f32 %v4663_v20, %v4662_v15  ;;  %7842 = vpow2.f32 %v4420_v19 }
 0x462   :  { %v10912_v40 = vpop.eup %7826  ;;  %v4757_v54 = vmul.f32 %v10740_v13, %v4712_v45  ;;  %v4758_v57 = vmul.f32 %v10745_v26, %v4712_v45  ;;  %v4759_v5 = vmul.f32 %v10749_v38, %v4712_v45  ;;  %v4760_v23 = vmul.f32 %v10756_v10, %v4712_v45 }
 0x463   :  { %13194 = vst [vmem:[#allocation62_spill] sm:$0xff] %v10912_v40  ;;  %v4761_v20 = vmul.f32 %v10763_v56, %v4712_v45  ;;  %v4762_v15 = vmul.f32 %v10770_v53, %v4712_v45  ;;  %v4763_v42 = vmul.f32 %v10776_v2, %v4712_v45  ;;  %v4764_v52 = vmul.f32 %v10782_v7, %v4712_v45 }
 0x464   :  { %v10923_v28 = vpop.eup %7828  ;;  %v4925_v19 = vrot.slane %v4758_v57, 7  ;;  %v4927_v13 = vrot.slane %v4759_v5, 6  ;;  %v13196_v26 = vunpack.c.0.s8 %v10708_v59  ;;  %7844 = vrcp.f32 %v4664_v25 }
 0x465   :  { %13195 = vst [vmem:[#allocation63_spill] sm:$0xff] %v10923_v28  ;;  %v7831_v10 = vpop.eup %7830  ;;  %v4929_v21 = vrot.slane %v4760_v23, 5  ;;  %v4931_v46 = vrot.slane %v4761_v20, 4  ;;  %v4933_v56 = vrot.slane %v4762_v15, 3  ;;  %v4935_v37 = vrot.slane %v4763_v42, 2  ;;  %v4789_v23 = vld [vmem:[#allocation7] sm:$0xff] }
 0x466   :  { %v10928_v38 = vsub.s32 %v13196_v26, %v10706_v60  ;;  %v10930_v53 = vpop.eup %7832  ;;  %v4926_v2 = vsel %vm4503_vm0, %v4925_v19, %v4757_v54  ;;  %v4678_v7 = vmul.f32 1.1111112, %v7831_v10  ;;  %v4636_v45 = vadd.f32 %v4635_v8, %v4536_v18 }
 0x467   :  { %13198 = vst [vmem:[#allocation102_spill] sm:$0xff] %v10930_v53  ;;  %v4593_v57 = vrot.slane %v10923_v28, 7  ;;  %v10934_v5 = vpop.eup %7834  ;;  %v4928_v59 = vsel %vm4506_vm1, %v4927_v13, %v4926_v2  ;;  %v4937_v60 = vrot.slane %v4764_v52, 1  ;;  %v4595_v25 = vrot.slane %v10930_v53, 6  ;;  %v13210_v28 = vld [vmem:[#allocation27_spill] sm:$0xff] }
 0x468   :  { %13197 = vst [vmem:[#allocation70_spill] sm:$0xff] %v10928_v38  ;;  %13199 = vst [vmem:[#allocation71_spill] sm:$0xff] %v10934_v5  ;;  %v10940_v20 = vpop.eup %7836  ;;  %v4930_v15 = vsel %vm4509_vm2, %v4929_v21, %v4928_v59  ;;  %v4696_v54 = vrot.slane %v4678_v7, %v10730_v17  ;;  %v4637_v42 = vrot.slane %v4636_v45, 2  ;;  %v4597_v13 = vrot.slane %v10934_v5, 5 }
 0x469   :  { %13200 = vst [vmem:[#allocation103_spill] sm:$0xff] %v10940_v20  ;;  %v4594_v18 = vsel %vm4503_vm0, %v4593_v57, %v10912_v40  ;;  %v10946_v8 = vpop.eup %7838  ;;  %v4932_v19 = vsel %vm4512_vm3, %v4931_v46, %v4930_v15  ;;  %vm4797_vm8 = vcmp.ge.f32.partialorder %v4789_v23, 0.1 }
 0x46a   :  { %13201 = vst [vmem:[#allocation104_spill] sm:$0xff] %v10946_v8  ;;  %v4596_v52 = vsel %vm4506_vm1, %v4595_v25, %v4594_v18  ;;  %v10952_v10 = vpop.eup %7840  ;;  %v4934_v21 = vsel %vm4515_vm4, %v4933_v56, %v4932_v19  ;;  %v4725_v2 = vmul.f32 %v10786_v4, %v4696_v54  ;;  %v4726_v7 = vmul.f32 %v10790_v63, %v4696_v54 }
 0x46b   :  { %13202 = vst [vmem:[#allocation105_spill] sm:$0xff] %v10952_v10  ;;  %v4727_v57 = vmul.f32 %v10793_v62, %v4696_v54  ;;  %v10958_v59 = vpop.eup %7842  ;;  %v4936_v46 = vsel %vm4518_vm5, %v4935_v37, %v4934_v21  ;;  %v4728_v25 = vmul.f32 %v10797_v47, %v4696_v54  ;;  %v4729_v15 = vmul.f32 %v10800_v31, %v4696_v54 }
 0x46c   :  { %13203 = vst [vmem:[#allocation79_spill] sm:$0xff] %v10958_v59  ;;  %v4730_v18 = vmul.f32 %v10805_v61, %v4696_v54  ;;  %v4938_v12 = vsel %vm4521_vm6, %v4937_v60, %v4936_v46  ;;  %v4731_v56 = vmul.f32 %v10809_v49, %v4696_v54  ;;  %v4732_v4 = vmul.f32 %v10813_v34, %v4696_v54 }
 0x46d   :  { %v4869_v63 = vrot.slane %v4726_v7, 7  ;;  %v4993_v62 = vsel %vm4801_vm7, %v4938_v12, 0.0  ;;  %v4871_v19 = vrot.slane %v4727_v57, 6  ;;  %v4873_v22 = vrot.slane %v4728_v25, 5 }
 0x46e   :  { %v4875_v37 = vrot.slane %v4729_v15, 4  ;;  %v7845_v21 = vpop.eup %7844  ;;  %v5201_v47 = vcombine.high %v4993_v62, %v4993_v62  ;;  %v5208_v31 = vrot.slane %v4993_v62, %v10928_v38  ;;  %v4877_v26 = vrot.slane %v4730_v18, 3 }
 0x46f   :  { %v4870_v61 = vsel %vm4503_vm0, %v4869_v63, %v4725_v2  ;;  %v4879_v49 = vrot.slane %v4731_v56, 2  ;;  %v4881_v46 = vrot.slane %v4732_v4, 1  ;;  %v4688_v34 = vmul.f32 1.1111112, %v7845_v21 }
 0x470   :  { %v4872_v60 = vsel %vm4506_vm1, %v4871_v19, %v4870_v61  ;;  %v5215_v54 = vrot.slane %v5201_v47, %v10928_v38  ;;  %v5216_v14 = vcombine.high %v5208_v31, %v5208_v31  ;;  %v5224_v12 = vrot.slane %v5208_v31, %v10928_v38 }
 0x471   :  { %v4874_v7 = vsel %vm4509_vm2, %v4873_v22, %v4872_v60  ;;  %v10977_v25 = vrot.slane %v4688_v34, %v10730_v17  ;;  %v10979_v15 = vadd.f32 %v4637_v42, %v4636_v45  ;;  %v10982_v2 = vsel %vm4509_vm2, %v4597_v13, %v4596_v52 }
 0x472   :  { %v4876_v57 = vsel %vm4512_vm3, %v4875_v37, %v4874_v7  ;;  %13204 = vst [vmem:[#allocation81_spill] sm:$0xff] %v10982_v2  ;;  %v5217_v18 = vcombine.high %v5215_v54, %v5215_v54  ;;  %v5231_v56 = vrot.slane %v5215_v54, %v10928_v38  ;;  %v5238_v4 = vrot.slane %v5216_v14, %v10928_v38 }
 0x473   :  { %v5246_v63 = vcombine.high %v5224_v12, %v5224_v12  ;;  %v10987_v62 = vrot.slane %v5224_v12, %v10730_v17  ;;  %v4878_v22 = vsel %vm4515_vm4, %v4877_v26, %v4876_v57  ;;  %v10992_v19 = vmul.f32 %v10817_v41, %v10977_v25  ;;  %v13205_v41 = vld [vmem:[#allocation42_spill] sm:$0xff] }
 0x474   :  { %v10996_v45 = vmul.f32 %v10821_v48, %v10977_v25  ;;  %v5245_v42 = vrot.slane %v5217_v18, %v10928_v38  ;;  %v5247_v52 = vcombine.high %v5231_v56, %v5231_v56  ;;  %v5248_v13 = vcombine.high %v5238_v4, %v5238_v4  ;;  %v13206_v12 = vld [vmem:[#allocation22_spill] sm:$0xff] }
 0x475   :  { %v11000_v37 = vrot.slane %v5238_v4, %v10730_v17  ;;  %v11003_v21 = vrot.slane %v5246_v63, %v10730_v17  ;;  %v11006_v26 = vrot.slane %v5231_v56, %v10730_v17  ;;  %v5845_v47 = vmul.f32 %v13205_v41, %v10987_v62 }
 0x476   :  { %v4880_v31 = vsel %vm4518_vm5, %v4879_v49, %v4878_v22  ;;  %v5249_v48 = vcombine.high %v5245_v42, %v5245_v42  ;;  %v11012_v61 = vrot.slane %v5248_v13, %v10730_v17  ;;  %v11015_v60 = vrot.slane %v5245_v42, %v10730_v17 }
 0x477   :  { %v11018_v34 = vrot.slane %v5247_v52, %v10730_v17  ;;  %v5849_v54 = vmul.f32 %v10584_v36, %v11000_v37  ;;  %v5853_v14 = vmul.f32 %v10616_v32, %v11003_v21  ;;  %v5861_v7 = vmul.f32 %v13206_v12, %v11006_v26 }
 0x478   :  { %v4882_v49 = vsel %vm4521_vm6, %v4881_v46, %v4880_v31  ;;  %v11028_v57 = vrot.slane %v5249_v48, %v10730_v17  ;;  %v5857_v18 = vmul.f32 %v10648_v30, %v11012_v61  ;;  %v5865_v56 = vmul.f32 %v10588_v29, %v11015_v60  ;;  %v13207_v48 = vld [vmem:[#allocation47_spill] sm:$0xff] }
 0x479   :  { %v5869_v4 = vmul.f32 %v10620_v11, %v11018_v34  ;;  %v6085_v63 = vadd.f32 %v5849_v54, %v5845_v47  ;;  %v4989_v22 = vsel %vm4797_vm8, %v4882_v49, 0.0  ;;  %v5846_v42 = vmul.f32 %v10538_v6, %v10987_v62  ;;  %v13208_v47 = vld [vmem:[#allocation64_spill] sm:$0xff]  ;;  %v13209_v54 = vld [vmem:[#allocation59_spill] sm:$0xff] }
 0x47a   :  { %v5850_v46 = vmul.f32 %v10592_v1, %v11000_v37  ;;  %v5873_v52 = vmul.f32 %v10652_v44, %v11028_v57  ;;  %v5005_v13 = vcombine.high %v4989_v22, %v4989_v22  ;;  %v5012_v31 = vrot.slane %v4989_v22, %v10928_v38  ;;  %v13211_v22 = vld [vmem:[#allocation52_spill] sm:$0xff] }
 0x47b   :  { %v5854_v5 = vmul.f32 %v13207_v48, %v11003_v21  ;;  %v6086_v53 = vadd.f32 %v6085_v63, %v5853_v14  ;;  %v5858_v23 = vmul.f32 %v13208_v47, %v11012_v61  ;;  %v5862_v49 = vmul.f32 %v13209_v54, %v11006_v26  ;;  %v13212_v14 = vld [vmem:[#allocation65_spill] sm:$0xff] }
 0x47c   :  { %v5866_v40 = vmul.f32 %v13210_v28, %v11015_v60  ;;  %v5019_v51 = vrot.slane %v5005_v13, %v10928_v38  ;;  %v5020_v9 = vcombine.high %v5012_v31, %v5012_v31  ;;  %v5028_v24 = vrot.slane %v5012_v31, %v10928_v38 }
 0x47d   :  { %v5870_v50 = vmul.f32 %v13211_v22, %v11018_v34  ;;  %v6087_v16 = vadd.f32 %v6086_v53, %v5857_v18  ;;  %v11058_v63 = vmul.f32 %v13212_v14, %v11028_v57  ;;  %v6092_v0 = vadd.f32 %v5850_v46, %v5846_v42  ;;  %v13214_v53 = vld [vmem:[#allocation13_spill] sm:$0xff] }
 0x47e   :  { %v5847_v33 = vmul.f32 %v13213_v39, %v10987_v62  ;;  %v5021_v58 = vcombine.high %v5019_v51, %v5019_v51  ;;  %v5035_v27 = vrot.slane %v5019_v51, %v10928_v38  ;;  %v5042_v13 = vrot.slane %v5020_v9, %v10928_v38 }
 0x47f   :  { %v5050_v35 = vcombine.high %v5028_v24, %v5028_v24  ;;  %v6088_v59 = vadd.f32 %v6087_v16, %v5861_v7  ;;  %v11065_v31 = vrot.slane %v5028_v24, %v10730_v17  ;;  %v6093_v10 = vadd.f32 %v6092_v0, %v5854_v5 }
 0x480   :  { %v5851_v18 = vmul.f32 %v13214_v53, %v11000_v37  ;;  %v5049_v8 = vrot.slane %v5021_v58, %v10928_v38  ;;  %v5051_v42 = vcombine.high %v5035_v27, %v5035_v27  ;;  %v5052_v46 = vcombine.high %v5042_v13, %v5042_v13 }
 0x481   :  { %v11071_v20 = vrot.slane %v5042_v13, %v10730_v17  ;;  %v6089_v2 = vadd.f32 %v6088_v59, %v5865_v56  ;;  %v11074_v51 = vrot.slane %v5050_v35, %v10730_v17  ;;  %v11077_v16 = vrot.slane %v5035_v27, %v10730_v17 }
 0x482   :  { %v5717_v0 = vmul.f32 %v13205_v41, %v11065_v31  ;;  %v5053_v24 = vcombine.high %v5049_v8, %v5049_v8  ;;  %v11082_v9 = vrot.slane %v5052_v46, %v10730_v17  ;;  %v11085_v58 = vrot.slane %v5049_v8, %v10730_v17 }
 0x483   :  { %v11088_v5 = vrot.slane %v5051_v42, %v10730_v17  ;;  %v6090_v59 = vadd.f32 %v6089_v2, %v5869_v4  ;;  %v5721_v35 = vmul.f32 %v10584_v36, %v11071_v20  ;;  %v5725_v27 = vmul.f32 %v10616_v32, %v11074_v51 }
 0x484   :  { %v5733_v7 = vmul.f32 %v13206_v12, %v11077_v16  ;;  %v11097_v56 = vrot.slane %v5053_v24, %v10730_v17  ;;  %v5729_v8 = vmul.f32 %v10648_v30, %v11082_v9  ;;  %v5737_v13 = vmul.f32 %v10588_v29, %v11085_v58 }
 0x485   :  { %v5741_v2 = vmul.f32 %v10620_v11, %v11088_v5  ;;  %v6091_v4 = vadd.f32 %v6090_v59, %v5873_v52  ;;  %v5973_v42 = vadd.f32 %v5721_v35, %v5717_v0  ;;  %v6094_v46 = vadd.f32 %v6093_v10, %v5858_v23 }
 0x486   :  { %v5718_v32 = vmul.f32 %v10538_v6, %v11065_v31  ;;  %v5745_v12 = vmul.f32 %v10652_v44, %v11097_v56  ;;  %v5722_v24 = vmul.f32 %v10592_v1, %v11071_v20  ;;  %v5726_v30 = vmul.f32 %v13207_v48, %v11074_v51  ;;  %v13215_v48 = vld [vmem:[#allocation145_spill] sm:$0xff] }
 0x487   :  { %v5730_v29 = vmul.f32 %v13208_v47, %v11082_v9  ;;  %6229 = vxpose.xlu1.b32.start [1/16] %v6091_v4, 128  ;;  %v5974_v11 = vadd.f32 %v5973_v42, %v5725_v27  ;;  %v6095_v52 = vadd.f32 %v6094_v46, %v5862_v49  ;;  %v5734_v10 = vmul.f32 %v13209_v54, %v11077_v16  ;;  %v13216_v49 = vld [vmem:[#allocation151_spill] sm:$0xff]  ;;  %v13217_v42 = vld [vmem:[#allocation73_spill] sm:$0xff] }
 0x488   :  { %v5738_v23 = vmul.f32 %v13210_v28, %v11085_v58  ;;  %v5742_v0 = vmul.f32 %v13211_v22, %v11088_v5  ;;  %v5746_v59 = vmul.f32 %v13212_v14, %v11097_v56  ;;  %v5980_v35 = vadd.f32 %v5722_v24, %v5718_v32  ;;  %v13218_v28 = vld [vmem:[#allocation31_spill] sm:$0xff]  ;;  %v13219_v22 = vld [vmem:[#allocation146_spill] sm:$0xff]  ;;  %v13220_v32 = vld [vmem:[#allocation152_spill] sm:$0xff] }
 0x489   :  { %v5855_v1 = vmul.f32 %v13215_v48, %v11003_v21  ;;  %v5975_v47 = vadd.f32 %v5974_v11, %v5729_v8  ;;  %v6096_v4 = vadd.f32 %v6095_v52, %v5866_v40  ;;  %v5859_v27 = vmul.f32 %v13216_v49, %v11012_v61 }
 0x48a   :  { %v5863_v46 = vmul.f32 %v13217_v42, %v11006_v26  ;;  %v5981_v54 = vadd.f32 %v5980_v35, %v5726_v30  ;;  %v5867_v44 = vmul.f32 %v13218_v28, %v11015_v60  ;;  %v5871_v6 = vmul.f32 %v13219_v22, %v11018_v34 }
 0x48b   :  { %v5875_v24 = vmul.f32 %v13220_v32, %v11028_v57  ;;  %v5976_v14 = vadd.f32 %v5975_v47, %v5733_v7  ;;  %v6097_v36 = vadd.f32 %v6096_v4, %v5870_v50  ;;  %v6099_v11 = vadd.f32 %v5851_v18, %v5847_v33  ;;  %v13223_v4 = vld [vmem:[#allocation147_spill] sm:$0xff] }
 0x48c   :  { %v5719_v40 = vmul.f32 %v13213_v39, %v11065_v31  ;;  %v5982_v8 = vadd.f32 %v5981_v54, %v5730_v29  ;;  %v5723_v52 = vmul.f32 %v13214_v53, %v11071_v20  ;;  %v5727_v30 = vmul.f32 %v13215_v48, %v11074_v51 }
 0x48d   :  { %v5731_v35 = vmul.f32 %v13216_v49, %v11082_v9  ;;  %v5977_v41 = vadd.f32 %v5976_v14, %v5737_v13  ;;  %v6098_v17 = vadd.f32 %v6097_v36, %v11058_v63  ;;  %v6100_v38 = vadd.f32 %v6099_v11, %v5855_v1  ;;  %v13221_v36 = vld [vmem:[#allocation76_spill] sm:$0xff]  ;;  %v13222_v13 = vld [vmem:[#allocation15_spill] sm:$0xff] }
 0x48e   :  { %v5735_v50 = vmul.f32 %v13217_v42, %v11077_v16  ;;  %v5983_v33 = vadd.f32 %v5982_v8, %v5734_v10  ;;  %v5739_v29 = vmul.f32 %v13218_v28, %v11085_v58  ;;  %v5743_v47 = vmul.f32 %v13219_v22, %v11088_v5  ;;  %v13224_v8 = vld [vmem:[#allocation34_spill] sm:$0xff] }
 0x48f   :  { %v5747_v54 = vmul.f32 %v13220_v32, %v11097_v56  ;;  %v5978_v18 = vadd.f32 %v5977_v41, %v5741_v2  ;;  %6230 = vxpose.xlu1.b32.cont [2/16] %v6098_v17, 128  ;;  %v6101_v7 = vadd.f32 %v6100_v38, %v5859_v27  ;;  %v5987_v14 = vadd.f32 %v5723_v52, %v5719_v40  ;;  %v13225_v17 = vld [vmem:[#allocation80_spill] sm:$0xff] }
 0x490   :  { %v5848_v1 = vmul.f32 %v13221_v36, %v10987_v62  ;;  %v5984_v63 = vadd.f32 %v5983_v33, %v5738_v23  ;;  %v5852_v10 = vmul.f32 %v13222_v13, %v11000_v37  ;;  %v5856_v11 = vmul.f32 %v13223_v4, %v11003_v21  ;;  %v13226_v2 = vld [vmem:[#allocation44_spill] sm:$0xff] }
 0x491   :  { %v5860_v22 = vmul.f32 %v13224_v8, %v11012_v61  ;;  %v5979_v28 = vadd.f32 %v5978_v18, %v5745_v12  ;;  %v6102_v42 = vadd.f32 %v6101_v7, %v5863_v46  ;;  %v5988_v32 = vadd.f32 %v5987_v14, %v5727_v30  ;;  %v13227_v23 = vld [vmem:[#allocation148_spill] sm:$0xff] }
 0x492   :  { %v5864_v38 = vmul.f32 %v13225_v17, %v11006_v26  ;;  %v5985_v41 = vadd.f32 %v5984_v63, %v5742_v0  ;;  %v5868_v62 = vmul.f32 %v13226_v2, %v11015_v60  ;;  %v5872_v27 = vmul.f32 %v13227_v23, %v11018_v34  ;;  %v13228_v37 = vld [vmem:[#allocation72_spill] sm:$0xff] }
 0x493   :  { %v5876_v40 = vmul.f32 %v13228_v37, %v11028_v57  ;;  %6197 = vxpose.xlu0.b32.start [1/16] %v5979_v28, 128  ;;  %v6103_v21 = vadd.f32 %v6102_v42, %v5867_v44  ;;  %v5989_v52 = vadd.f32 %v5988_v32, %v5731_v35  ;;  %v6106_v61 = vadd.f32 %v5852_v10, %v5848_v1  ;;  %v4794_v28 = vld [vmem:[#allocation7 + $0x28] sm:$0xff] }
 0x494   :  { %v5720_v12 = vmul.f32 %v13221_v36, %v11065_v31  ;;  %v5986_v46 = vadd.f32 %v5985_v41, %v5746_v59  ;;  %v5724_v26 = vmul.f32 %v13222_v13, %v11071_v20  ;;  %v5728_v60 = vmul.f32 %v13223_v4, %v11074_v51 }
 0x495   :  { %v5732_v34 = vmul.f32 %v13224_v8, %v11082_v9  ;;  %v6104_v0 = vadd.f32 %v6103_v21, %v5871_v6  ;;  %v5990_v30 = vadd.f32 %v5989_v52, %v5735_v50  ;;  %v6107_v57 = vadd.f32 %v6106_v61, %v5856_v11  ;;  %v13232_v61 = vld [vmem:[#allocation81_spill] sm:$0xff] }
 0x496   :  { %v5736_v44 = vmul.f32 %v13225_v17, %v11077_v16  ;;  %v5740_v31 = vmul.f32 %v13226_v2, %v11085_v58  ;;  %v5744_v59 = vmul.f32 %v13227_v23, %v11088_v5  ;;  %v5748_v20 = vmul.f32 %v13228_v37, %v11097_v56  ;;  %v13229_v5 = vld [vmem:[#allocation155_spill] sm:$0xff] }
 0x497   :  { %v5994_v51 = vadd.f32 %v5724_v26, %v5720_v12  ;;  %6198 = vxpose.xlu0.b32.cont [2/16] %v5986_v46, 128  ;;  %v6105_v42 = vadd.f32 %v6104_v0, %v5875_v24  ;;  %v5991_v9 = vadd.f32 %v5990_v30, %v5739_v29  ;;  %v6108_v6 = vadd.f32 %v6107_v57, %v5860_v22  ;;  %v13230_v24 = vld [vmem:[#allocation12_spill] sm:$0xff]  ;;  %v13231_v29 = vld [vmem:[#allocation25_spill] sm:$0xff]  ;;  %v13237_v57 = vld [vmem:[#allocation79_spill] sm:$0xff] }
 0x498   :  { %v4767_v32 = vmul.f32 %v10826_v55, %v10977_v25  ;;  %v4768_v16 = vmul.f32 %v10832_v43, %v10977_v25  ;;  %v4769_v58 = vmul.f32 %v10835_v3, %v10977_v25  ;;  %v4770_v50 = vmul.f32 %v13229_v5, %v10977_v25  ;;  %v13235_v26 = vld [vmem:[#allocation104_spill] sm:$0xff] }
 0x499   :  { %v5995_v35 = vadd.f32 %v5994_v51, %v5728_v60  ;;  %vm4802_vm9 = vcmp.ge.f32.partialorder %v4794_v28, 0.1  ;;  %6231 = vxpose.xlu1.b32.cont [3/16] %v6105_v42, 128  ;;  %v5992_v56 = vadd.f32 %v5991_v9, %v5743_v47  ;;  %v6109_v33 = vadd.f32 %v6108_v6, %v5864_v38  ;;  %v13238_v6 = vld [vmem:[#allocation68_spill] sm:$0xff] }
 0x49a   :  { %v4771_v22 = vmul.f32 %v13230_v24, %v10977_v25  ;;  %v4772_v55 = vmul.f32 %v13231_v29, %v10977_v25  ;;  %v4939_v7 = vrot.slane %v10996_v45, 7  ;;  %v4941_v43 = vrot.slane %v4767_v32, 6  ;;  %v13233_v45 = vld [vmem:[#allocation103_spill] sm:$0xff]  ;;  %v13243_v29 = vld [vmem:[#allocation93_spill] sm:$0xff] }
 0x49b   :  { %v5996_v18 = vadd.f32 %v5995_v35, %v5732_v34  ;;  %v4943_v14 = vrot.slane %v4768_v16, 5  ;;  %v5993_v1 = vadd.f32 %v5992_v56, %v5747_v54  ;;  %v6110_v3 = vadd.f32 %v6109_v33, %v5868_v62  ;;  %v13236_v34 = vld [vmem:[#allocation105_spill] sm:$0xff]  ;;  %v13240_v16 = vld [vmem:[#allocation84_spill] sm:$0xff] }
 0x49c   :  { %v4945_v63 = vrot.slane %v4769_v58, 4  ;;  %v4947_v10 = vrot.slane %v4770_v50, 3  ;;  %v4940_v47 = vsel %vm4503_vm0, %v4939_v7, %v10992_v19  ;;  %v4949_v38 = vrot.slane %v4771_v22, 2  ;;  %v13241_v50 = vld [vmem:[#allocation98_spill] sm:$0xff]  ;;  %v13245_v7 = vld [vmem:[#allocation139_spill] sm:$0xff] }
 0x49d   :  { %v5997_v11 = vadd.f32 %v5996_v18, %v5736_v44  ;;  %v4951_v41 = vrot.slane %v4772_v55, 1  ;;  %6199 = vxpose.xlu0.b32.cont [3/16] %v5993_v1, 128  ;;  %v6111_v21 = vadd.f32 %v6110_v3, %v5872_v27  ;;  %v4942_v52 = vsel %vm4506_vm1, %v4941_v43, %v4940_v47  ;;  %v13247_v1 = vld [vmem:[#allocation70_spill] sm:$0xff] }
 0x49e   :  { %v4639_v25 = vrot.slane %v10979_v15, 1  ;;  %v13234_v12 = vrot.slane %v13233_v45, 4  ;;  %v4944_v46 = vsel %vm4509_vm2, %v4943_v14, %v4942_v52  ;;  %v4601_v60 = vrot.slane %v13235_v26, 3  ;;  %v13250_v52 = vld [vmem:[#allocation66_spill] sm:$0xff]  ;;  %v13277_v45 = vld [vmem:[#allocation28_spill] sm:$0xff] }
 0x49f   :  { %v5998_v62 = vadd.f32 %v5997_v11, %v5740_v31  ;;  %v4603_v19 = vrot.slane %v13236_v34, 2  ;;  %v6112_v0 = vadd.f32 %v6111_v21, %v5876_v40  ;;  %v4946_v30 = vsel %vm4512_vm3, %v4945_v63, %v4944_v46  ;;  %v13239_v31 = vld [vmem:[#allocation82_spill] sm:$0xff]  ;;  %v13276_v34 = vld [vmem:[#allocation21_spill] sm:$0xff] }
 0x4a0   :  { %v4600_v54 = vsel %vm4512_vm3, %v13234_v12, %v13232_v61  ;;  %v4640_v27 = vadd.f32 %v4639_v25, %v10979_v15  ;;  %v4605_v44 = vrot.slane %v13237_v57, 1  ;;  %v4948_v42 = vsel %vm4515_vm4, %v4947_v10, %v4946_v30  ;;  %v13248_v10 = vld [vmem:[#allocation26_spill] sm:$0xff]  ;;  %v13255_v30 = vld [vmem:[#allocation75_spill] sm:$0xff] }
 0x4a1   :  { %v5999_v51 = vadd.f32 %v5998_v62, %v5744_v59  ;;  %v4602_v9 = vsel %vm4515_vm4, %v4601_v60, %v4600_v54  ;;  %v4268_v32 = vsub.f32 %v13239_v31, %v13238_v6  ;;  %6232 = vxpose.xlu1.b32.cont [4/16] %v6112_v0, 128  ;;  %v4950_v35 = vsel %vm4518_vm5, %v4949_v38, %v4948_v42  ;;  %v13252_v12 = vld [vmem:[#allocation38_spill] sm:$0xff] }
 0x4a2   :  { %7846 = vrcp.f32 %v4640_v27  ;;  %v4604_v40 = vsel %vm4518_vm5, %v4603_v19, %v4602_v9  ;;  %v4269_v58 = vsub.f32 %v13240_v16, %v13238_v6  ;;  %v4952_v5 = vsel %vm4521_vm6, %v4951_v41, %v4950_v35 }
 0x4a3   :  { %v6000_v15 = vadd.f32 %v5999_v51, %v5748_v20  ;;  %v4606_v59 = vsel %vm4521_vm6, %v4605_v44, %v4604_v40  ;;  %v13242_v56 = vsub.f32 %v13241_v50, %v13238_v6  ;;  %v4994_v24 = vsel %vm4802_vm9, %v4952_v5, 0.0  ;;  %v13258_v50 = vld [vmem:[#allocation42_spill] sm:$0xff] }
 0x4a4   :  { %v4665_v22 = vrot.slane %v4606_v59, 4  ;;  %v13244_v55 = vsub.f32 %v13243_v29, %v13238_v6  ;;  %v13246_v43 = vsub.f32 %v13245_v7, %v13238_v6  ;;  %v5250_v20 = vcombine.high %v4994_v24, %v4994_v24  ;;  %v13260_v29 = vld [vmem:[#allocation58_spill] sm:$0xff]  ;;  %v13261_v7 = vld [vmem:[#allocation23_spill] sm:$0xff] }
 0x4a5   :  { %v4342_v33 = vmul.f32 1.442695, %v13242_v56  ;;  %6200 = vxpose.xlu0.b32.cont [4/16] %v6000_v15, 128  ;;  %v5257_v3 = vrot.slane %v4994_v24, %v13247_v1  ;;  %v13249_v11 = vsub.f32 %v13248_v10, %v13238_v6  ;;  %v13251_v25 = vsub.f32 %v13250_v52, %v13238_v6  ;;  %v4790_v10 = vld [vmem:[#allocation7 + $0x8] sm:$0xff] }
 0x4a6   :  { %v4344_v18 = vmul.f32 1.442695, %v13244_v55  ;;  %v4346_v14 = vmul.f32 1.442695, %v13246_v43  ;;  %v4666_v63 = vadd.f32 %v4665_v22, %v4606_v59  ;;  %v5264_v47 = vrot.slane %v5250_v20, %v13247_v1 }
 0x4a7   :  { %7848 = vpow2.f32 %v4342_v33  ;;  %v4348_v28 = vmul.f32 1.442695, %v13249_v11  ;;  %v5265_v38 = vcombine.high %v5257_v3, %v5257_v3  ;;  %v5273_v41 = vrot.slane %v5257_v3, %v13247_v1  ;;  %v13259_v33 = vld [vmem:[#allocation83_spill] sm:$0xff]  ;;  %v13263_v3 = vld [vmem:[#allocation22_spill] sm:$0xff] }
 0x4a8   :  { %7850 = vpow2.f32 %v4344_v18  ;;  %v4667_v21 = vrot.slane %v4666_v63, 2  ;;  %v4350_v61 = vmul.f32 1.442695, %v13251_v25  ;;  %v13253_v54 = vsub.f32 %v13252_v12, %v13238_v6 }
 0x4a9   :  { %7852 = vpow2.f32 %v4346_v14  ;;  %v5266_v46 = vcombine.high %v5264_v47, %v5264_v47  ;;  %v5280_v60 = vrot.slane %v5264_v47, %v13247_v1  ;;  %v5287_v19 = vrot.slane %v5265_v38, %v13247_v1  ;;  %v13262_v14 = vld [vmem:[#allocation149_spill] sm:$0xff]  ;;  %v13266_v38 = vld [vmem:[#allocation16_spill] sm:$0xff] }
 0x4aa   :  { %v11243_v62 = vmul.f32 1.442695, %v13253_v54  ;;  %v5295_v0 = vcombine.high %v5273_v41, %v5273_v41  ;;  %v11248_v27 = vrot.slane %v5273_v41, %v13255_v30  ;;  %7854 = vpow2.f32 %v4348_v28  ;;  %v13265_v28 = vld [vmem:[#allocation85_spill] sm:$0xff]  ;;  %v13269_v54 = vld [vmem:[#allocation86_spill] sm:$0xff] }
 0x4ab   :  { %v11250_v44 = vmul.f32 1.442695, %v4268_v32  ;;  %v11252_v51 = vmul.f32 1.442695, %v4269_v58  ;;  %v5294_v42 = vrot.slane %v5266_v46, %v13247_v1  ;;  %v5296_v9 = vcombine.high %v5280_v60, %v5280_v60 }
 0x4ac   :  { %13254 = vst [vmem:[#allocation87_spill] sm:$0xff] %v11243_v62  ;;  %v5297_v6 = vcombine.high %v5287_v19, %v5287_v19  ;;  %v11256_v31 = vrot.slane %v5287_v19, %v13255_v30  ;;  %v7847_v35 = vpop.eup %7846  ;;  %v11259_v40 = vrot.slane %v5295_v0, %v13255_v30  ;;  %v11262_v16 = vrot.slane %v5280_v60, %v13255_v30  ;;  %v13270_v60 = vld [vmem:[#allocation47_spill] sm:$0xff]  ;;  %v13271_v0 = vld [vmem:[#allocation64_spill] sm:$0xff] }
 0x4ad   :  { %13256 = vst [vmem:[#allocation89_spill] sm:$0xff] %v11250_v44  ;;  %13257 = vst [vmem:[#allocation91_spill] sm:$0xff] %v11252_v51  ;;  %v11264_v15 = vadd.f32 %v4667_v21, %v4666_v63  ;;  %7856 = vpow2.f32 %v4350_v61  ;;  %v5298_v32 = vcombine.high %v5294_v42, %v5294_v42  ;;  %v11270_v5 = vrot.slane %v5294_v42, %v13255_v30  ;;  %v13268_v61 = vld [vmem:[#allocation150_spill] sm:$0xff] }
 0x4ae   :  { %v11267_v58 = vrot.slane %v5297_v6, %v13255_v30  ;;  %v11273_v59 = vrot.slane %v5296_v9, %v13255_v30  ;;  %v5877_v56 = vmul.f32 %v13258_v50, %v11248_v27  ;;  %v5881_v24 = vmul.f32 %v13259_v33, %v11256_v31 }
 0x4af   :  { %v4680_v22 = vmul.f32 1.1111112, %v7847_v35  ;;  %v5878_v55 = vmul.f32 %v13260_v29, %v11248_v27  ;;  %v11282_v18 = vrot.slane %v5298_v32, %v13255_v30  ;;  %v5885_v43 = vmul.f32 %v13261_v7, %v11259_v40  ;;  %v13273_v35 = vld [vmem:[#allocation14_spill] sm:$0xff] }
 0x4b0   :  { %v5889_v20 = vmul.f32 %v13262_v14, %v11267_v58  ;;  %v5893_v63 = vmul.f32 %v13263_v3, %v11262_v16  ;;  %v5897_v47 = vmul.f32 %v13265_v28, %v11270_v5  ;;  %v5901_v41 = vmul.f32 %v13266_v38, %v11273_v59 }
 0x4b1   :  { %v11290_v11 = vpop.eup %7848  ;;  %v6113_v21 = vadd.f32 %v5881_v24, %v5877_v56  ;;  %v4700_v52 = vrot.slane %v4680_v22, %v13255_v30  ;;  %v5905_v12 = vmul.f32 %v13268_v61, %v11282_v18  ;;  %v5882_v46 = vmul.f32 %v13269_v54, %v11256_v31  ;;  %v13274_v56 = vld [vmem:[#allocation20_spill] sm:$0xff]  ;;  %v13275_v22 = vld [vmem:[#allocation17_spill] sm:$0xff] }
 0x4b2   :  { %13264 = vst [vmem:[#allocation92_spill] sm:$0xff] %v11290_v11  ;;  %v11297_v25 = vpop.eup %7850  ;;  %v5886_v19 = vmul.f32 %v13270_v60, %v11259_v40  ;;  %v5890_v42 = vmul.f32 %v13271_v0, %v11267_v58  ;;  %vm4798_vm10 = vcmp.ge.f32.partialorder %v4790_v10, 0.1  ;;  %v13278_v11 = vld [vmem:[#allocation56_spill] sm:$0xff]  ;;  %v5892_v10 = vmul.f32 %v13224_v8, %v11267_v58 }
 0x4b3   :  { %13267 = vst [vmem:[#allocation37_spill] sm:$0xff] %v11297_v25  ;;  %v11307_v9 = vpop.eup %7852  ;;  %v6114_v6 = vadd.f32 %v6113_v21, %v5885_v43  ;;  %v4733_v32 = vmul.f32 %v13273_v35, %v4700_v52  ;;  %v4734_v24 = vmul.f32 %v13274_v56, %v4700_v52  ;;  %v4735_v57 = vmul.f32 %v13275_v22, %v4700_v52  ;;  %v13279_v25 = vld [vmem:[#allocation32_spill] sm:$0xff]  ;;  %v13282_v22 = vld [vmem:[#allocation59_spill] sm:$0xff] }
 0x4b4   :  { %13272 = vst [vmem:[#allocation39_spill] sm:$0xff] %v11307_v9  ;;  %v4736_v26 = vmul.f32 %v13276_v34, %v4700_v52  ;;  %v4737_v51 = vmul.f32 %v13277_v45, %v4700_v52  ;;  %v4738_v44 = vmul.f32 %v13278_v11, %v4700_v52  ;;  %v4739_v62 = vmul.f32 %v13279_v25, %v4700_v52  ;;  %v11316_v61 = vpop.eup %7854  ;;  %v13281_v9 = vld [vmem:[#allocation157_spill] sm:$0xff]  ;;  %v13283_v34 = vld [vmem:[#allocation27_spill] sm:$0xff] }
 0x4b5   :  { %13280 = vst [vmem:[#allocation40_spill] sm:$0xff] %v11316_v61  ;;  %v6115_v0 = vadd.f32 %v6114_v6, %v5889_v20  ;;  %v4740_v43 = vmul.f32 %v13281_v9, %v4700_v52  ;;  %v4883_v21 = vrot.slane %v4734_v24, 7  ;;  %v4885_v35 = vrot.slane %v4735_v57, 6  ;;  %v13284_v57 = vld [vmem:[#allocation52_spill] sm:$0xff]  ;;  %v13285_v24 = vld [vmem:[#allocation65_spill] sm:$0xff] }
 0x4b6   :  { %v4887_v60 = vrot.slane %v4736_v26, 5  ;;  %v4889_v56 = vrot.slane %v4737_v51, 4  ;;  %v5894_v38 = vmul.f32 %v13282_v22, %v11262_v16  ;;  %v5898_v28 = vmul.f32 %v13283_v34, %v11270_v5 }
 0x4b7   :  { %v11323_v45 = vpop.eup %7856  ;;  %v6116_v11 = vadd.f32 %v6115_v0, %v5893_v63  ;;  %v4884_v25 = vsel %vm4503_vm0, %v4883_v21, %v4733_v32  ;;  %v4891_v3 = vrot.slane %v4738_v44, 3  ;;  %v4893_v61 = vrot.slane %v4739_v62, 2 }
 0x4b8   :  { %v4886_v20 = vsel %vm4506_vm1, %v4885_v35, %v4884_v25  ;;  %v4895_v52 = vrot.slane %v4740_v43, 1  ;;  %v5902_v26 = vmul.f32 %v13284_v57, %v11273_v59  ;;  %v6120_v51 = vadd.f32 %v5882_v46, %v5878_v55  ;;  %v13286_v46 = vld [vmem:[#allocation73_spill] sm:$0xff] }
 0x4b9   :  { %v6117_v9 = vadd.f32 %v6116_v11, %v5897_v47  ;;  %v4888_v6 = vsel %vm4509_vm2, %v4887_v60, %v4886_v20  ;;  %v5906_v34 = vmul.f32 %v13285_v24, %v11282_v18  ;;  %v5883_v63 = vmul.f32 %v13214_v53, %v11256_v31 }
 0x4ba   :  { %v4890_v0 = vsel %vm4512_vm3, %v4889_v56, %v4888_v6  ;;  %v6121_v44 = vadd.f32 %v6120_v51, %v5886_v19  ;;  %v5879_v62 = vmul.f32 %v13213_v39, %v11248_v27  ;;  %v5887_v32 = vmul.f32 %v13215_v48, %v11259_v40  ;;  %v13287_v19 = vld [vmem:[#allocation31_spill] sm:$0xff] }
 0x4bb   :  { %v6118_v43 = vadd.f32 %v6117_v9, %v5901_v41  ;;  %v4892_v55 = vsel %vm4515_vm4, %v4891_v3, %v4890_v0  ;;  %v5891_v47 = vmul.f32 %v13216_v49, %v11267_v58  ;;  %v5895_v60 = vmul.f32 %v13286_v46, %v11262_v16  ;;  %v13288_v41 = vld [vmem:[#allocation146_spill] sm:$0xff]  ;;  %v13289_v3 = vld [vmem:[#allocation152_spill] sm:$0xff] }
 0x4bc   :  { %v4894_v21 = vsel %vm4518_vm5, %v4893_v61, %v4892_v55  ;;  %v6122_v35 = vadd.f32 %v6121_v44, %v5890_v42  ;;  %v5899_v56 = vmul.f32 %v13287_v19, %v11270_v5  ;;  %v6127_v11 = vadd.f32 %v5883_v63, %v5879_v62 }
 0x4bd   :  { %v6119_v25 = vadd.f32 %v6118_v43, %v5905_v12  ;;  %v4896_v20 = vsel %vm4521_vm6, %v4895_v52, %v4894_v21  ;;  %v11350_v51 = vmul.f32 %v13288_v41, %v11273_v59  ;;  %v11354_v9 = vmul.f32 %v13289_v3, %v11282_v18 }
 0x4be   :  { %v4990_v6 = vsel %vm4798_vm10, %v4896_v20, 0.0  ;;  %v6123_v0 = vadd.f32 %v6122_v35, %v5894_v38  ;;  %v6128_v61 = vadd.f32 %v6127_v11, %v5887_v32  ;;  %v5884_v42 = vmul.f32 %v13222_v13, %v11256_v31 }
 0x4bf   :  { %6233 = vxpose.xlu1.b32.cont [5/16] %v6119_v25, 128  ;;  %v5054_v63 = vcombine.high %v4990_v6, %v4990_v6  ;;  %v5061_v12 = vrot.slane %v4990_v6, %v13247_v1  ;;  %v5880_v52 = vmul.f32 %v13221_v36, %v11248_v27  ;;  %v5888_v44 = vmul.f32 %v13223_v4, %v11259_v40 }
 0x4c0   :  { %v6124_v62 = vadd.f32 %v6123_v0, %v5898_v28  ;;  %v6129_v43 = vadd.f32 %v6128_v61, %v5891_v47  ;;  %v11368_v38 = vmul.f32 %v13225_v17, %v11262_v16  ;;  %v11374_v27 = vmul.f32 %v13226_v2, %v11270_v5 }
 0x4c1   :  { %v5068_v31 = vrot.slane %v5054_v63, %v13247_v1  ;;  %v5069_v32 = vcombine.high %v5061_v12, %v5061_v12  ;;  %v5077_v55 = vrot.slane %v5061_v12, %v13247_v1  ;;  %v11378_v28 = vmul.f32 %v13227_v23, %v11273_v59 }
 0x4c2   :  { %v6125_v21 = vadd.f32 %v6124_v62, %v5902_v26  ;;  %v6130_v40 = vadd.f32 %v6129_v43, %v5895_v60  ;;  %v6134_v58 = vadd.f32 %v5884_v42, %v5880_v52  ;;  %v11385_v5 = vmul.f32 %v13228_v37, %v11282_v18 }
 0x4c3   :  { %v5070_v47 = vcombine.high %v5068_v31, %v5068_v31  ;;  %v5084_v16 = vrot.slane %v5068_v31, %v13247_v1  ;;  %v5091_v35 = vrot.slane %v5069_v32, %v13247_v1  ;;  %v5099_v11 = vcombine.high %v5077_v55, %v5077_v55 }
 0x4c4   :  { %v5432_v25 = vrot.slane %v5077_v55, %v13255_v30  ;;  %v6126_v20 = vadd.f32 %v6125_v21, %v5906_v34  ;;  %v6131_v63 = vadd.f32 %v6130_v40, %v5899_v56  ;;  %v6135_v12 = vadd.f32 %v6134_v58, %v5888_v44  ;;  %v13290_v40 = vld [vmem:[#allocation22_spill] sm:$0xff] }
 0x4c5   :  { %v5098_v60 = vrot.slane %v5070_v47, %v13247_v1  ;;  %v5100_v59 = vcombine.high %v5084_v16, %v5084_v16  ;;  %v5101_v6 = vcombine.high %v5091_v35, %v5091_v35  ;;  %v5436_v0 = vrot.slane %v5091_v35, %v13255_v30  ;;  %v13291_v47 = vld [vmem:[#allocation85_spill] sm:$0xff]  ;;  %v13292_v35 = vld [vmem:[#allocation16_spill] sm:$0xff] }
 0x4c6   :  { %v5440_v61 = vrot.slane %v5099_v11, %v13255_v30  ;;  %v5448_v42 = vrot.slane %v5084_v16, %v13255_v30  ;;  %6234 = vxpose.xlu1.b32.cont [6/16] %v6126_v20, 128  ;;  %v5749_v43 = vmul.f32 %v13258_v50, %v5432_v25  ;;  %v5750_v32 = vmul.f32 %v13260_v29, %v5432_v25  ;;  %v13295_v29 = vld [vmem:[#allocation64_spill] sm:$0xff] }
 0x4c7   :  { %v5102_v34 = vcombine.high %v5098_v60, %v5098_v60  ;;  %v5444_v52 = vrot.slane %v5101_v6, %v13255_v30  ;;  %v5452_v18 = vrot.slane %v5098_v60, %v13255_v30  ;;  %v11395_v62 = vrot.slane %v5100_v59, %v13255_v30  ;;  %v13293_v60 = vld [vmem:[#allocation47_spill] sm:$0xff]  ;;  %v13294_v6 = vld [vmem:[#allocation150_spill] sm:$0xff] }
 0x4c8   :  { %v5753_v31 = vmul.f32 %v13259_v33, %v5436_v0  ;;  %v5754_v55 = vmul.f32 %v13269_v54, %v5436_v0  ;;  %v5757_v56 = vmul.f32 %v13261_v7, %v5440_v61  ;;  %v5765_v58 = vmul.f32 %v13290_v40, %v5448_v42  ;;  %v13296_v7 = vld [vmem:[#allocation27_spill] sm:$0xff] }
 0x4c9   :  { %v11402_v21 = vrot.slane %v5102_v34, %v13255_v30  ;;  %v5761_v44 = vmul.f32 %v13262_v14, %v5444_v52  ;;  %v5769_v16 = vmul.f32 %v13291_v47, %v5452_v18  ;;  %v5773_v11 = vmul.f32 %v13292_v35, %v11395_v62 }
 0x4ca   :  { %v6001_v20 = vadd.f32 %v5753_v31, %v5749_v43  ;;  %v5758_v59 = vmul.f32 %v13293_v60, %v5440_v61  ;;  %v5762_v34 = vmul.f32 %v13295_v29, %v5444_v52  ;;  %v5766_v54 = vmul.f32 %v13282_v22, %v5448_v42 }
 0x4cb   :  { %v5777_v26 = vmul.f32 %v13294_v6, %v11402_v21  ;;  %v5770_v33 = vmul.f32 %v13296_v7, %v5452_v18  ;;  %v5774_v40 = vmul.f32 %v13284_v57, %v11395_v62  ;;  %v6008_v47 = vadd.f32 %v5754_v55, %v5750_v32 }
 0x4cc   :  { %v6002_v14 = vadd.f32 %v6001_v20, %v5757_v56  ;;  %v6132_v50 = vadd.f32 %v6131_v63, %v11350_v51  ;;  %v5778_v43 = vmul.f32 %v13285_v24, %v11402_v21  ;;  %v5751_v31 = vmul.f32 %v13213_v39, %v5432_v25 }
 0x4cd   :  { %v5755_v6 = vmul.f32 %v13214_v53, %v5436_v0  ;;  %v5759_v29 = vmul.f32 %v13215_v48, %v5440_v61  ;;  %v6009_v22 = vadd.f32 %v6008_v47, %v5758_v59  ;;  %v5763_v56 = vmul.f32 %v13216_v49, %v5444_v52 }
 0x4ce   :  { %v6003_v60 = vadd.f32 %v6002_v14, %v5761_v44  ;;  %v6133_v7 = vadd.f32 %v6132_v50, %v11354_v9  ;;  %v5767_v20 = vmul.f32 %v13286_v46, %v5448_v42  ;;  %v5771_v32 = vmul.f32 %v13287_v19, %v5452_v18 }
 0x4cf   :  { %v6015_v51 = vadd.f32 %v5755_v6, %v5751_v31  ;;  %v6136_v63 = vadd.f32 %v6135_v12, %v5892_v10  ;;  %v6010_v24 = vadd.f32 %v6009_v22, %v5762_v34  ;;  %v5775_v57 = vmul.f32 %v13288_v41, %v11395_v62 }
 0x4d0   :  { %v6004_v55 = vadd.f32 %v6003_v60, %v5765_v58  ;;  %6235 = vxpose.xlu1.b32.cont [7/16] %v6133_v7, 128  ;;  %v5756_v48 = vmul.f32 %v13222_v13, %v5436_v0  ;;  %v5779_v14 = vmul.f32 %v13289_v3, %v11402_v21  ;;  %v5752_v44 = vmul.f32 %v13221_v36, %v5432_v25 }
 0x4d1   :  { %v6016_v50 = vadd.f32 %v6015_v51, %v5759_v29  ;;  %v6137_v9 = vadd.f32 %v6136_v63, %v11368_v38  ;;  %v6011_v59 = vadd.f32 %v6010_v24, %v5766_v54  ;;  %v5760_v10 = vmul.f32 %v13223_v4, %v5440_v61  ;;  %v13298_v24 = vld [vmem:[#allocation87_spill] sm:$0xff]  ;;  %v13299_v61 = vld [vmem:[#allocation37_spill] sm:$0xff] }
 0x4d2   :  { %v6005_v47 = vadd.f32 %v6004_v55, %v5769_v16  ;;  %v5764_v22 = vmul.f32 %v13224_v8, %v5444_v52  ;;  %v5768_v58 = vmul.f32 %v13225_v17, %v5448_v42  ;;  %v5772_v0 = vmul.f32 %v13226_v2, %v5452_v18  ;;  %v13305_v55 = vld [vmem:[#allocation78_spill] sm:$0xff] }
 0x4d3   :  { %v6017_v7 = vadd.f32 %v6016_v50, %v5763_v56  ;;  %v6138_v12 = vadd.f32 %v6137_v9, %v11374_v27  ;;  %v6012_v6 = vadd.f32 %v6011_v59, %v5770_v33  ;;  %v6022_v29 = vadd.f32 %v5756_v48, %v5752_v44  ;;  %v13300_v33 = vld [vmem:[#allocation89_spill] sm:$0xff]  ;;  %v13301_v48 = vld [vmem:[#allocation92_spill] sm:$0xff] }
 0x4d4   :  { %v6006_v60 = vadd.f32 %v6005_v47, %v5773_v11  ;;  %v13297_v38 = vrot.slane %v11264_v15, 1  ;;  %7858 = vpow2.f32 %v13298_v24  ;;  %v4537_v52 = vrot.slane %v13299_v61, 7  ;;  %v13307_v47 = vld [vmem:[#allocation101_spill] sm:$0xff]  ;;  %v13308_v59 = vld [vmem:[#allocation144_spill] sm:$0xff] }
 0x4d5   :  { %v6018_v16 = vadd.f32 %v6017_v7, %v5767_v20  ;;  %v6139_v54 = vadd.f32 %v6138_v12, %v11378_v28  ;;  %v6013_v27 = vadd.f32 %v6012_v6, %v5774_v40  ;;  %v6023_v31 = vadd.f32 %v6022_v29, %v5760_v10  ;;  %v13302_v28 = vld [vmem:[#allocation91_spill] sm:$0xff] }
 0x4d6   :  { %v4670_v25 = vadd.f32 %v13297_v38, %v11264_v15  ;;  %v6007_v34 = vadd.f32 %v6006_v60, %v5777_v26  ;;  %v4538_v11 = vsel %vm4503_vm0, %v4537_v52, %v13301_v48  ;;  %v13303_v20 = vld [vmem:[#allocation39_spill] sm:$0xff]  ;;  %v13304_v26 = vld [vmem:[#allocation40_spill] sm:$0xff]  ;;  %v4304_v10 = vsub.f32 %v13308_v59, %v13305_v55  ;;  %v13310_v60 = vld [vmem:[#allocation77_spill] sm:$0xff] }
 0x4d7   :  { %v6019_v42 = vadd.f32 %v6018_v16, %v5771_v32  ;;  %v6140_v18 = vadd.f32 %v6139_v54, %v11385_v5  ;;  %v6014_v15 = vadd.f32 %v6013_v27, %v5778_v43  ;;  %v6024_v56 = vadd.f32 %v6023_v31, %v5764_v22  ;;  %v13306_v5 = vld [vmem:[#allocation57_spill] sm:$0xff]  ;;  %v13309_v7 = vld [vmem:[#allocation19_spill] sm:$0xff]  ;;  %v13312_v16 = vld [vmem:[#allocation48_spill] sm:$0xff] }
 0x4d8   :  { %7860 = vrcp.f32 %v4670_v25  ;;  %6201 = vxpose.xlu0.b32.cont [5/16] %v6007_v34, 128  ;;  %v4539_v51 = vrot.slane %v13303_v20, 6  ;;  %v4541_v40 = vrot.slane %v13304_v26, 5  ;;  %v4543_v32 = vrot.slane %v11323_v45, 4  ;;  %v13311_v38 = vld [vmem:[#allocation51_spill] sm:$0xff] }
 0x4d9   :  { %7862 = vpow2.f32 %v13300_v33  ;;  %v6020_v63 = vadd.f32 %v6019_v42, %v5775_v57  ;;  %6236 = vxpose.xlu1.b32.cont [8/16] %v6140_v18, 128  ;;  %v4302_v50 = vsub.f32 %v13306_v5, %v13305_v55  ;;  %v6025_v9 = vadd.f32 %v6024_v56, %v5768_v58  ;;  %v13316_v5 = vld [vmem:[#allocation94_spill] sm:$0xff] }
 0x4da   :  { %7864 = vpow2.f32 %v13302_v28  ;;  %v4540_v44 = vsel %vm4506_vm1, %v4539_v51, %v4538_v11  ;;  %v4303_v43 = vsub.f32 %v13307_v47, %v13305_v55  ;;  %v5776_v57 = vmul.f32 %v13227_v23, %v11395_v62  ;;  %v13313_v62 = vld [vmem:[#allocation54_spill] sm:$0xff] }
 0x4db   :  { %v4542_v22 = vsel %vm4509_vm2, %v4541_v40, %v4540_v44  ;;  %v4305_v12 = vsub.f32 %v13309_v7, %v13305_v55  ;;  %v4306_v6 = vsub.f32 %v13310_v60, %v13305_v55  ;;  %v6026_v58 = vadd.f32 %v6025_v9, %v5772_v0  ;;  %v13317_v9 = vld [vmem:[#allocation140_spill] sm:$0xff] }
 0x4dc   :  { %6202 = vxpose.xlu0.b32.cont [6/16] %v6014_v15, 128  ;;  %v4544_v29 = vsel %vm4512_vm3, %v4543_v32, %v4542_v22  ;;  %v4307_v25 = vsub.f32 %v13311_v38, %v13305_v55  ;;  %v4308_v54 = vsub.f32 %v13312_v16, %v13305_v55  ;;  %v4309_v24 = vsub.f32 %v13313_v62, %v13305_v55  ;;  %v13314_v32 = vld [vmem:[#allocation74_spill] sm:$0xff]  ;;  %v13321_v38 = vld [vmem:[#allocation156_spill] sm:$0xff]  ;;  %v13323_v62 = vld [vmem:[#allocation63_spill] sm:$0xff] }
 0x4dd   :  { %v4422_v52 = vmul.f32 1.442695, %v4302_v50  ;;  %v4424_v34 = vmul.f32 1.442695, %v4303_v43  ;;  %v4426_v27 = vmul.f32 1.442695, %v4304_v10  ;;  %v6021_v31 = vadd.f32 %v6020_v63, %v5779_v14 }
 0x4de   :  { %v5780_v42 = vmul.f32 %v13228_v37, %v11402_v21  ;;  %v6027_v18 = vadd.f32 %v6026_v58, %v5776_v57  ;;  %v4428_v0 = vmul.f32 1.442695, %v4305_v12  ;;  %v11477_v33 = vpop.eup %7858  ;;  %v4430_v11 = vmul.f32 1.442695, %v4306_v6  ;;  %v13315_v55 = vld [vmem:[#allocation18_spill] sm:$0xff]  ;;  %v13318_v10 = vld [vmem:[#allocation36_spill] sm:$0xff] }
 0x4df   :  { %7866 = vpow2.f32 %v4422_v52  ;;  %v4432_v15 = vmul.f32 1.442695, %v4307_v25  ;;  %v4434_v56 = vmul.f32 1.442695, %v4308_v54  ;;  %v4545_v40 = vrot.slane %v11477_v33, 3  ;;  %v13319_v12 = vld [vmem:[#allocation67_spill] sm:$0xff] }
 0x4e0   :  { %6203 = vxpose.xlu0.b32.cont [7/16] %v6021_v31, 128  ;;  %v6028_v51 = vadd.f32 %v6027_v18, %v5780_v42  ;;  %7868 = vpow2.f32 %v4424_v34  ;;  %v4270_v14 = vsub.f32 %v13315_v55, %v13314_v32  ;;  %v4271_v50 = vsub.f32 %v13316_v5, %v13314_v32  ;;  %v13320_v58 = vld [vmem:[#allocation60_spill] sm:$0xff]  ;;  %v13322_v16 = vld [vmem:[#allocation62_spill] sm:$0xff]  ;;  %v13325_v31 = vld [vmem:[#allocation71_spill] sm:$0xff] }
 0x4e1   :  { %7870 = vpow2.f32 %v4426_v27  ;;  %v4272_v44 = vsub.f32 %v13317_v9, %v13314_v32  ;;  %v4546_v43 = vsel %vm4515_vm4, %v4545_v40, %v4544_v29  ;;  %v13324_v34 = vld [vmem:[#allocation102_spill] sm:$0xff]  ;;  %v13326_v18 = vld [vmem:[#allocation103_spill] sm:$0xff]  ;;  %v4436_v60 = vmul.f32 1.442695, %v4309_v24 }
 0x4e2   :  { %v7861_v28 = vpop.eup %7860  ;;  %7872 = vpow2.f32 %v4428_v0  ;;  %v13329_v40 = vld [vmem:[#allocation79_spill] sm:$0xff]  ;;  %v13339_v9 = vsub.f32 %v13319_v12, %v13314_v32  ;;  %v4791_v37 = vld [vmem:[#allocation7 + $0x10] sm:$0xff] }
 0x4e3   :  { %v11482_v63 = vpop.eup %7862  ;;  %v4690_v21 = vmul.f32 1.1111112, %v7861_v28  ;;  %7874 = vpow2.f32 %v4430_v11  ;;  %v13327_v11 = vld [vmem:[#allocation104_spill] sm:$0xff]  ;;  %v4362_v5 = vmul.f32 1.442695, %v4272_v44 }
 0x4e4   :  { %v11488_v47 = vpop.eup %7864  ;;  %v4547_v59 = vrot.slane %v11482_v63, 2  ;;  %6204 = vxpose.xlu0.b32.cont [8/16] %v6028_v51, 128  ;;  %7876 = vpow2.f32 %v4432_v15  ;;  %v13328_v51 = vld [vmem:[#allocation105_spill] sm:$0xff]  ;;  %v4366_v44 = vmul.f32 1.442695, %v13339_v9  ;;  %vm4799_vm12 = vcmp.ge.f32.partialorder %v4791_v37, 0.1 }
 0x4e5   :  { %v4720_v22 = vrot.slane %v4690_v21, %v13255_v30  ;;  %v4549_v7 = vrot.slane %v11488_v47, 1  ;;  %7878 = vpow2.f32 %v4434_v56 }
 0x4e6   :  { %v4548_v6 = vsel %vm4518_vm5, %v4547_v59, %v4546_v43  ;;  %v4795_v43 = vld [vmem:[#allocation7 + $0x30] sm:$0xff]  ;;  %7880 = vpow2.f32 %v4436_v60 }
 0x4e7   :  { %v4773_v54 = vmul.f32 %v13322_v16, %v4720_v22  ;;  %v4774_v52 = vmul.f32 %v13323_v62, %v4720_v22  ;;  %v4775_v27 = vmul.f32 %v13324_v34, %v4720_v22  ;;  %v4776_v42 = vmul.f32 %v13325_v31, %v4720_v22 }
 0x4e8   :  { %v4777_v0 = vmul.f32 %v13326_v18, %v4720_v22  ;;  %v4778_v28 = vmul.f32 %v13327_v11, %v4720_v22  ;;  %v4779_v15 = vmul.f32 %v13328_v51, %v4720_v22  ;;  %v4780_v21 = vmul.f32 %v13329_v40, %v4720_v22  ;;  %v13331_v18 = vld [vmem:[#allocation53_spill] sm:$0xff] }
 0x4e9   :  { %v4953_v59 = vrot.slane %v4774_v52, 7  ;;  %v4955_v29 = vrot.slane %v4775_v27, 6  ;;  %v4550_v25 = vsel %vm4521_vm6, %v4549_v7, %v4548_v6  ;;  %v4957_v16 = vrot.slane %v4776_v42, 5  ;;  %v11512_v62 = vpop.eup %7866 }
 0x4ea   :  { %13330 = vst [vmem:[#allocation41_spill] sm:$0xff] %v11512_v62  ;;  %v4641_v31 = vrot.slane %v4550_v25, 4  ;;  %v11517_v57 = vpop.eup %7868  ;;  %vm4803_vm11 = vcmp.ge.f32.partialorder %v4795_v43, 0.1  ;;  %v4959_v52 = vrot.slane %v4777_v0, 4  ;;  %v4961_v27 = vrot.slane %v4778_v28, 3 }
 0x4eb   :  { %v4954_v34 = vsel %vm4503_vm0, %v4953_v59, %v4773_v54  ;;  %13332 = vst [vmem:[#allocation43_spill] sm:$0xff] %v11517_v57  ;;  %v11520_v51 = vpop.eup %7870  ;;  %v4963_v7 = vrot.slane %v4779_v15, 2  ;;  %v4607_v54 = vrot.slane %v11517_v57, 7  ;;  %v4965_v40 = vrot.slane %v4780_v21, 1 }
 0x4ec   :  { %v4956_v22 = vsel %vm4506_vm1, %v4955_v29, %v4954_v34  ;;  %13333 = vst [vmem:[#allocation46_spill] sm:$0xff] %v11520_v51  ;;  %v4642_v6 = vadd.f32 %v4641_v31, %v4550_v25  ;;  %v11524_v42 = vpop.eup %7872  ;;  %v4609_v59 = vrot.slane %v11520_v51, 6  ;;  %v4358_v21 = vmul.f32 1.442695, %v4270_v14 }
 0x4ed   :  { %v4958_v24 = vsel %vm4509_vm2, %v4957_v16, %v4956_v22  ;;  %13334 = vst [vmem:[#allocation49_spill] sm:$0xff] %v11524_v42  ;;  %v11528_v11 = vpop.eup %7874  ;;  %v4608_v28 = vsel %vm4503_vm0, %v4607_v54, %v11512_v62  ;;  %v4611_v25 = vrot.slane %v11524_v42, 5  ;;  %v13353_v62 = vld [vmem:[#allocation150_spill] sm:$0xff] }
 0x4ee   :  { %v4960_v56 = vsel %vm4512_vm3, %v4959_v52, %v4958_v24  ;;  %13335 = vst [vmem:[#allocation50_spill] sm:$0xff] %v11528_v11  ;;  %v4643_v0 = vrot.slane %v4642_v6, 2  ;;  %v11534_v15 = vpop.eup %7876  ;;  %v4610_v34 = vsel %vm4506_vm1, %v4609_v59, %v4608_v28  ;;  %v4613_v60 = vrot.slane %v11528_v11, 4 }
 0x4ef   :  { %v4962_v29 = vsel %vm4515_vm4, %v4961_v27, %v4960_v56  ;;  %13336 = vst [vmem:[#allocation106_spill] sm:$0xff] %v11534_v15  ;;  %v4612_v52 = vsel %vm4509_vm2, %v4611_v25, %v4610_v34  ;;  %v4615_v27 = vrot.slane %v11534_v15, 3  ;;  %7882 = vpow2.f32 %v4358_v21 }
 0x4f0   :  { %v4964_v16 = vsel %vm4518_vm5, %v4963_v7, %v4962_v29  ;;  %v4644_v22 = vadd.f32 %v4643_v0, %v4642_v6  ;;  %v4614_v54 = vsel %vm4512_vm3, %v4613_v60, %v4612_v52  ;;  %v4360_v7 = vmul.f32 1.442695, %v4271_v50  ;;  %v11552_v6 = vpop.eup %7878 }
 0x4f1   :  { %v4966_v31 = vsel %vm4521_vm6, %v4965_v40, %v4964_v16  ;;  %v4616_v14 = vsel %vm4515_vm4, %v4615_v27, %v4614_v54  ;;  %13337 = vst [vmem:[#allocation107_spill] sm:$0xff] %v11552_v6  ;;  %v4617_v28 = vrot.slane %v11552_v6, 2  ;;  %v13338_v50 = vsub.f32 %v13318_v10, %v13314_v32  ;;  %v13349_v6 = vld [vmem:[#allocation149_spill] sm:$0xff] }
 0x4f2   :  { %v4995_v24 = vsel %vm4803_vm11, %v4966_v31, 0.0  ;;  %v4645_v55 = vrot.slane %v4644_v22, 1  ;;  %7884 = vpow2.f32 %v4360_v7  ;;  %v11565_v31 = vpop.eup %7880 }
 0x4f3   :  { %v5299_v56 = vcombine.high %v4995_v24, %v4995_v24  ;;  %v5306_v59 = vrot.slane %v4995_v24, %v13247_v1  ;;  %v4364_v25 = vmul.f32 1.442695, %v13338_v50  ;;  %v11569_v52 = vsel %vm4518_vm5, %v4617_v28, %v4616_v14  ;;  %v13342_v28 = vld [vmem:[#allocation86_spill] sm:$0xff] }
 0x4f4   :  { %v4646_v0 = vadd.f32 %v4645_v55, %v4644_v22 }
 0x4f5   :  { %v5313_v40 = vrot.slane %v5299_v56, %v13247_v1  ;;  %v5314_v29 = vcombine.high %v5306_v59, %v5306_v59  ;;  %v5322_v43 = vrot.slane %v5306_v59, %v13247_v1 }
 0x4f6   :  { %7886 = vrcp.f32 %v4646_v0 }
 0x4f7   :  { %v5315_v16 = vcombine.high %v5313_v40, %v5313_v40  ;;  %v5329_v34 = vrot.slane %v5313_v40, %v13247_v1  ;;  %v5336_v60 = vrot.slane %v5314_v29, %v13247_v1  ;;  %v5344_v21 = vcombine.high %v5322_v43, %v5322_v43  ;;  %v13340_v40 = vld [vmem:[#allocation42_spill] sm:$0xff] }
 0x4f8   :  { %v5592_v22 = vrot.slane %v5322_v43, %v13255_v30  ;;  %7888 = vpow2.f32 %v4362_v5  ;;  %v13341_v43 = vld [vmem:[#allocation83_spill] sm:$0xff]  ;;  %v13343_v5 = vsub.f32 %v13320_v58, %v13314_v32 }
 0x4f9   :  { %v5343_v10 = vrot.slane %v5315_v16, %v13247_v1  ;;  %v5345_v27 = vcombine.high %v5329_v34, %v5329_v34  ;;  %v5346_v24 = vcombine.high %v5336_v60, %v5336_v60  ;;  %v5596_v54 = vrot.slane %v5336_v60, %v13255_v30  ;;  %v11607_v9 = vpop.eup %7882 }
 0x4fa   :  { %v11577_v7 = vrot.slane %v5344_v21, %v13255_v30  ;;  %v11580_v56 = vrot.slane %v5329_v34, %v13255_v30  ;;  %v5909_v29 = vmul.f32 %v13340_v40, %v5592_v22  ;;  %7890 = vpow2.f32 %v4364_v25 }
 0x4fb   :  { %v5347_v59 = vcombine.high %v5343_v10, %v5343_v10  ;;  %v11583_v55 = vrot.slane %v5346_v24, %v13255_v30  ;;  %v11586_v12 = vrot.slane %v5343_v10, %v13255_v30  ;;  %v11589_v14 = vrot.slane %v5345_v27, %v13255_v30  ;;  %v13347_v10 = vld [vmem:[#allocation23_spill] sm:$0xff]  ;;  %v13348_v24 = vld [vmem:[#allocation58_spill] sm:$0xff] }
 0x4fc   :  { %v5913_v0 = vmul.f32 %v13341_v43, %v5596_v54  ;;  %v5914_v50 = vmul.f32 %v13342_v28, %v5596_v54  ;;  %7892 = vpow2.f32 %v4366_v44  ;;  %v11600_v34 = vmul.f32 1.442695, %v13343_v5  ;;  %v13350_v5 = vld [vmem:[#allocation22_spill] sm:$0xff]  ;;  %v11621_v42 = vpop.eup %7884 }
 0x4fd   :  { %v11595_v16 = vrot.slane %v5347_v59, %v13255_v30  ;;  %v13345_v60 = vsub.f32 %v13321_v38, %v13314_v32  ;;  %v5917_v27 = vmul.f32 %v13347_v10, %v11577_v7  ;;  %v5910_v59 = vmul.f32 %v13348_v24, %v5592_v22  ;;  %v13351_v38 = vld [vmem:[#allocation85_spill] sm:$0xff] }
 0x4fe   :  { %13344 = vst [vmem:[#allocation108_spill] sm:$0xff] %v11600_v34  ;;  %v6141_v25 = vadd.f32 %v5913_v0, %v5909_v29  ;;  %v5921_v58 = vmul.f32 %v13349_v6, %v11583_v55  ;;  %v5925_v15 = vmul.f32 %v13350_v5, %v11580_v56  ;;  %v5933_v11 = vmul.f32 %v13292_v35, %v11589_v14  ;;  %v13352_v29 = vld [vmem:[#allocation47_spill] sm:$0xff]  ;;  %v13354_v5 = vld [vmem:[#allocation64_spill] sm:$0xff] }
 0x4ff   :  { %v11605_v21 = vmul.f32 1.442695, %v13345_v60  ;;  %v5929_v60 = vmul.f32 %v13351_v38, %v11586_v12  ;;  %v5918_v0 = vmul.f32 %v13352_v29, %v11577_v7  ;;  %v6148_v57 = vadd.f32 %v5914_v50, %v5910_v59  ;;  %v13355_v38 = vld [vmem:[#allocation59_spill] sm:$0xff]  ;;  %v13357_v50 = vld [vmem:[#allocation52_spill] sm:$0xff] }
 0x500   :  { %v6142_v51 = vadd.f32 %v6141_v25, %v5917_v27  ;;  %v5915_v44 = vmul.f32 %v13214_v53, %v5596_v54  ;;  %v5937_v6 = vmul.f32 %v13353_v62, %v11595_v16  ;;  %v5922_v24 = vmul.f32 %v13354_v5, %v11583_v55  ;;  %v7887_v28 = vpop.eup %7886  ;;  %v13356_v27 = vld [vmem:[#allocation27_spill] sm:$0xff]  ;;  %v13358_v62 = vld [vmem:[#allocation65_spill] sm:$0xff] }
 0x501   :  { %13346 = vst [vmem:[#allocation109_spill] sm:$0xff] %v11605_v21  ;;  %v5926_v10 = vmul.f32 %v13355_v38, %v11580_v56  ;;  %v5911_v35 = vmul.f32 %v13213_v39, %v5592_v22  ;;  %v5930_v25 = vmul.f32 %v13356_v27, %v11586_v12  ;;  %v5934_v59 = vmul.f32 %v13357_v50, %v11589_v14  ;;  %v13359_v5 = vld [vmem:[#allocation145_spill] sm:$0xff] }
 0x502   :  { %v6143_v43 = vadd.f32 %v6142_v51, %v5921_v58  ;;  %v6149_v53 = vadd.f32 %v6148_v57, %v5918_v0  ;;  %v4682_v29 = vmul.f32 1.1111112, %v7887_v28  ;;  %v5938_v40 = vmul.f32 %v13358_v62, %v11595_v16  ;;  %v11641_v38 = vpop.eup %7888 }
 0x503   :  { %v5919_v21 = vmul.f32 %v13359_v5, %v11577_v7  ;;  %v6155_v34 = vadd.f32 %v5915_v44, %v5911_v35  ;;  %v5923_v58 = vmul.f32 %v13216_v49, %v11583_v55  ;;  %v5927_v50 = vmul.f32 %v13286_v46, %v11580_v56 }
 0x504   :  { %v6144_v39 = vadd.f32 %v6143_v43, %v5925_v15  ;;  %v6150_v51 = vadd.f32 %v6149_v53, %v5922_v24  ;;  %v4704_v57 = vrot.slane %v4682_v29, %v13255_v30  ;;  %v5931_v28 = vmul.f32 %v13287_v19, %v11586_v12  ;;  %v11653_v44 = vpop.eup %7890 }
 0x505   :  { %v5935_v0 = vmul.f32 %v13288_v41, %v11589_v14  ;;  %v5912_v35 = vmul.f32 %v13221_v36, %v5592_v22  ;;  %v6156_v43 = vadd.f32 %v6155_v34, %v5919_v21  ;;  %v5916_v24 = vmul.f32 %v13222_v13, %v5596_v54 }
 0x506   :  { %v6145_v15 = vadd.f32 %v6144_v39, %v5929_v60  ;;  %v6151_v53 = vadd.f32 %v6150_v51, %v5926_v10  ;;  %v11656_v62 = vpop.eup %7892  ;;  %v4741_v46 = vmul.f32 %v13301_v48, %v4704_v57  ;;  %v4742_v29 = vmul.f32 %v13299_v61, %v4704_v57 }
 0x507   :  { %v4743_v19 = vmul.f32 %v13303_v20, %v4704_v57  ;;  %v4744_v49 = vmul.f32 %v13304_v26, %v4704_v57  ;;  %v4745_v22 = vmul.f32 %v11323_v45, %v4704_v57  ;;  %v4746_v39 = vmul.f32 %v11477_v33, %v4704_v57 }
 0x508   :  { %v6146_v41 = vadd.f32 %v6145_v15, %v5933_v11  ;;  %v4747_v34 = vmul.f32 %v11482_v63, %v4704_v57  ;;  %v4748_v54 = vmul.f32 %v11488_v47, %v4704_v57  ;;  %v4897_v21 = vrot.slane %v4742_v29, 7 }
 0x509   :  { %v4899_v10 = vrot.slane %v4743_v19, 6  ;;  %v5920_v48 = vmul.f32 %v13223_v4, %v11577_v7  ;;  %v4901_v60 = vrot.slane %v4744_v49, 5  ;;  %v4903_v20 = vrot.slane %v4745_v22, 4 }
 0x50a   :  { %v6147_v61 = vadd.f32 %v6146_v41, %v5937_v6  ;;  %v5924_v26 = vmul.f32 %v13224_v8, %v11583_v55  ;;  %v4898_v11 = vsel %vm4503_vm0, %v4897_v21, %v4741_v46  ;;  %v4905_v45 = vrot.slane %v4746_v39, 3 }
 0x50b   :  { %v6152_v51 = vadd.f32 %v6151_v53, %v5930_v25  ;;  %v6157_v33 = vadd.f32 %v6156_v43, %v5923_v58  ;;  %v4900_v63 = vsel %vm4506_vm1, %v4899_v10, %v4898_v11  ;;  %v4907_v47 = vrot.slane %v4747_v34, 2 }
 0x50c   :  { %6237 = vxpose.xlu1.b32.cont [9/16] %v6147_v61, 128  ;;  %v6162_v57 = vadd.f32 %v5916_v24, %v5912_v35  ;;  %v13360_v19 = vrot.slane %v11565_v31, 1  ;;  %v4902_v49 = vsel %vm4509_vm2, %v4901_v60, %v4900_v63  ;;  %v4909_v15 = vrot.slane %v4748_v54, 1 }
 0x50d   :  { %v6153_v6 = vadd.f32 %v6152_v51, %v5934_v59  ;;  %v6158_v7 = vadd.f32 %v6157_v33, %v5927_v50  ;;  %v4904_v46 = vsel %vm4512_vm3, %v4903_v20, %v4902_v49  ;;  %v4551_v58 = vrot.slane %v11621_v42, 7  ;;  %v13362_v33 = vld [vmem:[#allocation72_spill] sm:$0xff] }
 0x50e   :  { %v4620_v41 = vsel %vm4521_vm6, %v13360_v19, %v11569_v52  ;;  %v6163_v25 = vadd.f32 %v6162_v57, %v5920_v48  ;;  %v4906_v53 = vsel %vm4515_vm4, %v4905_v45, %v4904_v46  ;;  %v5928_v52 = vmul.f32 %v13225_v17, %v11580_v56 }
 0x50f   :  { %v4671_v55 = vrot.slane %v4620_v41, 4  ;;  %v6154_v43 = vadd.f32 %v6153_v6, %v5938_v40  ;;  %v6159_v35 = vadd.f32 %v6158_v7, %v5931_v28  ;;  %v4908_v29 = vsel %vm4518_vm5, %v4907_v47, %v4906_v53 }
 0x510   :  { %v6164_v22 = vadd.f32 %v6163_v25, %v5924_v26  ;;  %v4552_v50 = vsel %vm4503_vm0, %v4551_v58, %v11607_v9  ;;  %v4910_v59 = vsel %vm4521_vm6, %v4909_v15, %v4908_v29  ;;  %v5939_v39 = vmul.f32 %v13289_v3, %v11595_v16 }
 0x511   :  { %v4672_v24 = vadd.f32 %v4671_v55, %v4620_v41  ;;  %6238 = vxpose.xlu1.b32.cont [10/16] %v6154_v43, 128  ;;  %v6160_v34 = vadd.f32 %v6159_v35, %v5935_v0  ;;  %v4553_v40 = vrot.slane %v11641_v38, 6  ;;  %v4991_v28 = vsel %vm4799_vm12, %v4910_v59, 0.0  ;;  %v13363_v55 = vld [vmem:[#allocation108_spill] sm:$0xff]  ;;  %v13364_v43 = vld [vmem:[#allocation109_spill] sm:$0xff]  ;;  %v13366_v59 = vld [vmem:[#allocation83_spill] sm:$0xff] }
 0x512   :  { %v5932_v54 = vmul.f32 %v13226_v2, %v11586_v12  ;;  %v6165_v21 = vadd.f32 %v6164_v22, %v5928_v52  ;;  %v5103_v10 = vcombine.high %v4991_v28, %v4991_v28  ;;  %v5110_v48 = vrot.slane %v4991_v28, %v13247_v1  ;;  %v13365_v22 = vld [vmem:[#allocation42_spill] sm:$0xff] }
 0x513   :  { %v4673_v56 = vrot.slane %v4672_v24, 2  ;;  %v6161_v61 = vadd.f32 %v6160_v34, %v5939_v39  ;;  %v13361_v60 = vsub.f32 %v13331_v18, %v13314_v32  ;;  %v5936_v0 = vmul.f32 %v13227_v23, %v11589_v14  ;;  %v13367_v34 = vld [vmem:[#allocation86_spill] sm:$0xff] }
 0x514   :  { %v6166_v26 = vadd.f32 %v6165_v21, %v5932_v54  ;;  %v4554_v37 = vsel %vm4506_vm1, %v4553_v40, %v4552_v50  ;;  %v4555_v11 = vrot.slane %v11653_v44, 5  ;;  %v5117_v12 = vrot.slane %v5103_v10, %v13247_v1 }
 0x515   :  { %v4372_v20 = vmul.f32 1.442695, %v13361_v60  ;;  %v5118_v45 = vcombine.high %v5110_v48, %v5110_v48  ;;  %v5126_v51 = vrot.slane %v5110_v48, %v13247_v1  ;;  %6239 = vxpose.xlu1.b32.cont [11/16] %v6161_v61, 128  ;;  %v5940_v63 = vmul.f32 %v13362_v33, %v11595_v16  ;;  %v13369_v61 = vld [vmem:[#allocation58_spill] sm:$0xff] }
 0x516   :  { %v6167_v47 = vadd.f32 %v6166_v26, %v5936_v0  ;;  %v4674_v32 = vadd.f32 %v4673_v56, %v4672_v24  ;;  %v4556_v18 = vsel %vm4509_vm2, %v4555_v11, %v4554_v37  ;;  %v4557_v14 = vrot.slane %v11656_v62, 4  ;;  %v13368_v56 = vld [vmem:[#allocation23_spill] sm:$0xff]  ;;  %v13370_v0 = vld [vmem:[#allocation149_spill] sm:$0xff]  ;;  %v13371_v37 = vld [vmem:[#allocation22_spill] sm:$0xff] }
 0x517   :  { %v5119_v57 = vcombine.high %v5117_v12, %v5117_v12  ;;  %v5133_v19 = vrot.slane %v5117_v12, %v13247_v1  ;;  %v5140_v41 = vrot.slane %v5118_v45, %v13247_v1  ;;  %v5148_v49 = vcombine.high %v5126_v51, %v5126_v51 }
 0x518   :  { %v5464_v6 = vrot.slane %v5126_v51, %v13255_v30  ;;  %v6168_v7 = vadd.f32 %v6167_v47, %v5940_v63  ;;  %7894 = vpow2.f32 %v13363_v55  ;;  %v11711_v46 = vsel %vm4512_vm3, %v4557_v14, %v4556_v18  ;;  %v13373_v47 = vld [vmem:[#allocation13_spill] sm:$0xff] }
 0x519   :  { %v5147_v16 = vrot.slane %v5119_v57, %v13247_v1  ;;  %v5149_v15 = vcombine.high %v5133_v19, %v5133_v19  ;;  %v5150_v25 = vcombine.high %v5140_v41, %v5140_v41  ;;  %v5468_v58 = vrot.slane %v5140_v41, %v13255_v30  ;;  %v13374_v14 = vld [vmem:[#allocation85_spill] sm:$0xff] }
 0x51a   :  { %v5472_v53 = vrot.slane %v5148_v49, %v13255_v30  ;;  %6240 = vxpose.xlu1.b32.cont [12/16] %v6168_v7, 128  ;;  %7896 = vpow2.f32 %v13364_v43  ;;  %v5480_v29 = vrot.slane %v5133_v19, %v13255_v30  ;;  %v4675_v52 = vrot.slane %v4674_v32, 1  ;;  %v13375_v19 = vld [vmem:[#allocation16_spill] sm:$0xff]  ;;  %v13377_v55 = vld [vmem:[#allocation69_spill] sm:$0xff] }
 0x51b   :  { %v5151_v35 = vcombine.high %v5147_v16, %v5147_v16  ;;  %v5476_v24 = vrot.slane %v5150_v25, %v13255_v30  ;;  %v5781_v50 = vmul.f32 %v13365_v22, %v5464_v6  ;;  %v5785_v39 = vmul.f32 %v13366_v59, %v5468_v58  ;;  %v13376_v49 = vld [vmem:[#allocation64_spill] sm:$0xff]  ;;  %v13378_v25 = vld [vmem:[#allocation150_spill] sm:$0xff] }
 0x51c   :  { %v5786_v40 = vmul.f32 %v13367_v34, %v5468_v58  ;;  %7898 = vpow2.f32 %v4372_v20  ;;  %v5484_v28 = vrot.slane %v5147_v16, %v13255_v30  ;;  %v11724_v54 = vrot.slane %v5149_v15, %v13255_v30  ;;  %v13372_v20 = vld [vmem:[#allocation47_spill] sm:$0xff] }
 0x51d   :  { %v11727_v21 = vrot.slane %v5151_v35, %v13255_v30  ;;  %v5789_v10 = vmul.f32 %v13368_v56, %v5472_v53  ;;  %v6029_v48 = vadd.f32 %v5785_v39, %v5781_v50  ;;  %v5782_v60 = vmul.f32 %v13369_v61, %v5464_v6  ;;  %v13379_v35 = vld [vmem:[#allocation59_spill] sm:$0xff] }
 0x51e   :  { %v5793_v26 = vmul.f32 %v13370_v0, %v5476_v24  ;;  %v5797_v11 = vmul.f32 %v13371_v37, %v5480_v29  ;;  %v4676_v12 = vadd.f32 %v4675_v52, %v4674_v32  ;;  %v5790_v51 = vmul.f32 %v13372_v20, %v5472_v53 }
 0x51f   :  { %v6030_v45 = vadd.f32 %v6029_v48, %v5789_v10  ;;  %v6036_v63 = vadd.f32 %v5786_v40, %v5782_v60  ;;  %v5787_v18 = vmul.f32 %v13373_v47, %v5468_v58  ;;  %v5801_v57 = vmul.f32 %v13374_v14, %v5484_v28 }
 0x520   :  { %v5805_v41 = vmul.f32 %v13375_v19, %v11724_v54  ;;  %v5794_v7 = vmul.f32 %v13376_v49, %v5476_v24  ;;  %v5783_v16 = vmul.f32 %v13377_v55, %v5464_v6  ;;  %v5809_v32 = vmul.f32 %v13378_v25, %v11727_v21  ;;  %v13380_v55 = vld [vmem:[#allocation52_spill] sm:$0xff] }
 0x521   :  { %v6031_v43 = vadd.f32 %v6030_v45, %v5793_v26  ;;  %v5798_v52 = vmul.f32 %v13379_v35, %v5480_v29  ;;  %v6037_v50 = vadd.f32 %v6036_v63, %v5790_v51  ;;  %v5802_v39 = vmul.f32 %v13356_v27, %v5484_v28  ;;  %v13381_v26 = vld [vmem:[#allocation151_spill] sm:$0xff]  ;;  %v13382_v35 = vld [vmem:[#allocation73_spill] sm:$0xff] }
 0x522   :  { %v11740_v15 = vpop.eup %7894  ;;  %v5791_v40 = vmul.f32 %v13359_v5, %v5472_v53  ;;  %v6043_v10 = vadd.f32 %v5787_v18, %v5783_v16  ;;  %v5788_v48 = vmul.f32 %v13222_v13, %v5468_v58  ;;  %v5806_v47 = vmul.f32 %v13380_v55, %v11724_v54 }
 0x523   :  { %v6032_v49 = vadd.f32 %v6031_v43, %v5797_v11  ;;  %v6038_v20 = vadd.f32 %v6037_v50, %v5794_v7  ;;  %v5784_v25 = vmul.f32 %v13221_v36, %v5464_v6  ;;  %v5795_v45 = vmul.f32 %v13381_v26, %v5476_v24  ;;  %v13383_v11 = vld [vmem:[#allocation31_spill] sm:$0xff] }
 0x524   :  { %v11748_v60 = vpop.eup %7896  ;;  %v5799_v51 = vmul.f32 %v13382_v35, %v5480_v29  ;;  %v6044_v63 = vadd.f32 %v6043_v10, %v5791_v40  ;;  %v5792_v27 = vmul.f32 %v13223_v4, %v5472_v53  ;;  %7900 = vrcp.f32 %v4676_v12 }
 0x525   :  { %v6033_v18 = vadd.f32 %v6032_v49, %v5801_v57  ;;  %v6039_v58 = vadd.f32 %v6038_v20, %v5798_v52  ;;  %v6050_v16 = vadd.f32 %v5788_v48, %v5784_v25  ;;  %v5803_v43 = vmul.f32 %v13383_v11, %v5484_v28  ;;  %v13384_v52 = vld [vmem:[#allocation65_spill] sm:$0xff] }
 0x526   :  { %v11756_v5 = vpop.eup %7898  ;;  %v6045_v13 = vadd.f32 %v6044_v63, %v5795_v45  ;;  %v5796_v7 = vmul.f32 %v13224_v8, %v5476_v24  ;;  %v4559_v6 = vrot.slane %v11740_v15, 3  ;;  %v4561_v40 = vrot.slane %v11748_v60, 2 }
 0x527   :  { %v6034_v50 = vadd.f32 %v6033_v18, %v5805_v41  ;;  %v6040_v36 = vadd.f32 %v6039_v58, %v5802_v39  ;;  %v6051_v26 = vadd.f32 %v6050_v16, %v5792_v27  ;;  %v5800_v53 = vmul.f32 %v13225_v17, %v5480_v29 }
 0x528   :  { %v6046_v10 = vadd.f32 %v6045_v13, %v5799_v51  ;;  %v4560_v20 = vsel %vm4515_vm4, %v4559_v6, %v11711_v46  ;;  %v4563_v12 = vrot.slane %v11756_v5, 1  ;;  %v5810_v41 = vmul.f32 %v13384_v52, %v11727_v21  ;;  %v13385_v13 = vld [vmem:[#allocation146_spill] sm:$0xff] }
 0x529   :  { %v6035_v57 = vadd.f32 %v6034_v50, %v5809_v32  ;;  %v6041_v49 = vadd.f32 %v6040_v36, %v5806_v47  ;;  %v6052_v25 = vadd.f32 %v6051_v26, %v5796_v7  ;;  %v4562_v24 = vsel %vm4518_vm5, %v4561_v40, %v4560_v20  ;;  %v13387_v20 = vld [vmem:[#allocation43_spill] sm:$0xff] }
 0x52a   :  { %v6047_v39 = vadd.f32 %v6046_v10, %v5803_v43  ;;  %v4564_v27 = vsel %vm4521_vm6, %v4563_v12, %v4562_v24  ;;  %v5807_v29 = vmul.f32 %v13385_v13, %v11724_v54  ;;  %v5804_v48 = vmul.f32 %v13226_v2, %v5484_v28  ;;  %v13386_v10 = vld [vmem:[#allocation41_spill] sm:$0xff] }
 0x52b   :  { %6205 = vxpose.xlu0.b32.cont [9/16] %v6035_v57, 128  ;;  %v6053_v46 = vadd.f32 %v6052_v25, %v5800_v53  ;;  %v4647_v45 = vrot.slane %v4564_v27, 4  ;;  %v5808_v36 = vmul.f32 %v13227_v23, %v11724_v54  ;;  %v6042_v47 = vadd.f32 %v6041_v49, %v5810_v41  ;;  %v13388_v57 = vld [vmem:[#allocation46_spill] sm:$0xff]  ;;  %v13389_v25 = vld [vmem:[#allocation49_spill] sm:$0xff] }
 0x52c   :  { %v6048_v32 = vadd.f32 %v6047_v39, %v5807_v29  ;;  %v5811_v18 = vmul.f32 %v13289_v3, %v11727_v21  ;;  %v5812_v28 = vmul.f32 %v13362_v33, %v11727_v21  ;;  %v13390_v41 = vld [vmem:[#allocation50_spill] sm:$0xff] }
 0x52d   :  { %v6054_v26 = vadd.f32 %v6053_v46, %v5804_v48  ;;  %v4648_v51 = vadd.f32 %v4647_v45, %v4564_v27  ;;  %v13391_v27 = vld [vmem:[#allocation106_spill] sm:$0xff]  ;;  %v13392_v48 = vld [vmem:[#allocation107_spill] sm:$0xff] }
 0x52e   :  { %v7901_v63 = vpop.eup %7900  ;;  %v6049_v7 = vadd.f32 %v6048_v32, %v5811_v18 }
 0x52f   :  { %6206 = vxpose.xlu0.b32.cont [10/16] %v6042_v47, 128  ;;  %v6055_v58 = vadd.f32 %v6054_v26, %v5808_v36  ;;  %v4649_v16 = vrot.slane %v4648_v51, 2  ;;  %v4692_v43 = vmul.f32 1.1111112, %v7901_v63 }
 0x531   :  { %v4650_v6 = vadd.f32 %v4649_v16, %v4648_v51  ;;  %v4724_v50 = vrot.slane %v4692_v43, %v13255_v30  ;;  %v6056_v54 = vadd.f32 %v6055_v58, %v5812_v28  ;;  %v4796_v51 = vld [vmem:[#allocation7 + $0x38] sm:$0xff] }
 0x532   :  { %vm4804_vm13 = vcmp.ge.f32.partialorder %v4796_v51, 0.1 }
 0x533   :  { %6207 = vxpose.xlu0.b32.cont [11/16] %v6049_v7, 128  ;;  %v4651_v40 = vrot.slane %v4650_v6, 1  ;;  %v4781_v53 = vmul.f32 %v13386_v10, %v4724_v50  ;;  %v4782_v12 = vmul.f32 %v13387_v20, %v4724_v50  ;;  %v4783_v49 = vmul.f32 %v13388_v57, %v4724_v50 }
 0x534   :  { %v4784_v24 = vmul.f32 %v13389_v25, %v4724_v50  ;;  %v4785_v39 = vmul.f32 %v13390_v41, %v4724_v50  ;;  %v4786_v29 = vmul.f32 %v13391_v27, %v4724_v50  ;;  %v4787_v21 = vmul.f32 %v13392_v48, %v4724_v50 }
 0x535   :  { %v4788_v46 = vmul.f32 %v11565_v31, %v4724_v50  ;;  %v4967_v45 = vrot.slane %v4782_v12, 7  ;;  %v4969_v36 = vrot.slane %v4783_v49, 6  ;;  %v4652_v47 = vadd.f32 %v4651_v40, %v4650_v6 }
 0x536   :  { %v4971_v26 = vrot.slane %v4784_v24, 5  ;;  %v4973_v18 = vrot.slane %v4785_v39, 4  ;;  %v4975_v16 = vrot.slane %v4786_v29, 3  ;;  %v4977_v7 = vrot.slane %v4787_v21, 2 }
 0x537   :  { %6208 = vxpose.xlu0.b32.cont [12/16] %v6056_v54, 128  ;;  %v4968_v32 = vsel %vm4503_vm0, %v4967_v45, %v4781_v53  ;;  %7902 = vrcp.f32 %v4652_v47  ;;  %v4979_v28 = vrot.slane %v4788_v46, 1 }
 0x538   :  { %v4970_v63 = vsel %vm4506_vm1, %v4969_v36, %v4968_v32 }
 0x539   :  { %v4972_v58 = vsel %vm4509_vm2, %v4971_v26, %v4970_v63 }
 0x53a   :  { %v4974_v43 = vsel %vm4512_vm3, %v4973_v18, %v4972_v58 }
 0x53b   :  { %v4976_v31 = vsel %vm4515_vm4, %v4975_v16, %v4974_v43 }
 0x53c   :  { %v4978_v6 = vsel %vm4518_vm5, %v4977_v7, %v4976_v31 }
 0x53d   :  { %v4980_v50 = vsel %vm4521_vm6, %v4979_v28, %v4978_v6  ;;  %v4792_v6 = vld [vmem:[#allocation7 + $0x18] sm:$0xff] }
 0x53e   :  { %v4996_v54 = vsel %vm4804_vm13, %v4980_v50, 0.0  ;;  %vm4800_vm14 = vcmp.ge.f32.partialorder %v4792_v6, 0.1 }
 0x53f   :  { %v5348_v40 = vcombine.high %v4996_v54, %v4996_v54  ;;  %v5355_v10 = vrot.slane %v4996_v54, %v13247_v1 }
 0x541   :  { %v7903_v53 = vpop.eup %7902  ;;  %v5362_v20 = vrot.slane %v5348_v40, %v13247_v1  ;;  %v5363_v12 = vcombine.high %v5355_v10, %v5355_v10  ;;  %v5371_v57 = vrot.slane %v5355_v10, %v13247_v1 }
 0x542   :  { %v4684_v49 = vmul.f32 1.1111112, %v7903_v53 }
 0x543   :  { %v5364_v25 = vcombine.high %v5362_v20, %v5362_v20  ;;  %v5378_v24 = vrot.slane %v5362_v20, %v13247_v1  ;;  %v5385_v41 = vrot.slane %v5363_v12, %v13247_v1  ;;  %v5393_v39 = vcombine.high %v5371_v57, %v5371_v57 }
 0x544   :  { %v11801_v27 = vrot.slane %v5371_v57, %v13255_v30  ;;  %v4708_v29 = vrot.slane %v4684_v49, %v13255_v30 }
 0x545   :  { %v5392_v48 = vrot.slane %v5364_v25, %v13247_v1  ;;  %v5395_v21 = vcombine.high %v5385_v41, %v5385_v41  ;;  %v11806_v46 = vrot.slane %v5385_v41, %v13255_v30  ;;  %v11809_v45 = vrot.slane %v5393_v39, %v13255_v30 }
 0x546   :  { %v4749_v36 = vmul.f32 %v11607_v9, %v4708_v29  ;;  %v5394_v47 = vcombine.high %v5378_v24, %v5378_v24  ;;  %v5941_v26 = vmul.f32 %v13365_v22, %v11801_v27  ;;  %v4750_v63 = vmul.f32 %v11621_v42, %v4708_v29 }
 0x547   :  { %v11813_v32 = vrot.slane %v5395_v21, %v13255_v30  ;;  %v5945_v51 = vmul.f32 %v13366_v59, %v11806_v46  ;;  %v5396_v18 = vcombine.high %v5392_v48, %v5392_v48  ;;  %v11821_v58 = vrot.slane %v5378_v24, %v13255_v30 }
 0x548   :  { %v11824_v16 = vrot.slane %v5392_v48, %v13255_v30  ;;  %v5949_v9 = vmul.f32 %v13368_v56, %v11809_v45  ;;  %v4751_v7 = vmul.f32 %v11641_v38, %v4708_v29  ;;  %v4752_v31 = vmul.f32 %v11653_v44, %v4708_v29 }
 0x549   :  { %v6169_v43 = vadd.f32 %v5945_v51, %v5941_v26  ;;  %v4753_v28 = vmul.f32 %v11656_v62, %v4708_v29  ;;  %v11832_v42 = vrot.slane %v5394_v47, %v13255_v30  ;;  %v4754_v50 = vmul.f32 %v11740_v15, %v4708_v29  ;;  %v13393_v47 = vld [vmem:[#allocation47_spill] sm:$0xff] }
 0x54a   :  { %v4755_v54 = vmul.f32 %v11748_v60, %v4708_v29  ;;  %v4756_v40 = vmul.f32 %v11756_v5, %v4708_v29  ;;  %v5953_v10 = vmul.f32 %v13370_v0, %v11813_v32  ;;  %v4911_v20 = vrot.slane %v4750_v63, 7 }
 0x54b   :  { %v6170_v53 = vadd.f32 %v6169_v43, %v5949_v9  ;;  %v4913_v38 = vrot.slane %v4751_v7, 6  ;;  %v11840_v44 = vrot.slane %v5396_v18, %v13255_v30  ;;  %v5957_v62 = vmul.f32 %v13371_v37, %v11821_v58  ;;  %v13394_v43 = vld [vmem:[#allocation13_spill] sm:$0xff] }
 0x54c   :  { %v4912_v15 = vsel %vm4503_vm0, %v4911_v20, %v4749_v36  ;;  %v4915_v57 = vrot.slane %v4752_v31, 5  ;;  %v5946_v5 = vmul.f32 %v13367_v34, %v11806_v46  ;;  %v5961_v60 = vmul.f32 %v13374_v14, %v11824_v16  ;;  %v13397_v20 = vld [vmem:[#allocation150_spill] sm:$0xff] }
 0x54d   :  { %v6171_v12 = vadd.f32 %v6170_v53, %v5953_v10  ;;  %v4914_v49 = vsel %vm4506_vm1, %v4913_v38, %v4912_v15  ;;  %v4917_v25 = vrot.slane %v4753_v28, 4  ;;  %v5942_v24 = vmul.f32 %v13369_v61, %v11801_v27  ;;  %v13395_v28 = vld [vmem:[#allocation64_spill] sm:$0xff]  ;;  %v13396_v53 = vld [vmem:[#allocation69_spill] sm:$0xff] }
 0x54e   :  { %v5965_v41 = vmul.f32 %v13375_v19, %v11832_v42  ;;  %v4916_v29 = vsel %vm4509_vm2, %v4915_v57, %v4914_v49  ;;  %v4919_v48 = vrot.slane %v4754_v50, 3  ;;  %v4921_v36 = vrot.slane %v4755_v54, 2 }
 0x54f   :  { %v6172_v39 = vadd.f32 %v6171_v12, %v5957_v62  ;;  %v4918_v21 = vsel %vm4512_vm3, %v4917_v25, %v4916_v29  ;;  %v5950_v26 = vmul.f32 %v13393_v47, %v11809_v45  ;;  %v6176_v51 = vadd.f32 %v5946_v5, %v5942_v24 }
 0x550   :  { %v4920_v18 = vsel %vm4515_vm4, %v4919_v48, %v4918_v21  ;;  %v4923_v9 = vrot.slane %v4756_v40, 1  ;;  %v5947_v7 = vmul.f32 %v13394_v43, %v11806_v46  ;;  %v5954_v10 = vmul.f32 %v13395_v28, %v11813_v32  ;;  %v13398_v40 = vld [vmem:[#allocation59_spill] sm:$0xff] }
 0x551   :  { %v6173_v63 = vadd.f32 %v6172_v39, %v5961_v60  ;;  %v4922_v31 = vsel %vm4518_vm5, %v4921_v36, %v4920_v18  ;;  %v6177_v50 = vadd.f32 %v6176_v51, %v5950_v26  ;;  %v5943_v54 = vmul.f32 %v13396_v53, %v11801_v27  ;;  %v13399_v60 = vld [vmem:[#allocation145_spill] sm:$0xff]  ;;  %v13400_v48 = vld [vmem:[#allocation27_spill] sm:$0xff] }
 0x552   :  { %v5969_v38 = vmul.f32 %v13397_v20, %v11840_v44  ;;  %v4924_v12 = vsel %vm4521_vm6, %v4923_v9, %v4922_v31  ;;  %v5958_v15 = vmul.f32 %v13398_v40, %v11821_v58  ;;  %v5951_v49 = vmul.f32 %v13399_v60, %v11809_v45  ;;  %v13401_v9 = vld [vmem:[#allocation151_spill] sm:$0xff] }
 0x553   :  { %v6174_v62 = vadd.f32 %v6173_v63, %v5965_v41  ;;  %v4992_v57 = vsel %vm4800_vm14, %v4924_v12, 0.0  ;;  %v6178_v5 = vadd.f32 %v6177_v50, %v5954_v10  ;;  %v6183_v25 = vadd.f32 %v5947_v7, %v5943_v54 }
 0x554   :  { %v5152_v39 = vcombine.high %v4992_v57, %v4992_v57  ;;  %v5159_v29 = vrot.slane %v4992_v57, %v13247_v1  ;;  %v5962_v21 = vmul.f32 %v13400_v48, %v11824_v16  ;;  %v5966_v63 = vmul.f32 %v13380_v55, %v11832_v42 }
 0x555   :  { %v6175_v24 = vadd.f32 %v6174_v62, %v5969_v38  ;;  %v6179_v41 = vadd.f32 %v6178_v5, %v5958_v15  ;;  %v6184_v36 = vadd.f32 %v6183_v25, %v5951_v49  ;;  %v5955_v7 = vmul.f32 %v13401_v9, %v11813_v32 }
 0x556   :  { %v5166_v26 = vrot.slane %v5152_v39, %v13247_v1  ;;  %v5167_v51 = vcombine.high %v5159_v29, %v5159_v29  ;;  %v5175_v6 = vrot.slane %v5159_v29, %v13247_v1  ;;  %v5970_v62 = vmul.f32 %v13384_v52, %v11840_v44 }
 0x557   :  { %6241 = vxpose.xlu1.b32.cont [13/16] %v6175_v24, 128  ;;  %v6180_v18 = vadd.f32 %v6179_v41, %v5962_v21  ;;  %v6185_v15 = vadd.f32 %v6184_v36, %v5955_v7  ;;  %v5959_v25 = vmul.f32 %v13382_v35, %v11821_v58  ;;  %v5963_v29 = vmul.f32 %v13383_v11, %v11824_v16  ;;  %v13403_v7 = vld [vmem:[#allocation15_spill] sm:$0xff] }
 0x558   :  { %v5168_v31 = vcombine.high %v5166_v26, %v5166_v26  ;;  %v5182_v10 = vrot.slane %v5166_v26, %v13247_v1  ;;  %v5189_v50 = vrot.slane %v5167_v51, %v13247_v1  ;;  %v5197_v54 = vcombine.high %v5175_v6, %v5175_v6  ;;  %v13402_v26 = vld [vmem:[#allocation76_spill] sm:$0xff] }
 0x559   :  { %v11886_v38 = vrot.slane %v5175_v6, %v13255_v30  ;;  %v6181_v12 = vadd.f32 %v6180_v18, %v5966_v63  ;;  %v5967_v21 = vmul.f32 %v13385_v13, %v11832_v42  ;;  %v5944_v51 = vmul.f32 %v13402_v26, %v11801_v27 }
 0x55a   :  { %v5196_v57 = vrot.slane %v5168_v31, %v13247_v1  ;;  %v5199_v5 = vcombine.high %v5189_v50, %v5189_v50  ;;  %v5500_v49 = vrot.slane %v5189_v50, %v13255_v30  ;;  %v11895_v24 = vrot.slane %v5197_v54, %v13255_v30 }
 0x55b   :  { %v6182_v39 = vadd.f32 %v6181_v12, %v5970_v62  ;;  %v5198_v41 = vcombine.high %v5182_v10, %v5182_v10  ;;  %v5971_v1 = vmul.f32 %v13289_v3, %v11840_v44  ;;  %v5813_v6 = vmul.f32 %v13365_v22, %v11886_v38 }
 0x55c   :  { %v11902_v36 = vrot.slane %v5199_v5, %v13255_v30  ;;  %v5817_v63 = vmul.f32 %v13366_v59, %v5500_v49  ;;  %v6186_v18 = vadd.f32 %v6185_v15, %v5959_v25  ;;  %v5948_v31 = vmul.f32 %v13403_v7, %v11806_v46 }
 0x55d   :  { %6242 = vxpose.xlu1.b32.cont [14/16] %v6182_v39, 128  ;;  %v5200_v50 = vcombine.high %v5196_v57, %v5196_v57  ;;  %v11914_v54 = vrot.slane %v5182_v10, %v13255_v30  ;;  %v5952_v62 = vmul.f32 %v13223_v4, %v11809_v45  ;;  %v5956_v27 = vmul.f32 %v13224_v8, %v11813_v32 }
 0x55e   :  { %v5821_v22 = vmul.f32 %v13368_v56, %v11895_v24  ;;  %v6057_v12 = vadd.f32 %v5817_v63, %v5813_v6  ;;  %v5814_v59 = vmul.f32 %v13369_v61, %v11886_v38  ;;  %v5818_v15 = vmul.f32 %v13367_v34, %v5500_v49 }
 0x55f   :  { %v11926_v46 = vrot.slane %v5196_v57, %v13255_v30  ;;  %v11929_v10 = vrot.slane %v5198_v41, %v13255_v30  ;;  %v5825_v45 = vmul.f32 %v13370_v0, %v11902_v36  ;;  %v5960_v32 = vmul.f32 %v13225_v17, %v11821_v58 }
 0x560   :  { %v6058_v5 = vadd.f32 %v6057_v12, %v5821_v22  ;;  %v5822_v56 = vmul.f32 %v13393_v47, %v11895_v24  ;;  %v6064_v25 = vadd.f32 %v5818_v15, %v5814_v59  ;;  %v6187_v61 = vadd.f32 %v6186_v18, %v5963_v29 }
 0x561   :  { %v11938_v34 = vrot.slane %v5200_v50, %v13255_v30  ;;  %v5829_v57 = vmul.f32 %v13371_v37, %v11914_v54  ;;  %v5815_v39 = vmul.f32 %v13396_v53, %v11886_v38  ;;  %v5819_v0 = vmul.f32 %v13394_v43, %v5500_v49 }
 0x562   :  { %v6059_v41 = vadd.f32 %v6058_v5, %v5825_v45  ;;  %v5826_v58 = vmul.f32 %v13395_v28, %v11902_v36  ;;  %v6065_v6 = vadd.f32 %v6064_v25, %v5822_v56  ;;  %v6188_v63 = vadd.f32 %v6187_v61, %v5967_v21 }
 0x563   :  { %v5833_v47 = vmul.f32 %v13374_v14, %v11926_v46  ;;  %v5837_v30 = vmul.f32 %v13375_v19, %v11929_v10  ;;  %v5823_v37 = vmul.f32 %v13399_v60, %v11895_v24  ;;  %v6071_v29 = vadd.f32 %v5819_v0, %v5815_v39 }
 0x564   :  { %v6060_v18 = vadd.f32 %v6059_v41, %v5829_v57  ;;  %v5830_v43 = vmul.f32 %v13398_v40, %v11914_v54  ;;  %v6066_v53 = vadd.f32 %v6065_v6, %v5826_v58  ;;  %v6189_v50 = vadd.f32 %v6188_v63, %v5971_v1 }
 0x565   :  { %v5827_v28 = vmul.f32 %v13401_v9, %v11902_v36  ;;  %v6072_v21 = vadd.f32 %v6071_v29, %v5823_v37  ;;  %v6190_v22 = vadd.f32 %v5948_v31, %v5944_v51  ;;  %v5820_v14 = vmul.f32 %v13403_v7, %v5500_v49 }
 0x566   :  { %v5841_v19 = vmul.f32 %v13397_v20, %v11938_v34  ;;  %v6061_v12 = vadd.f32 %v6060_v18, %v5833_v47  ;;  %v5834_v60 = vmul.f32 %v13400_v48, %v11926_v46  ;;  %v6067_v59 = vadd.f32 %v6066_v53, %v5830_v43  ;;  %6243 = vxpose.xlu1.b32.cont [15/16] %v6189_v50, 128 }
 0x567   :  { %v5831_v40 = vmul.f32 %v13382_v35, %v11914_v54  ;;  %v6073_v1 = vadd.f32 %v6072_v21, %v5827_v28  ;;  %v6191_v15 = vadd.f32 %v6190_v22, %v5952_v62  ;;  %v5816_v9 = vmul.f32 %v13402_v26, %v11886_v38 }
 0x568   :  { %v6062_v51 = vadd.f32 %v6061_v12, %v5837_v30  ;;  %v5838_v49 = vmul.f32 %v13380_v55, %v11929_v10  ;;  %v6068_v7 = vadd.f32 %v6067_v59, %v5834_v60  ;;  %v5835_v20 = vmul.f32 %v13383_v11, %v11926_v46 }
 0x569   :  { %v6074_v31 = vadd.f32 %v6073_v1, %v5831_v40  ;;  %v6192_v48 = vadd.f32 %v6191_v15, %v5956_v27  ;;  %v5824_v45 = vmul.f32 %v13223_v4, %v11895_v24  ;;  %v6078_v5 = vadd.f32 %v5820_v14, %v5816_v9 }
 0x56a   :  { %v6063_v35 = vadd.f32 %v6062_v51, %v5841_v19  ;;  %v6069_v56 = vadd.f32 %v6068_v7, %v5838_v49  ;;  %v5964_v62 = vmul.f32 %v13226_v2, %v11824_v16  ;;  %v5828_v55 = vmul.f32 %v13224_v8, %v11902_v36 }
 0x56b   :  { %v6075_v38 = vadd.f32 %v6074_v31, %v5835_v20  ;;  %v6193_v26 = vadd.f32 %v6192_v48, %v5960_v32  ;;  %v6079_v25 = vadd.f32 %v6078_v5, %v5824_v45  ;;  %v5842_v11 = vmul.f32 %v13384_v52, %v11938_v34 }
 0x56c   :  { %6209 = vxpose.xlu0.b32.cont [13/16] %v6063_v35, 128  ;;  %v5839_v27 = vmul.f32 %v13385_v13, %v11929_v10  ;;  %v5968_v4 = vmul.f32 %v13227_v23, %v11832_v42  ;;  %v5832_v16 = vmul.f32 %v13225_v17, %v11914_v54  ;;  %v5972_v8 = vmul.f32 %v13362_v33, %v11840_v44 }
 0x56d   :  { %v6194_v24 = vadd.f32 %v6193_v26, %v5964_v62  ;;  %v6080_v61 = vadd.f32 %v6079_v25, %v5828_v55  ;;  %v6070_v32 = vadd.f32 %v6069_v56, %v5842_v11  ;;  %v5836_v52 = vmul.f32 %v13226_v2, %v11926_v46 }
 0x56e   :  { %v6076_v57 = vadd.f32 %v6075_v38, %v5839_v27  ;;  %v5843_v13 = vmul.f32 %v13289_v3, %v11938_v34  ;;  %v5840_v0 = vmul.f32 %v13227_v23, %v11929_v10  ;;  %v5844_v44 = vmul.f32 %v13362_v33, %v11938_v34 }
 0x56f   :  { %v6195_v36 = vadd.f32 %v6194_v24, %v5968_v4  ;;  %v6081_v39 = vadd.f32 %v6080_v61, %v5832_v16 }
 0x570   :  { %6210 = vxpose.xlu0.b32.cont [14/16] %v6070_v32, 128  ;;  %v6077_v54 = vadd.f32 %v6076_v57, %v5843_v13 }
 0x571   :  { %v6196_v42 = vadd.f32 %v6195_v36, %v5972_v8  ;;  %v6082_v17 = vadd.f32 %v6081_v39, %v5836_v52 }
 0x573   :  { %6244 = vxpose.xlu1.b32.end [16/16] %v6196_v42, 128  ;;  %v6083_v41 = vadd.f32 %v6082_v17, %v5840_v0 }
 0x574   :  { %6211 = vxpose.xlu0.b32.cont [15/16] %v6077_v54, 128 }
 0x575   :  { %v6084_v58 = vadd.f32 %v6083_v41, %v5844_v44 }
 0x578   :  { %6212 = vxpose.xlu0.b32.end [16/16] %v6084_v58, 128 }
 0x5b7   :  { %v6245_v2 = vpop.trf.xlu1 }
 0x5b8   :  { %6262 = vst [vmem:[#allocation8 + $0x8] sm:$0xff] %v6245_v2 }
 0x5bb   :  { %v6246_v46 = vpop.trf.xlu1 }
 0x5bc   :  { %v6213_v6 = vpop.trf.xlu0  ;;  %6264 = vst [vmem:[#allocation8 + $0x18] sm:$0xff] %v6246_v46 }
 0x5bd   :  { %6261 = vst [vmem:[#allocation8] sm:$0xff] %v6213_v6 }
 0x5bf   :  { %v6247_v3 = vpop.trf.xlu1 }
 0x5c0   :  { %v6214_v63 = vpop.trf.xlu0  ;;  %6266 = vst [vmem:[#allocation8 + $0x28] sm:$0xff] %v6247_v3 }
 0x5c1   :  { %6263 = vst [vmem:[#allocation8 + $0x10] sm:$0xff] %v6214_v63 }
 0x5c3   :  { %v6248_v23 = vpop.trf.xlu1 }
 0x5c4   :  { %v6215_v10 = vpop.trf.xlu0  ;;  %6268 = vst [vmem:[#allocation8 + $0x38] sm:$0xff] %v6248_v23 }
 0x5c5   :  { %6265 = vst [vmem:[#allocation8 + $0x20] sm:$0xff] %v6215_v10 }
 0x5c7   :  { %v6249_v47 = vpop.trf.xlu1 }
 0x5c8   :  { %v6216_v30 = vpop.trf.xlu0  ;;  %6270 = vst [vmem:[#allocation8 + $0x48] sm:$0xff] %v6249_v47 }
 0x5c9   :  { %6267 = vst [vmem:[#allocation8 + $0x30] sm:$0xff] %v6216_v30 }
 0x5cb   :  { %v6250_v33 = vpop.trf.xlu1 }
 0x5cc   :  { %v6217_v34 = vpop.trf.xlu0  ;;  %6272 = vst [vmem:[#allocation8 + $0x58] sm:$0xff] %v6250_v33 }
 0x5cd   :  { %6269 = vst [vmem:[#allocation8 + $0x40] sm:$0xff] %v6217_v34 }
 0x5cf   :  { %v6251_v37 = vpop.trf.xlu1 }
 0x5d0   :  { %v6218_v29 = vpop.trf.xlu0  ;;  %6274 = vst [vmem:[#allocation8 + $0x68] sm:$0xff] %v6251_v37 }
 0x5d1   :  { %6271 = vst [vmem:[#allocation8 + $0x50] sm:$0xff] %v6218_v29 }
 0x5d3   :  { %v6252_v18 = vpop.trf.xlu1 }
 0x5d4   :  { %v6219_v43 = vpop.trf.xlu0  ;;  %6276 = vst [vmem:[#allocation8 + $0x78] sm:$0xff] %v6252_v18 }
 0x5d5   :  { %6273 = vst [vmem:[#allocation8 + $0x60] sm:$0xff] %v6219_v43 }
 0x5d7   :  { %v6253_v53 = vpop.trf.xlu1 }
 0x5d8   :  { %v6220_v50 = vpop.trf.xlu0  ;;  %6278 = vst [vmem:[#allocation8 + $0x88] sm:$0xff] %v6253_v53 }
 0x5d9   :  { %6275 = vst [vmem:[#allocation8 + $0x70] sm:$0xff] %v6220_v50 }
 0x5db   :  { %v6254_v28 = vpop.trf.xlu1 }
 0x5dc   :  { %v6221_v21 = vpop.trf.xlu0  ;;  %6280 = vst [vmem:[#allocation8 + $0x98] sm:$0xff] %v6254_v28 }
 0x5dd   :  { %6277 = vst [vmem:[#allocation8 + $0x80] sm:$0xff] %v6221_v21 }
 0x5df   :  { %v6255_v22 = vpop.trf.xlu1 }
 0x5e0   :  { %v6222_v14 = vpop.trf.xlu0  ;;  %6282 = vst [vmem:[#allocation8 + $0xa8] sm:$0xff] %v6255_v22 }
 0x5e1   :  { %6279 = vst [vmem:[#allocation8 + $0x90] sm:$0xff] %v6222_v14 }
 0x5e3   :  { %v6256_v19 = vpop.trf.xlu1 }
 0x5e4   :  { %v6223_v12 = vpop.trf.xlu0  ;;  %6284 = vst [vmem:[#allocation8 + $0xb8] sm:$0xff] %v6256_v19 }
 0x5e5   :  { %6281 = vst [vmem:[#allocation8 + $0xa0] sm:$0xff] %v6223_v12 }
 0x5e7   :  { %v6257_v60 = vpop.trf.xlu1 }
 0x5e8   :  { %v6224_v59 = vpop.trf.xlu0  ;;  %6286 = vst [vmem:[#allocation8 + $0xc8] sm:$0xff] %v6257_v60 }
 0x5e9   :  { %6283 = vst [vmem:[#allocation8 + $0xb0] sm:$0xff] %v6224_v59 }
 0x5eb   :  { %v6258_v40 = vpop.trf.xlu1 }
 0x5ec   :  { %v6225_v1 = vpop.trf.xlu0  ;;  %6288 = vst [vmem:[#allocation8 + $0xd8] sm:$0xff] %v6258_v40 }
 0x5ed   :  { %6285 = vst [vmem:[#allocation8 + $0xc0] sm:$0xff] %v6225_v1 }
 0x5ef   :  { %v6259_v15 = vpop.trf.xlu1 }
 0x5f0   :  { %v6226_v9 = vpop.trf.xlu0  ;;  %6290 = vst [vmem:[#allocation8 + $0xe8] sm:$0xff] %v6259_v15 }
 0x5f1   :  { %6287 = vst [vmem:[#allocation8 + $0xd0] sm:$0xff] %v6226_v9 }
 0x5f3   :  { %v6260_v51 = vpop.trf.xlu1 }
 0x5f4   :  { %v6227_v49 = vpop.trf.xlu0  ;;  %6292 = vst [vmem:[#allocation8 + $0xf8] sm:$0xff] %v6260_v51 }
 0x5f5   :  { %6289 = vst [vmem:[#allocation8 + $0xe0] sm:$0xff] %v6227_v49 }
 0x5f8   :  { %v6228_v7 = vpop.trf.xlu0 }
 0x5f9   :  { %6291 = vst [vmem:[#allocation8 + $0xf0] sm:$0xff] %v6228_v7 }
 0x5fa   :  { %7981 = shalt.err (!%p7978_p0)
}
 0x5fb   :  { %s7982_s25 = scalar_lea.hbm %s12009_s3, 4096 }
 0x5fc   :  { %p7983_p1 = scmp.ne.s32.totalorder %s12009_s3, %s7982_s25  ;;  %p7986_p2 = scmp.lt.u32.totalorder %s7982_s25, %s12009_s3 }
 0x5fe   :  { %p7988_p3 = pnand %p7986_p2, %p7983_p1 }
 0x600   :  { %7991 = shalt.err (!%p7988_p3)
}
 0x601   :  { %s8005_s30 = smov 256   ;;  %s8006_s4 = smov 16  }
 0x602   :  { %6304 = dma.vmem_to_hbm [thread:$0]  %s6299_s21, 4096, %s12009_s3, [#allocation4], %s8005_s30, %s8005_s30, %s8006_s4  }
 0x603   :  { %7996 = dma.done.wait [#allocation4], 4096  }
 0x604   :  { %7997 = vsyncadd [#allocation4], 4294963200 }
 0x605   :  { %6308 = vsyncpa [#allocation3], 1 }
 0x606   :  { %6309 = vsyncpa [#allocation6], 1 }
 0x607   :  { %6310 = vsyncpa [#allocation4], 1 }

</bundles_post_ra>
